<compile_context>
chip_gen: v6e
topology: v6e:2x2x1
jax: 0.10.0
libtpu: 0.0.40
codegen_flags: <defaults>
</compile_context>

<pallas_src>
import numpy as np
import jax
import jax.numpy as jnp
from jax.experimental import pallas as pl
from jax.experimental.pallas import tpu as pltpu


def msaa_forward(x_nchw, params):
    """MSAA forward. Input NCHW, output NCHW (like the PyTorch module)."""
    N, Cin, H, W = x_nchw.shape
    dim = params['w_down'].shape[1]
    Cout = params['w_up'].shape[1]
    HW = H * W

    GUARD = 4                       # lane guard so every 7x7 tap slice stays in-bounds
    LO = GUARD + 3 * W              # start of the "real" rows inside the H-padded slab
    LP = (H + 6) * W + 2 * GUARD    # padded-slab length (H padded by 3 rows each side)

    mxu = jnp.bfloat16              # MXU operands in bf16 (v6e/v7x native rate);
                                    # all VPU/elementwise math stays f32 (v5e-safe).

    # ---- weight preparation (plain JAX, once per call) ----
    x = x_nchw.reshape(N, Cin, HW).astype(jnp.float32)

    w_down_t = params['w_down'].T.astype(mxu)                 # (dim, Cin)
    b_down = params['b_down'].reshape(dim, 1).astype(jnp.float32)
    w_ca1_t = params['w_ca1'].T.astype(jnp.float32)           # (r, dim)
    w_ca2_t = params['w_ca2'].T.astype(jnp.float32)           # (dim, r)

    # fuse 3x3 + 5x5 + 7x7 into one 7x7 kernel, then flatten for im2col matmul
    wc = params['w7']
    wc = wc.at[1:6, 1:6].add(params['w5'])
    wc = wc.at[2:5, 2:5].add(params['w3'])
    w_conv = wc.reshape(49 * dim, dim).T.astype(mxu)          # (dim, 49*dim)
    b_conv = (params['b3'] + params['b5'] + params['b7']
              ).reshape(dim, 1).astype(jnp.float32)

    # spatial-attention 7x7 weights, flattened (dy, dx, {avg,max}) -> SMEM scalars
    wsa_flat = params['w_sa'][..., 0].reshape(-1).astype(jnp.float32)   # (98,)

    w_up_t = params['w_up'].T.astype(mxu)                     # (Cout, dim)
    b_up = params['b_up'].reshape(Cout, 1).astype(jnp.float32)

    # per-dx width-boundary masks, shared by im2col build and spatial attention
    col = jnp.arange(HW, dtype=jnp.int32) % W
    masks = jnp.stack(
        [((col + dx - 3 >= 0) & (col + dx - 3 < W)) for dx in range(7)],
        axis=0).astype(jnp.float32)                           # (7, HW)

    # ---- the kernel (closes over static H, W, dim, GUARD, LO, LP) ----
    def kernel(x_ref, wd_ref, bd_ref, wc1_ref, wc2_ref, wcv_ref, bcv_ref,
               mask_ref, wsa_ref, wu_ref, bu_ref, o_ref,
               ppad_ref, qpad_ref, patch_ref):
        f32 = jnp.float32
        bf16 = jnp.bfloat16

        xin = x_ref[0]                                        # (Cin, HW) f32

        # down 1x1 conv: one lane-dense MXU matmul
        xd = jnp.dot(wd_ref[...], xin.astype(bf16),
                     preferred_element_type=f32) + bd_ref[...]        # (dim, HW)

        # channel attention: avg & max pooled columns through the shared MLP
        pooled = jnp.concatenate(
            [jnp.mean(xd, axis=1, keepdims=True),
             jnp.max(xd, axis=1, keepdims=True)], axis=1)             # (dim, 2)
        h = jnp.maximum(jnp.dot(wc1_ref[...], pooled,
                                preferred_element_type=f32), 0.0)     # (r, 2)
        h = jnp.dot(wc2_ref[...], h, preferred_element_type=f32)      # (dim, 2)
        ca = jax.nn.sigmoid(h[:, 0:1] + h[:, 1:2])                    # (dim, 1)
        xa = xd * ca                                                  # (dim, HW)

        # H-padded slab of xa; zero only the halo strips (interior overwritten)
        ppad_ref[:, 0:LO] = jnp.zeros((dim, LO), f32)
        ppad_ref[:, LO + HW:LP] = jnp.zeros((dim, LP - LO - HW), f32)
        ppad_ref[:, LO:LO + HW] = xa

        # im2col: 49 shifted lane-dense slices -> (49*dim, HW) patch matrix
        for dy in range(7):
            for dx in range(7):
                t = dy * 7 + dx
                s = GUARD + dy * W + dx - 3
                sl = ppad_ref[:, s:s + HW]
                if dx != 3:
                    sl = sl * mask_ref[dx:dx + 1, :]
                patch_ref[t * dim:(t + 1) * dim, :] = sl

        # fused 3x3 + 5x5 + 7x7 convs: ONE (dim,49*dim)@(49*dim,HW) matmul
        xs = jnp.dot(wcv_ref[...], patch_ref[...].astype(bf16),
                     preferred_element_type=f32) + bcv_ref[...]       # (dim, HW)

        # spatial attention: channel mean/max -> 7x7 conv (2->1) -> sigmoid
        qpad_ref[:, 0:LO] = jnp.zeros((2, LO), f32)
        qpad_ref[:, LO + HW:LP] = jnp.zeros((2, LP - LO - HW), f32)
        qpad_ref[0:1, LO:LO + HW] = jnp.mean(xs, axis=0, keepdims=True)
        qpad_ref[1:2, LO:LO + HW] = jnp.max(xs, axis=0, keepdims=True)

        sa = jnp.zeros((1, HW), f32)
        for dy in range(7):
            for dx in range(7):
                t = dy * 7 + dx
                s = GUARD + dy * W + dx - 3
                q = qpad_ref[:, s:s + HW]                             # (2, HW)
                tap = q[0:1] * wsa_ref[2 * t] + q[1:2] * wsa_ref[2 * t + 1]
                if dx != 3:
                    tap = tap * mask_ref[dx:dx + 1, :]
                sa = sa + tap
        sa = jax.nn.sigmoid(sa)                                       # (1, HW)

        # up 1x1 conv on (x_s * sa + x_a); lane-dense (Cout, HW) output store
        out = jnp.dot(wu_ref[...], (xs * sa + xa).astype(bf16),
                      preferred_element_type=f32) + bu_ref[...]       # (Cout, HW)
        o_ref[0] = out.astype(o_ref.dtype)

    def full_spec(a):
        nd = a.ndim
        return pl.BlockSpec(a.shape, lambda n, _nd=nd: (0,) * _nd)

    args = (x, w_down_t, b_down, w_ca1_t, w_ca2_t, w_conv, b_conv,
            masks, wsa_flat, w_up_t, b_up)

    in_specs = [
        pl.BlockSpec((1, Cin, HW), lambda n: (n, 0, 0)),
        full_spec(w_down_t), full_spec(b_down),
        full_spec(w_ca1_t), full_spec(w_ca2_t),
        full_spec(w_conv), full_spec(b_conv),
        full_spec(masks),
        pl.BlockSpec(wsa_flat.shape, lambda n: (0,), memory_space=pltpu.SMEM),
        full_spec(w_up_t), full_spec(b_up),
    ]

    # TODO(synk): for production-size feature maps, tile the grid over rows with
    # a 3-row halo instead of holding the whole padded image per step (v7x VMEM).
    out = pl.pallas_call(
        kernel,
        out_shape=jax.ShapeDtypeStruct((N, Cout, HW), jnp.float32),
        grid_spec=pltpu.PrefetchScalarGridSpec(
            num_scalar_prefetch=0,
            grid=(N,),
            in_specs=in_specs,
            out_specs=pl.BlockSpec((1, Cout, HW), lambda n: (n, 0, 0)),
            scratch_shapes=[
                pltpu.VMEM((dim, LP), jnp.float32),        # padded xa slab
                pltpu.VMEM((2, LP), jnp.float32),          # padded avg/max maps
                pltpu.VMEM((49 * dim, HW), jnp.float32),   # im2col patches
            ]),
        compiler_params=pltpu.CompilerParams(
            dimension_semantics=("parallel",),             # batch across TCs on v7x
            vmem_limit_bytes=32 * 1024 * 1024),
    )(*args)
    return out.reshape(N, Cout, H, W)


def init_params(key, in_channels, out_channels, factor=4.0):
    """Deterministic synthetic parameters (shapes follow MSAA.__init__)."""
    dim = int(out_channels // factor)
    r = max(dim // 4, 1)   # ChannelAttentionModule reduction=4
    ks = jax.random.split(key, 13)

    def nrm(k, shape, scale=0.2):
        return jax.random.normal(k, shape, jnp.float32) * scale

    # TODO(synk): `down_2` exists in __init__ but is unused in forward(); omitted.
    return dict(
        w_down=nrm(ks[0], (in_channels, dim)),
        b_down=nrm(ks[1], (1, dim)),
        w_ca1=nrm(ks[2], (dim, r)),
        w_ca2=nrm(ks[3], (r, dim)),
        w3=nrm(ks[4], (3, 3, dim, dim)),
        b3=nrm(ks[5], (1, dim)),
        w5=nrm(ks[6], (5, 5, dim, dim)),
        b5=nrm(ks[7], (1, dim)),
        w7=nrm(ks[8], (7, 7, dim, dim)),
        b7=nrm(ks[9], (1, dim)),
        w_sa=nrm(ks[10], (7, 7, 2, 1)),
        w_up=nrm(ks[11], (dim, out_channels)),
        b_up=nrm(ks[12], (1, out_channels)),
    )


def msaa_reference(x_nchw, params):
    """Pure-JAX f32 reference (mirrors the PyTorch forward)."""
    x = jnp.transpose(x_nchw, (0, 2, 3, 1)).astype(jnp.float32)
    dn = ('NHWC', 'HWIO', 'NHWC')

    def conv(v, w, pad):
        return jax.lax.conv_general_dilated(
            v, w, (1, 1), [(pad, pad), (pad, pad)], dimension_numbers=dn)

    xd = conv(x, params['w_down'][None, None], 0) + params['b_down']
    avg = jnp.mean(xd, axis=(1, 2))
    mx = jnp.max(xd, axis=(1, 2))

    def fc(v):
        return jnp.maximum(v @ params['w_ca1'], 0.0) @ params['w_ca2']

    ca = jax.nn.sigmoid(fc(avg) + fc(mx))[:, None, None, :]
    xa = xd * ca
    xs = (conv(xa, params['w3'], 1) + params['b3']
          + conv(xa, params['w5'], 2) + params['b5']
          + conv(xa, params['w7'], 3) + params['b7'])
    sa_in = jnp.concatenate([jnp.mean(xs, -1, keepdims=True),
                             jnp.max(xs, -1, keepdims=True)], axis=-1)
    sa = jax.nn.sigmoid(conv(sa_in, params['w_sa'], 3))
    xs = xs * sa
    out = conv(xs + xa, params['w_up'][None, None], 0) + params['b_up']
    return jnp.transpose(out, (0, 3, 1, 2))


if __name__ == "__main__":
    N, Cin, H, W = 2, 8, 16, 16
    Cout, factor = 16, 4.0  # -> dim = 4

    params = init_params(jax.random.PRNGKey(0), Cin, Cout, factor)
    x = jax.random.normal(jax.random.PRNGKey(1), (N, Cin, H, W), jnp.float32)

    out = jax.block_until_ready(msaa_forward(x, params))
    assert out.shape == (N, Cout, H, W), out.shape

    ref = jax.block_until_ready(msaa_reference(x, params))
    # Tolerance is loose because MXU operands are bf16 (f32 accumulation);
    # the f32 reference differs by ~1e-2 absolute at these magnitudes.
    np.testing.assert_allclose(np.asarray(out), np.asarray(ref),
                               rtol=5e-2, atol=5e-2)
    print("KERNEL_OK")
</pallas_src>

<mosaic_0001>
module attributes {stable_mosaic.version = 11 : i64} {
  func.func @kernel(%arg0: i32, %arg1: memref<1x8x256xf32, #tpu.memory_space<vmem>>, %arg2: memref<4x8xbf16, #tpu.memory_space<vmem>>, %arg3: memref<4x1xf32, #tpu.memory_space<vmem>>, %arg4: memref<1x4xf32, #tpu.memory_space<vmem>>, %arg5: memref<4x1xf32, #tpu.memory_space<vmem>>, %arg6: memref<4x196xbf16, #tpu.memory_space<vmem>>, %arg7: memref<4x1xf32, #tpu.memory_space<vmem>>, %arg8: memref<7x256xf32, #tpu.memory_space<vmem>>, %arg9: memref<98xf32, #tpu.memory_space<smem>>, %arg10: memref<16x4xbf16, #tpu.memory_space<vmem>>, %arg11: memref<16x1xf32, #tpu.memory_space<vmem>>, %arg12: memref<1x16x256xf32, #tpu.memory_space<vmem>>, %arg13: memref<4x360xf32, #tpu.memory_space<vmem>>, %arg14: memref<2x360xf32, #tpu.memory_space<vmem>>, %arg15: memref<196x256xf32, #tpu.memory_space<vmem>>) attributes {dimension_semantics = [#tpu.dimension_semantics<parallel>], iteration_bounds = array<i64: 2>, scalar_prefetch = 0 : i64, scratch_operands = 3 : i64, tpu.core_type = #tpu.core_type<tc>, window_params = [{transform_indices = @transform_0, window_bounds = array<i64: 1, 8, 256>}, {pipeline_mode = #tpu.pipeline_mode<synchronous>, transform_indices = @transform_1, window_bounds = array<i64: 4, 8>}, {pipeline_mode = #tpu.pipeline_mode<synchronous>, transform_indices = @transform_2, window_bounds = array<i64: 4, 1>}, {pipeline_mode = #tpu.pipeline_mode<synchronous>, transform_indices = @transform_3, window_bounds = array<i64: 1, 4>}, {pipeline_mode = #tpu.pipeline_mode<synchronous>, transform_indices = @transform_4, window_bounds = array<i64: 4, 1>}, {pipeline_mode = #tpu.pipeline_mode<synchronous>, transform_indices = @transform_5, window_bounds = array<i64: 4, 196>}, {pipeline_mode = #tpu.pipeline_mode<synchronous>, transform_indices = @transform_6, window_bounds = array<i64: 4, 1>}, {pipeline_mode = #tpu.pipeline_mode<synchronous>, transform_indices = @transform_7, window_bounds = array<i64: 7, 256>}, {transform_indices = @transform_8, window_bounds = array<i64: 98>}, {pipeline_mode = #tpu.pipeline_mode<synchronous>, transform_indices = @transform_9, window_bounds = array<i64: 16, 4>}, {pipeline_mode = #tpu.pipeline_mode<synchronous>, transform_indices = @transform_10, window_bounds = array<i64: 16, 1>}, {transform_indices = @transform_11, window_bounds = array<i64: 1, 16, 256>}]} {
    %c0 = arith.constant 0 : index
    %c0_0 = arith.constant 0 : index
    %c0_1 = arith.constant 0 : index
    %0 = vector.load %arg1[%c0, %c0_0, %c0_1] : memref<1x8x256xf32, #tpu.memory_space<vmem>>, vector<1x8x256xf32>
    %1 = vector.shape_cast %0 : vector<1x8x256xf32> to vector<8x256xf32>
    %c0_2 = arith.constant 0 : index
    %c0_3 = arith.constant 0 : index
    %2 = vector.load %arg2[%c0_2, %c0_3] : memref<4x8xbf16, #tpu.memory_space<vmem>>, vector<4x8xbf16>
    %3 = arith.truncf %1 : vector<8x256xf32> to vector<8x256xbf16>
    %cst = arith.constant dense<0.000000e+00> : vector<4x256xf32>
    %4 = tpu.matmul %2, %3, %cst {dimension_numbers = #tpu.dot_dimension_numbers<[1], [0], [0], [1], [0, 0, 1, 1], [], []>} : vector<4x8xbf16>, vector<8x256xbf16>, vector<4x256xf32> -> vector<4x256xf32>
    %c0_4 = arith.constant 0 : index
    %c0_5 = arith.constant 0 : index
    %5 = vector.load %arg3[%c0_4, %c0_5] : memref<4x1xf32, #tpu.memory_space<vmem>>, vector<4x1xf32>
    %6 = vector.broadcast %5 : vector<4x1xf32> to vector<4x256xf32>
    %7 = arith.addf %4, %6 : vector<4x256xf32>
    %cst_6 = arith.constant dense<0.000000e+00> : vector<4xf32>
    %8 = vector.multi_reduction <add>, %7, %cst_6 [1] : vector<4x256xf32> to vector<4xf32>
    %9 = vector.shape_cast %8 : vector<4xf32> to vector<4x1xf32>
    %cst_7 = arith.constant 2.560000e+02 : f32
    %10 = vector.broadcast %cst_7 : f32 to vector<4x1xf32>
    %11 = arith.divf %9, %10 : vector<4x1xf32>
    %cst_8 = arith.constant dense<0xFF800000> : vector<4xf32>
    %12 = vector.multi_reduction <maximumf>, %7, %cst_8 [1] : vector<4x256xf32> to vector<4xf32>
    %13 = vector.shape_cast %12 : vector<4xf32> to vector<4x1xf32>
    %14 = tpu.concatenate %11, %13 in 1 : vector<4x1xf32>, vector<4x1xf32> -> vector<4x2xf32>
    %c0_9 = arith.constant 0 : index
    %c0_10 = arith.constant 0 : index
    %15 = vector.load %arg4[%c0_9, %c0_10] : memref<1x4xf32, #tpu.memory_space<vmem>>, vector<1x4xf32>
    %cst_11 = arith.constant dense<0.000000e+00> : vector<1x2xf32>
    %16 = tpu.matmul %15, %14, %cst_11 {dimension_numbers = #tpu.dot_dimension_numbers<[1], [0], [0], [1], [0, 0, 1, 1], [], []>} : vector<1x4xf32>, vector<4x2xf32>, vector<1x2xf32> -> vector<1x2xf32>
    %cst_12 = arith.constant 0.000000e+00 : f32
    %17 = vector.broadcast %cst_12 : f32 to vector<1x2xf32>
    %18 = arith.maximumf %16, %17 : vector<1x2xf32>
    %c0_13 = arith.constant 0 : index
    %c0_14 = arith.constant 0 : index
    %19 = vector.load %arg5[%c0_13, %c0_14] : memref<4x1xf32, #tpu.memory_space<vmem>>, vector<4x1xf32>
    %cst_15 = arith.constant dense<0.000000e+00> : vector<4x2xf32>
    %20 = tpu.matmul %19, %18, %cst_15 {dimension_numbers = #tpu.dot_dimension_numbers<[1], [0], [0], [1], [0, 0, 1, 1], [], []>} : vector<4x1xf32>, vector<1x2xf32>, vector<4x2xf32> -> vector<4x2xf32>
    %21 = vector.extract_strided_slice %20 {offsets = [0, 0], sizes = [4, 1], strides = [1, 1]} : vector<4x2xf32> to vector<4x1xf32>
    %22 = vector.extract_strided_slice %20 {offsets = [0, 1], sizes = [4, 1], strides = [1, 1]} : vector<4x2xf32> to vector<4x1xf32>
    %23 = arith.addf %21, %22 : vector<4x1xf32>
    %24 = arith.negf %23 : vector<4x1xf32>
    %25 = math.exp %24 : vector<4x1xf32>
    %cst_16 = arith.constant 1.000000e+00 : f32
    %26 = vector.broadcast %cst_16 : f32 to vector<4x1xf32>
    %27 = arith.addf %26, %25 : vector<4x1xf32>
    %28 = arith.divf %26, %27 : vector<4x1xf32>
    %29 = vector.broadcast %28 : vector<4x1xf32> to vector<4x256xf32>
    %30 = arith.mulf %7, %29 : vector<4x256xf32>
    %cst_17 = arith.constant 0.000000e+00 : f32
    %31 = vector.broadcast %cst_17 : f32 to vector<4x52xf32>
    %c0_18 = arith.constant 0 : index
    %c0_19 = arith.constant 0 : index
    %32 = vector.load %arg13[%c0_18, %c0_19] : memref<4x360xf32, #tpu.memory_space<vmem>>, vector<4x52xf32>
    tpu.vector_store %arg13[%c0_18, %c0_19], %31 {strides = array<i32>} : memref<4x360xf32, #tpu.memory_space<vmem>>, vector<4x52xf32>,
    %cst_20 = arith.constant 0.000000e+00 : f32
    %33 = vector.broadcast %cst_20 : f32 to vector<4x52xf32>
    %c0_21 = arith.constant 0 : index
    %c308 = arith.constant 308 : index
    %34 = vector.load %arg13[%c0_21, %c308] : memref<4x360xf32, #tpu.memory_space<vmem>>, vector<4x52xf32>
    tpu.vector_store %arg13[%c0_21, %c308], %33 {strides = array<i32>} : memref<4x360xf32, #tpu.memory_space<vmem>>, vector<4x52xf32>,
    %c0_22 = arith.constant 0 : index
    %c52 = arith.constant 52 : index
    %35 = vector.load %arg13[%c0_22, %c52] : memref<4x360xf32, #tpu.memory_space<vmem>>, vector<4x256xf32>
    tpu.vector_store %arg13[%c0_22, %c52], %30 {strides = array<i32>} : memref<4x360xf32, #tpu.memory_space<vmem>>, vector<4x256xf32>,
    %c0_23 = arith.constant 0 : index
    %c1 = arith.constant 1 : index
    %36 = vector.load %arg13[%c0_23, %c1] : memref<4x360xf32, #tpu.memory_space<vmem>>, vector<4x256xf32>
    %c0_24 = arith.constant 0 : index
    %c0_25 = arith.constant 0 : index
    %37 = vector.load %arg8[%c0_24, %c0_25] : memref<7x256xf32, #tpu.memory_space<vmem>>, vector<1x256xf32>
    %38 = vector.broadcast %37 : vector<1x256xf32> to vector<4x256xf32>
    %39 = arith.mulf %36, %38 : vector<4x256xf32>
    %c0_26 = arith.constant 0 : index
    %c0_27 = arith.constant 0 : index
    %40 = vector.load %arg15[%c0_26, %c0_27] : memref<196x256xf32, #tpu.memory_space<vmem>>, vector<4x256xf32>
    tpu.vector_store %arg15[%c0_26, %c0_27], %39 {strides = array<i32>} : memref<196x256xf32, #tpu.memory_space<vmem>>, vector<4x256xf32>,
    %c0_28 = arith.constant 0 : index
    %c2 = arith.constant 2 : index
    %41 = vector.load %arg13[%c0_28, %c2] : memref<4x360xf32, #tpu.memory_space<vmem>>, vector<4x256xf32>
    %c1_29 = arith.constant 1 : index
    %c0_30 = arith.constant 0 : index
    %42 = vector.load %arg8[%c1_29, %c0_30] : memref<7x256xf32, #tpu.memory_space<vmem>>, vector<1x256xf32>
    %43 = vector.broadcast %42 : vector<1x256xf32> to vector<4x256xf32>
    %44 = arith.mulf %41, %43 : vector<4x256xf32>
    %c4 = arith.constant 4 : index
    %c0_31 = arith.constant 0 : index
    %45 = vector.load %arg15[%c4, %c0_31] : memref<196x256xf32, #tpu.memory_space<vmem>>, vector<4x256xf32>
    tpu.vector_store %arg15[%c4, %c0_31], %44 {strides = array<i32>} : memref<196x256xf32, #tpu.memory_space<vmem>>, vector<4x256xf32>,
    %c0_32 = arith.constant 0 : index
    %c3 = arith.constant 3 : index
    %46 = vector.load %arg13[%c0_32, %c3] : memref<4x360xf32, #tpu.memory_space<vmem>>, vector<4x256xf32>
    %c2_33 = arith.constant 2 : index
    %c0_34 = arith.constant 0 : index
    %47 = vector.load %arg8[%c2_33, %c0_34] : memref<7x256xf32, #tpu.memory_space<vmem>>, vector<1x256xf32>
    %48 = vector.broadcast %47 : vector<1x256xf32> to vector<4x256xf32>
    %49 = arith.mulf %46, %48 : vector<4x256xf32>
    %c8 = arith.constant 8 : index
    %c0_35 = arith.constant 0 : index
    %50 = vector.load %arg15[%c8, %c0_35] : memref<196x256xf32, #tpu.memory_space<vmem>>, vector<4x256xf32>
    tpu.vector_store %arg15[%c8, %c0_35], %49 {strides = array<i32>} : memref<196x256xf32, #tpu.memory_space<vmem>>, vector<4x256xf32>,
    %c0_36 = arith.constant 0 : index
    %c4_37 = arith.constant 4 : index
    %51 = vector.load %arg13[%c0_36, %c4_37] : memref<4x360xf32, #tpu.memory_space<vmem>>, vector<4x256xf32>
    %c12 = arith.constant 12 : index
    %c0_38 = arith.constant 0 : index
    %52 = vector.load %arg15[%c12, %c0_38] : memref<196x256xf32, #tpu.memory_space<vmem>>, vector<4x256xf32>
    tpu.vector_store %arg15[%c12, %c0_38], %51 {strides = array<i32>} : memref<196x256xf32, #tpu.memory_space<vmem>>, vector<4x256xf32>,
    %c0_39 = arith.constant 0 : index
    %c5 = arith.constant 5 : index
    %53 = vector.load %arg13[%c0_39, %c5] : memref<4x360xf32, #tpu.memory_space<vmem>>, vector<4x256xf32>
    %c4_40 = arith.constant 4 : index
    %c0_41 = arith.constant 0 : index
    %54 = vector.load %arg8[%c4_40, %c0_41] : memref<7x256xf32, #tpu.memory_space<vmem>>, vector<1x256xf32>
    %55 = vector.broadcast %54 : vector<1x256xf32> to vector<4x256xf32>
    %56 = arith.mulf %53, %55 : vector<4x256xf32>
    %c16 = arith.constant 16 : index
    %c0_42 = arith.constant 0 : index
    %57 = vector.load %arg15[%c16, %c0_42] : memref<196x256xf32, #tpu.memory_space<vmem>>, vector<4x256xf32>
    tpu.vector_store %arg15[%c16, %c0_42], %56 {strides = array<i32>} : memref<196x256xf32, #tpu.memory_space<vmem>>, vector<4x256xf32>,
    %c0_43 = arith.constant 0 : index
    %c6 = arith.constant 6 : index
    %58 = vector.load %arg13[%c0_43, %c6] : memref<4x360xf32, #tpu.memory_space<vmem>>, vector<4x256xf32>
    %c5_44 = arith.constant 5 : index
    %c0_45 = arith.constant 0 : index
    %59 = vector.load %arg8[%c5_44, %c0_45] : memref<7x256xf32, #tpu.memory_space<vmem>>, vector<1x256xf32>
    %60 = vector.broadcast %59 : vector<1x256xf32> to vector<4x256xf32>
    %61 = arith.mulf %58, %60 : vector<4x256xf32>
    %c20 = arith.constant 20 : index
    %c0_46 = arith.constant 0 : index
    %62 = vector.load %arg15[%c20, %c0_46] : memref<196x256xf32, #tpu.memory_space<vmem>>, vector<4x256xf32>
    tpu.vector_store %arg15[%c20, %c0_46], %61 {strides = array<i32>} : memref<196x256xf32, #tpu.memory_space<vmem>>, vector<4x256xf32>,
    %c0_47 = arith.constant 0 : index
    %c7 = arith.constant 7 : index
    %63 = vector.load %arg13[%c0_47, %c7] : memref<4x360xf32, #tpu.memory_space<vmem>>, vector<4x256xf32>
    %c6_48 = arith.constant 6 : index
    %c0_49 = arith.constant 0 : index
    %64 = vector.load %arg8[%c6_48, %c0_49] : memref<7x256xf32, #tpu.memory_space<vmem>>, vector<1x256xf32>
    %65 = vector.broadcast %64 : vector<1x256xf32> to vector<4x256xf32>
    %66 = arith.mulf %63, %65 : vector<4x256xf32>
    %c24 = arith.constant 24 : index
    %c0_50 = arith.constant 0 : index
    %67 = vector.load %arg15[%c24, %c0_50] : memref<196x256xf32, #tpu.memory_space<vmem>>, vector<4x256xf32>
    tpu.vector_store %arg15[%c24, %c0_50], %66 {strides = array<i32>} : memref<196x256xf32, #tpu.memory_space<vmem>>, vector<4x256xf32>,
    %c0_51 = arith.constant 0 : index
    %c17 = arith.constant 17 : index
    %68 = vector.load %arg13[%c0_51, %c17] : memref<4x360xf32, #tpu.memory_space<vmem>>, vector<4x256xf32>
    %c0_52 = arith.constant 0 : index
    %c0_53 = arith.constant 0 : index
    %69 = vector.load %arg8[%c0_52, %c0_53] : memref<7x256xf32, #tpu.memory_space<vmem>>, vector<1x256xf32>
    %70 = vector.broadcast %69 : vector<1x256xf32> to vector<4x256xf32>
    %71 = arith.mulf %68, %70 : vector<4x256xf32>
    %c28 = arith.constant 28 : index
    %c0_54 = arith.constant 0 : index
    %72 = vector.load %arg15[%c28, %c0_54] : memref<196x256xf32, #tpu.memory_space<vmem>>, vector<4x256xf32>
    tpu.vector_store %arg15[%c28, %c0_54], %71 {strides = array<i32>} : memref<196x256xf32, #tpu.memory_space<vmem>>, vector<4x256xf32>,
    %c0_55 = arith.constant 0 : index
    %c18 = arith.constant 18 : index
    %73 = vector.load %arg13[%c0_55, %c18] : memref<4x360xf32, #tpu.memory_space<vmem>>, vector<4x256xf32>
    %c1_56 = arith.constant 1 : index
    %c0_57 = arith.constant 0 : index
    %74 = vector.load %arg8[%c1_56, %c0_57] : memref<7x256xf32, #tpu.memory_space<vmem>>, vector<1x256xf32>
    %75 = vector.broadcast %74 : vector<1x256xf32> to vector<4x256xf32>
    %76 = arith.mulf %73, %75 : vector<4x256xf32>
    %c32 = arith.constant 32 : index
    %c0_58 = arith.constant 0 : index
    %77 = vector.load %arg15[%c32, %c0_58] : memref<196x256xf32, #tpu.memory_space<vmem>>, vector<4x256xf32>
    tpu.vector_store %arg15[%c32, %c0_58], %76 {strides = array<i32>} : memref<196x256xf32, #tpu.memory_space<vmem>>, vector<4x256xf32>,
    %c0_59 = arith.constant 0 : index
    %c19 = arith.constant 19 : index
    %78 = vector.load %arg13[%c0_59, %c19] : memref<4x360xf32, #tpu.memory_space<vmem>>, vector<4x256xf32>
    %c2_60 = arith.constant 2 : index
    %c0_61 = arith.constant 0 : index
    %79 = vector.load %arg8[%c2_60, %c0_61] : memref<7x256xf32, #tpu.memory_space<vmem>>, vector<1x256xf32>
    %80 = vector.broadcast %79 : vector<1x256xf32> to vector<4x256xf32>
    %81 = arith.mulf %78, %80 : vector<4x256xf32>
    %c36 = arith.constant 36 : index
    %c0_62 = arith.constant 0 : index
    %82 = vector.load %arg15[%c36, %c0_62] : memref<196x256xf32, #tpu.memory_space<vmem>>, vector<4x256xf32>
    tpu.vector_store %arg15[%c36, %c0_62], %81 {strides = array<i32>} : memref<196x256xf32, #tpu.memory_space<vmem>>, vector<4x256xf32>,
    %c0_63 = arith.constant 0 : index
    %c20_64 = arith.constant 20 : index
    %83 = vector.load %arg13[%c0_63, %c20_64] : memref<4x360xf32, #tpu.memory_space<vmem>>, vector<4x256xf32>
    %c40 = arith.constant 40 : index
    %c0_65 = arith.constant 0 : index
    %84 = vector.load %arg15[%c40, %c0_65] : memref<196x256xf32, #tpu.memory_space<vmem>>, vector<4x256xf32>
    tpu.vector_store %arg15[%c40, %c0_65], %83 {strides = array<i32>} : memref<196x256xf32, #tpu.memory_space<vmem>>, vector<4x256xf32>,
    %c0_66 = arith.constant 0 : index
    %c21 = arith.constant 21 : index
    %85 = vector.load %arg13[%c0_66, %c21] : memref<4x360xf32, #tpu.memory_space<vmem>>, vector<4x256xf32>
    %c4_67 = arith.constant 4 : index
    %c0_68 = arith.constant 0 : index
    %86 = vector.load %arg8[%c4_67, %c0_68] : memref<7x256xf32, #tpu.memory_space<vmem>>, vector<1x256xf32>
    %87 = vector.broadcast %86 : vector<1x256xf32> to vector<4x256xf32>
    %88 = arith.mulf %85, %87 : vector<4x256xf32>
    %c44 = arith.constant 44 : index
    %c0_69 = arith.constant 0 : index
    %89 = vector.load %arg15[%c44, %c0_69] : memref<196x256xf32, #tpu.memory_space<vmem>>, vector<4x256xf32>
    tpu.vector_store %arg15[%c44, %c0_69], %88 {strides = array<i32>} : memref<196x256xf32, #tpu.memory_space<vmem>>, vector<4x256xf32>,
    %c0_70 = arith.constant 0 : index
    %c22 = arith.constant 22 : index
    %90 = vector.load %arg13[%c0_70, %c22] : memref<4x360xf32, #tpu.memory_space<vmem>>, vector<4x256xf32>
    %c5_71 = arith.constant 5 : index
    %c0_72 = arith.constant 0 : index
    %91 = vector.load %arg8[%c5_71, %c0_72] : memref<7x256xf32, #tpu.memory_space<vmem>>, vector<1x256xf32>
    %92 = vector.broadcast %91 : vector<1x256xf32> to vector<4x256xf32>
    %93 = arith.mulf %90, %92 : vector<4x256xf32>
    %c48 = arith.constant 48 : index
    %c0_73 = arith.constant 0 : index
    %94 = vector.load %arg15[%c48, %c0_73] : memref<196x256xf32, #tpu.memory_space<vmem>>, vector<4x256xf32>
    tpu.vector_store %arg15[%c48, %c0_73], %93 {strides = array<i32>} : memref<196x256xf32, #tpu.memory_space<vmem>>, vector<4x256xf32>,
    %c0_74 = arith.constant 0 : index
    %c23 = arith.constant 23 : index
    %95 = vector.load %arg13[%c0_74, %c23] : memref<4x360xf32, #tpu.memory_space<vmem>>, vector<4x256xf32>
    %c6_75 = arith.constant 6 : index
    %c0_76 = arith.constant 0 : index
    %96 = vector.load %arg8[%c6_75, %c0_76] : memref<7x256xf32, #tpu.memory_space<vmem>>, vector<1x256xf32>
    %97 = vector.broadcast %96 : vector<1x256xf32> to vector<4x256xf32>
    %98 = arith.mulf %95, %97 : vector<4x256xf32>
    %c52_77 = arith.constant 52 : index
    %c0_78 = arith.constant 0 : index
    %99 = vector.load %arg15[%c52_77, %c0_78] : memref<196x256xf32, #tpu.memory_space<vmem>>, vector<4x256xf32>
    tpu.vector_store %arg15[%c52_77, %c0_78], %98 {strides = array<i32>} : memref<196x256xf32, #tpu.memory_space<vmem>>, vector<4x256xf32>,
    %c0_79 = arith.constant 0 : index
    %c33 = arith.constant 33 : index
    %100 = vector.load %arg13[%c0_79, %c33] : memref<4x360xf32, #tpu.memory_space<vmem>>, vector<4x256xf32>
    %c0_80 = arith.constant 0 : index
    %c0_81 = arith.constant 0 : index
    %101 = vector.load %arg8[%c0_80, %c0_81] : memref<7x256xf32, #tpu.memory_space<vmem>>, vector<1x256xf32>
    %102 = vector.broadcast %101 : vector<1x256xf32> to vector<4x256xf32>
    %103 = arith.mulf %100, %102 : vector<4x256xf32>
    %c56 = arith.constant 56 : index
    %c0_82 = arith.constant 0 : index
    %104 = vector.load %arg15[%c56, %c0_82] : memref<196x256xf32, #tpu.memory_space<vmem>>, vector<4x256xf32>
    tpu.vector_store %arg15[%c56, %c0_82], %103 {strides = array<i32>} : memref<196x256xf32, #tpu.memory_space<vmem>>, vector<4x256xf32>,
    %c0_83 = arith.constant 0 : index
    %c34 = arith.constant 34 : index
    %105 = vector.load %arg13[%c0_83, %c34] : memref<4x360xf32, #tpu.memory_space<vmem>>, vector<4x256xf32>
    %c1_84 = arith.constant 1 : index
    %c0_85 = arith.constant 0 : index
    %106 = vector.load %arg8[%c1_84, %c0_85] : memref<7x256xf32, #tpu.memory_space<vmem>>, vector<1x256xf32>
    %107 = vector.broadcast %106 : vector<1x256xf32> to vector<4x256xf32>
    %108 = arith.mulf %105, %107 : vector<4x256xf32>
    %c60 = arith.constant 60 : index
    %c0_86 = arith.constant 0 : index
    %109 = vector.load %arg15[%c60, %c0_86] : memref<196x256xf32, #tpu.memory_space<vmem>>, vector<4x256xf32>
    tpu.vector_store %arg15[%c60, %c0_86], %108 {strides = array<i32>} : memref<196x256xf32, #tpu.memory_space<vmem>>, vector<4x256xf32>,
    %c0_87 = arith.constant 0 : index
    %c35 = arith.constant 35 : index
    %110 = vector.load %arg13[%c0_87, %c35] : memref<4x360xf32, #tpu.memory_space<vmem>>, vector<4x256xf32>
    %c2_88 = arith.constant 2 : index
    %c0_89 = arith.constant 0 : index
    %111 = vector.load %arg8[%c2_88, %c0_89] : memref<7x256xf32, #tpu.memory_space<vmem>>, vector<1x256xf32>
    %112 = vector.broadcast %111 : vector<1x256xf32> to vector<4x256xf32>
    %113 = arith.mulf %110, %112 : vector<4x256xf32>
    %c64 = arith.constant 64 : index
    %c0_90 = arith.constant 0 : index
    %114 = vector.load %arg15[%c64, %c0_90] : memref<196x256xf32, #tpu.memory_space<vmem>>, vector<4x256xf32>
    tpu.vector_store %arg15[%c64, %c0_90], %113 {strides = array<i32>} : memref<196x256xf32, #tpu.memory_space<vmem>>, vector<4x256xf32>,
    %c0_91 = arith.constant 0 : index
    %c36_92 = arith.constant 36 : index
    %115 = vector.load %arg13[%c0_91, %c36_92] : memref<4x360xf32, #tpu.memory_space<vmem>>, vector<4x256xf32>
    %c68 = arith.constant 68 : index
    %c0_93 = arith.constant 0 : index
    %116 = vector.load %arg15[%c68, %c0_93] : memref<196x256xf32, #tpu.memory_space<vmem>>, vector<4x256xf32>
    tpu.vector_store %arg15[%c68, %c0_93], %115 {strides = array<i32>} : memref<196x256xf32, #tpu.memory_space<vmem>>, vector<4x256xf32>,
    %c0_94 = arith.constant 0 : index
    %c37 = arith.constant 37 : index
    %117 = vector.load %arg13[%c0_94, %c37] : memref<4x360xf32, #tpu.memory_space<vmem>>, vector<4x256xf32>
    %c4_95 = arith.constant 4 : index
    %c0_96 = arith.constant 0 : index
    %118 = vector.load %arg8[%c4_95, %c0_96] : memref<7x256xf32, #tpu.memory_space<vmem>>, vector<1x256xf32>
    %119 = vector.broadcast %118 : vector<1x256xf32> to vector<4x256xf32>
    %120 = arith.mulf %117, %119 : vector<4x256xf32>
    %c72 = arith.constant 72 : index
    %c0_97 = arith.constant 0 : index
    %121 = vector.load %arg15[%c72, %c0_97] : memref<196x256xf32, #tpu.memory_space<vmem>>, vector<4x256xf32>
    tpu.vector_store %arg15[%c72, %c0_97], %120 {strides = array<i32>} : memref<196x256xf32, #tpu.memory_space<vmem>>, vector<4x256xf32>,
    %c0_98 = arith.constant 0 : index
    %c38 = arith.constant 38 : index
    %122 = vector.load %arg13[%c0_98, %c38] : memref<4x360xf32, #tpu.memory_space<vmem>>, vector<4x256xf32>
    %c5_99 = arith.constant 5 : index
    %c0_100 = arith.constant 0 : index
    %123 = vector.load %arg8[%c5_99, %c0_100] : memref<7x256xf32, #tpu.memory_space<vmem>>, vector<1x256xf32>
    %124 = vector.broadcast %123 : vector<1x256xf32> to vector<4x256xf32>
    %125 = arith.mulf %122, %124 : vector<4x256xf32>
    %c76 = arith.constant 76 : index
    %c0_101 = arith.constant 0 : index
    %126 = vector.load %arg15[%c76, %c0_101] : memref<196x256xf32, #tpu.memory_space<vmem>>, vector<4x256xf32>
    tpu.vector_store %arg15[%c76, %c0_101], %125 {strides = array<i32>} : memref<196x256xf32, #tpu.memory_space<vmem>>, vector<4x256xf32>,
    %c0_102 = arith.constant 0 : index
    %c39 = arith.constant 39 : index
    %127 = vector.load %arg13[%c0_102, %c39] : memref<4x360xf32, #tpu.memory_space<vmem>>, vector<4x256xf32>
    %c6_103 = arith.constant 6 : index
    %c0_104 = arith.constant 0 : index
    %128 = vector.load %arg8[%c6_103, %c0_104] : memref<7x256xf32, #tpu.memory_space<vmem>>, vector<1x256xf32>
    %129 = vector.broadcast %128 : vector<1x256xf32> to vector<4x256xf32>
    %130 = arith.mulf %127, %129 : vector<4x256xf32>
    %c80 = arith.constant 80 : index
    %c0_105 = arith.constant 0 : index
    %131 = vector.load %arg15[%c80, %c0_105] : memref<196x256xf32, #tpu.memory_space<vmem>>, vector<4x256xf32>
    tpu.vector_store %arg15[%c80, %c0_105], %130 {strides = array<i32>} : memref<196x256xf32, #tpu.memory_space<vmem>>, vector<4x256xf32>,
    %c0_106 = arith.constant 0 : index
    %c49 = arith.constant 49 : index
    %132 = vector.load %arg13[%c0_106, %c49] : memref<4x360xf32, #tpu.memory_space<vmem>>, vector<4x256xf32>
    %c0_107 = arith.constant 0 : index
    %c0_108 = arith.constant 0 : index
    %133 = vector.load %arg8[%c0_107, %c0_108] : memref<7x256xf32, #tpu.memory_space<vmem>>, vector<1x256xf32>
    %134 = vector.broadcast %133 : vector<1x256xf32> to vector<4x256xf32>
    %135 = arith.mulf %132, %134 : vector<4x256xf32>
    %c84 = arith.constant 84 : index
    %c0_109 = arith.constant 0 : index
    %136 = vector.load %arg15[%c84, %c0_109] : memref<196x256xf32, #tpu.memory_space<vmem>>, vector<4x256xf32>
    tpu.vector_store %arg15[%c84, %c0_109], %135 {strides = array<i32>} : memref<196x256xf32, #tpu.memory_space<vmem>>, vector<4x256xf32>,
    %c0_110 = arith.constant 0 : index
    %c50 = arith.constant 50 : index
    %137 = vector.load %arg13[%c0_110, %c50] : memref<4x360xf32, #tpu.memory_space<vmem>>, vector<4x256xf32>
    %c1_111 = arith.constant 1 : index
    %c0_112 = arith.constant 0 : index
    %138 = vector.load %arg8[%c1_111, %c0_112] : memref<7x256xf32, #tpu.memory_space<vmem>>, vector<1x256xf32>
    %139 = vector.broadcast %138 : vector<1x256xf32> to vector<4x256xf32>
    %140 = arith.mulf %137, %139 : vector<4x256xf32>
    %c88 = arith.constant 88 : index
    %c0_113 = arith.constant 0 : index
    %141 = vector.load %arg15[%c88, %c0_113] : memref<196x256xf32, #tpu.memory_space<vmem>>, vector<4x256xf32>
    tpu.vector_store %arg15[%c88, %c0_113], %140 {strides = array<i32>} : memref<196x256xf32, #tpu.memory_space<vmem>>, vector<4x256xf32>,
    %c0_114 = arith.constant 0 : index
    %c51 = arith.constant 51 : index
    %142 = vector.load %arg13[%c0_114, %c51] : memref<4x360xf32, #tpu.memory_space<vmem>>, vector<4x256xf32>
    %c2_115 = arith.constant 2 : index
    %c0_116 = arith.constant 0 : index
    %143 = vector.load %arg8[%c2_115, %c0_116] : memref<7x256xf32, #tpu.memory_space<vmem>>, vector<1x256xf32>
    %144 = vector.broadcast %143 : vector<1x256xf32> to vector<4x256xf32>
    %145 = arith.mulf %142, %144 : vector<4x256xf32>
    %c92 = arith.constant 92 : index
    %c0_117 = arith.constant 0 : index
    %146 = vector.load %arg15[%c92, %c0_117] : memref<196x256xf32, #tpu.memory_space<vmem>>, vector<4x256xf32>
    tpu.vector_store %arg15[%c92, %c0_117], %145 {strides = array<i32>} : memref<196x256xf32, #tpu.memory_space<vmem>>, vector<4x256xf32>,
    %c0_118 = arith.constant 0 : index
    %c52_119 = arith.constant 52 : index
    %147 = vector.load %arg13[%c0_118, %c52_119] : memref<4x360xf32, #tpu.memory_space<vmem>>, vector<4x256xf32>
    %c96 = arith.constant 96 : index
    %c0_120 = arith.constant 0 : index
    %148 = vector.load %arg15[%c96, %c0_120] : memref<196x256xf32, #tpu.memory_space<vmem>>, vector<4x256xf32>
    tpu.vector_store %arg15[%c96, %c0_120], %147 {strides = array<i32>} : memref<196x256xf32, #tpu.memory_space<vmem>>, vector<4x256xf32>,
    %c0_121 = arith.constant 0 : index
    %c53 = arith.constant 53 : index
    %149 = vector.load %arg13[%c0_121, %c53] : memref<4x360xf32, #tpu.memory_space<vmem>>, vector<4x256xf32>
    %c4_122 = arith.constant 4 : index
    %c0_123 = arith.constant 0 : index
    %150 = vector.load %arg8[%c4_122, %c0_123] : memref<7x256xf32, #tpu.memory_space<vmem>>, vector<1x256xf32>
    %151 = vector.broadcast %150 : vector<1x256xf32> to vector<4x256xf32>
    %152 = arith.mulf %149, %151 : vector<4x256xf32>
    %c100 = arith.constant 100 : index
    %c0_124 = arith.constant 0 : index
    %153 = vector.load %arg15[%c100, %c0_124] : memref<196x256xf32, #tpu.memory_space<vmem>>, vector<4x256xf32>
    tpu.vector_store %arg15[%c100, %c0_124], %152 {strides = array<i32>} : memref<196x256xf32, #tpu.memory_space<vmem>>, vector<4x256xf32>,
    %c0_125 = arith.constant 0 : index
    %c54 = arith.constant 54 : index
    %154 = vector.load %arg13[%c0_125, %c54] : memref<4x360xf32, #tpu.memory_space<vmem>>, vector<4x256xf32>
    %c5_126 = arith.constant 5 : index
    %c0_127 = arith.constant 0 : index
    %155 = vector.load %arg8[%c5_126, %c0_127] : memref<7x256xf32, #tpu.memory_space<vmem>>, vector<1x256xf32>
    %156 = vector.broadcast %155 : vector<1x256xf32> to vector<4x256xf32>
    %157 = arith.mulf %154, %156 : vector<4x256xf32>
    %c104 = arith.constant 104 : index
    %c0_128 = arith.constant 0 : index
    %158 = vector.load %arg15[%c104, %c0_128] : memref<196x256xf32, #tpu.memory_space<vmem>>, vector<4x256xf32>
    tpu.vector_store %arg15[%c104, %c0_128], %157 {strides = array<i32>} : memref<196x256xf32, #tpu.memory_space<vmem>>, vector<4x256xf32>,
    %c0_129 = arith.constant 0 : index
    %c55 = arith.constant 55 : index
    %159 = vector.load %arg13[%c0_129, %c55] : memref<4x360xf32, #tpu.memory_space<vmem>>, vector<4x256xf32>
    %c6_130 = arith.constant 6 : index
    %c0_131 = arith.constant 0 : index
    %160 = vector.load %arg8[%c6_130, %c0_131] : memref<7x256xf32, #tpu.memory_space<vmem>>, vector<1x256xf32>
    %161 = vector.broadcast %160 : vector<1x256xf32> to vector<4x256xf32>
    %162 = arith.mulf %159, %161 : vector<4x256xf32>
    %c108 = arith.constant 108 : index
    %c0_132 = arith.constant 0 : index
    %163 = vector.load %arg15[%c108, %c0_132] : memref<196x256xf32, #tpu.memory_space<vmem>>, vector<4x256xf32>
    tpu.vector_store %arg15[%c108, %c0_132], %162 {strides = array<i32>} : memref<196x256xf32, #tpu.memory_space<vmem>>, vector<4x256xf32>,
    %c0_133 = arith.constant 0 : index
    %c65 = arith.constant 65 : index
    %164 = vector.load %arg13[%c0_133, %c65] : memref<4x360xf32, #tpu.memory_space<vmem>>, vector<4x256xf32>
    %c0_134 = arith.constant 0 : index
    %c0_135 = arith.constant 0 : index
    %165 = vector.load %arg8[%c0_134, %c0_135] : memref<7x256xf32, #tpu.memory_space<vmem>>, vector<1x256xf32>
    %166 = vector.broadcast %165 : vector<1x256xf32> to vector<4x256xf32>
    %167 = arith.mulf %164, %166 : vector<4x256xf32>
    %c112 = arith.constant 112 : index
    %c0_136 = arith.constant 0 : index
    %168 = vector.load %arg15[%c112, %c0_136] : memref<196x256xf32, #tpu.memory_space<vmem>>, vector<4x256xf32>
    tpu.vector_store %arg15[%c112, %c0_136], %167 {strides = array<i32>} : memref<196x256xf32, #tpu.memory_space<vmem>>, vector<4x256xf32>,
    %c0_137 = arith.constant 0 : index
    %c66 = arith.constant 66 : index
    %169 = vector.load %arg13[%c0_137, %c66] : memref<4x360xf32, #tpu.memory_space<vmem>>, vector<4x256xf32>
    %c1_138 = arith.constant 1 : index
    %c0_139 = arith.constant 0 : index
    %170 = vector.load %arg8[%c1_138, %c0_139] : memref<7x256xf32, #tpu.memory_space<vmem>>, vector<1x256xf32>
    %171 = vector.broadcast %170 : vector<1x256xf32> to vector<4x256xf32>
    %172 = arith.mulf %169, %171 : vector<4x256xf32>
    %c116 = arith.constant 116 : index
    %c0_140 = arith.constant 0 : index
    %173 = vector.load %arg15[%c116, %c0_140] : memref<196x256xf32, #tpu.memory_space<vmem>>, vector<4x256xf32>
    tpu.vector_store %arg15[%c116, %c0_140], %172 {strides = array<i32>} : memref<196x256xf32, #tpu.memory_space<vmem>>, vector<4x256xf32>,
    %c0_141 = arith.constant 0 : index
    %c67 = arith.constant 67 : index
    %174 = vector.load %arg13[%c0_141, %c67] : memref<4x360xf32, #tpu.memory_space<vmem>>, vector<4x256xf32>
    %c2_142 = arith.constant 2 : index
    %c0_143 = arith.constant 0 : index
    %175 = vector.load %arg8[%c2_142, %c0_143] : memref<7x256xf32, #tpu.memory_space<vmem>>, vector<1x256xf32>
    %176 = vector.broadcast %175 : vector<1x256xf32> to vector<4x256xf32>
    %177 = arith.mulf %174, %176 : vector<4x256xf32>
    %c120 = arith.constant 120 : index
    %c0_144 = arith.constant 0 : index
    %178 = vector.load %arg15[%c120, %c0_144] : memref<196x256xf32, #tpu.memory_space<vmem>>, vector<4x256xf32>
    tpu.vector_store %arg15[%c120, %c0_144], %177 {strides = array<i32>} : memref<196x256xf32, #tpu.memory_space<vmem>>, vector<4x256xf32>,
    %c0_145 = arith.constant 0 : index
    %c68_146 = arith.constant 68 : index
    %179 = vector.load %arg13[%c0_145, %c68_146] : memref<4x360xf32, #tpu.memory_space<vmem>>, vector<4x256xf32>
    %c124 = arith.constant 124 : index
    %c0_147 = arith.constant 0 : index
    %180 = vector.load %arg15[%c124, %c0_147] : memref<196x256xf32, #tpu.memory_space<vmem>>, vector<4x256xf32>
    tpu.vector_store %arg15[%c124, %c0_147], %179 {strides = array<i32>} : memref<196x256xf32, #tpu.memory_space<vmem>>, vector<4x256xf32>,
    %c0_148 = arith.constant 0 : index
    %c69 = arith.constant 69 : index
    %181 = vector.load %arg13[%c0_148, %c69] : memref<4x360xf32, #tpu.memory_space<vmem>>, vector<4x256xf32>
    %c4_149 = arith.constant 4 : index
    %c0_150 = arith.constant 0 : index
    %182 = vector.load %arg8[%c4_149, %c0_150] : memref<7x256xf32, #tpu.memory_space<vmem>>, vector<1x256xf32>
    %183 = vector.broadcast %182 : vector<1x256xf32> to vector<4x256xf32>
    %184 = arith.mulf %181, %183 : vector<4x256xf32>
    %c128 = arith.constant 128 : index
    %c0_151 = arith.constant 0 : index
    %185 = vector.load %arg15[%c128, %c0_151] : memref<196x256xf32, #tpu.memory_space<vmem>>, vector<4x256xf32>
    tpu.vector_store %arg15[%c128, %c0_151], %184 {strides = array<i32>} : memref<196x256xf32, #tpu.memory_space<vmem>>, vector<4x256xf32>,
    %c0_152 = arith.constant 0 : index
    %c70 = arith.constant 70 : index
    %186 = vector.load %arg13[%c0_152, %c70] : memref<4x360xf32, #tpu.memory_space<vmem>>, vector<4x256xf32>
    %c5_153 = arith.constant 5 : index
    %c0_154 = arith.constant 0 : index
    %187 = vector.load %arg8[%c5_153, %c0_154] : memref<7x256xf32, #tpu.memory_space<vmem>>, vector<1x256xf32>
    %188 = vector.broadcast %187 : vector<1x256xf32> to vector<4x256xf32>
    %189 = arith.mulf %186, %188 : vector<4x256xf32>
    %c132 = arith.constant 132 : index
    %c0_155 = arith.constant 0 : index
    %190 = vector.load %arg15[%c132, %c0_155] : memref<196x256xf32, #tpu.memory_space<vmem>>, vector<4x256xf32>
    tpu.vector_store %arg15[%c132, %c0_155], %189 {strides = array<i32>} : memref<196x256xf32, #tpu.memory_space<vmem>>, vector<4x256xf32>,
    %c0_156 = arith.constant 0 : index
    %c71 = arith.constant 71 : index
    %191 = vector.load %arg13[%c0_156, %c71] : memref<4x360xf32, #tpu.memory_space<vmem>>, vector<4x256xf32>
    %c6_157 = arith.constant 6 : index
    %c0_158 = arith.constant 0 : index
    %192 = vector.load %arg8[%c6_157, %c0_158] : memref<7x256xf32, #tpu.memory_space<vmem>>, vector<1x256xf32>
    %193 = vector.broadcast %192 : vector<1x256xf32> to vector<4x256xf32>
    %194 = arith.mulf %191, %193 : vector<4x256xf32>
    %c136 = arith.constant 136 : index
    %c0_159 = arith.constant 0 : index
    %195 = vector.load %arg15[%c136, %c0_159] : memref<196x256xf32, #tpu.memory_space<vmem>>, vector<4x256xf32>
    tpu.vector_store %arg15[%c136, %c0_159], %194 {strides = array<i32>} : memref<196x256xf32, #tpu.memory_space<vmem>>, vector<4x256xf32>,
    %c0_160 = arith.constant 0 : index
    %c81 = arith.constant 81 : index
    %196 = vector.load %arg13[%c0_160, %c81] : memref<4x360xf32, #tpu.memory_space<vmem>>, vector<4x256xf32>
    %c0_161 = arith.constant 0 : index
    %c0_162 = arith.constant 0 : index
    %197 = vector.load %arg8[%c0_161, %c0_162] : memref<7x256xf32, #tpu.memory_space<vmem>>, vector<1x256xf32>
    %198 = vector.broadcast %197 : vector<1x256xf32> to vector<4x256xf32>
    %199 = arith.mulf %196, %198 : vector<4x256xf32>
    %c140 = arith.constant 140 : index
    %c0_163 = arith.constant 0 : index
    %200 = vector.load %arg15[%c140, %c0_163] : memref<196x256xf32, #tpu.memory_space<vmem>>, vector<4x256xf32>
    tpu.vector_store %arg15[%c140, %c0_163], %199 {strides = array<i32>} : memref<196x256xf32, #tpu.memory_space<vmem>>, vector<4x256xf32>,
    %c0_164 = arith.constant 0 : index
    %c82 = arith.constant 82 : index
    %201 = vector.load %arg13[%c0_164, %c82] : memref<4x360xf32, #tpu.memory_space<vmem>>, vector<4x256xf32>
    %c1_165 = arith.constant 1 : index
    %c0_166 = arith.constant 0 : index
    %202 = vector.load %arg8[%c1_165, %c0_166] : memref<7x256xf32, #tpu.memory_space<vmem>>, vector<1x256xf32>
    %203 = vector.broadcast %202 : vector<1x256xf32> to vector<4x256xf32>
    %204 = arith.mulf %201, %203 : vector<4x256xf32>
    %c144 = arith.constant 144 : index
    %c0_167 = arith.constant 0 : index
    %205 = vector.load %arg15[%c144, %c0_167] : memref<196x256xf32, #tpu.memory_space<vmem>>, vector<4x256xf32>
    tpu.vector_store %arg15[%c144, %c0_167], %204 {strides = array<i32>} : memref<196x256xf32, #tpu.memory_space<vmem>>, vector<4x256xf32>,
    %c0_168 = arith.constant 0 : index
    %c83 = arith.constant 83 : index
    %206 = vector.load %arg13[%c0_168, %c83] : memref<4x360xf32, #tpu.memory_space<vmem>>, vector<4x256xf32>
    %c2_169 = arith.constant 2 : index
    %c0_170 = arith.constant 0 : index
    %207 = vector.load %arg8[%c2_169, %c0_170] : memref<7x256xf32, #tpu.memory_space<vmem>>, vector<1x256xf32>
    %208 = vector.broadcast %207 : vector<1x256xf32> to vector<4x256xf32>
    %209 = arith.mulf %206, %208 : vector<4x256xf32>
    %c148 = arith.constant 148 : index
    %c0_171 = arith.constant 0 : index
    %210 = vector.load %arg15[%c148, %c0_171] : memref<196x256xf32, #tpu.memory_space<vmem>>, vector<4x256xf32>
    tpu.vector_store %arg15[%c148, %c0_171], %209 {strides = array<i32>} : memref<196x256xf32, #tpu.memory_space<vmem>>, vector<4x256xf32>,
    %c0_172 = arith.constant 0 : index
    %c84_173 = arith.constant 84 : index
    %211 = vector.load %arg13[%c0_172, %c84_173] : memref<4x360xf32, #tpu.memory_space<vmem>>, vector<4x256xf32>
    %c152 = arith.constant 152 : index
    %c0_174 = arith.constant 0 : index
    %212 = vector.load %arg15[%c152, %c0_174] : memref<196x256xf32, #tpu.memory_space<vmem>>, vector<4x256xf32>
    tpu.vector_store %arg15[%c152, %c0_174], %211 {strides = array<i32>} : memref<196x256xf32, #tpu.memory_space<vmem>>, vector<4x256xf32>,
    %c0_175 = arith.constant 0 : index
    %c85 = arith.constant 85 : index
    %213 = vector.load %arg13[%c0_175, %c85] : memref<4x360xf32, #tpu.memory_space<vmem>>, vector<4x256xf32>
    %c4_176 = arith.constant 4 : index
    %c0_177 = arith.constant 0 : index
    %214 = vector.load %arg8[%c4_176, %c0_177] : memref<7x256xf32, #tpu.memory_space<vmem>>, vector<1x256xf32>
    %215 = vector.broadcast %214 : vector<1x256xf32> to vector<4x256xf32>
    %216 = arith.mulf %213, %215 : vector<4x256xf32>
    %c156 = arith.constant 156 : index
    %c0_178 = arith.constant 0 : index
    %217 = vector.load %arg15[%c156, %c0_178] : memref<196x256xf32, #tpu.memory_space<vmem>>, vector<4x256xf32>
    tpu.vector_store %arg15[%c156, %c0_178], %216 {strides = array<i32>} : memref<196x256xf32, #tpu.memory_space<vmem>>, vector<4x256xf32>,
    %c0_179 = arith.constant 0 : index
    %c86 = arith.constant 86 : index
    %218 = vector.load %arg13[%c0_179, %c86] : memref<4x360xf32, #tpu.memory_space<vmem>>, vector<4x256xf32>
    %c5_180 = arith.constant 5 : index
    %c0_181 = arith.constant 0 : index
    %219 = vector.load %arg8[%c5_180, %c0_181] : memref<7x256xf32, #tpu.memory_space<vmem>>, vector<1x256xf32>
    %220 = vector.broadcast %219 : vector<1x256xf32> to vector<4x256xf32>
    %221 = arith.mulf %218, %220 : vector<4x256xf32>
    %c160 = arith.constant 160 : index
    %c0_182 = arith.constant 0 : index
    %222 = vector.load %arg15[%c160, %c0_182] : memref<196x256xf32, #tpu.memory_space<vmem>>, vector<4x256xf32>
    tpu.vector_store %arg15[%c160, %c0_182], %221 {strides = array<i32>} : memref<196x256xf32, #tpu.memory_space<vmem>>, vector<4x256xf32>,
    %c0_183 = arith.constant 0 : index
    %c87 = arith.constant 87 : index
    %223 = vector.load %arg13[%c0_183, %c87] : memref<4x360xf32, #tpu.memory_space<vmem>>, vector<4x256xf32>
    %c6_184 = arith.constant 6 : index
    %c0_185 = arith.constant 0 : index
    %224 = vector.load %arg8[%c6_184, %c0_185] : memref<7x256xf32, #tpu.memory_space<vmem>>, vector<1x256xf32>
    %225 = vector.broadcast %224 : vector<1x256xf32> to vector<4x256xf32>
    %226 = arith.mulf %223, %225 : vector<4x256xf32>
    %c164 = arith.constant 164 : index
    %c0_186 = arith.constant 0 : index
    %227 = vector.load %arg15[%c164, %c0_186] : memref<196x256xf32, #tpu.memory_space<vmem>>, vector<4x256xf32>
    tpu.vector_store %arg15[%c164, %c0_186], %226 {strides = array<i32>} : memref<196x256xf32, #tpu.memory_space<vmem>>, vector<4x256xf32>,
    %c0_187 = arith.constant 0 : index
    %c97 = arith.constant 97 : index
    %228 = vector.load %arg13[%c0_187, %c97] : memref<4x360xf32, #tpu.memory_space<vmem>>, vector<4x256xf32>
    %c0_188 = arith.constant 0 : index
    %c0_189 = arith.constant 0 : index
    %229 = vector.load %arg8[%c0_188, %c0_189] : memref<7x256xf32, #tpu.memory_space<vmem>>, vector<1x256xf32>
    %230 = vector.broadcast %229 : vector<1x256xf32> to vector<4x256xf32>
    %231 = arith.mulf %228, %230 : vector<4x256xf32>
    %c168 = arith.constant 168 : index
    %c0_190 = arith.constant 0 : index
    %232 = vector.load %arg15[%c168, %c0_190] : memref<196x256xf32, #tpu.memory_space<vmem>>, vector<4x256xf32>
    tpu.vector_store %arg15[%c168, %c0_190], %231 {strides = array<i32>} : memref<196x256xf32, #tpu.memory_space<vmem>>, vector<4x256xf32>,
    %c0_191 = arith.constant 0 : index
    %c98 = arith.constant 98 : index
    %233 = vector.load %arg13[%c0_191, %c98] : memref<4x360xf32, #tpu.memory_space<vmem>>, vector<4x256xf32>
    %c1_192 = arith.constant 1 : index
    %c0_193 = arith.constant 0 : index
    %234 = vector.load %arg8[%c1_192, %c0_193] : memref<7x256xf32, #tpu.memory_space<vmem>>, vector<1x256xf32>
    %235 = vector.broadcast %234 : vector<1x256xf32> to vector<4x256xf32>
    %236 = arith.mulf %233, %235 : vector<4x256xf32>
    %c172 = arith.constant 172 : index
    %c0_194 = arith.constant 0 : index
    %237 = vector.load %arg15[%c172, %c0_194] : memref<196x256xf32, #tpu.memory_space<vmem>>, vector<4x256xf32>
    tpu.vector_store %arg15[%c172, %c0_194], %236 {strides = array<i32>} : memref<196x256xf32, #tpu.memory_space<vmem>>, vector<4x256xf32>,
    %c0_195 = arith.constant 0 : index
    %c99 = arith.constant 99 : index
    %238 = vector.load %arg13[%c0_195, %c99] : memref<4x360xf32, #tpu.memory_space<vmem>>, vector<4x256xf32>
    %c2_196 = arith.constant 2 : index
    %c0_197 = arith.constant 0 : index
    %239 = vector.load %arg8[%c2_196, %c0_197] : memref<7x256xf32, #tpu.memory_space<vmem>>, vector<1x256xf32>
    %240 = vector.broadcast %239 : vector<1x256xf32> to vector<4x256xf32>
    %241 = arith.mulf %238, %240 : vector<4x256xf32>
    %c176 = arith.constant 176 : index
    %c0_198 = arith.constant 0 : index
    %242 = vector.load %arg15[%c176, %c0_198] : memref<196x256xf32, #tpu.memory_space<vmem>>, vector<4x256xf32>
    tpu.vector_store %arg15[%c176, %c0_198], %241 {strides = array<i32>} : memref<196x256xf32, #tpu.memory_space<vmem>>, vector<4x256xf32>,
    %c0_199 = arith.constant 0 : index
    %c100_200 = arith.constant 100 : index
    %243 = vector.load %arg13[%c0_199, %c100_200] : memref<4x360xf32, #tpu.memory_space<vmem>>, vector<4x256xf32>
    %c180 = arith.constant 180 : index
    %c0_201 = arith.constant 0 : index
    %244 = vector.load %arg15[%c180, %c0_201] : memref<196x256xf32, #tpu.memory_space<vmem>>, vector<4x256xf32>
    tpu.vector_store %arg15[%c180, %c0_201], %243 {strides = array<i32>} : memref<196x256xf32, #tpu.memory_space<vmem>>, vector<4x256xf32>,
    %c0_202 = arith.constant 0 : index
    %c101 = arith.constant 101 : index
    %245 = vector.load %arg13[%c0_202, %c101] : memref<4x360xf32, #tpu.memory_space<vmem>>, vector<4x256xf32>
    %c4_203 = arith.constant 4 : index
    %c0_204 = arith.constant 0 : index
    %246 = vector.load %arg8[%c4_203, %c0_204] : memref<7x256xf32, #tpu.memory_space<vmem>>, vector<1x256xf32>
    %247 = vector.broadcast %246 : vector<1x256xf32> to vector<4x256xf32>
    %248 = arith.mulf %245, %247 : vector<4x256xf32>
    %c184 = arith.constant 184 : index
    %c0_205 = arith.constant 0 : index
    %249 = vector.load %arg15[%c184, %c0_205] : memref<196x256xf32, #tpu.memory_space<vmem>>, vector<4x256xf32>
    tpu.vector_store %arg15[%c184, %c0_205], %248 {strides = array<i32>} : memref<196x256xf32, #tpu.memory_space<vmem>>, vector<4x256xf32>,
    %c0_206 = arith.constant 0 : index
    %c102 = arith.constant 102 : index
    %250 = vector.load %arg13[%c0_206, %c102] : memref<4x360xf32, #tpu.memory_space<vmem>>, vector<4x256xf32>
    %c5_207 = arith.constant 5 : index
    %c0_208 = arith.constant 0 : index
    %251 = vector.load %arg8[%c5_207, %c0_208] : memref<7x256xf32, #tpu.memory_space<vmem>>, vector<1x256xf32>
    %252 = vector.broadcast %251 : vector<1x256xf32> to vector<4x256xf32>
    %253 = arith.mulf %250, %252 : vector<4x256xf32>
    %c188 = arith.constant 188 : index
    %c0_209 = arith.constant 0 : index
    %254 = vector.load %arg15[%c188, %c0_209] : memref<196x256xf32, #tpu.memory_space<vmem>>, vector<4x256xf32>
    tpu.vector_store %arg15[%c188, %c0_209], %253 {strides = array<i32>} : memref<196x256xf32, #tpu.memory_space<vmem>>, vector<4x256xf32>,
    %c0_210 = arith.constant 0 : index
    %c103 = arith.constant 103 : index
    %255 = vector.load %arg13[%c0_210, %c103] : memref<4x360xf32, #tpu.memory_space<vmem>>, vector<4x256xf32>
    %c6_211 = arith.constant 6 : index
    %c0_212 = arith.constant 0 : index
    %256 = vector.load %arg8[%c6_211, %c0_212] : memref<7x256xf32, #tpu.memory_space<vmem>>, vector<1x256xf32>
    %257 = vector.broadcast %256 : vector<1x256xf32> to vector<4x256xf32>
    %258 = arith.mulf %255, %257 : vector<4x256xf32>
    %c192 = arith.constant 192 : index
    %c0_213 = arith.constant 0 : index
    %259 = vector.load %arg15[%c192, %c0_213] : memref<196x256xf32, #tpu.memory_space<vmem>>, vector<4x256xf32>
    tpu.vector_store %arg15[%c192, %c0_213], %258 {strides = array<i32>} : memref<196x256xf32, #tpu.memory_space<vmem>>, vector<4x256xf32>,
    %c0_214 = arith.constant 0 : index
    %c0_215 = arith.constant 0 : index
    %260 = vector.load %arg6[%c0_214, %c0_215] : memref<4x196xbf16, #tpu.memory_space<vmem>>, vector<4x196xbf16>
    %c0_216 = arith.constant 0 : index
    %c0_217 = arith.constant 0 : index
    %261 = vector.load %arg15[%c0_216, %c0_217] : memref<196x256xf32, #tpu.memory_space<vmem>>, vector<196x256xf32>
    %262 = arith.truncf %261 : vector<196x256xf32> to vector<196x256xbf16>
    %cst_218 = arith.constant dense<0.000000e+00> : vector<4x256xf32>
    %263 = tpu.matmul %260, %262, %cst_218 {dimension_numbers = #tpu.dot_dimension_numbers<[1], [0], [0], [1], [0, 0, 1, 1], [], []>} : vector<4x196xbf16>, vector<196x256xbf16>, vector<4x256xf32> -> vector<4x256xf32>
    %c0_219 = arith.constant 0 : index
    %c0_220 = arith.constant 0 : index
    %264 = vector.load %arg7[%c0_219, %c0_220] : memref<4x1xf32, #tpu.memory_space<vmem>>, vector<4x1xf32>
    %265 = vector.broadcast %264 : vector<4x1xf32> to vector<4x256xf32>
    %266 = arith.addf %263, %265 : vector<4x256xf32>
    %cst_221 = arith.constant 0.000000e+00 : f32
    %267 = vector.broadcast %cst_221 : f32 to vector<2x52xf32>
    %c0_222 = arith.constant 0 : index
    %c0_223 = arith.constant 0 : index
    %268 = vector.load %arg14[%c0_222, %c0_223] : memref<2x360xf32, #tpu.memory_space<vmem>>, vector<2x52xf32>
    tpu.vector_store %arg14[%c0_222, %c0_223], %267 {strides = array<i32>} : memref<2x360xf32, #tpu.memory_space<vmem>>, vector<2x52xf32>,
    %cst_224 = arith.constant 0.000000e+00 : f32
    %269 = vector.broadcast %cst_224 : f32 to vector<2x52xf32>
    %c0_225 = arith.constant 0 : index
    %c308_226 = arith.constant 308 : index
    %270 = vector.load %arg14[%c0_225, %c308_226] : memref<2x360xf32, #tpu.memory_space<vmem>>, vector<2x52xf32>
    tpu.vector_store %arg14[%c0_225, %c308_226], %269 {strides = array<i32>} : memref<2x360xf32, #tpu.memory_space<vmem>>, vector<2x52xf32>,
    %cst_227 = arith.constant dense<0.000000e+00> : vector<256xf32>
    %271 = vector.multi_reduction <add>, %266, %cst_227 [0] : vector<4x256xf32> to vector<256xf32>
    %272 = vector.shape_cast %271 : vector<256xf32> to vector<1x256xf32>
    %cst_228 = arith.constant 4.000000e+00 : f32
    %273 = vector.broadcast %cst_228 : f32 to vector<1x256xf32>
    %274 = arith.divf %272, %273 : vector<1x256xf32>
    %c0_229 = arith.constant 0 : index
    %c52_230 = arith.constant 52 : index
    %275 = vector.load %arg14[%c0_229, %c52_230] : memref<2x360xf32, #tpu.memory_space<vmem>>, vector<1x256xf32>
    tpu.vector_store %arg14[%c0_229, %c52_230], %274 {strides = array<i32>} : memref<2x360xf32, #tpu.memory_space<vmem>>, vector<1x256xf32>,
    %cst_231 = arith.constant dense<0xFF800000> : vector<256xf32>
    %276 = vector.multi_reduction <maximumf>, %266, %cst_231 [0] : vector<4x256xf32> to vector<256xf32>
    %277 = vector.shape_cast %276 : vector<256xf32> to vector<1x256xf32>
    %c1_232 = arith.constant 1 : index
    %c52_233 = arith.constant 52 : index
    %278 = vector.load %arg14[%c1_232, %c52_233] : memref<2x360xf32, #tpu.memory_space<vmem>>, vector<1x256xf32>
    tpu.vector_store %arg14[%c1_232, %c52_233], %277 {strides = array<i32>} : memref<2x360xf32, #tpu.memory_space<vmem>>, vector<1x256xf32>,
    %cst_234 = arith.constant 0.000000e+00 : f32
    %279 = vector.broadcast %cst_234 : f32 to vector<1x256xf32>
    %c0_235 = arith.constant 0 : index
    %c1_236 = arith.constant 1 : index
    %280 = vector.load %arg14[%c0_235, %c1_236] : memref<2x360xf32, #tpu.memory_space<vmem>>, vector<2x256xf32>
    %281 = vector.extract_strided_slice %280 {offsets = [0, 0], sizes = [1, 256], strides = [1, 1]} : vector<2x256xf32> to vector<1x256xf32>
    %c0_237 = arith.constant 0 : index
    %282 = memref.load %arg9[%c0_237] : memref<98xf32, #tpu.memory_space<smem>>
    %283 = vector.broadcast %282 : f32 to vector<1x256xf32>
    %284 = arith.mulf %281, %283 : vector<1x256xf32>
    %285 = vector.extract_strided_slice %280 {offsets = [1, 0], sizes = [1, 256], strides = [1, 1]} : vector<2x256xf32> to vector<1x256xf32>
    %c1_238 = arith.constant 1 : index
    %286 = memref.load %arg9[%c1_238] : memref<98xf32, #tpu.memory_space<smem>>
    %287 = vector.broadcast %286 : f32 to vector<1x256xf32>
    %288 = arith.mulf %285, %287 : vector<1x256xf32>
    %289 = arith.addf %284, %288 : vector<1x256xf32>
    %c0_239 = arith.constant 0 : index
    %c0_240 = arith.constant 0 : index
    %290 = vector.load %arg8[%c0_239, %c0_240] : memref<7x256xf32, #tpu.memory_space<vmem>>, vector<1x256xf32>
    %291 = arith.mulf %289, %290 : vector<1x256xf32>
    %292 = arith.addf %279, %291 : vector<1x256xf32>
    %c0_241 = arith.constant 0 : index
    %c2_242 = arith.constant 2 : index
    %293 = vector.load %arg14[%c0_241, %c2_242] : memref<2x360xf32, #tpu.memory_space<vmem>>, vector<2x256xf32>
    %294 = vector.extract_strided_slice %293 {offsets = [0, 0], sizes = [1, 256], strides = [1, 1]} : vector<2x256xf32> to vector<1x256xf32>
    %c2_243 = arith.constant 2 : index
    %295 = memref.load %arg9[%c2_243] : memref<98xf32, #tpu.memory_space<smem>>
    %296 = vector.broadcast %295 : f32 to vector<1x256xf32>
    %297 = arith.mulf %294, %296 : vector<1x256xf32>
    %298 = vector.extract_strided_slice %293 {offsets = [1, 0], sizes = [1, 256], strides = [1, 1]} : vector<2x256xf32> to vector<1x256xf32>
    %c3_244 = arith.constant 3 : index
    %299 = memref.load %arg9[%c3_244] : memref<98xf32, #tpu.memory_space<smem>>
    %300 = vector.broadcast %299 : f32 to vector<1x256xf32>
    %301 = arith.mulf %298, %300 : vector<1x256xf32>
    %302 = arith.addf %297, %301 : vector<1x256xf32>
    %c1_245 = arith.constant 1 : index
    %c0_246 = arith.constant 0 : index
    %303 = vector.load %arg8[%c1_245, %c0_246] : memref<7x256xf32, #tpu.memory_space<vmem>>, vector<1x256xf32>
    %304 = arith.mulf %302, %303 : vector<1x256xf32>
    %305 = arith.addf %292, %304 : vector<1x256xf32>
    %c0_247 = arith.constant 0 : index
    %c3_248 = arith.constant 3 : index
    %306 = vector.load %arg14[%c0_247, %c3_248] : memref<2x360xf32, #tpu.memory_space<vmem>>, vector<2x256xf32>
    %307 = vector.extract_strided_slice %306 {offsets = [0, 0], sizes = [1, 256], strides = [1, 1]} : vector<2x256xf32> to vector<1x256xf32>
    %c4_249 = arith.constant 4 : index
    %308 = memref.load %arg9[%c4_249] : memref<98xf32, #tpu.memory_space<smem>>
    %309 = vector.broadcast %308 : f32 to vector<1x256xf32>
    %310 = arith.mulf %307, %309 : vector<1x256xf32>
    %311 = vector.extract_strided_slice %306 {offsets = [1, 0], sizes = [1, 256], strides = [1, 1]} : vector<2x256xf32> to vector<1x256xf32>
    %c5_250 = arith.constant 5 : index
    %312 = memref.load %arg9[%c5_250] : memref<98xf32, #tpu.memory_space<smem>>
    %313 = vector.broadcast %312 : f32 to vector<1x256xf32>
    %314 = arith.mulf %311, %313 : vector<1x256xf32>
    %315 = arith.addf %310, %314 : vector<1x256xf32>
    %c2_251 = arith.constant 2 : index
    %c0_252 = arith.constant 0 : index
    %316 = vector.load %arg8[%c2_251, %c0_252] : memref<7x256xf32, #tpu.memory_space<vmem>>, vector<1x256xf32>
    %317 = arith.mulf %315, %316 : vector<1x256xf32>
    %318 = arith.addf %305, %317 : vector<1x256xf32>
    %c0_253 = arith.constant 0 : index
    %c4_254 = arith.constant 4 : index
    %319 = vector.load %arg14[%c0_253, %c4_254] : memref<2x360xf32, #tpu.memory_space<vmem>>, vector<2x256xf32>
    %320 = vector.extract_strided_slice %319 {offsets = [0, 0], sizes = [1, 256], strides = [1, 1]} : vector<2x256xf32> to vector<1x256xf32>
    %c6_255 = arith.constant 6 : index
    %321 = memref.load %arg9[%c6_255] : memref<98xf32, #tpu.memory_space<smem>>
    %322 = vector.broadcast %321 : f32 to vector<1x256xf32>
    %323 = arith.mulf %320, %322 : vector<1x256xf32>
    %324 = vector.extract_strided_slice %319 {offsets = [1, 0], sizes = [1, 256], strides = [1, 1]} : vector<2x256xf32> to vector<1x256xf32>
    %c7_256 = arith.constant 7 : index
    %325 = memref.load %arg9[%c7_256] : memref<98xf32, #tpu.memory_space<smem>>
    %326 = vector.broadcast %325 : f32 to vector<1x256xf32>
    %327 = arith.mulf %324, %326 : vector<1x256xf32>
    %328 = arith.addf %323, %327 : vector<1x256xf32>
    %329 = arith.addf %318, %328 : vector<1x256xf32>
    %c0_257 = arith.constant 0 : index
    %c5_258 = arith.constant 5 : index
    %330 = vector.load %arg14[%c0_257, %c5_258] : memref<2x360xf32, #tpu.memory_space<vmem>>, vector<2x256xf32>
    %331 = vector.extract_strided_slice %330 {offsets = [0, 0], sizes = [1, 256], strides = [1, 1]} : vector<2x256xf32> to vector<1x256xf32>
    %c8_259 = arith.constant 8 : index
    %332 = memref.load %arg9[%c8_259] : memref<98xf32, #tpu.memory_space<smem>>
    %333 = vector.broadcast %332 : f32 to vector<1x256xf32>
    %334 = arith.mulf %331, %333 : vector<1x256xf32>
    %335 = vector.extract_strided_slice %330 {offsets = [1, 0], sizes = [1, 256], strides = [1, 1]} : vector<2x256xf32> to vector<1x256xf32>
    %c9 = arith.constant 9 : index
    %336 = memref.load %arg9[%c9] : memref<98xf32, #tpu.memory_space<smem>>
    %337 = vector.broadcast %336 : f32 to vector<1x256xf32>
    %338 = arith.mulf %335, %337 : vector<1x256xf32>
    %339 = arith.addf %334, %338 : vector<1x256xf32>
    %c4_260 = arith.constant 4 : index
    %c0_261 = arith.constant 0 : index
    %340 = vector.load %arg8[%c4_260, %c0_261] : memref<7x256xf32, #tpu.memory_space<vmem>>, vector<1x256xf32>
    %341 = arith.mulf %339, %340 : vector<1x256xf32>
    %342 = arith.addf %329, %341 : vector<1x256xf32>
    %c0_262 = arith.constant 0 : index
    %c6_263 = arith.constant 6 : index
    %343 = vector.load %arg14[%c0_262, %c6_263] : memref<2x360xf32, #tpu.memory_space<vmem>>, vector<2x256xf32>
    %344 = vector.extract_strided_slice %343 {offsets = [0, 0], sizes = [1, 256], strides = [1, 1]} : vector<2x256xf32> to vector<1x256xf32>
    %c10 = arith.constant 10 : index
    %345 = memref.load %arg9[%c10] : memref<98xf32, #tpu.memory_space<smem>>
    %346 = vector.broadcast %345 : f32 to vector<1x256xf32>
    %347 = arith.mulf %344, %346 : vector<1x256xf32>
    %348 = vector.extract_strided_slice %343 {offsets = [1, 0], sizes = [1, 256], strides = [1, 1]} : vector<2x256xf32> to vector<1x256xf32>
    %c11 = arith.constant 11 : index
    %349 = memref.load %arg9[%c11] : memref<98xf32, #tpu.memory_space<smem>>
    %350 = vector.broadcast %349 : f32 to vector<1x256xf32>
    %351 = arith.mulf %348, %350 : vector<1x256xf32>
    %352 = arith.addf %347, %351 : vector<1x256xf32>
    %c5_264 = arith.constant 5 : index
    %c0_265 = arith.constant 0 : index
    %353 = vector.load %arg8[%c5_264, %c0_265] : memref<7x256xf32, #tpu.memory_space<vmem>>, vector<1x256xf32>
    %354 = arith.mulf %352, %353 : vector<1x256xf32>
    %355 = arith.addf %342, %354 : vector<1x256xf32>
    %c0_266 = arith.constant 0 : index
    %c7_267 = arith.constant 7 : index
    %356 = vector.load %arg14[%c0_266, %c7_267] : memref<2x360xf32, #tpu.memory_space<vmem>>, vector<2x256xf32>
    %357 = vector.extract_strided_slice %356 {offsets = [0, 0], sizes = [1, 256], strides = [1, 1]} : vector<2x256xf32> to vector<1x256xf32>
    %c12_268 = arith.constant 12 : index
    %358 = memref.load %arg9[%c12_268] : memref<98xf32, #tpu.memory_space<smem>>
    %359 = vector.broadcast %358 : f32 to vector<1x256xf32>
    %360 = arith.mulf %357, %359 : vector<1x256xf32>
    %361 = vector.extract_strided_slice %356 {offsets = [1, 0], sizes = [1, 256], strides = [1, 1]} : vector<2x256xf32> to vector<1x256xf32>
    %c13 = arith.constant 13 : index
    %362 = memref.load %arg9[%c13] : memref<98xf32, #tpu.memory_space<smem>>
    %363 = vector.broadcast %362 : f32 to vector<1x256xf32>
    %364 = arith.mulf %361, %363 : vector<1x256xf32>
    %365 = arith.addf %360, %364 : vector<1x256xf32>
    %c6_269 = arith.constant 6 : index
    %c0_270 = arith.constant 0 : index
    %366 = vector.load %arg8[%c6_269, %c0_270] : memref<7x256xf32, #tpu.memory_space<vmem>>, vector<1x256xf32>
    %367 = arith.mulf %365, %366 : vector<1x256xf32>
    %368 = arith.addf %355, %367 : vector<1x256xf32>
    %c0_271 = arith.constant 0 : index
    %c17_272 = arith.constant 17 : index
    %369 = vector.load %arg14[%c0_271, %c17_272] : memref<2x360xf32, #tpu.memory_space<vmem>>, vector<2x256xf32>
    %370 = vector.extract_strided_slice %369 {offsets = [0, 0], sizes = [1, 256], strides = [1, 1]} : vector<2x256xf32> to vector<1x256xf32>
    %c14 = arith.constant 14 : index
    %371 = memref.load %arg9[%c14] : memref<98xf32, #tpu.memory_space<smem>>
    %372 = vector.broadcast %371 : f32 to vector<1x256xf32>
    %373 = arith.mulf %370, %372 : vector<1x256xf32>
    %374 = vector.extract_strided_slice %369 {offsets = [1, 0], sizes = [1, 256], strides = [1, 1]} : vector<2x256xf32> to vector<1x256xf32>
    %c15 = arith.constant 15 : index
    %375 = memref.load %arg9[%c15] : memref<98xf32, #tpu.memory_space<smem>>
    %376 = vector.broadcast %375 : f32 to vector<1x256xf32>
    %377 = arith.mulf %374, %376 : vector<1x256xf32>
    %378 = arith.addf %373, %377 : vector<1x256xf32>
    %c0_273 = arith.constant 0 : index
    %c0_274 = arith.constant 0 : index
    %379 = vector.load %arg8[%c0_273, %c0_274] : memref<7x256xf32, #tpu.memory_space<vmem>>, vector<1x256xf32>
    %380 = arith.mulf %378, %379 : vector<1x256xf32>
    %381 = arith.addf %368, %380 : vector<1x256xf32>
    %c0_275 = arith.constant 0 : index
    %c18_276 = arith.constant 18 : index
    %382 = vector.load %arg14[%c0_275, %c18_276] : memref<2x360xf32, #tpu.memory_space<vmem>>, vector<2x256xf32>
    %383 = vector.extract_strided_slice %382 {offsets = [0, 0], sizes = [1, 256], strides = [1, 1]} : vector<2x256xf32> to vector<1x256xf32>
    %c16_277 = arith.constant 16 : index
    %384 = memref.load %arg9[%c16_277] : memref<98xf32, #tpu.memory_space<smem>>
    %385 = vector.broadcast %384 : f32 to vector<1x256xf32>
    %386 = arith.mulf %383, %385 : vector<1x256xf32>
    %387 = vector.extract_strided_slice %382 {offsets = [1, 0], sizes = [1, 256], strides = [1, 1]} : vector<2x256xf32> to vector<1x256xf32>
    %c17_278 = arith.constant 17 : index
    %388 = memref.load %arg9[%c17_278] : memref<98xf32, #tpu.memory_space<smem>>
    %389 = vector.broadcast %388 : f32 to vector<1x256xf32>
    %390 = arith.mulf %387, %389 : vector<1x256xf32>
    %391 = arith.addf %386, %390 : vector<1x256xf32>
    %c1_279 = arith.constant 1 : index
    %c0_280 = arith.constant 0 : index
    %392 = vector.load %arg8[%c1_279, %c0_280] : memref<7x256xf32, #tpu.memory_space<vmem>>, vector<1x256xf32>
    %393 = arith.mulf %391, %392 : vector<1x256xf32>
    %394 = arith.addf %381, %393 : vector<1x256xf32>
    %c0_281 = arith.constant 0 : index
    %c19_282 = arith.constant 19 : index
    %395 = vector.load %arg14[%c0_281, %c19_282] : memref<2x360xf32, #tpu.memory_space<vmem>>, vector<2x256xf32>
    %396 = vector.extract_strided_slice %395 {offsets = [0, 0], sizes = [1, 256], strides = [1, 1]} : vector<2x256xf32> to vector<1x256xf32>
    %c18_283 = arith.constant 18 : index
    %397 = memref.load %arg9[%c18_283] : memref<98xf32, #tpu.memory_space<smem>>
    %398 = vector.broadcast %397 : f32 to vector<1x256xf32>
    %399 = arith.mulf %396, %398 : vector<1x256xf32>
    %400 = vector.extract_strided_slice %395 {offsets = [1, 0], sizes = [1, 256], strides = [1, 1]} : vector<2x256xf32> to vector<1x256xf32>
    %c19_284 = arith.constant 19 : index
    %401 = memref.load %arg9[%c19_284] : memref<98xf32, #tpu.memory_space<smem>>
    %402 = vector.broadcast %401 : f32 to vector<1x256xf32>
    %403 = arith.mulf %400, %402 : vector<1x256xf32>
    %404 = arith.addf %399, %403 : vector<1x256xf32>
    %c2_285 = arith.constant 2 : index
    %c0_286 = arith.constant 0 : index
    %405 = vector.load %arg8[%c2_285, %c0_286] : memref<7x256xf32, #tpu.memory_space<vmem>>, vector<1x256xf32>
    %406 = arith.mulf %404, %405 : vector<1x256xf32>
    %407 = arith.addf %394, %406 : vector<1x256xf32>
    %c0_287 = arith.constant 0 : index
    %c20_288 = arith.constant 20 : index
    %408 = vector.load %arg14[%c0_287, %c20_288] : memref<2x360xf32, #tpu.memory_space<vmem>>, vector<2x256xf32>
    %409 = vector.extract_strided_slice %408 {offsets = [0, 0], sizes = [1, 256], strides = [1, 1]} : vector<2x256xf32> to vector<1x256xf32>
    %c20_289 = arith.constant 20 : index
    %410 = memref.load %arg9[%c20_289] : memref<98xf32, #tpu.memory_space<smem>>
    %411 = vector.broadcast %410 : f32 to vector<1x256xf32>
    %412 = arith.mulf %409, %411 : vector<1x256xf32>
    %413 = vector.extract_strided_slice %408 {offsets = [1, 0], sizes = [1, 256], strides = [1, 1]} : vector<2x256xf32> to vector<1x256xf32>
    %c21_290 = arith.constant 21 : index
    %414 = memref.load %arg9[%c21_290] : memref<98xf32, #tpu.memory_space<smem>>
    %415 = vector.broadcast %414 : f32 to vector<1x256xf32>
    %416 = arith.mulf %413, %415 : vector<1x256xf32>
    %417 = arith.addf %412, %416 : vector<1x256xf32>
    %418 = arith.addf %407, %417 : vector<1x256xf32>
    %c0_291 = arith.constant 0 : index
    %c21_292 = arith.constant 21 : index
    %419 = vector.load %arg14[%c0_291, %c21_292] : memref<2x360xf32, #tpu.memory_space<vmem>>, vector<2x256xf32>
    %420 = vector.extract_strided_slice %419 {offsets = [0, 0], sizes = [1, 256], strides = [1, 1]} : vector<2x256xf32> to vector<1x256xf32>
    %c22_293 = arith.constant 22 : index
    %421 = memref.load %arg9[%c22_293] : memref<98xf32, #tpu.memory_space<smem>>
    %422 = vector.broadcast %421 : f32 to vector<1x256xf32>
    %423 = arith.mulf %420, %422 : vector<1x256xf32>
    %424 = vector.extract_strided_slice %419 {offsets = [1, 0], sizes = [1, 256], strides = [1, 1]} : vector<2x256xf32> to vector<1x256xf32>
    %c23_294 = arith.constant 23 : index
    %425 = memref.load %arg9[%c23_294] : memref<98xf32, #tpu.memory_space<smem>>
    %426 = vector.broadcast %425 : f32 to vector<1x256xf32>
    %427 = arith.mulf %424, %426 : vector<1x256xf32>
    %428 = arith.addf %423, %427 : vector<1x256xf32>
    %c4_295 = arith.constant 4 : index
    %c0_296 = arith.constant 0 : index
    %429 = vector.load %arg8[%c4_295, %c0_296] : memref<7x256xf32, #tpu.memory_space<vmem>>, vector<1x256xf32>
    %430 = arith.mulf %428, %429 : vector<1x256xf32>
    %431 = arith.addf %418, %430 : vector<1x256xf32>
    %c0_297 = arith.constant 0 : index
    %c22_298 = arith.constant 22 : index
    %432 = vector.load %arg14[%c0_297, %c22_298] : memref<2x360xf32, #tpu.memory_space<vmem>>, vector<2x256xf32>
    %433 = vector.extract_strided_slice %432 {offsets = [0, 0], sizes = [1, 256], strides = [1, 1]} : vector<2x256xf32> to vector<1x256xf32>
    %c24_299 = arith.constant 24 : index
    %434 = memref.load %arg9[%c24_299] : memref<98xf32, #tpu.memory_space<smem>>
    %435 = vector.broadcast %434 : f32 to vector<1x256xf32>
    %436 = arith.mulf %433, %435 : vector<1x256xf32>
    %437 = vector.extract_strided_slice %432 {offsets = [1, 0], sizes = [1, 256], strides = [1, 1]} : vector<2x256xf32> to vector<1x256xf32>
    %c25 = arith.constant 25 : index
    %438 = memref.load %arg9[%c25] : memref<98xf32, #tpu.memory_space<smem>>
    %439 = vector.broadcast %438 : f32 to vector<1x256xf32>
    %440 = arith.mulf %437, %439 : vector<1x256xf32>
    %441 = arith.addf %436, %440 : vector<1x256xf32>
    %c5_300 = arith.constant 5 : index
    %c0_301 = arith.constant 0 : index
    %442 = vector.load %arg8[%c5_300, %c0_301] : memref<7x256xf32, #tpu.memory_space<vmem>>, vector<1x256xf32>
    %443 = arith.mulf %441, %442 : vector<1x256xf32>
    %444 = arith.addf %431, %443 : vector<1x256xf32>
    %c0_302 = arith.constant 0 : index
    %c23_303 = arith.constant 23 : index
    %445 = vector.load %arg14[%c0_302, %c23_303] : memref<2x360xf32, #tpu.memory_space<vmem>>, vector<2x256xf32>
    %446 = vector.extract_strided_slice %445 {offsets = [0, 0], sizes = [1, 256], strides = [1, 1]} : vector<2x256xf32> to vector<1x256xf32>
    %c26 = arith.constant 26 : index
    %447 = memref.load %arg9[%c26] : memref<98xf32, #tpu.memory_space<smem>>
    %448 = vector.broadcast %447 : f32 to vector<1x256xf32>
    %449 = arith.mulf %446, %448 : vector<1x256xf32>
    %450 = vector.extract_strided_slice %445 {offsets = [1, 0], sizes = [1, 256], strides = [1, 1]} : vector<2x256xf32> to vector<1x256xf32>
    %c27 = arith.constant 27 : index
    %451 = memref.load %arg9[%c27] : memref<98xf32, #tpu.memory_space<smem>>
    %452 = vector.broadcast %451 : f32 to vector<1x256xf32>
    %453 = arith.mulf %450, %452 : vector<1x256xf32>
    %454 = arith.addf %449, %453 : vector<1x256xf32>
    %c6_304 = arith.constant 6 : index
    %c0_305 = arith.constant 0 : index
    %455 = vector.load %arg8[%c6_304, %c0_305] : memref<7x256xf32, #tpu.memory_space<vmem>>, vector<1x256xf32>
    %456 = arith.mulf %454, %455 : vector<1x256xf32>
    %457 = arith.addf %444, %456 : vector<1x256xf32>
    %c0_306 = arith.constant 0 : index
    %c33_307 = arith.constant 33 : index
    %458 = vector.load %arg14[%c0_306, %c33_307] : memref<2x360xf32, #tpu.memory_space<vmem>>, vector<2x256xf32>
    %459 = vector.extract_strided_slice %458 {offsets = [0, 0], sizes = [1, 256], strides = [1, 1]} : vector<2x256xf32> to vector<1x256xf32>
    %c28_308 = arith.constant 28 : index
    %460 = memref.load %arg9[%c28_308] : memref<98xf32, #tpu.memory_space<smem>>
    %461 = vector.broadcast %460 : f32 to vector<1x256xf32>
    %462 = arith.mulf %459, %461 : vector<1x256xf32>
    %463 = vector.extract_strided_slice %458 {offsets = [1, 0], sizes = [1, 256], strides = [1, 1]} : vector<2x256xf32> to vector<1x256xf32>
    %c29 = arith.constant 29 : index
    %464 = memref.load %arg9[%c29] : memref<98xf32, #tpu.memory_space<smem>>
    %465 = vector.broadcast %464 : f32 to vector<1x256xf32>
    %466 = arith.mulf %463, %465 : vector<1x256xf32>
    %467 = arith.addf %462, %466 : vector<1x256xf32>
    %c0_309 = arith.constant 0 : index
    %c0_310 = arith.constant 0 : index
    %468 = vector.load %arg8[%c0_309, %c0_310] : memref<7x256xf32, #tpu.memory_space<vmem>>, vector<1x256xf32>
    %469 = arith.mulf %467, %468 : vector<1x256xf32>
    %470 = arith.addf %457, %469 : vector<1x256xf32>
    %c0_311 = arith.constant 0 : index
    %c34_312 = arith.constant 34 : index
    %471 = vector.load %arg14[%c0_311, %c34_312] : memref<2x360xf32, #tpu.memory_space<vmem>>, vector<2x256xf32>
    %472 = vector.extract_strided_slice %471 {offsets = [0, 0], sizes = [1, 256], strides = [1, 1]} : vector<2x256xf32> to vector<1x256xf32>
    %c30 = arith.constant 30 : index
    %473 = memref.load %arg9[%c30] : memref<98xf32, #tpu.memory_space<smem>>
    %474 = vector.broadcast %473 : f32 to vector<1x256xf32>
    %475 = arith.mulf %472, %474 : vector<1x256xf32>
    %476 = vector.extract_strided_slice %471 {offsets = [1, 0], sizes = [1, 256], strides = [1, 1]} : vector<2x256xf32> to vector<1x256xf32>
    %c31 = arith.constant 31 : index
    %477 = memref.load %arg9[%c31] : memref<98xf32, #tpu.memory_space<smem>>
    %478 = vector.broadcast %477 : f32 to vector<1x256xf32>
    %479 = arith.mulf %476, %478 : vector<1x256xf32>
    %480 = arith.addf %475, %479 : vector<1x256xf32>
    %c1_313 = arith.constant 1 : index
    %c0_314 = arith.constant 0 : index
    %481 = vector.load %arg8[%c1_313, %c0_314] : memref<7x256xf32, #tpu.memory_space<vmem>>, vector<1x256xf32>
    %482 = arith.mulf %480, %481 : vector<1x256xf32>
    %483 = arith.addf %470, %482 : vector<1x256xf32>
    %c0_315 = arith.constant 0 : index
    %c35_316 = arith.constant 35 : index
    %484 = vector.load %arg14[%c0_315, %c35_316] : memref<2x360xf32, #tpu.memory_space<vmem>>, vector<2x256xf32>
    %485 = vector.extract_strided_slice %484 {offsets = [0, 0], sizes = [1, 256], strides = [1, 1]} : vector<2x256xf32> to vector<1x256xf32>
    %c32_317 = arith.constant 32 : index
    %486 = memref.load %arg9[%c32_317] : memref<98xf32, #tpu.memory_space<smem>>
    %487 = vector.broadcast %486 : f32 to vector<1x256xf32>
    %488 = arith.mulf %485, %487 : vector<1x256xf32>
    %489 = vector.extract_strided_slice %484 {offsets = [1, 0], sizes = [1, 256], strides = [1, 1]} : vector<2x256xf32> to vector<1x256xf32>
    %c33_318 = arith.constant 33 : index
    %490 = memref.load %arg9[%c33_318] : memref<98xf32, #tpu.memory_space<smem>>
    %491 = vector.broadcast %490 : f32 to vector<1x256xf32>
    %492 = arith.mulf %489, %491 : vector<1x256xf32>
    %493 = arith.addf %488, %492 : vector<1x256xf32>
    %c2_319 = arith.constant 2 : index
    %c0_320 = arith.constant 0 : index
    %494 = vector.load %arg8[%c2_319, %c0_320] : memref<7x256xf32, #tpu.memory_space<vmem>>, vector<1x256xf32>
    %495 = arith.mulf %493, %494 : vector<1x256xf32>
    %496 = arith.addf %483, %495 : vector<1x256xf32>
    %c0_321 = arith.constant 0 : index
    %c36_322 = arith.constant 36 : index
    %497 = vector.load %arg14[%c0_321, %c36_322] : memref<2x360xf32, #tpu.memory_space<vmem>>, vector<2x256xf32>
    %498 = vector.extract_strided_slice %497 {offsets = [0, 0], sizes = [1, 256], strides = [1, 1]} : vector<2x256xf32> to vector<1x256xf32>
    %c34_323 = arith.constant 34 : index
    %499 = memref.load %arg9[%c34_323] : memref<98xf32, #tpu.memory_space<smem>>
    %500 = vector.broadcast %499 : f32 to vector<1x256xf32>
    %501 = arith.mulf %498, %500 : vector<1x256xf32>
    %502 = vector.extract_strided_slice %497 {offsets = [1, 0], sizes = [1, 256], strides = [1, 1]} : vector<2x256xf32> to vector<1x256xf32>
    %c35_324 = arith.constant 35 : index
    %503 = memref.load %arg9[%c35_324] : memref<98xf32, #tpu.memory_space<smem>>
    %504 = vector.broadcast %503 : f32 to vector<1x256xf32>
    %505 = arith.mulf %502, %504 : vector<1x256xf32>
    %506 = arith.addf %501, %505 : vector<1x256xf32>
    %507 = arith.addf %496, %506 : vector<1x256xf32>
    %c0_325 = arith.constant 0 : index
    %c37_326 = arith.constant 37 : index
    %508 = vector.load %arg14[%c0_325, %c37_326] : memref<2x360xf32, #tpu.memory_space<vmem>>, vector<2x256xf32>
    %509 = vector.extract_strided_slice %508 {offsets = [0, 0], sizes = [1, 256], strides = [1, 1]} : vector<2x256xf32> to vector<1x256xf32>
    %c36_327 = arith.constant 36 : index
    %510 = memref.load %arg9[%c36_327] : memref<98xf32, #tpu.memory_space<smem>>
    %511 = vector.broadcast %510 : f32 to vector<1x256xf32>
    %512 = arith.mulf %509, %511 : vector<1x256xf32>
    %513 = vector.extract_strided_slice %508 {offsets = [1, 0], sizes = [1, 256], strides = [1, 1]} : vector<2x256xf32> to vector<1x256xf32>
    %c37_328 = arith.constant 37 : index
    %514 = memref.load %arg9[%c37_328] : memref<98xf32, #tpu.memory_space<smem>>
    %515 = vector.broadcast %514 : f32 to vector<1x256xf32>
    %516 = arith.mulf %513, %515 : vector<1x256xf32>
    %517 = arith.addf %512, %516 : vector<1x256xf32>
    %c4_329 = arith.constant 4 : index
    %c0_330 = arith.constant 0 : index
    %518 = vector.load %arg8[%c4_329, %c0_330] : memref<7x256xf32, #tpu.memory_space<vmem>>, vector<1x256xf32>
    %519 = arith.mulf %517, %518 : vector<1x256xf32>
    %520 = arith.addf %507, %519 : vector<1x256xf32>
    %c0_331 = arith.constant 0 : index
    %c38_332 = arith.constant 38 : index
    %521 = vector.load %arg14[%c0_331, %c38_332] : memref<2x360xf32, #tpu.memory_space<vmem>>, vector<2x256xf32>
    %522 = vector.extract_strided_slice %521 {offsets = [0, 0], sizes = [1, 256], strides = [1, 1]} : vector<2x256xf32> to vector<1x256xf32>
    %c38_333 = arith.constant 38 : index
    %523 = memref.load %arg9[%c38_333] : memref<98xf32, #tpu.memory_space<smem>>
    %524 = vector.broadcast %523 : f32 to vector<1x256xf32>
    %525 = arith.mulf %522, %524 : vector<1x256xf32>
    %526 = vector.extract_strided_slice %521 {offsets = [1, 0], sizes = [1, 256], strides = [1, 1]} : vector<2x256xf32> to vector<1x256xf32>
    %c39_334 = arith.constant 39 : index
    %527 = memref.load %arg9[%c39_334] : memref<98xf32, #tpu.memory_space<smem>>
    %528 = vector.broadcast %527 : f32 to vector<1x256xf32>
    %529 = arith.mulf %526, %528 : vector<1x256xf32>
    %530 = arith.addf %525, %529 : vector<1x256xf32>
    %c5_335 = arith.constant 5 : index
    %c0_336 = arith.constant 0 : index
    %531 = vector.load %arg8[%c5_335, %c0_336] : memref<7x256xf32, #tpu.memory_space<vmem>>, vector<1x256xf32>
    %532 = arith.mulf %530, %531 : vector<1x256xf32>
    %533 = arith.addf %520, %532 : vector<1x256xf32>
    %c0_337 = arith.constant 0 : index
    %c39_338 = arith.constant 39 : index
    %534 = vector.load %arg14[%c0_337, %c39_338] : memref<2x360xf32, #tpu.memory_space<vmem>>, vector<2x256xf32>
    %535 = vector.extract_strided_slice %534 {offsets = [0, 0], sizes = [1, 256], strides = [1, 1]} : vector<2x256xf32> to vector<1x256xf32>
    %c40_339 = arith.constant 40 : index
    %536 = memref.load %arg9[%c40_339] : memref<98xf32, #tpu.memory_space<smem>>
    %537 = vector.broadcast %536 : f32 to vector<1x256xf32>
    %538 = arith.mulf %535, %537 : vector<1x256xf32>
    %539 = vector.extract_strided_slice %534 {offsets = [1, 0], sizes = [1, 256], strides = [1, 1]} : vector<2x256xf32> to vector<1x256xf32>
    %c41 = arith.constant 41 : index
    %540 = memref.load %arg9[%c41] : memref<98xf32, #tpu.memory_space<smem>>
    %541 = vector.broadcast %540 : f32 to vector<1x256xf32>
    %542 = arith.mulf %539, %541 : vector<1x256xf32>
    %543 = arith.addf %538, %542 : vector<1x256xf32>
    %c6_340 = arith.constant 6 : index
    %c0_341 = arith.constant 0 : index
    %544 = vector.load %arg8[%c6_340, %c0_341] : memref<7x256xf32, #tpu.memory_space<vmem>>, vector<1x256xf32>
    %545 = arith.mulf %543, %544 : vector<1x256xf32>
    %546 = arith.addf %533, %545 : vector<1x256xf32>
    %c0_342 = arith.constant 0 : index
    %c49_343 = arith.constant 49 : index
    %547 = vector.load %arg14[%c0_342, %c49_343] : memref<2x360xf32, #tpu.memory_space<vmem>>, vector<2x256xf32>
    %548 = vector.extract_strided_slice %547 {offsets = [0, 0], sizes = [1, 256], strides = [1, 1]} : vector<2x256xf32> to vector<1x256xf32>
    %c42 = arith.constant 42 : index
    %549 = memref.load %arg9[%c42] : memref<98xf32, #tpu.memory_space<smem>>
    %550 = vector.broadcast %549 : f32 to vector<1x256xf32>
    %551 = arith.mulf %548, %550 : vector<1x256xf32>
    %552 = vector.extract_strided_slice %547 {offsets = [1, 0], sizes = [1, 256], strides = [1, 1]} : vector<2x256xf32> to vector<1x256xf32>
    %c43 = arith.constant 43 : index
    %553 = memref.load %arg9[%c43] : memref<98xf32, #tpu.memory_space<smem>>
    %554 = vector.broadcast %553 : f32 to vector<1x256xf32>
    %555 = arith.mulf %552, %554 : vector<1x256xf32>
    %556 = arith.addf %551, %555 : vector<1x256xf32>
    %c0_344 = arith.constant 0 : index
    %c0_345 = arith.constant 0 : index
    %557 = vector.load %arg8[%c0_344, %c0_345] : memref<7x256xf32, #tpu.memory_space<vmem>>, vector<1x256xf32>
    %558 = arith.mulf %556, %557 : vector<1x256xf32>
    %559 = arith.addf %546, %558 : vector<1x256xf32>
    %c0_346 = arith.constant 0 : index
    %c50_347 = arith.constant 50 : index
    %560 = vector.load %arg14[%c0_346, %c50_347] : memref<2x360xf32, #tpu.memory_space<vmem>>, vector<2x256xf32>
    %561 = vector.extract_strided_slice %560 {offsets = [0, 0], sizes = [1, 256], strides = [1, 1]} : vector<2x256xf32> to vector<1x256xf32>
    %c44_348 = arith.constant 44 : index
    %562 = memref.load %arg9[%c44_348] : memref<98xf32, #tpu.memory_space<smem>>
    %563 = vector.broadcast %562 : f32 to vector<1x256xf32>
    %564 = arith.mulf %561, %563 : vector<1x256xf32>
    %565 = vector.extract_strided_slice %560 {offsets = [1, 0], sizes = [1, 256], strides = [1, 1]} : vector<2x256xf32> to vector<1x256xf32>
    %c45 = arith.constant 45 : index
    %566 = memref.load %arg9[%c45] : memref<98xf32, #tpu.memory_space<smem>>
    %567 = vector.broadcast %566 : f32 to vector<1x256xf32>
    %568 = arith.mulf %565, %567 : vector<1x256xf32>
    %569 = arith.addf %564, %568 : vector<1x256xf32>
    %c1_349 = arith.constant 1 : index
    %c0_350 = arith.constant 0 : index
    %570 = vector.load %arg8[%c1_349, %c0_350] : memref<7x256xf32, #tpu.memory_space<vmem>>, vector<1x256xf32>
    %571 = arith.mulf %569, %570 : vector<1x256xf32>
    %572 = arith.addf %559, %571 : vector<1x256xf32>
    %c0_351 = arith.constant 0 : index
    %c51_352 = arith.constant 51 : index
    %573 = vector.load %arg14[%c0_351, %c51_352] : memref<2x360xf32, #tpu.memory_space<vmem>>, vector<2x256xf32>
    %574 = vector.extract_strided_slice %573 {offsets = [0, 0], sizes = [1, 256], strides = [1, 1]} : vector<2x256xf32> to vector<1x256xf32>
    %c46 = arith.constant 46 : index
    %575 = memref.load %arg9[%c46] : memref<98xf32, #tpu.memory_space<smem>>
    %576 = vector.broadcast %575 : f32 to vector<1x256xf32>
    %577 = arith.mulf %574, %576 : vector<1x256xf32>
    %578 = vector.extract_strided_slice %573 {offsets = [1, 0], sizes = [1, 256], strides = [1, 1]} : vector<2x256xf32> to vector<1x256xf32>
    %c47 = arith.constant 47 : index
    %579 = memref.load %arg9[%c47] : memref<98xf32, #tpu.memory_space<smem>>
    %580 = vector.broadcast %579 : f32 to vector<1x256xf32>
    %581 = arith.mulf %578, %580 : vector<1x256xf32>
    %582 = arith.addf %577, %581 : vector<1x256xf32>
    %c2_353 = arith.constant 2 : index
    %c0_354 = arith.constant 0 : index
    %583 = vector.load %arg8[%c2_353, %c0_354] : memref<7x256xf32, #tpu.memory_space<vmem>>, vector<1x256xf32>
    %584 = arith.mulf %582, %583 : vector<1x256xf32>
    %585 = arith.addf %572, %584 : vector<1x256xf32>
    %c0_355 = arith.constant 0 : index
    %c52_356 = arith.constant 52 : index
    %586 = vector.load %arg14[%c0_355, %c52_356] : memref<2x360xf32, #tpu.memory_space<vmem>>, vector<2x256xf32>
    %587 = vector.extract_strided_slice %586 {offsets = [0, 0], sizes = [1, 256], strides = [1, 1]} : vector<2x256xf32> to vector<1x256xf32>
    %c48_357 = arith.constant 48 : index
    %588 = memref.load %arg9[%c48_357] : memref<98xf32, #tpu.memory_space<smem>>
    %589 = vector.broadcast %588 : f32 to vector<1x256xf32>
    %590 = arith.mulf %587, %589 : vector<1x256xf32>
    %591 = vector.extract_strided_slice %586 {offsets = [1, 0], sizes = [1, 256], strides = [1, 1]} : vector<2x256xf32> to vector<1x256xf32>
    %c49_358 = arith.constant 49 : index
    %592 = memref.load %arg9[%c49_358] : memref<98xf32, #tpu.memory_space<smem>>
    %593 = vector.broadcast %592 : f32 to vector<1x256xf32>
    %594 = arith.mulf %591, %593 : vector<1x256xf32>
    %595 = arith.addf %590, %594 : vector<1x256xf32>
    %596 = arith.addf %585, %595 : vector<1x256xf32>
    %c0_359 = arith.constant 0 : index
    %c53_360 = arith.constant 53 : index
    %597 = vector.load %arg14[%c0_359, %c53_360] : memref<2x360xf32, #tpu.memory_space<vmem>>, vector<2x256xf32>
    %598 = vector.extract_strided_slice %597 {offsets = [0, 0], sizes = [1, 256], strides = [1, 1]} : vector<2x256xf32> to vector<1x256xf32>
    %c50_361 = arith.constant 50 : index
    %599 = memref.load %arg9[%c50_361] : memref<98xf32, #tpu.memory_space<smem>>
    %600 = vector.broadcast %599 : f32 to vector<1x256xf32>
    %601 = arith.mulf %598, %600 : vector<1x256xf32>
    %602 = vector.extract_strided_slice %597 {offsets = [1, 0], sizes = [1, 256], strides = [1, 1]} : vector<2x256xf32> to vector<1x256xf32>
    %c51_362 = arith.constant 51 : index
    %603 = memref.load %arg9[%c51_362] : memref<98xf32, #tpu.memory_space<smem>>
    %604 = vector.broadcast %603 : f32 to vector<1x256xf32>
    %605 = arith.mulf %602, %604 : vector<1x256xf32>
    %606 = arith.addf %601, %605 : vector<1x256xf32>
    %c4_363 = arith.constant 4 : index
    %c0_364 = arith.constant 0 : index
    %607 = vector.load %arg8[%c4_363, %c0_364] : memref<7x256xf32, #tpu.memory_space<vmem>>, vector<1x256xf32>
    %608 = arith.mulf %606, %607 : vector<1x256xf32>
    %609 = arith.addf %596, %608 : vector<1x256xf32>
    %c0_365 = arith.constant 0 : index
    %c54_366 = arith.constant 54 : index
    %610 = vector.load %arg14[%c0_365, %c54_366] : memref<2x360xf32, #tpu.memory_space<vmem>>, vector<2x256xf32>
    %611 = vector.extract_strided_slice %610 {offsets = [0, 0], sizes = [1, 256], strides = [1, 1]} : vector<2x256xf32> to vector<1x256xf32>
    %c52_367 = arith.constant 52 : index
    %612 = memref.load %arg9[%c52_367] : memref<98xf32, #tpu.memory_space<smem>>
    %613 = vector.broadcast %612 : f32 to vector<1x256xf32>
    %614 = arith.mulf %611, %613 : vector<1x256xf32>
    %615 = vector.extract_strided_slice %610 {offsets = [1, 0], sizes = [1, 256], strides = [1, 1]} : vector<2x256xf32> to vector<1x256xf32>
    %c53_368 = arith.constant 53 : index
    %616 = memref.load %arg9[%c53_368] : memref<98xf32, #tpu.memory_space<smem>>
    %617 = vector.broadcast %616 : f32 to vector<1x256xf32>
    %618 = arith.mulf %615, %617 : vector<1x256xf32>
    %619 = arith.addf %614, %618 : vector<1x256xf32>
    %c5_369 = arith.constant 5 : index
    %c0_370 = arith.constant 0 : index
    %620 = vector.load %arg8[%c5_369, %c0_370] : memref<7x256xf32, #tpu.memory_space<vmem>>, vector<1x256xf32>
    %621 = arith.mulf %619, %620 : vector<1x256xf32>
    %622 = arith.addf %609, %621 : vector<1x256xf32>
    %c0_371 = arith.constant 0 : index
    %c55_372 = arith.constant 55 : index
    %623 = vector.load %arg14[%c0_371, %c55_372] : memref<2x360xf32, #tpu.memory_space<vmem>>, vector<2x256xf32>
    %624 = vector.extract_strided_slice %623 {offsets = [0, 0], sizes = [1, 256], strides = [1, 1]} : vector<2x256xf32> to vector<1x256xf32>
    %c54_373 = arith.constant 54 : index
    %625 = memref.load %arg9[%c54_373] : memref<98xf32, #tpu.memory_space<smem>>
    %626 = vector.broadcast %625 : f32 to vector<1x256xf32>
    %627 = arith.mulf %624, %626 : vector<1x256xf32>
    %628 = vector.extract_strided_slice %623 {offsets = [1, 0], sizes = [1, 256], strides = [1, 1]} : vector<2x256xf32> to vector<1x256xf32>
    %c55_374 = arith.constant 55 : index
    %629 = memref.load %arg9[%c55_374] : memref<98xf32, #tpu.memory_space<smem>>
    %630 = vector.broadcast %629 : f32 to vector<1x256xf32>
    %631 = arith.mulf %628, %630 : vector<1x256xf32>
    %632 = arith.addf %627, %631 : vector<1x256xf32>
    %c6_375 = arith.constant 6 : index
    %c0_376 = arith.constant 0 : index
    %633 = vector.load %arg8[%c6_375, %c0_376] : memref<7x256xf32, #tpu.memory_space<vmem>>, vector<1x256xf32>
    %634 = arith.mulf %632, %633 : vector<1x256xf32>
    %635 = arith.addf %622, %634 : vector<1x256xf32>
    %c0_377 = arith.constant 0 : index
    %c65_378 = arith.constant 65 : index
    %636 = vector.load %arg14[%c0_377, %c65_378] : memref<2x360xf32, #tpu.memory_space<vmem>>, vector<2x256xf32>
    %637 = vector.extract_strided_slice %636 {offsets = [0, 0], sizes = [1, 256], strides = [1, 1]} : vector<2x256xf32> to vector<1x256xf32>
    %c56_379 = arith.constant 56 : index
    %638 = memref.load %arg9[%c56_379] : memref<98xf32, #tpu.memory_space<smem>>
    %639 = vector.broadcast %638 : f32 to vector<1x256xf32>
    %640 = arith.mulf %637, %639 : vector<1x256xf32>
    %641 = vector.extract_strided_slice %636 {offsets = [1, 0], sizes = [1, 256], strides = [1, 1]} : vector<2x256xf32> to vector<1x256xf32>
    %c57 = arith.constant 57 : index
    %642 = memref.load %arg9[%c57] : memref<98xf32, #tpu.memory_space<smem>>
    %643 = vector.broadcast %642 : f32 to vector<1x256xf32>
    %644 = arith.mulf %641, %643 : vector<1x256xf32>
    %645 = arith.addf %640, %644 : vector<1x256xf32>
    %c0_380 = arith.constant 0 : index
    %c0_381 = arith.constant 0 : index
    %646 = vector.load %arg8[%c0_380, %c0_381] : memref<7x256xf32, #tpu.memory_space<vmem>>, vector<1x256xf32>
    %647 = arith.mulf %645, %646 : vector<1x256xf32>
    %648 = arith.addf %635, %647 : vector<1x256xf32>
    %c0_382 = arith.constant 0 : index
    %c66_383 = arith.constant 66 : index
    %649 = vector.load %arg14[%c0_382, %c66_383] : memref<2x360xf32, #tpu.memory_space<vmem>>, vector<2x256xf32>
    %650 = vector.extract_strided_slice %649 {offsets = [0, 0], sizes = [1, 256], strides = [1, 1]} : vector<2x256xf32> to vector<1x256xf32>
    %c58 = arith.constant 58 : index
    %651 = memref.load %arg9[%c58] : memref<98xf32, #tpu.memory_space<smem>>
    %652 = vector.broadcast %651 : f32 to vector<1x256xf32>
    %653 = arith.mulf %650, %652 : vector<1x256xf32>
    %654 = vector.extract_strided_slice %649 {offsets = [1, 0], sizes = [1, 256], strides = [1, 1]} : vector<2x256xf32> to vector<1x256xf32>
    %c59 = arith.constant 59 : index
    %655 = memref.load %arg9[%c59] : memref<98xf32, #tpu.memory_space<smem>>
    %656 = vector.broadcast %655 : f32 to vector<1x256xf32>
    %657 = arith.mulf %654, %656 : vector<1x256xf32>
    %658 = arith.addf %653, %657 : vector<1x256xf32>
    %c1_384 = arith.constant 1 : index
    %c0_385 = arith.constant 0 : index
    %659 = vector.load %arg8[%c1_384, %c0_385] : memref<7x256xf32, #tpu.memory_space<vmem>>, vector<1x256xf32>
    %660 = arith.mulf %658, %659 : vector<1x256xf32>
    %661 = arith.addf %648, %660 : vector<1x256xf32>
    %c0_386 = arith.constant 0 : index
    %c67_387 = arith.constant 67 : index
    %662 = vector.load %arg14[%c0_386, %c67_387] : memref<2x360xf32, #tpu.memory_space<vmem>>, vector<2x256xf32>
    %663 = vector.extract_strided_slice %662 {offsets = [0, 0], sizes = [1, 256], strides = [1, 1]} : vector<2x256xf32> to vector<1x256xf32>
    %c60_388 = arith.constant 60 : index
    %664 = memref.load %arg9[%c60_388] : memref<98xf32, #tpu.memory_space<smem>>
    %665 = vector.broadcast %664 : f32 to vector<1x256xf32>
    %666 = arith.mulf %663, %665 : vector<1x256xf32>
    %667 = vector.extract_strided_slice %662 {offsets = [1, 0], sizes = [1, 256], strides = [1, 1]} : vector<2x256xf32> to vector<1x256xf32>
    %c61 = arith.constant 61 : index
    %668 = memref.load %arg9[%c61] : memref<98xf32, #tpu.memory_space<smem>>
    %669 = vector.broadcast %668 : f32 to vector<1x256xf32>
    %670 = arith.mulf %667, %669 : vector<1x256xf32>
    %671 = arith.addf %666, %670 : vector<1x256xf32>
    %c2_389 = arith.constant 2 : index
    %c0_390 = arith.constant 0 : index
    %672 = vector.load %arg8[%c2_389, %c0_390] : memref<7x256xf32, #tpu.memory_space<vmem>>, vector<1x256xf32>
    %673 = arith.mulf %671, %672 : vector<1x256xf32>
    %674 = arith.addf %661, %673 : vector<1x256xf32>
    %c0_391 = arith.constant 0 : index
    %c68_392 = arith.constant 68 : index
    %675 = vector.load %arg14[%c0_391, %c68_392] : memref<2x360xf32, #tpu.memory_space<vmem>>, vector<2x256xf32>
    %676 = vector.extract_strided_slice %675 {offsets = [0, 0], sizes = [1, 256], strides = [1, 1]} : vector<2x256xf32> to vector<1x256xf32>
    %c62 = arith.constant 62 : index
    %677 = memref.load %arg9[%c62] : memref<98xf32, #tpu.memory_space<smem>>
    %678 = vector.broadcast %677 : f32 to vector<1x256xf32>
    %679 = arith.mulf %676, %678 : vector<1x256xf32>
    %680 = vector.extract_strided_slice %675 {offsets = [1, 0], sizes = [1, 256], strides = [1, 1]} : vector<2x256xf32> to vector<1x256xf32>
    %c63 = arith.constant 63 : index
    %681 = memref.load %arg9[%c63] : memref<98xf32, #tpu.memory_space<smem>>
    %682 = vector.broadcast %681 : f32 to vector<1x256xf32>
    %683 = arith.mulf %680, %682 : vector<1x256xf32>
    %684 = arith.addf %679, %683 : vector<1x256xf32>
    %685 = arith.addf %674, %684 : vector<1x256xf32>
    %c0_393 = arith.constant 0 : index
    %c69_394 = arith.constant 69 : index
    %686 = vector.load %arg14[%c0_393, %c69_394] : memref<2x360xf32, #tpu.memory_space<vmem>>, vector<2x256xf32>
    %687 = vector.extract_strided_slice %686 {offsets = [0, 0], sizes = [1, 256], strides = [1, 1]} : vector<2x256xf32> to vector<1x256xf32>
    %c64_395 = arith.constant 64 : index
    %688 = memref.load %arg9[%c64_395] : memref<98xf32, #tpu.memory_space<smem>>
    %689 = vector.broadcast %688 : f32 to vector<1x256xf32>
    %690 = arith.mulf %687, %689 : vector<1x256xf32>
    %691 = vector.extract_strided_slice %686 {offsets = [1, 0], sizes = [1, 256], strides = [1, 1]} : vector<2x256xf32> to vector<1x256xf32>
    %c65_396 = arith.constant 65 : index
    %692 = memref.load %arg9[%c65_396] : memref<98xf32, #tpu.memory_space<smem>>
    %693 = vector.broadcast %692 : f32 to vector<1x256xf32>
    %694 = arith.mulf %691, %693 : vector<1x256xf32>
    %695 = arith.addf %690, %694 : vector<1x256xf32>
    %c4_397 = arith.constant 4 : index
    %c0_398 = arith.constant 0 : index
    %696 = vector.load %arg8[%c4_397, %c0_398] : memref<7x256xf32, #tpu.memory_space<vmem>>, vector<1x256xf32>
    %697 = arith.mulf %695, %696 : vector<1x256xf32>
    %698 = arith.addf %685, %697 : vector<1x256xf32>
    %c0_399 = arith.constant 0 : index
    %c70_400 = arith.constant 70 : index
    %699 = vector.load %arg14[%c0_399, %c70_400] : memref<2x360xf32, #tpu.memory_space<vmem>>, vector<2x256xf32>
    %700 = vector.extract_strided_slice %699 {offsets = [0, 0], sizes = [1, 256], strides = [1, 1]} : vector<2x256xf32> to vector<1x256xf32>
    %c66_401 = arith.constant 66 : index
    %701 = memref.load %arg9[%c66_401] : memref<98xf32, #tpu.memory_space<smem>>
    %702 = vector.broadcast %701 : f32 to vector<1x256xf32>
    %703 = arith.mulf %700, %702 : vector<1x256xf32>
    %704 = vector.extract_strided_slice %699 {offsets = [1, 0], sizes = [1, 256], strides = [1, 1]} : vector<2x256xf32> to vector<1x256xf32>
    %c67_402 = arith.constant 67 : index
    %705 = memref.load %arg9[%c67_402] : memref<98xf32, #tpu.memory_space<smem>>
    %706 = vector.broadcast %705 : f32 to vector<1x256xf32>
    %707 = arith.mulf %704, %706 : vector<1x256xf32>
    %708 = arith.addf %703, %707 : vector<1x256xf32>
    %c5_403 = arith.constant 5 : index
    %c0_404 = arith.constant 0 : index
    %709 = vector.load %arg8[%c5_403, %c0_404] : memref<7x256xf32, #tpu.memory_space<vmem>>, vector<1x256xf32>
    %710 = arith.mulf %708, %709 : vector<1x256xf32>
    %711 = arith.addf %698, %710 : vector<1x256xf32>
    %c0_405 = arith.constant 0 : index
    %c71_406 = arith.constant 71 : index
    %712 = vector.load %arg14[%c0_405, %c71_406] : memref<2x360xf32, #tpu.memory_space<vmem>>, vector<2x256xf32>
    %713 = vector.extract_strided_slice %712 {offsets = [0, 0], sizes = [1, 256], strides = [1, 1]} : vector<2x256xf32> to vector<1x256xf32>
    %c68_407 = arith.constant 68 : index
    %714 = memref.load %arg9[%c68_407] : memref<98xf32, #tpu.memory_space<smem>>
    %715 = vector.broadcast %714 : f32 to vector<1x256xf32>
    %716 = arith.mulf %713, %715 : vector<1x256xf32>
    %717 = vector.extract_strided_slice %712 {offsets = [1, 0], sizes = [1, 256], strides = [1, 1]} : vector<2x256xf32> to vector<1x256xf32>
    %c69_408 = arith.constant 69 : index
    %718 = memref.load %arg9[%c69_408] : memref<98xf32, #tpu.memory_space<smem>>
    %719 = vector.broadcast %718 : f32 to vector<1x256xf32>
    %720 = arith.mulf %717, %719 : vector<1x256xf32>
    %721 = arith.addf %716, %720 : vector<1x256xf32>
    %c6_409 = arith.constant 6 : index
    %c0_410 = arith.constant 0 : index
    %722 = vector.load %arg8[%c6_409, %c0_410] : memref<7x256xf32, #tpu.memory_space<vmem>>, vector<1x256xf32>
    %723 = arith.mulf %721, %722 : vector<1x256xf32>
    %724 = arith.addf %711, %723 : vector<1x256xf32>
    %c0_411 = arith.constant 0 : index
    %c81_412 = arith.constant 81 : index
    %725 = vector.load %arg14[%c0_411, %c81_412] : memref<2x360xf32, #tpu.memory_space<vmem>>, vector<2x256xf32>
    %726 = vector.extract_strided_slice %725 {offsets = [0, 0], sizes = [1, 256], strides = [1, 1]} : vector<2x256xf32> to vector<1x256xf32>
    %c70_413 = arith.constant 70 : index
    %727 = memref.load %arg9[%c70_413] : memref<98xf32, #tpu.memory_space<smem>>
    %728 = vector.broadcast %727 : f32 to vector<1x256xf32>
    %729 = arith.mulf %726, %728 : vector<1x256xf32>
    %730 = vector.extract_strided_slice %725 {offsets = [1, 0], sizes = [1, 256], strides = [1, 1]} : vector<2x256xf32> to vector<1x256xf32>
    %c71_414 = arith.constant 71 : index
    %731 = memref.load %arg9[%c71_414] : memref<98xf32, #tpu.memory_space<smem>>
    %732 = vector.broadcast %731 : f32 to vector<1x256xf32>
    %733 = arith.mulf %730, %732 : vector<1x256xf32>
    %734 = arith.addf %729, %733 : vector<1x256xf32>
    %c0_415 = arith.constant 0 : index
    %c0_416 = arith.constant 0 : index
    %735 = vector.load %arg8[%c0_415, %c0_416] : memref<7x256xf32, #tpu.memory_space<vmem>>, vector<1x256xf32>
    %736 = arith.mulf %734, %735 : vector<1x256xf32>
    %737 = arith.addf %724, %736 : vector<1x256xf32>
    %c0_417 = arith.constant 0 : index
    %c82_418 = arith.constant 82 : index
    %738 = vector.load %arg14[%c0_417, %c82_418] : memref<2x360xf32, #tpu.memory_space<vmem>>, vector<2x256xf32>
    %739 = vector.extract_strided_slice %738 {offsets = [0, 0], sizes = [1, 256], strides = [1, 1]} : vector<2x256xf32> to vector<1x256xf32>
    %c72_419 = arith.constant 72 : index
    %740 = memref.load %arg9[%c72_419] : memref<98xf32, #tpu.memory_space<smem>>
    %741 = vector.broadcast %740 : f32 to vector<1x256xf32>
    %742 = arith.mulf %739, %741 : vector<1x256xf32>
    %743 = vector.extract_strided_slice %738 {offsets = [1, 0], sizes = [1, 256], strides = [1, 1]} : vector<2x256xf32> to vector<1x256xf32>
    %c73 = arith.constant 73 : index
    %744 = memref.load %arg9[%c73] : memref<98xf32, #tpu.memory_space<smem>>
    %745 = vector.broadcast %744 : f32 to vector<1x256xf32>
    %746 = arith.mulf %743, %745 : vector<1x256xf32>
    %747 = arith.addf %742, %746 : vector<1x256xf32>
    %c1_420 = arith.constant 1 : index
    %c0_421 = arith.constant 0 : index
    %748 = vector.load %arg8[%c1_420, %c0_421] : memref<7x256xf32, #tpu.memory_space<vmem>>, vector<1x256xf32>
    %749 = arith.mulf %747, %748 : vector<1x256xf32>
    %750 = arith.addf %737, %749 : vector<1x256xf32>
    %c0_422 = arith.constant 0 : index
    %c83_423 = arith.constant 83 : index
    %751 = vector.load %arg14[%c0_422, %c83_423] : memref<2x360xf32, #tpu.memory_space<vmem>>, vector<2x256xf32>
    %752 = vector.extract_strided_slice %751 {offsets = [0, 0], sizes = [1, 256], strides = [1, 1]} : vector<2x256xf32> to vector<1x256xf32>
    %c74 = arith.constant 74 : index
    %753 = memref.load %arg9[%c74] : memref<98xf32, #tpu.memory_space<smem>>
    %754 = vector.broadcast %753 : f32 to vector<1x256xf32>
    %755 = arith.mulf %752, %754 : vector<1x256xf32>
    %756 = vector.extract_strided_slice %751 {offsets = [1, 0], sizes = [1, 256], strides = [1, 1]} : vector<2x256xf32> to vector<1x256xf32>
    %c75 = arith.constant 75 : index
    %757 = memref.load %arg9[%c75] : memref<98xf32, #tpu.memory_space<smem>>
    %758 = vector.broadcast %757 : f32 to vector<1x256xf32>
    %759 = arith.mulf %756, %758 : vector<1x256xf32>
    %760 = arith.addf %755, %759 : vector<1x256xf32>
    %c2_424 = arith.constant 2 : index
    %c0_425 = arith.constant 0 : index
    %761 = vector.load %arg8[%c2_424, %c0_425] : memref<7x256xf32, #tpu.memory_space<vmem>>, vector<1x256xf32>
    %762 = arith.mulf %760, %761 : vector<1x256xf32>
    %763 = arith.addf %750, %762 : vector<1x256xf32>
    %c0_426 = arith.constant 0 : index
    %c84_427 = arith.constant 84 : index
    %764 = vector.load %arg14[%c0_426, %c84_427] : memref<2x360xf32, #tpu.memory_space<vmem>>, vector<2x256xf32>
    %765 = vector.extract_strided_slice %764 {offsets = [0, 0], sizes = [1, 256], strides = [1, 1]} : vector<2x256xf32> to vector<1x256xf32>
    %c76_428 = arith.constant 76 : index
    %766 = memref.load %arg9[%c76_428] : memref<98xf32, #tpu.memory_space<smem>>
    %767 = vector.broadcast %766 : f32 to vector<1x256xf32>
    %768 = arith.mulf %765, %767 : vector<1x256xf32>
    %769 = vector.extract_strided_slice %764 {offsets = [1, 0], sizes = [1, 256], strides = [1, 1]} : vector<2x256xf32> to vector<1x256xf32>
    %c77 = arith.constant 77 : index
    %770 = memref.load %arg9[%c77] : memref<98xf32, #tpu.memory_space<smem>>
    %771 = vector.broadcast %770 : f32 to vector<1x256xf32>
    %772 = arith.mulf %769, %771 : vector<1x256xf32>
    %773 = arith.addf %768, %772 : vector<1x256xf32>
    %774 = arith.addf %763, %773 : vector<1x256xf32>
    %c0_429 = arith.constant 0 : index
    %c85_430 = arith.constant 85 : index
    %775 = vector.load %arg14[%c0_429, %c85_430] : memref<2x360xf32, #tpu.memory_space<vmem>>, vector<2x256xf32>
    %776 = vector.extract_strided_slice %775 {offsets = [0, 0], sizes = [1, 256], strides = [1, 1]} : vector<2x256xf32> to vector<1x256xf32>
    %c78 = arith.constant 78 : index
    %777 = memref.load %arg9[%c78] : memref<98xf32, #tpu.memory_space<smem>>
    %778 = vector.broadcast %777 : f32 to vector<1x256xf32>
    %779 = arith.mulf %776, %778 : vector<1x256xf32>
    %780 = vector.extract_strided_slice %775 {offsets = [1, 0], sizes = [1, 256], strides = [1, 1]} : vector<2x256xf32> to vector<1x256xf32>
    %c79 = arith.constant 79 : index
    %781 = memref.load %arg9[%c79] : memref<98xf32, #tpu.memory_space<smem>>
    %782 = vector.broadcast %781 : f32 to vector<1x256xf32>
    %783 = arith.mulf %780, %782 : vector<1x256xf32>
    %784 = arith.addf %779, %783 : vector<1x256xf32>
    %c4_431 = arith.constant 4 : index
    %c0_432 = arith.constant 0 : index
    %785 = vector.load %arg8[%c4_431, %c0_432] : memref<7x256xf32, #tpu.memory_space<vmem>>, vector<1x256xf32>
    %786 = arith.mulf %784, %785 : vector<1x256xf32>
    %787 = arith.addf %774, %786 : vector<1x256xf32>
    %c0_433 = arith.constant 0 : index
    %c86_434 = arith.constant 86 : index
    %788 = vector.load %arg14[%c0_433, %c86_434] : memref<2x360xf32, #tpu.memory_space<vmem>>, vector<2x256xf32>
    %789 = vector.extract_strided_slice %788 {offsets = [0, 0], sizes = [1, 256], strides = [1, 1]} : vector<2x256xf32> to vector<1x256xf32>
    %c80_435 = arith.constant 80 : index
    %790 = memref.load %arg9[%c80_435] : memref<98xf32, #tpu.memory_space<smem>>
    %791 = vector.broadcast %790 : f32 to vector<1x256xf32>
    %792 = arith.mulf %789, %791 : vector<1x256xf32>
    %793 = vector.extract_strided_slice %788 {offsets = [1, 0], sizes = [1, 256], strides = [1, 1]} : vector<2x256xf32> to vector<1x256xf32>
    %c81_436 = arith.constant 81 : index
    %794 = memref.load %arg9[%c81_436] : memref<98xf32, #tpu.memory_space<smem>>
    %795 = vector.broadcast %794 : f32 to vector<1x256xf32>
    %796 = arith.mulf %793, %795 : vector<1x256xf32>
    %797 = arith.addf %792, %796 : vector<1x256xf32>
    %c5_437 = arith.constant 5 : index
    %c0_438 = arith.constant 0 : index
    %798 = vector.load %arg8[%c5_437, %c0_438] : memref<7x256xf32, #tpu.memory_space<vmem>>, vector<1x256xf32>
    %799 = arith.mulf %797, %798 : vector<1x256xf32>
    %800 = arith.addf %787, %799 : vector<1x256xf32>
    %c0_439 = arith.constant 0 : index
    %c87_440 = arith.constant 87 : index
    %801 = vector.load %arg14[%c0_439, %c87_440] : memref<2x360xf32, #tpu.memory_space<vmem>>, vector<2x256xf32>
    %802 = vector.extract_strided_slice %801 {offsets = [0, 0], sizes = [1, 256], strides = [1, 1]} : vector<2x256xf32> to vector<1x256xf32>
    %c82_441 = arith.constant 82 : index
    %803 = memref.load %arg9[%c82_441] : memref<98xf32, #tpu.memory_space<smem>>
    %804 = vector.broadcast %803 : f32 to vector<1x256xf32>
    %805 = arith.mulf %802, %804 : vector<1x256xf32>
    %806 = vector.extract_strided_slice %801 {offsets = [1, 0], sizes = [1, 256], strides = [1, 1]} : vector<2x256xf32> to vector<1x256xf32>
    %c83_442 = arith.constant 83 : index
    %807 = memref.load %arg9[%c83_442] : memref<98xf32, #tpu.memory_space<smem>>
    %808 = vector.broadcast %807 : f32 to vector<1x256xf32>
    %809 = arith.mulf %806, %808 : vector<1x256xf32>
    %810 = arith.addf %805, %809 : vector<1x256xf32>
    %c6_443 = arith.constant 6 : index
    %c0_444 = arith.constant 0 : index
    %811 = vector.load %arg8[%c6_443, %c0_444] : memref<7x256xf32, #tpu.memory_space<vmem>>, vector<1x256xf32>
    %812 = arith.mulf %810, %811 : vector<1x256xf32>
    %813 = arith.addf %800, %812 : vector<1x256xf32>
    %c0_445 = arith.constant 0 : index
    %c97_446 = arith.constant 97 : index
    %814 = vector.load %arg14[%c0_445, %c97_446] : memref<2x360xf32, #tpu.memory_space<vmem>>, vector<2x256xf32>
    %815 = vector.extract_strided_slice %814 {offsets = [0, 0], sizes = [1, 256], strides = [1, 1]} : vector<2x256xf32> to vector<1x256xf32>
    %c84_447 = arith.constant 84 : index
    %816 = memref.load %arg9[%c84_447] : memref<98xf32, #tpu.memory_space<smem>>
    %817 = vector.broadcast %816 : f32 to vector<1x256xf32>
    %818 = arith.mulf %815, %817 : vector<1x256xf32>
    %819 = vector.extract_strided_slice %814 {offsets = [1, 0], sizes = [1, 256], strides = [1, 1]} : vector<2x256xf32> to vector<1x256xf32>
    %c85_448 = arith.constant 85 : index
    %820 = memref.load %arg9[%c85_448] : memref<98xf32, #tpu.memory_space<smem>>
    %821 = vector.broadcast %820 : f32 to vector<1x256xf32>
    %822 = arith.mulf %819, %821 : vector<1x256xf32>
    %823 = arith.addf %818, %822 : vector<1x256xf32>
    %c0_449 = arith.constant 0 : index
    %c0_450 = arith.constant 0 : index
    %824 = vector.load %arg8[%c0_449, %c0_450] : memref<7x256xf32, #tpu.memory_space<vmem>>, vector<1x256xf32>
    %825 = arith.mulf %823, %824 : vector<1x256xf32>
    %826 = arith.addf %813, %825 : vector<1x256xf32>
    %c0_451 = arith.constant 0 : index
    %c98_452 = arith.constant 98 : index
    %827 = vector.load %arg14[%c0_451, %c98_452] : memref<2x360xf32, #tpu.memory_space<vmem>>, vector<2x256xf32>
    %828 = vector.extract_strided_slice %827 {offsets = [0, 0], sizes = [1, 256], strides = [1, 1]} : vector<2x256xf32> to vector<1x256xf32>
    %c86_453 = arith.constant 86 : index
    %829 = memref.load %arg9[%c86_453] : memref<98xf32, #tpu.memory_space<smem>>
    %830 = vector.broadcast %829 : f32 to vector<1x256xf32>
    %831 = arith.mulf %828, %830 : vector<1x256xf32>
    %832 = vector.extract_strided_slice %827 {offsets = [1, 0], sizes = [1, 256], strides = [1, 1]} : vector<2x256xf32> to vector<1x256xf32>
    %c87_454 = arith.constant 87 : index
    %833 = memref.load %arg9[%c87_454] : memref<98xf32, #tpu.memory_space<smem>>
    %834 = vector.broadcast %833 : f32 to vector<1x256xf32>
    %835 = arith.mulf %832, %834 : vector<1x256xf32>
    %836 = arith.addf %831, %835 : vector<1x256xf32>
    %c1_455 = arith.constant 1 : index
    %c0_456 = arith.constant 0 : index
    %837 = vector.load %arg8[%c1_455, %c0_456] : memref<7x256xf32, #tpu.memory_space<vmem>>, vector<1x256xf32>
    %838 = arith.mulf %836, %837 : vector<1x256xf32>
    %839 = arith.addf %826, %838 : vector<1x256xf32>
    %c0_457 = arith.constant 0 : index
    %c99_458 = arith.constant 99 : index
    %840 = vector.load %arg14[%c0_457, %c99_458] : memref<2x360xf32, #tpu.memory_space<vmem>>, vector<2x256xf32>
    %841 = vector.extract_strided_slice %840 {offsets = [0, 0], sizes = [1, 256], strides = [1, 1]} : vector<2x256xf32> to vector<1x256xf32>
    %c88_459 = arith.constant 88 : index
    %842 = memref.load %arg9[%c88_459] : memref<98xf32, #tpu.memory_space<smem>>
    %843 = vector.broadcast %842 : f32 to vector<1x256xf32>
    %844 = arith.mulf %841, %843 : vector<1x256xf32>
    %845 = vector.extract_strided_slice %840 {offsets = [1, 0], sizes = [1, 256], strides = [1, 1]} : vector<2x256xf32> to vector<1x256xf32>
    %c89 = arith.constant 89 : index
    %846 = memref.load %arg9[%c89] : memref<98xf32, #tpu.memory_space<smem>>
    %847 = vector.broadcast %846 : f32 to vector<1x256xf32>
    %848 = arith.mulf %845, %847 : vector<1x256xf32>
    %849 = arith.addf %844, %848 : vector<1x256xf32>
    %c2_460 = arith.constant 2 : index
    %c0_461 = arith.constant 0 : index
    %850 = vector.load %arg8[%c2_460, %c0_461] : memref<7x256xf32, #tpu.memory_space<vmem>>, vector<1x256xf32>
    %851 = arith.mulf %849, %850 : vector<1x256xf32>
    %852 = arith.addf %839, %851 : vector<1x256xf32>
    %c0_462 = arith.constant 0 : index
    %c100_463 = arith.constant 100 : index
    %853 = vector.load %arg14[%c0_462, %c100_463] : memref<2x360xf32, #tpu.memory_space<vmem>>, vector<2x256xf32>
    %854 = vector.extract_strided_slice %853 {offsets = [0, 0], sizes = [1, 256], strides = [1, 1]} : vector<2x256xf32> to vector<1x256xf32>
    %c90 = arith.constant 90 : index
    %855 = memref.load %arg9[%c90] : memref<98xf32, #tpu.memory_space<smem>>
    %856 = vector.broadcast %855 : f32 to vector<1x256xf32>
    %857 = arith.mulf %854, %856 : vector<1x256xf32>
    %858 = vector.extract_strided_slice %853 {offsets = [1, 0], sizes = [1, 256], strides = [1, 1]} : vector<2x256xf32> to vector<1x256xf32>
    %c91 = arith.constant 91 : index
    %859 = memref.load %arg9[%c91] : memref<98xf32, #tpu.memory_space<smem>>
    %860 = vector.broadcast %859 : f32 to vector<1x256xf32>
    %861 = arith.mulf %858, %860 : vector<1x256xf32>
    %862 = arith.addf %857, %861 : vector<1x256xf32>
    %863 = arith.addf %852, %862 : vector<1x256xf32>
    %c0_464 = arith.constant 0 : index
    %c101_465 = arith.constant 101 : index
    %864 = vector.load %arg14[%c0_464, %c101_465] : memref<2x360xf32, #tpu.memory_space<vmem>>, vector<2x256xf32>
    %865 = vector.extract_strided_slice %864 {offsets = [0, 0], sizes = [1, 256], strides = [1, 1]} : vector<2x256xf32> to vector<1x256xf32>
    %c92_466 = arith.constant 92 : index
    %866 = memref.load %arg9[%c92_466] : memref<98xf32, #tpu.memory_space<smem>>
    %867 = vector.broadcast %866 : f32 to vector<1x256xf32>
    %868 = arith.mulf %865, %867 : vector<1x256xf32>
    %869 = vector.extract_strided_slice %864 {offsets = [1, 0], sizes = [1, 256], strides = [1, 1]} : vector<2x256xf32> to vector<1x256xf32>
    %c93 = arith.constant 93 : index
    %870 = memref.load %arg9[%c93] : memref<98xf32, #tpu.memory_space<smem>>
    %871 = vector.broadcast %870 : f32 to vector<1x256xf32>
    %872 = arith.mulf %869, %871 : vector<1x256xf32>
    %873 = arith.addf %868, %872 : vector<1x256xf32>
    %c4_467 = arith.constant 4 : index
    %c0_468 = arith.constant 0 : index
    %874 = vector.load %arg8[%c4_467, %c0_468] : memref<7x256xf32, #tpu.memory_space<vmem>>, vector<1x256xf32>
    %875 = arith.mulf %873, %874 : vector<1x256xf32>
    %876 = arith.addf %863, %875 : vector<1x256xf32>
    %c0_469 = arith.constant 0 : index
    %c102_470 = arith.constant 102 : index
    %877 = vector.load %arg14[%c0_469, %c102_470] : memref<2x360xf32, #tpu.memory_space<vmem>>, vector<2x256xf32>
    %878 = vector.extract_strided_slice %877 {offsets = [0, 0], sizes = [1, 256], strides = [1, 1]} : vector<2x256xf32> to vector<1x256xf32>
    %c94 = arith.constant 94 : index
    %879 = memref.load %arg9[%c94] : memref<98xf32, #tpu.memory_space<smem>>
    %880 = vector.broadcast %879 : f32 to vector<1x256xf32>
    %881 = arith.mulf %878, %880 : vector<1x256xf32>
    %882 = vector.extract_strided_slice %877 {offsets = [1, 0], sizes = [1, 256], strides = [1, 1]} : vector<2x256xf32> to vector<1x256xf32>
    %c95 = arith.constant 95 : index
    %883 = memref.load %arg9[%c95] : memref<98xf32, #tpu.memory_space<smem>>
    %884 = vector.broadcast %883 : f32 to vector<1x256xf32>
    %885 = arith.mulf %882, %884 : vector<1x256xf32>
    %886 = arith.addf %881, %885 : vector<1x256xf32>
    %c5_471 = arith.constant 5 : index
    %c0_472 = arith.constant 0 : index
    %887 = vector.load %arg8[%c5_471, %c0_472] : memref<7x256xf32, #tpu.memory_space<vmem>>, vector<1x256xf32>
    %888 = arith.mulf %886, %887 : vector<1x256xf32>
    %889 = arith.addf %876, %888 : vector<1x256xf32>
    %c0_473 = arith.constant 0 : index
    %c103_474 = arith.constant 103 : index
    %890 = vector.load %arg14[%c0_473, %c103_474] : memref<2x360xf32, #tpu.memory_space<vmem>>, vector<2x256xf32>
    %891 = vector.extract_strided_slice %890 {offsets = [0, 0], sizes = [1, 256], strides = [1, 1]} : vector<2x256xf32> to vector<1x256xf32>
    %c96_475 = arith.constant 96 : index
    %892 = memref.load %arg9[%c96_475] : memref<98xf32, #tpu.memory_space<smem>>
    %893 = vector.broadcast %892 : f32 to vector<1x256xf32>
    %894 = arith.mulf %891, %893 : vector<1x256xf32>
    %895 = vector.extract_strided_slice %890 {offsets = [1, 0], sizes = [1, 256], strides = [1, 1]} : vector<2x256xf32> to vector<1x256xf32>
    %c97_476 = arith.constant 97 : index
    %896 = memref.load %arg9[%c97_476] : memref<98xf32, #tpu.memory_space<smem>>
    %897 = vector.broadcast %896 : f32 to vector<1x256xf32>
    %898 = arith.mulf %895, %897 : vector<1x256xf32>
    %899 = arith.addf %894, %898 : vector<1x256xf32>
    %c6_477 = arith.constant 6 : index
    %c0_478 = arith.constant 0 : index
    %900 = vector.load %arg8[%c6_477, %c0_478] : memref<7x256xf32, #tpu.memory_space<vmem>>, vector<1x256xf32>
    %901 = arith.mulf %899, %900 : vector<1x256xf32>
    %902 = arith.addf %889, %901 : vector<1x256xf32>
    %903 = arith.negf %902 : vector<1x256xf32>
    %904 = math.exp %903 : vector<1x256xf32>
    %cst_479 = arith.constant 1.000000e+00 : f32
    %905 = vector.broadcast %cst_479 : f32 to vector<1x256xf32>
    %906 = arith.addf %905, %904 : vector<1x256xf32>
    %907 = arith.divf %905, %906 : vector<1x256xf32>
    %c0_480 = arith.constant 0 : index
    %c0_481 = arith.constant 0 : index
    %908 = vector.load %arg10[%c0_480, %c0_481] : memref<16x4xbf16, #tpu.memory_space<vmem>>, vector<16x4xbf16>
    %909 = vector.broadcast %907 : vector<1x256xf32> to vector<4x256xf32>
    %910 = arith.mulf %266, %909 : vector<4x256xf32>
    %911 = arith.addf %910, %30 : vector<4x256xf32>
    %912 = arith.truncf %911 : vector<4x256xf32> to vector<4x256xbf16>
    %cst_482 = arith.constant dense<0.000000e+00> : vector<16x256xf32>
    %913 = tpu.matmul %908, %912, %cst_482 {dimension_numbers = #tpu.dot_dimension_numbers<[1], [0], [0], [1], [0, 0, 1, 1], [], []>} : vector<16x4xbf16>, vector<4x256xbf16>, vector<16x256xf32> -> vector<16x256xf32>
    %c0_483 = arith.constant 0 : index
    %c0_484 = arith.constant 0 : index
    %914 = vector.load %arg11[%c0_483, %c0_484] : memref<16x1xf32, #tpu.memory_space<vmem>>, vector<16x1xf32>
    %915 = vector.broadcast %914 : vector<16x1xf32> to vector<16x256xf32>
    %916 = arith.addf %913, %915 : vector<16x256xf32>
    %c0_485 = arith.constant 0 : index
    %c0_486 = arith.constant 0 : index
    %c0_487 = arith.constant 0 : index
    %917 = vector.load %arg12[%c0_485, %c0_486, %c0_487] : memref<1x16x256xf32, #tpu.memory_space<vmem>>, vector<1x16x256xf32>
    %918 = vector.shape_cast %917 : vector<1x16x256xf32> to vector<16x256xf32>
    %919 = vector.shape_cast %916 : vector<16x256xf32> to vector<1x16x256xf32>
    tpu.vector_store %arg12[%c0_485, %c0_486, %c0_487], %919 {strides = array<i32>} : memref<1x16x256xf32, #tpu.memory_space<vmem>>, vector<1x16x256xf32>,
    return
  }
  func.func @transform_0(%arg0: i32) -> (i32, i32, i32) {
    %c0_i32 = arith.constant 0 : i32
    %c0_i32_0 = arith.constant 0 : i32
    %c0_i32_1 = arith.constant 0 : i32
    return %arg0, %c0_i32, %c0_i32_0 : i32, i32, i32
  }
  func.func @transform_1(%arg0: i32) -> (i32, i32) {
    %c0_i32 = arith.constant 0 : i32
    %c0_i32_0 = arith.constant 0 : i32
    %c0_i32_1 = arith.constant 0 : i32
    return %c0_i32, %c0_i32_0 : i32, i32
  }
  func.func @transform_2(%arg0: i32) -> (i32, i32) {
    %c0_i32 = arith.constant 0 : i32
    %c0_i32_0 = arith.constant 0 : i32
    %c0_i32_1 = arith.constant 0 : i32
    return %c0_i32, %c0_i32_0 : i32, i32
  }
  func.func @transform_3(%arg0: i32) -> (i32, i32) {
    %c0_i32 = arith.constant 0 : i32
    %c0_i32_0 = arith.constant 0 : i32
    %c0_i32_1 = arith.constant 0 : i32
    return %c0_i32, %c0_i32_0 : i32, i32
  }
  func.func @transform_4(%arg0: i32) -> (i32, i32) {
    %c0_i32 = arith.constant 0 : i32
    %c0_i32_0 = arith.constant 0 : i32
    %c0_i32_1 = arith.constant 0 : i32
    return %c0_i32, %c0_i32_0 : i32, i32
  }
  func.func @transform_5(%arg0: i32) -> (i32, i32) {
    %c0_i32 = arith.constant 0 : i32
    %c0_i32_0 = arith.constant 0 : i32
    %c0_i32_1 = arith.constant 0 : i32
    return %c0_i32, %c0_i32_0 : i32, i32
  }
  func.func @transform_6(%arg0: i32) -> (i32, i32) {
    %c0_i32 = arith.constant 0 : i32
    %c0_i32_0 = arith.constant 0 : i32
    %c0_i32_1 = arith.constant 0 : i32
    return %c0_i32, %c0_i32_0 : i32, i32
  }
  func.func @transform_7(%arg0: i32) -> (i32, i32) {
    %c0_i32 = arith.constant 0 : i32
    %c0_i32_0 = arith.constant 0 : i32
    %c0_i32_1 = arith.constant 0 : i32
    return %c0_i32, %c0_i32_0 : i32, i32
  }
  func.func @transform_8(%arg0: i32) -> i32 {
    %c0_i32 = arith.constant 0 : i32
    %c0_i32_0 = arith.constant 0 : i32
    return %c0_i32 : i32
  }
  func.func @transform_9(%arg0: i32) -> (i32, i32) {
    %c0_i32 = arith.constant 0 : i32
    %c0_i32_0 = arith.constant 0 : i32
    %c0_i32_1 = arith.constant 0 : i32
    return %c0_i32, %c0_i32_0 : i32, i32
  }
  func.func @transform_10(%arg0: i32) -> (i32, i32) {
    %c0_i32 = arith.constant 0 : i32
    %c0_i32_0 = arith.constant 0 : i32
    %c0_i32_1 = arith.constant 0 : i32
    return %c0_i32, %c0_i32_0 : i32, i32
  }
  func.func @transform_11(%arg0: i32) -> (i32, i32, i32) {
    %c0_i32 = arith.constant 0 : i32
    %c0_i32_0 = arith.constant 0 : i32
    %c0_i32_1 = arith.constant 0 : i32
    return %arg0, %c0_i32, %c0_i32_0 : i32, i32, i32
  }
}

</mosaic_0001>

<bundles_post_ra>
// kernel: tpu_custom_call.1
= control target key start
LH: loop header
LB: loop body
LE: loop exit
PB: predicated region body
PF: predicated region fallthrough
CT: control target
= control target key end

     0   :  { %s7380_s0 = inlined_call_operand.vmem [shape: f32[2,8,256], index: 0, kind: input, shape index: {}]   ;;  %s7381_s1 = inlined_call_operand.hbm [shape: bf16[4,8], index: 1, kind: input, shape index: {}]   ;;  %s7382_s2 = inlined_call_operand.vmem [shape: f32[4,1], index: 2, kind: input, shape index: {}]   ;;  %s7383_s3 = inlined_call_operand.hbm [shape: f32[1,4], index: 3, kind: input, shape index: {}]   ;;  %s7384_s4 = inlined_call_operand.vmem [shape: f32[4,1], index: 4, kind: input, shape index: {}]   ;;  %s7385_s5 = inlined_call_operand.hbm [shape: bf16[4,196], index: 5, kind: input, shape index: {}]   ;;  %s7386_s6 = inlined_call_operand.vmem [shape: f32[4,1], index: 6, kind: input, shape index: {}]   ;;  %s7387_s7 = inlined_call_operand.vmem [shape: f32[7,256], index: 7, kind: input, shape index: {}]   ;;  %s7388_s8 = inlined_call_operand.vmem [shape: f32[98], index: 8, kind: input, shape index: {}]   ;;  %s7389_s9 = inlined_call_operand.vmem [shape: bf16[16,4], index: 9, kind: input, shape index: {}]   ;;  %s7390_s10 = inlined_call_operand.vmem [shape: f32[16,1], index: 10, kind: input, shape index: {}]   ;;  %s7391_s11 = inlined_call_operand.hbm [shape: f32[2,16,256], index: 11, kind: output, shape index: {}]  }
   0x1   :  { %7691 = sst [smem:[#allocation66_spill]] %s7380_s0 }
   0x2   :  { %7692 = sst [smem:[#allocation67_spill]] %s7381_s1 }
   0x3   :  { %7693 = sst [smem:[#allocation68_spill]] %s7382_s2 }
   0x4   :  { %7694 = sst [smem:[#allocation69_spill]] %s7383_s3 }
   0x5   :  { %7695 = sst [smem:[#allocation70_spill]] %s7384_s4 }
   0x6   :  { %7696 = sst [smem:[#allocation71_spill]] %s7385_s5 }
   0x7   :  { %7697 = sst [smem:[#allocation72_spill]] %s7386_s6 }
   0x8   :  { %7698 = sst [smem:[#allocation73_spill]] %s7387_s7 }
   0x9   :  { %7699 = sst [smem:[#allocation74_spill]] %s7388_s8 }
   0xa   :  { %7700 = sst [smem:[#allocation75_spill]] %s7389_s9 }
   0xb   :  { %7701 = sst [smem:[#allocation76_spill]] %s7390_s10 }
   0xc   :  { %7702 = sst [smem:[#allocation77_spill]] %s7391_s11 }
   0xd   :  { %16 = vsyncpa [#allocation6], 0 }
   0xe   :  { %17 = vsyncpa [#allocation10], 0 }
   0xf   :  { %18 = vsyncpa [#allocation8], 0 }
  0x10   :  { %19 = vsyncpa [#allocation7], 0 }
  0x11   :  { %21 = vsyncpa [#allocation7 + $0x1], 0  ;;  %s4903_s17 = smov 0   ;;  %s4905_s18 = smov 0  }
  0x12   :  { %s4907_s19 = smov 0   ;;  %s4909_s20 = smov 0  }
  0x13 LB: > { %7703 = sst [smem:[#allocation18_spill]] %s4719_s17  ;;  %s4924_s21 = sadd.s32 4294967295, %s4731_s20   ;;  %s4731_s20 = sphi %s4909_s20, %s8075_s20   ;;  %s4727_s19 = sphi %s4907_s19, %s8078_s19   ;;  %s4723_s18 = sphi %s4905_s18, %s8077_s18   ;;  %s4719_s17 = sphi %s4903_s17, %s8076_s17  }
  0x14   : > { %7704 = sst [smem:[#allocation19_spill]] %s4723_s18  ;;  %s4126_s22 = sadd.s32 4294967294, %s4731_s20  }
  0x15   : > { %7705 = sst [smem:[#allocation20_spill]] %s4727_s19  ;;  %s4928_s23 = sadd.s32 1, %s4731_s20  }
  0x16   : > { %7706 = sst [smem:[#allocation21_spill]] %s4731_s20  ;;  %s270_s24 = sadd.s32 1, %s4727_s19 }
  0x17   : > { %7707 = sst [smem:[#allocation22_spill]] %s4924_s21  ;;  %s267_s25 = ssub.s32 %s4731_s20, %s4928_s23 }
  0x18   : > { %7708 = sst [smem:[#allocation23_spill]] %s4928_s23  ;;  %p280_p0 = scmp.ne.s32.totalorder %s4727_s19, %s4723_s18 }
  0x19   : > { %p268_p1 = scmp.eq.s32.totalorder %s267_s25, 0  ;;  %p281_p2 = scmp.eq.s32.totalorder %s4924_s21, 1 }
  0x1a   : > { %p286_p3 = scmp.ne.s32.totalorder %s4723_s18, %s4719_s17  ;;  %p287_p4 = scmp.eq.s32.totalorder %s4126_s22, 1 }
  0x1b   : > { %s4939_s26 = scalar_select %p268_p1, %s4727_s19, %s270_s24  }
  0x1c   : > { %p4941_p5 = por %p281_p2, %p280_p0  ;;  %p4945_p6 = por %p287_p4, %p286_p3 }
  0x1d   : > { %7709 = sst [smem:[#allocation24_spill]] %s4939_s26  ;;  %p4127_p7 = scmp.ge.s32.totalorder %s4731_s20, 1 }
  0x1e   : > { %s7710_s27 = scalar_select %p4941_p5, 1, 0 }
  0x1f   : > { %s7712_s28 = scalar_select %p4945_p6, 1, 0 }
  0x20   : > { %7711 = sst [smem:[#allocation25_spill]] %s7710_s27  ;;  %p294_p8 = scmp.lt.s32.totalorder %s4731_s20, 3 }
  0x21   : > { %7713 = sst [smem:[#allocation26_spill]] %s7712_s28  ;;  %p7392_p9 = scmp.eq.s32.totalorder %s4924_s21, 0 }
  0x22   : > { %p4952_p10 = pnand %p4127_p7, %p294_p8  ;;  %s4733_s30 = smov [#allocation9]  }
  0x23   : > { %s321_s12 = sshll.u32 %s4733_s30, 4  ;;  %s4734_s13 = smov [#allocation5]   ;;  %s322_s12 = int_to_ptr.vmem [resolvable:$true] %s321_s12 }
  0x24   : > { %s7714_s29 = scalar_select %p4952_p10, 1, 0 }
  0x25   : > { %p4380_p11 = pneg %p4952_p10  ;;  %s307_s14 = sshll.u32 %s4734_s13, 4  ;;  %s308_s14 = int_to_ptr.vmem [resolvable:$true] %s307_s14 }
  0x26   : > { %s4735_s16 = smov [#allocation11]   ;;  %s7716_s8 = sld [smem:[#allocation74_spill]] }
  0x27   : > { %p4960_p12 = pnand %p7392_p9, %p4380_p11  ;;  %s335_s22 = sshll.u32 %s4735_s16, 4  ;;  %s4967_s22 = int_to_ptr.vmem [resolvable:$true] %s335_s22 }
  0x28   : > { %s4577_s30 = scalar_lea.vmem %s322_s12, 16  ;;  %s4584_s13 = scalar_lea.vmem %s322_s12, 32 }
  0x29   : > { %p4568_p13 = pneg %p4960_p12  ;;  %p4578_p0 = scmp.ne.s32.totalorder %s322_s12, %s4577_s30 }
  0x2a   : > { %p4585_p3 = scmp.lt.s32.totalorder %s322_s12, %s322_s12  ;;  %p4586_p4 = scmp.lt.s32.totalorder %s4584_s13, %s4577_s30 }
  0x2b   : > { %p4580_p1 = pnand %p4578_p0, %p4568_p13 }
  0x2c   : > { %s352_s26 = sshll.u32 %s7716_s8, 4  ;;  %p4587_p7 = por %p4586_p4, %p4585_p3  ;;  %s353_s26 = int_to_ptr.vmem [resolvable:$true] %s352_s26 }
  0x2d   : > { %p4581_p2 = pneg %p4580_p1 }
  0x2f   : > { %p4588_p8 = pnand %p4587_p7, %p4581_p2 }
  0x31   : > { %4591 = shalt.err (!%p4588_p8)
}
  0x32   : > { %s7717_s3 = sld [smem:[#allocation69_spill]]  ;;  %s4603_s25 = scalar_lea.vmem %s308_s14, 32 }
  0x33   : > { %p4604_p11 = scmp.ne.s32.totalorder %s308_s14, %s4603_s25  ;;  %p4611_p1 = scmp.lt.s32.totalorder %s308_s14, %s308_s14 }
  0x34   : > { %p4612_p6 = scmp.lt.s32.totalorder %s4603_s25, %s4603_s25 }
  0x35   : > { %p4606_p9 = pnand %p4604_p11, %p4568_p13 }
  0x36   : > { %p4613_p5 = por %p4612_p6, %p4611_p1 }
  0x37   : > { %p4607_p0 = pneg %p4606_p9 }
  0x38   : > { %4386 = dma.hbm_to_vmem [thread:$0]  (!%p4960_p12), %s7717_s3, 16, %s322_s12, [#allocation10]  }
  0x39   : > { %p4614_p10 = pnand %p4613_p5, %p4607_p0 }
  0x3b   : > { %4617 = shalt.err (!%p4614_p10)
}
  0x3c   : > { %s7718_s1 = sld [smem:[#allocation67_spill]]  ;;  %s4629_s12 = scalar_lea.vmem %s4967_s22, 64 }
  0x3d   : > { %p4630_p2 = scmp.ne.s32.totalorder %s4967_s22, %s4629_s12  ;;  %p4637_p6 = scmp.lt.s32.totalorder %s4967_s22, %s4967_s22 }
  0x3e   : > { %p4638_p5 = scmp.lt.s32.totalorder %s4629_s12, %s4629_s12 }
  0x3f   : > { %p4632_p9 = pnand %p4630_p2, %p4568_p13 }
  0x40   : > { %p4639_p10 = por %p4638_p5, %p4637_p6 }
  0x41   : > { %p4633_p3 = pneg %p4632_p9 }
  0x42   : > { %4383 = dma.hbm_to_vmem [thread:$0]  (!%p4960_p12), %s7718_s1, 32, %s308_s14, [#allocation6]  }
  0x43   : > { %p4640_p4 = pnand %p4639_p10, %p4633_p3 }
  0x45   : > { %4643 = shalt.err (!%p4640_p4)
}
  0x46   : > { %s7719_s5 = sld [smem:[#allocation71_spill]]  ;;  %s4644_s30 = scalar_lea.vmem %s353_s26, 16 }
  0x47   : > { %p4645_p7 = scmp.ne.s32.totalorder %s353_s26, %s4644_s30  ;;  %p4652_p0 = scmp.lt.s32.totalorder %s353_s26, %s353_s26 }
  0x48   : > { %p4653_p1 = scmp.lt.s32.totalorder %s4644_s30, %s4644_s30 }
  0x49   : > { %p4647_p8 = pnand %p4645_p7, %p4568_p13 }
  0x4a   : > { %p4654_p2 = por %p4653_p1, %p4652_p0 }
  0x4b   : > { %p4648_p11 = pneg %p4647_p8 }
  0x4c   : > { %4389 = dma.hbm_to_vmem [thread:$0]  (!%p4960_p12), %s7719_s5, 64, %s4967_s22, [#allocation10]  }
  0x4d   : > { %p4655_p9 = pnand %p4654_p2, %p4648_p11 }
  0x4f   : > { %4658 = shalt.err (!%p4655_p9)
}
  0x50   : > { %s4736_s13 = smov [#allocation12]   ;;  %p7720_p3 = scmp.ne.s32.totalorder %s7714_s29, 0 }
  0x51   : > { %4392 = dma.vmem_to_smem (!%p4960_p12), %s353_s26, 16, %s4736_s13, [#allocation8]  }
  0x52   : > { %379 = sbr.rel (%p7720_p3) target bundleno = 2677 (0xa75), region = 64 }
  0x57   : > { %p7721_p6 = scmp.eq.s32.totalorder %s4924_s21, 0 }
  0x59   : > { %4702 = dma.done.wait (%p7721_p6), [#allocation6], 32   ;;  %p7722_p5 = pmov %p7721_p6 }
  0x5b   : > { %4704 = vsyncadd (%p7722_p5), [#allocation6], 4294967264  ;;  %p7723_p13 = pmov %p7722_p5 }
  0x5c   : > { %p7724_p10 = pmov %p7722_p5 }
  0x5d   : > { %4706 = dma.done.wait (%p7723_p13), [#allocation10], 80  }
  0x5e   : > { %4708 = vsyncadd (%p7724_p10), [#allocation10], 4294967216  ;;  %p7725_p4 = pmov %p7722_p5 }
  0x60   : > { %4710 = dma.done.wait (%p7725_p4), [#allocation8], 16   ;;  %p7726_p12 = pmov %p7725_p4 }
  0x62   : > { %4712 = vsyncadd (%p7726_p12), [#allocation8], 4294967280 }
  0x63   : > { %397 = sfence }
  0x64   : > { %p432_p7 = scmp.lt.s32.totalorder %s4924_s21, 1  ;;  %v4737_v0 = vmov 0   ;;  %s7727_s2 = sld [smem:[#allocation68_spill]]  ;;  %vm7659_vm0 = vcmask 1043456   ;;  %v440_v7 = vld [vmem:[#allocation5] sm:$0x3]  ;;  %v7447_v27 = vlaneseq }
  0x65   : > { %492 = vmatprep.mubr.bf16.mxu1 %v4737_v0  ;;  %4547 = vset.pattern.permute.xlu0 %v4737_v0  ;;  %s7728_s0 = sld [smem:[#allocation66_spill]]  ;;  %vm449_vm1 = vcmask 64512   ;;  %vm690_vm2 = vcmask 420864   ;;  %vm692_vm3 = vcmask 847264   ;;  %v7453_v21 = vmov 0.0   ;;  %s7395_s16 = smov 67  }
  0x66   : > { %s433_s15 = scalar_select %p432_p7, %s4924_s21, 1  ;;  %4548 = vset.pattern.permute.xlu1 %v4737_v0  ;;  %691 = vst.msk [vmem:[#allocation2] sm:$0xf] %vm690_vm2, %v7453_v21  ;;  %vm4739_vm4 = vmmov 0   ;;  %vm7622_vm5 = vcmask 7168   ;;  %vm7506_vm6 = vcmask 31744  }
  0x67   : > { %693 = vst.msk [vmem:[#allocation2 + $0x8] sm:$0xf] %vm692_vm3, %v7453_v21  ;;  %v515_v25 = vld [vmem:[#allocation9] sm:$0x1]  ;;  %v5059_v28 = vshrl.u32 %v7447_v27, 7  ;;  %s7730_s7 = sld [smem:[#allocation73_spill]] }
  0x68   : > { %s4346_s22 = sshll.u32 %s433_s15, 4  ;;  %s7397_s15 = smov 65   ;;  %vm598_vm7 = vcmask 1040384   ;;  %vm704_vm8 = vcmask 1043872   ;;  %vm705_vm9 = vcmask 1047556   ;;  %vm7658_vm10 = vcmask 424960  }
  0x69   : > { %7729 = vst [vmem:[#allocation27_spill] sm:$0xff] %v5059_v28  ;;  %v5068_v31 = vsub.s32 0, %v5059_v28  ;;  %v5071_v32 = vsub.s32 1, %v5059_v28  ;;  %s7399_s25 = smov 54   ;;  %s7398_s26 = smov 53   ;;  %vm706_vm11 = vmor %vm705_vm9, %vm704_vm8  ;;  %vm7596_vm12 = vcmask 285696  }
  0x6a   : > { %v443_v1 = vld [vmem:[%s7727_s2] sm:$0xf]  ;;  %s7396_s12 = smov 55   ;;  %s7402_s30 = smov 39   ;;  %vm7512_vm13 = vcmask 539648   ;;  %vm7544_vm14 = vcmask 531456  }
  0x6b   : > { %446 = vperm.xlu0 %4547, %v443_v1   ;;  %s436_s24 = scalar_lea.vmem %s7728_s0, %s4346_s22  ;;  %7731 = vst [vmem:[#allocation28_spill] sm:$0xff] %v5068_v31  ;;  %s7400_s22 = smov 50   ;;  %vm7518_vm15 = vcmask 547840   ;;  %vm7563_vm3 = vcmask 441344   ;;  %vm7593_vm8 = vcmask 318464   ;;  %vm7509_vm9 = vcmask 834560  }
  0x6c   : > { %v439_v2 = vld [vmem:[%s436_s24 + $0x8] sm:$0xff]  ;;  %v438_v3 = vld [vmem:[%s436_s24] sm:$0xff]  ;;  %s7412_s13 = smov 71   ;;  %s7411_s29 = smov 81  }
  0x6d   : > { %v442_v4 = vpack.c.bf16 %v439_v2, %v439_v2  ;;  %v441_v5 = vpack.c.bf16 %v438_v3, %v438_v3  ;;  %v1713_v29 = vld [vmem:[%s7730_s7] ss:$8 sm:$0x3]  ;;  %v4169_v30 = vld [vmem:[%s7730_s7 + $0x2] ss:$8 sm:$0x3] }
  0x6e   : > { %v1718_v33 = vrot.slane %v1713_v29, %v5068_v31  ;;  %v1722_v34 = vrot.slane %v1713_v29, %v5071_v32  ;;  %v1795_v35 = vrot.slane %v4169_v30, %v5068_v31  ;;  %v1799_v36 = vrot.slane %v4169_v30, %v5071_v32  ;;  %v4166_v37 = vld [vmem:[%s7730_s7 + $0x5] ss:$8 sm:$0x3]  ;;  %v4165_v42 = vld [vmem:[%s7730_s7 + $0x4] ss:$8 sm:$0x3] }
  0x6f   : > { %4141 = vmatprep.subr.msk.bf16.mxu1 %vm7659_vm0, %v442_v4  ;;  %v455_v6 = vsel %vm7659_vm0, %v441_v5, 0  ;;  %v1641_v40 = vrot.slane %v4166_v37, %v5068_v31  ;;  %v1645_v41 = vrot.slane %v4166_v37, %v5071_v32  ;;  %v1602_v44 = vrot.slane %v4165_v42, %v5068_v31  ;;  %v4167_v46 = vld [vmem:[%s7730_s7 + $0x6] ss:$8 sm:$0x3]  ;;  %s7732_s4 = sld [smem:[#allocation70_spill]]  ;;  %s7494_s24 = smov 127  }
  0x70   : > { %475 = vmatpush1.bf16.msra.mxu1 %v455_v6  ;;  %v1723_v38 = vcombine.low %v1718_v33, %v1722_v34  ;;  %v1800_v39 = vcombine.low %v1795_v35, %v1799_v36  ;;  %v1606_v45 = vrot.slane %v4165_v42, %v5071_v32  ;;  %v1679_v48 = vrot.slane %v4167_v46, %v5068_v31  ;;  %v4162_v50 = vld [vmem:[%s7730_s7 + $0x6] ss:$8 sm:$0x3]  ;;  %v4163_v54 = vld [vmem:[%s7730_s7 + $0x1] ss:$8 sm:$0x3] }
  0x71   : > { %4352 = vmatprep.subr.mxu1 %v7453_v21  ;;  %v1646_v43 = vcombine.low %v1641_v40, %v1645_v41  ;;  %v1683_v49 = vrot.slane %v4167_v46, %v5071_v32  ;;  %v1430_v52 = vrot.slane %v4162_v50, %v5068_v31  ;;  %v1434_v53 = vrot.slane %v4162_v50, %v5071_v32  ;;  %v4164_v58 = vld [vmem:[%s7730_s7 + $0x2] ss:$8 sm:$0x3]  ;;  %v4160_v62 = vld [vmem:[%s7730_s7 + $0x4] ss:$8 sm:$0x3] }
  0x72   : > { %v1607_v47 = vcombine.low %v1602_v44, %v1606_v45  ;;  %v1507_v56 = vrot.slane %v4163_v54, %v5068_v31  ;;  %v1511_v57 = vrot.slane %v4163_v54, %v5071_v32  ;;  %v1545_v60 = vrot.slane %v4164_v58, %v5068_v31  ;;  %v4156_v3 = vld [vmem:[%s7730_s7 + $0x5] ss:$8 sm:$0x3]  ;;  %v4149_v34 = vld [vmem:[%s7730_s7 + $0x2] ss:$8 sm:$0x3] }
  0x73   : > { %4142 = vmatmul.mubr.msk.bf16.vlgmr.msra.gmra.mxu1 %vm449_vm1, %v440_v7  ;;  %v1684_v51 = vcombine.low %v1679_v48, %v1683_v49  ;;  %v1435_v55 = vcombine.low %v1430_v52, %v1434_v53  ;;  %v1549_v61 = vrot.slane %v4164_v58, %v5071_v32  ;;  %v1353_v1 = vrot.slane %v4160_v62, %v5068_v31  ;;  %v4157_v7 = vld [vmem:[%s7730_s7 + $0x6] ss:$8 sm:$0x3]  ;;  %v4180_v42 = vld [vmem:[%s7730_s7 + $0x4] ss:$8 sm:$0x3] }
  0x74   : > { %4354 = vmatprep.mubr.msk.f32.mxu1 %vm4739_vm4, %v7453_v21  ;;  %v1512_v59 = vcombine.low %v1507_v56, %v1511_v57  ;;  %v1357_v2 = vrot.slane %v4160_v62, %v5071_v32  ;;  %v1142_v5 = vrot.slane %v4156_v3, %v5068_v31  ;;  %v1146_v6 = vrot.slane %v4156_v3, %v5071_v32  ;;  %v4176_v46 = vld [vmem:[%s7730_s7 + $0x5] ss:$8 sm:$0x3]  ;;  %v4177_v50 = vld [vmem:[%s7730_s7 + $0x6] ss:$8 sm:$0x3] }
  0x75   : > { %v1550_v63 = vcombine.low %v1545_v60, %v1549_v61  ;;  %v794_v36 = vrot.slane %v4149_v34, %v5068_v31  ;;  %v798_v37 = vrot.slane %v4149_v34, %v5071_v32  ;;  %v2351_v44 = vrot.slane %v4180_v42, %v5068_v31  ;;  %v4173_v54 = vld [vmem:[%s7730_s7 + $0x1] ss:$8 sm:$0x3]  ;;  %v4175_v58 = vld [vmem:[%s7730_s7 + $0x4] ss:$8 sm:$0x3] }
  0x76   : > { %v1358_v4 = vcombine.low %v1353_v1, %v1357_v2  ;;  %v2355_v45 = vrot.slane %v4180_v42, %v5071_v32  ;;  %v2140_v48 = vrot.slane %v4176_v46, %v5068_v31  ;;  %v2144_v49 = vrot.slane %v4176_v46, %v5071_v32  ;;  %v4172_v62 = vld [vmem:[%s7730_s7 + $0x6] ss:$8 sm:$0x3]  ;;  %v1962_v3 = vld [vmem:[%s7730_s7] ss:$8 sm:$0x3] }
  0x77   : > { %v2178_v52 = vrot.slane %v4177_v50, %v5068_v31  ;;  %v2182_v53 = vrot.slane %v4177_v50, %v5071_v32  ;;  %v2006_v56 = vrot.slane %v4173_v54, %v5068_v31  ;;  %v2010_v57 = vrot.slane %v4173_v54, %v5071_v32  ;;  %s7416_s14 = smov 49   ;;  %v4158_v50 = vld [vmem:[%s7730_s7 + $0x1] ss:$8 sm:$0x3]  ;;  %s7764_s0 = smov 44  }
  0x78   : > { %v2101_v60 = vrot.slane %v4175_v58, %v5068_v31  ;;  %v2105_v61 = vrot.slane %v4175_v58, %v5071_v32  ;;  %v1929_v1 = vrot.slane %v4172_v62, %v5068_v31  ;;  %v1933_v2 = vrot.slane %v4172_v62, %v5071_v32  ;;  %s7594_s1 = smov 107   ;;  %s7781_s2 = smov 110  }
  0x79   : > { %v1261_v54 = vrot.slane %v4158_v50, %v5071_v32  ;;  %vm7537_vm1 = vcmask 433152   ;;  %s7608_s3 = smov 122   ;;  %s7795_s5 = smov 123  }
  0x7a   : > { %s7801_s8 = smov 121   ;;  %s7805_s19 = smov 73  }
  0x7b   : > { %s7623_s23 = smov 126   ;;  %s7808_s28 = smov 79  }
  0x7c   : > { %s7809_s17 = smov 127   ;;  %s7814_s20 = smov 125  }
  0x7d   : > { %s7818_s11 = smov 90   ;;  %s7819_s27 = smov 25  }
  0x7e   : > { %s7823_s21 = smov 105   ;;  %s7824_s9 = smov 28  }
  0x7f   : > { %s7827_s18 = smov 94   ;;  %s7828_s10 = smov 26  }
  0x80   : > { %s7840_s6 = smov 45  }
  0xe6   : > { %v447_v8 = vpop.permute.xlu0 %446 }
 0x133   : > { %v494_v9 = vpop.f32.mrf.mxu1 }
 0x134   : > { %v5036_v10 = vadd.f32 %v494_v9, %v447_v8  ;;  %v1180_v9 = vrot.slane %v4157_v7, %v5068_v31 }
 0x135   : > { %v496_v11 = vpop.f32.mrf.mxu1 }
 0x136   : > { %v5038_v12 = vadd.f32 %v496_v11, %v447_v8  ;;  %v508_v14 = vsel %vm7659_vm0, %v5036_v10, -inf  ;;  %v501_v16 = vsel %vm7659_vm0, %v5036_v10, 0.0  ;;  %v1147_v8 = vcombine.low %v1142_v5, %v1146_v6 }
 0x137   : > { %v498_v13 = vpop.f32.mrf.mxu1  ;;  %v1184_v11 = vrot.slane %v4157_v7, %v5071_v32  ;;  %v1967_v5 = vrot.slane %v1962_v3, %v5068_v31  ;;  %v1971_v6 = vrot.slane %v1962_v3, %v5071_v32 }
 0x138   : > { %v509_v15 = vsel %vm7659_vm0, %v5038_v12, -inf  ;;  %v502_v17 = vsel %vm7659_vm0, %v5038_v12, 0.0  ;;  %v4153_v13 = vld [vmem:[%s7730_s7 + $0x1] ss:$8 sm:$0x3] }
 0x139   : > { %v499_v18 = vpop.f32.mrf.mxu1  ;;  %v510_v19 = vmax.f32 %v508_v14, %v509_v15  ;;  %v503_v20 = vadd.f32 %v502_v17, %v501_v16  ;;  %v1185_v14 = vcombine.low %v1180_v9, %v1184_v11  ;;  %v1008_v15 = vrot.slane %v4153_v13, %v5068_v31  ;;  %v4155_v17 = vld [vmem:[%s7730_s7 + $0x4] ss:$8 sm:$0x3]  ;;  %v594_v11 = vld [vmem:[%s7732_s4] sm:$0xf]  ;;  %s7794_s4 = smov 62  }
 0x13a   : > { %v1012_v16 = vrot.slane %v4153_v13, %v5071_v32  ;;  %v1972_v7 = vcombine.low %v1967_v5, %v1971_v6  ;;  %v711_v6 = vld [vmem:[%s7730_s7] ss:$8 sm:$0x3] }
 0x13b   : > { %511 = vmax.xlane.f32.xlu1 %v510_v19  ;;  %504 = vadd.xlane.f32.xlu0 %v503_v20  ;;  %v1103_v19 = vrot.slane %v4155_v17, %v5068_v31  ;;  %v1107_v20 = vrot.slane %v4155_v17, %v5071_v32 }
 0x13c   : > { %v1013_v18 = vcombine.low %v1008_v15, %v1012_v16 }
 0x14c   : > { %1724 = vrot.lane.b32.xlu1 %v1723_v38, %s7397_s15  ;;  %s7414_s15 = smov 22   ;;  %v4182_v38 = vld [vmem:[%s7730_s7 + $0x6] ss:$8 sm:$0x3] }
 0x14d   : > { %v2428_v40 = vrot.slane %v4182_v38, %v5068_v31  ;;  %v2432_v41 = vrot.slane %v4182_v38, %v5071_v32 }
 0x150   : > { %1801 = vrot.lane.b32.xlu1 %v1800_v39, %s7395_s16  ;;  %s7401_s16 = smov 51   ;;  %v799_v39 = vcombine.low %v794_v36, %v798_v37 }
 0x154   : > { %1647 = vrot.lane.b32.xlu1 %v1646_v43, %s7399_s25  ;;  %s7421_s25 = smov 18   ;;  %v2433_v43 = vcombine.low %v2428_v40, %v2432_v41  ;;  %v4161_v41 = vld [vmem:[%s7730_s7 + $0x5] ss:$8 sm:$0x3] }
 0x158   : > { %1608 = vrot.lane.b32.xlu1 %v1607_v47, %s7398_s26  ;;  %s7404_s26 = smov 23   ;;  %v2356_v47 = vcombine.low %v2351_v44, %v2355_v45  ;;  %v1395_v44 = vrot.slane %v4161_v41, %v5071_v32  ;;  %v1214_v45 = vld [vmem:[%s7730_s7] ss:$8 sm:$0x3] }
 0x15c   : > { %1685 = vrot.lane.b32.xlu1 %v1684_v51, %s7396_s12  ;;  %s7403_s12 = smov 37   ;;  %v2145_v51 = vcombine.low %v2140_v48, %v2144_v49  ;;  %v1219_v48 = vrot.slane %v1214_v45, %v5068_v31  ;;  %v1223_v49 = vrot.slane %v1214_v45, %v5071_v32 }
 0x160   : > { %1436 = vrot.lane.b32.xlu1 %v1435_v55, %s7402_s30  ;;  %s7428_s30 = smov 17   ;;  %v2183_v55 = vcombine.low %v2178_v52, %v2182_v53  ;;  %v1224_v52 = vcombine.low %v1219_v48, %v1223_v49  ;;  %v1257_v53 = vrot.slane %v4158_v50, %v5068_v31 }
 0x164   : > { %1513 = vrot.lane.b32.xlu1 %v1512_v59, %s7400_s22  ;;  %s7405_s22 = smov 21   ;;  %v2011_v59 = vcombine.low %v2006_v56, %v2010_v57  ;;  %v1262_v56 = vcombine.low %v1257_v53, %v1261_v54 }
 0x168   : > { %1551 = vrot.lane.b32.xlu1 %v1550_v63, %s7401_s16  ;;  %s7423_s16 = smov 7   ;;  %v2106_v63 = vcombine.low %v2101_v60, %v2105_v61 }
 0x16c   : > { %1359 = vrot.lane.b32.xlu1 %v1358_v4, %s7403_s12  ;;  %s7438_s12 = smov 3   ;;  %v1934_v4 = vcombine.low %v1929_v1, %v1933_v2  ;;  %v4151_v1 = vld [vmem:[%s7730_s7 + $0x5] ss:$8 sm:$0x3] }
 0x16d   : > { %v895_v5 = vrot.slane %v4151_v1, %v5071_v32 }
 0x170   : > { %1148 = vrot.lane.b32.xlu1 %v1147_v8, %s7414_s15  ;;  %s7425_s15 = smov 102  }
 0x174   : > { %1186 = vrot.lane.b32.xlu1 %v1185_v14, %s7404_s26  ;;  %s7406_s26 = smov 103  }
 0x178   : > { %1014 = vrot.lane.b32.xlu1 %v1013_v18, %s7421_s25  ;;  %s7436_s25 = smov 6  }
 0x1c4   : > { %v505_v22 = vpop.xlane.xlu0 %504  ;;  %v512_v24 = vpop.xlane.xlu1 %511 }
 0x1c5   : > { %v507_v23 = vmul.f32 0.00390625, %v505_v22  ;;  %v4152_v22 = vld [vmem:[%s7730_s7 + $0x6] ss:$8 sm:$0x3] }
 0x1c7   : > { %v514_v26 = vsel %vm7622_vm5, %v507_v23, %v512_v24  ;;  %v1108_v23 = vcombine.low %v1103_v19, %v1107_v20  ;;  %v931_v24 = vrot.slane %v4152_v22, %v5068_v31 }
 0x1c8   : > { %4353 = vmatpush3.msk.msra.mxu1 %vm7659_vm0, %v514_v26  ;;  %v964_v26 = vld [vmem:[%s7730_s7] ss:$8 sm:$0x3]  ;;  %v5216_v14 = vpop.permute.xlu1 %1724  ;;  %vm994_vm0 = vcmask 908288  }
 0x1c9   : > { %4355 = vmatmul.mubr.msk.f32.vlgmr.msra.gmra.mxu1 %vm7506_vm6, %v515_v25  ;;  %4357 = vmatprep.subr.mxu1 %v7453_v21  ;;  %v935_v25 = vrot.slane %v4152_v22, %v5071_v32  ;;  %v969_v30 = vrot.slane %v964_v26, %v5068_v31  ;;  %v973_v33 = vrot.slane %v964_v26, %v5071_v32  ;;  %vm7517_vm6 = vcmask 809984  }
 0x1ca   : > { %4359 = vmatprep.mubr.msk.f32.mxu1 %vm4739_vm4, %v7453_v21  ;;  %1109 = vrot.lane.b32.xlu1 %v1108_v23, %s7405_s22  ;;  %s7407_s22 = smov 101   ;;  %vm7577_vm4 = vcmask 400384  }
 0x1cb   : > { %v936_v29 = vcombine.low %v931_v24, %v935_v25  ;;  %v974_v35 = vcombine.low %v969_v30, %v973_v33  ;;  %v4168_v25 = vld [vmem:[%s7730_s7 + $0x1] ss:$8 sm:$0x3]  ;;  %v1463_v30 = vld [vmem:[%s7730_s7] ss:$8 sm:$0x3] }
 0x1cc   : > { %v5218_v15 = vpop.permute.xlu1 %1801  ;;  %v1756_v26 = vrot.slane %v4168_v25, %v5068_v31  ;;  %v1468_v33 = vrot.slane %v1463_v30, %v5068_v31  ;;  %v1472_v34 = vrot.slane %v1463_v30, %v5071_v32 }
 0x1ce   : > { %937 = vrot.lane.b32.xlu1 %v936_v29, %s7423_s16  ;;  %v1760_v29 = vrot.slane %v4168_v25, %v5071_v32  ;;  %v1473_v38 = vcombine.low %v1468_v33, %v1472_v34  ;;  %s7437_s16 = smov 2  }
 0x1d0   : > { %v5220_v16 = vpop.permute.xlu1 %1647  ;;  %v1761_v36 = vcombine.low %v1756_v26, %v1760_v29  ;;  %v4179_v29 = vld [vmem:[%s7730_s7 + $0x2] ss:$8 sm:$0x3] }
 0x1d1   : > { %v2294_v34 = vrot.slane %v4179_v29, %v5068_v31 }
 0x1d2   : > { %975 = vrot.lane.b32.xlu1 %v974_v35, %s7428_s30  ;;  %v4159_v35 = vld [vmem:[%s7730_s7 + $0x2] ss:$8 sm:$0x3]  ;;  %s7430_s30 = smov 83  }
 0x1d3   : > { %v1300_v40 = vrot.slane %v4159_v35, %v5071_v32 }
 0x1d4   : > { %v5222_v17 = vpop.permute.xlu1 %1608 }
 0x1d6   : > { %800 = vrot.lane.b32.xlu1 %v799_v39, %s7438_s12  ;;  %v1296_v39 = vrot.slane %v4159_v35, %v5068_v31  ;;  %v2298_v35 = vrot.slane %v4179_v29, %v5071_v32  ;;  %s7441_s12 = smov 25  }
 0x1d8   : > { %v5224_v18 = vpop.permute.xlu1 %1685  ;;  %v1301_v42 = vcombine.low %v1296_v39, %v1300_v40 }
 0x1da   : > { %2434 = vrot.lane.b32.xlu1 %v2433_v43, %s7406_s26  ;;  %s7408_s26 = smov 86   ;;  %v1391_v43 = vrot.slane %v4161_v41, %v5068_v31  ;;  %v2212_v41 = vld [vmem:[%s7730_s7] ss:$8 sm:$0x3] }
 0x1db   : > { %v2221_v45 = vrot.slane %v2212_v41, %v5071_v32 }
 0x1dc   : > { %v5230_v22 = vpop.permute.xlu1 %1436 }
 0x1de   : > { %2357 = vrot.lane.b32.xlu1 %v2356_v47, %s7407_s22  ;;  %s7409_s22 = smov 87   ;;  %v1396_v47 = vcombine.low %v1391_v43, %v1395_v44  ;;  %v2217_v44 = vrot.slane %v2212_v41, %v5068_v31 }
 0x1e0   : > { %v2222_v48 = vcombine.low %v2217_v44, %v2221_v45 }
 0x1e2   : > { %2146 = vrot.lane.b32.xlu1 %v2145_v51, %s7408_s26  ;;  %s7410_s26 = smov 82  }
 0x1e6   : > { %2184 = vrot.lane.b32.xlu1 %v2183_v55, %s7409_s22  ;;  %s7413_s22 = smov 85   ;;  %v4154_v55 = vld [vmem:[%s7730_s7 + $0x2] ss:$8 sm:$0x3] }
 0x1e7   : > { %v1046_v57 = vrot.slane %v4154_v55, %v5068_v31  ;;  %v1050_v58 = vrot.slane %v4154_v55, %v5071_v32 }
 0x1e9   : > { %v1051_v61 = vcombine.low %v1046_v57, %v1050_v58 }
 0x1ea   : > { %2012 = vrot.lane.b32.xlu1 %v2011_v59, %s7410_s26  ;;  %s7415_s26 = smov 66   ;;  %v4150_v59 = vld [vmem:[%s7730_s7 + $0x4] ss:$8 sm:$0x3] }
 0x1eb   : > { %1762 = vrot.lane.b32.xlu0 %v1761_v36, %s7415_s26  ;;  %s7417_s26 = smov 35   ;;  %v852_v62 = vrot.slane %v4150_v59, %v5068_v31  ;;  %v4181_v36 = vld [vmem:[%s7730_s7 + $0x5] ss:$8 sm:$0x3] }
 0x1ec   : > { %v2389_v39 = vrot.slane %v4181_v36, %v5068_v31  ;;  %v2393_v40 = vrot.slane %v4181_v36, %v5071_v32 }
 0x1ee   : > { %2107 = vrot.lane.b32.xlu1 %v2106_v63, %s7413_s22  ;;  %v856_v63 = vrot.slane %v4150_v59, %v5071_v32  ;;  %v2394_v43 = vcombine.low %v2389_v39, %v2393_v40  ;;  %s7427_s22 = smov 97  }
 0x1ef   : > { %1474 = vrot.lane.b32.xlu0 %v1473_v38, %s7416_s14  ;;  %s7418_s14 = smov 38   ;;  %v2299_v38 = vcombine.low %v2294_v34, %v2298_v35 }
 0x1f0   : > { %v857_v3 = vcombine.low %v852_v62, %v856_v63  ;;  %v4178_v62 = vld [vmem:[%s7730_s7 + $0x1] ss:$8 sm:$0x3] }
 0x1f1   : > { %v2255_v63 = vrot.slane %v4178_v62, %v5068_v31 }
 0x1f2   : > { %1935 = vrot.lane.b32.xlu1 %v1934_v4, %s7412_s13  ;;  %v891_v4 = vrot.slane %v4151_v1, %v5068_v31  ;;  %v2259_v1 = vrot.slane %v4178_v62, %v5071_v32  ;;  %s7431_s13 = smov 70  }
 0x1f3   : > { %1302 = vrot.lane.b32.xlu0 %v1301_v42, %s7417_s26  ;;  %s7419_s26 = smov 33  }
 0x1f6   : > { %1973 = vrot.lane.b32.xlu1 %v1972_v7, %s7411_s29  ;;  %v896_v7 = vcombine.low %v891_v4, %v895_v5  ;;  %v4174_v4 = vld [vmem:[%s7730_s7 + $0x2] ss:$8 sm:$0x3]  ;;  %s7433_s29 = smov 52  }
 0x1f7   : > { %1397 = vrot.lane.b32.xlu0 %v1396_v47, %s7418_s14  ;;  %s7420_s14 = smov 34   ;;  %v2048_v5 = vrot.slane %v4174_v4, %v5071_v32 }
 0x1fb   : > { %1225 = vrot.lane.b32.xlu0 %v1224_v52, %s7419_s26  ;;  %s7422_s26 = smov 19  }
 0x1ff   : > { %1263 = vrot.lane.b32.xlu0 %v1262_v56, %s7420_s14  ;;  %s7435_s14 = smov 5  }
 0x203   : > { %1052 = vrot.lane.b32.xlu0 %v1051_v61, %s7422_s26  ;;  %s7424_s26 = smov 1  }
 0x207   : > { %858 = vrot.lane.b32.xlu0 %v857_v3, %s7435_s14  ;;  %v2260_v3 = vcombine.low %v2255_v63, %v2259_v1  ;;  %s7486_s14 = smov 63  }
 0x20b   : > { %897 = vrot.lane.b32.xlu0 %v896_v7, %s7436_s25  ;;  %s7511_s25 = smov 124  }
 0x289   : > { %v589_v8 = vpop.f32.mrf.mxu1 }
 0x28a   : > { %v593_v9 = vmax.f32 %v589_v8, 0.0  ;;  %v716_v8 = vrot.slane %v711_v6, %v5068_v31 }
 0x28b   : > { %v4356_v13 = vpop.f32.mrf.mxu1 }
 0x28c   : > { %4358 = vmatpush3.msk.msra.mxu1 %vm598_vm7, %v593_v9  ;;  %v720_v9 = vrot.slane %v711_v6, %v5071_v32  ;;  %vm7575_vm7 = vcmask 416768  }
 0x28d   : > { %4360 = vmatmul.mubr.msk.f32.vlgmr.msra.gmra.mxu1 %vm7622_vm5, %v594_v11  ;;  %v4148_v11 = vld [vmem:[%s7730_s7 + $0x1] ss:$8 sm:$0x3] }
 0x28e   : > { %3992 = vmatprep.mubr.bf16.mxu1 %v4737_v0  ;;  %v5232_v0 = vpop.permute.xlu1 %1513  ;;  %v754_v25 = vrot.slane %v4148_v11, %v5068_v31  ;;  %v758_v26 = vrot.slane %v4148_v11, %v5071_v32 }
 0x290   : > { %v759_v33 = vcombine.low %v754_v25, %v758_v26 }
 0x292   : > { %v5234_v23 = vpop.permute.xlu1 %1551 }
 0x296   : > { %v5236_v24 = vpop.permute.xlu1 %1359 }
 0x29a   : > { %v5251_v37 = vpop.permute.xlu1 %1148 }
 0x29e   : > { %v5265_v46 = vpop.permute.xlu1 %1186 }
 0x2a2   : > { %v5273_v51 = vpop.permute.xlu1 %1014 }
 0x2a6   : > { %v5287_v60 = vpop.permute.xlu1 %1109 }
 0x2aa   : > { %v5295_v2 = vpop.permute.xlu1 %937 }
 0x2ae   : > { %v5309_v13 = vpop.permute.xlu1 %975 }
 0x2b2   : > { %v5317_v30 = vpop.permute.xlu1 %800 }
 0x2b6   : > { %v5331_v42 = vpop.permute.xlu1 %2434 }
 0x2ba   : > { %v5336_v47 = vpop.permute.xlu1 %2357 }
 0x2be   : > { %v5340_v49 = vpop.permute.xlu1 %2146 }
 0x2c2   : > { %v5342_v50 = vpop.permute.xlu1 %2184 }
 0x2c6   : > { %v5344_v52 = vpop.permute.xlu1 %2012 }
 0x2ca   : > { %v5346_v53 = vpop.permute.xlu1 %2107 }
 0x2ce   : > { %v5348_v54 = vpop.permute.xlu1 %1935 }
 0x2cf   : > { %7733 = vst [vmem:[#allocation29_spill] sm:$0xff] %v5348_v54 }
 0x2d2   : > { %v5350_v55 = vpop.permute.xlu1 %1973 }
 0x34d   : > { %v5226_v19 = vpop.f32.mrf.mxu1 }
 0x34e   : > { %673 = vrot.lane.b32.xlu1 %v5226_v19, %s7494_s24 }
 0x34f   : > { %v4361_v20 = vpop.f32.mrf.mxu1 }
 0x350   : > { %v721_v20 = vcombine.low %v716_v8, %v720_v9  ;;  %v4170_v8 = vld [vmem:[%s7730_s7 + $0x4] ss:$8 sm:$0x3] }
 0x351   : > { %v1852_v9 = vrot.slane %v4170_v8, %v5068_v31  ;;  %v1856_v11 = vrot.slane %v4170_v8, %v5071_v32 }
 0x352   : > { %722 = vrot.lane.b32.xlu0 %v721_v20, %s7424_s26  ;;  %s7426_s26 = smov 99   ;;  %v4171_v20 = vld [vmem:[%s7730_s7 + $0x5] ss:$8 sm:$0x3]  ;;  %s7839_s7 = smov 122  }
 0x353   : > { %v1890_v25 = vrot.slane %v4171_v20, %v5068_v31  ;;  %v1894_v26 = vrot.slane %v4171_v20, %v5071_v32  ;;  %v1857_v29 = vcombine.low %v1852_v9, %v1856_v11  ;;  %v5386_v32 = vpop.permute.xlu0 %1762  ;;  %v7457_v9 = vrot.slane %v5331_v42, 4 }
 0x356   : > { %760 = vrot.lane.b32.xlu0 %v759_v33, %s7437_s16  ;;  %v1895_v33 = vcombine.low %v1890_v25, %v1894_v26  ;;  %s7492_s16 = smov 61  }
 0x357   : > { %v5388_v39 = vpop.permute.xlu0 %1474 }
 0x35a   : > { %2300 = vrot.lane.b32.xlu0 %v2299_v38, %s7426_s26  ;;  %s7443_s26 = smov 44  }
 0x35b   : > { %v5390_v40 = vpop.permute.xlu0 %1302 }
 0x35e   : > { %2395 = vrot.lane.b32.xlu0 %v2394_v43, %s7425_s15  ;;  %s7490_s15 = smov 76  }
 0x35f   : > { %v5392_v41 = vpop.permute.xlu0 %1397 }
 0x362   : > { %2223 = vrot.lane.b32.xlu0 %v2222_v48, %s7427_s22  ;;  %s7429_s22 = smov 98  }
 0x363   : > { %v5394_v43 = vpop.permute.xlu0 %1225 }
 0x366   : > { %2261 = vrot.lane.b32.xlu0 %v2260_v3, %s7429_s22  ;;  %s7432_s22 = smov 69  }
 0x3c0   : > { %v674_v56 = vpop.permute.xlu1 %673 }
 0x3c1   : > { %v676_v57 = vadd.f32 %v674_v56, %v5226_v19  ;;  %v2044_v19 = vrot.slane %v4174_v4, %v5068_v31  ;;  %v1726_v4 = vrot.slane %v5216_v14, 4 }
 0x3c3   : > { %v4147_v58 = vmul.f32 -1.442695, %v676_v57  ;;  %v2049_v6 = vcombine.low %v2044_v19, %v2048_v5 }
 0x3c5   : > { %4556 = vpow2.f32 %v4147_v58  ;;  %2050 = vrot.lane.b32.xlu0 %v2049_v6, %s7430_s30  ;;  %s7458_s30 = smov 60  }
 0x3c9   : > { %1858 = vrot.lane.b32.xlu0 %v1857_v29, %s7432_s22  ;;  %s7449_s22 = smov 28   ;;  %v1304_v29 = vrot.slane %v5390_v40, 4 }
 0x3cd   : > { %1896 = vrot.lane.b32.xlu0 %v1895_v33, %s7431_s13  ;;  %s7439_s13 = smov 108  }
 0x3d2   : > { %v4557_v59 = vpop.eup %4556 }
 0x3d3   : > { %v680_v61 = vadd.f32 1.0, %v4557_v59 }
 0x3d5   : > { %4558 = vrcp.f32 %v680_v61 }
 0x3e2   : > { %v4559_v7 = vpop.eup %4558 }
 0x3e3   : > { %685 = vperm.xlu1 %4548, %v4559_v7   ;;  %v1803_v7 = vrot.slane %v5218_v15, 4 }
 0x45e   : > { %v686_v34 = vpop.permute.xlu1 %685 }
 0x45f   : > { %v5378_v35 = vmul.f32 %v686_v34, %v5036_v10  ;;  %v5381_v36 = vmul.f32 %v686_v34, %v5038_v12  ;;  %v5396_v10 = vpop.permute.xlu0 %1263 }
 0x461   : > { %7734 = vst [vmem:[#allocation30_spill] sm:$0xff] %v5378_v35  ;;  %7735 = vst [vmem:[#allocation31_spill] sm:$0xff] %v5381_v36  ;;  %v696_v38 = vcombine.low %v5378_v35, %v5381_v36  ;;  %v7545_v36 = vrot.slane %v5396_v10, 4 }
 0x463   : > { %697 = vrot.lane.b32.xlu1 %v696_v38, %s7433_s29  ;;  %v5398_v45 = vpop.permute.xlu0 %1052  ;;  %s7507_s29 = smov 92  }
 0x467   : > { %v5402_v56 = vpop.permute.xlu0 %858 }
 0x46b   : > { %v5404_v57 = vpop.permute.xlu0 %897 }
 0x46f   : > { %v5408_v61 = vpop.permute.xlu0 %722 }
 0x473   : > { %v5417_v1 = vpop.permute.xlu0 %760 }
 0x477   : > { %v5426_v19 = vpop.permute.xlu0 %2300 }
 0x478   : > { %v2302_v25 = vrot.slane %v5426_v19, 4 }
 0x47b   : > { %v5437_v11 = vpop.permute.xlu0 %2395 }
 0x4d5   : > { %v698_v12 = vpop.permute.xlu1 %697 }
 0x4d6   : > { %v699_v44 = vrot.slane %v698_v12, 4 }
 0x4d8   : > { %v701_v48 = vsel %vm7658_vm10, %v699_v44, %v698_v12  ;;  %708 = vst.msk [vmem:[#allocation2 + $0x8] sm:$0xf] %vm690_vm2, %v699_v44  ;;  %v1649_v44 = vrot.slane %v5220_v16, 4  ;;  %vm7519_vm2 = vcmask 449536   ;;  %vm7663_vm10 = vcmask 367616  }
 0x4d9   : > { %707 = vst.msk [vmem:[#allocation2] sm:$0xff] %vm706_vm11, %v701_v48  ;;  %v1306_v48 = vsel %vm7596_vm12, %v1304_v29, %v5390_v40  ;;  %vm7590_vm11 = vcmask 408576   ;;  %vm7655_vm12 = vcmask 228352  }
 0x4df   : > { %v2077_v58 = vld [vmem:[#allocation2 + $0x8] sm:$0xf] }
 0x4e0   : > { %v1578_v59 = vld [vmem:[#allocation2 + $0x8] sm:$0xf]  ;;  %2085 = vrot.lane.b32.xlu0 %v2077_v58, %s7443_s26  ;;  %v5410_v62 = vld [vmem:[#allocation2] sm:$0xff]  ;;  %v5452_v58 = vpop.permute.xlu0 %2223 }
 0x4e1   : > { %1586 = vrot.lane.b32.xlu1 %v1578_v59, %s7490_s15  ;;  %v1079_v63 = vld [vmem:[#allocation2 + $0x8] sm:$0xf]  ;;  %v5457_v59 = vmul.f32 %v1306_v48, %v5410_v62  ;;  %v7460_v48 = vrot.slane %v5340_v49, 4 }
 0x4e2   : > { %v1712_v3 = vld [vmem:[#allocation2 + $0x8] sm:$0xf] }
 0x4e3   : > { %v1732_v5 = vmul.f32 %v1726_v4, %v1712_v3  ;;  %v1789_v6 = vld [vmem:[#allocation2 + $0x8] sm:$0xf] }
 0x4e4   : > { %1834 = vrot.lane.b32.xlu0 %v5410_v62, %s7458_s30  ;;  %v2422_v8 = vld [vmem:[#allocation2 + $0x8] sm:$0xf]  ;;  %v1809_v20 = vmul.f32 %v1803_v7, %v1789_v6  ;;  %v1438_v6 = vrot.slane %v5230_v22, 4 }
 0x4e5   : > { %1087 = vrot.lane.b32.xlu1 %v1079_v63, %s7439_s13  ;;  %v2442_v26 = vmul.f32 %v7457_v9, %v2422_v8  ;;  %v2288_v33 = vld [vmem:[#allocation2 + $0x8] sm:$0xf]  ;;  %v7461_v8 = vrot.slane %v5336_v47, 4  ;;  %v7467_v9 = vrot.slane %v5344_v52, 4 }
 0x4e6   : > { %v4551_v34 = vld [vmem:[#allocation2 + $0x8] ss:$0 sps:$4 sm:$0xff]   ;;  %v2308_v12 = vmul.f32 %v2302_v25, %v2288_v33 }
 0x4e7   : > { %v1635_v38 = vld [vmem:[#allocation2 + $0x8] sm:$0xf] }
 0x4e8   : > { %1582 = vrot.lane.b32.xlu0 %v5410_v62, %s7490_s15  ;;  %v1655_v63 = vmul.f32 %v1649_v44, %v1635_v38  ;;  %v1424_v3 = vld [vmem:[#allocation2 + $0x8] sm:$0xf]  ;;  %v1515_v38 = vrot.slane %v5232_v0, 4 }
 0x4e9   : > { %2333 = vrot.lane.b32.xlu1 %v5410_v62, %s7449_s22  ;;  %v2345_v40 = vld [vmem:[#allocation2 + $0x8] sm:$0xf] }
 0x4ea   : > { %v1501_v33 = vld [vmem:[#allocation2 + $0x8] sm:$0xf] }
 0x4ec   : > { %1335 = vrot.lane.b32.xlu0 %v5410_v62, %s7507_s29 }
 0x4ed   : > { %2081 = vrot.lane.b32.xlu1 %v5410_v62, %s7443_s26  ;;  %s7451_s26 = smov 89  }
 0x4f0   : > { %1083 = vrot.lane.b32.xlu0 %v5410_v62, %s7439_s13  ;;  %s7445_s13 = smov 29  }
 0x4f1   : > { %1740 = vrot.lane.b32.xlu1 %v1732_v5, %s7486_s14  ;;  %v4552_v5 = vld [vmem:[#allocation2 + $0x8] ss:$0 sps:$4 sm:$0xff]  }
 0x4f4   : > { %833 = vrot.lane.b32.xlu0 %v5410_v62, %s7511_s25 }
 0x4f5   : > { %1817 = vrot.lane.b32.xlu1 %v1809_v20, %s7492_s16  ;;  %v5465_v20 = vpop.permute.xlu0 %2261 }
 0x4f8   : > { %2450 = vrot.lane.b32.xlu0 %v2442_v26, %s7441_s12  ;;  %s7503_s12 = smov 74   ;;  %v1444_v26 = vmul.f32 %v1438_v6, %v1424_v3  ;;  %v7464_v3 = vrot.slane %v5452_v58, 4 }
 0x4f9   : > { %1836 = vrot.lane.b32.xlu1 %v4551_v34, %s7458_s30  ;;  %v2365_v34 = vmul.f32 %v7461_v8, %v2345_v40  ;;  %v5480_v27 = vpop.permute.xlu0 %2050  ;;  %s7465_s30 = smov 31   ;;  %v1347_v8 = vld [vmem:[#allocation2 + $0x8] sm:$0xf] }
 0x4fa   : > { %v7566_v28 = vrot.slane %v5480_v27, 4 }
 0x4fc   : > { %2316 = vrot.lane.b32.xlu0 %v2308_v12, %s7445_s13  ;;  %v2134_v12 = vld [vmem:[#allocation2 + $0x8] sm:$0xf]  ;;  %s7455_s13 = smov 27  }
 0x4fd   : > { %1663 = vrot.lane.b32.xlu1 %v1655_v63, %s7503_s12  ;;  %v1521_v63 = vmul.f32 %v1515_v38, %v1501_v33  ;;  %v2154_v40 = vmul.f32 %v7460_v48, %v2134_v12  ;;  %v2000_v33 = vld [vmem:[#allocation2 + $0x8] sm:$0xf]  ;;  %v5489_v12 = vpop.permute.xlu0 %1858 }
 0x4fe   : > { %v7470_v48 = vrot.slane %v5489_v12, 4 }
 0x500   : > { %2335 = vrot.lane.b32.xlu0 %v4552_v5, %s7449_s22  ;;  %v1290_v5 = vld [vmem:[#allocation2 + $0x8] sm:$0xf]  ;;  %s7515_s22 = smov 78  }
 0x501   : > { %1452 = vrot.lane.b32.xlu1 %v1444_v26, %s7451_s26  ;;  %v2211_v26 = vld [vmem:[#allocation2 + $0x8] sm:$0xf]  ;;  %s7462_s26 = smov 42   ;;  %v1310_v21 = vmul.f32 %v1304_v29, %v1290_v5  ;;  %v2020_v29 = vmul.f32 %v7467_v9, %v2000_v33  ;;  %v1361_v5 = vrot.slane %v5236_v24, 4  ;;  %v7475_v9 = vrot.slane %v5348_v54, 4 }
 0x502   : > { %v1923_v33 = vld [vmem:[#allocation2 + $0x8] sm:$0xf] }
 0x504   : > { %2373 = vrot.lane.b32.xlu0 %v2365_v34, %s7455_s13  ;;  %v2231_v34 = vmul.f32 %v7464_v3, %v2211_v26  ;;  %s7468_s13 = smov 93   ;;  %v1136_v26 = vld [vmem:[#allocation2 + $0x8] sm:$0xf]  ;;  %v7528_v3 = vrot.slane %v5251_v37, 4 }
 0x505   : > { %1529 = vrot.lane.b32.xlu1 %v1521_v63, %s7515_s22  ;;  %v4553_v63 = vld [vmem:[#allocation2 + $0x8] ss:$0 sps:$4 sm:$0xff]  }
 0x508   : > { %2162 = vrot.lane.b32.xlu0 %v2154_v40, %s7462_s26  ;;  %s7471_s26 = smov 46   ;;  %v1367_v40 = vmul.f32 %v1361_v5, %v1347_v8  ;;  %v1156_v8 = vmul.f32 %v7528_v3, %v1136_v26 }
 0x509   : > { %1318 = vrot.lane.b32.xlu1 %v1310_v21, %s7468_s13  ;;  %v1846_v21 = vld [vmem:[#allocation2 + $0x8] sm:$0xf]  ;;  %s7476_s13 = smov 59  }
 0x50c   : > { %2239 = vrot.lane.b32.xlu0 %v2231_v34, %s7465_s30  ;;  %v1866_v34 = vmul.f32 %v7470_v48, %v1846_v21  ;;  %s7473_s30 = smov 91   ;;  %v1943_v21 = vmul.f32 %v7475_v9, %v1923_v33  ;;  %v7526_v48 = vrot.slane %v5394_v43, 4  ;;  %v7485_v9 = vrot.slane %v5273_v51, 4 }
 0x50d   : > { %1337 = vrot.lane.b32.xlu1 %v4553_v63, %s7507_s29  ;;  %v7480_v63 = vrot.slane %v5386_v32, 4 }
 0x510   : > { %2028 = vrot.lane.b32.xlu0 %v2020_v29, %s7471_s26  ;;  %v1213_v29 = vld [vmem:[#allocation2 + $0x8] sm:$0xf]  ;;  %s7478_s26 = smov 106  }
 0x511   : > { %1375 = vrot.lane.b32.xlu1 %v1367_v40, %s7473_s30  ;;  %s7481_s30 = smov 57   ;;  %v1766_v40 = vsel %vm7512_vm13, %v7480_v63, %v5386_v32  ;;  %v1233_v26 = vmul.f32 %v7526_v48, %v1213_v29  ;;  %v7489_v29 = vrot.slane %v5402_v56, 4  ;;  %vm7525_vm13 = vcmask 826368  }
 0x512   : > { %v5520_v33 = vmul.f32 %v1766_v40, %v5410_v62  ;;  %v845_v40 = vld [vmem:[#allocation2 + $0x8] sm:$0xf] }
 0x514   : > { %1874 = vrot.lane.b32.xlu0 %v1866_v34, %s7476_s13  ;;  %v1002_v34 = vld [vmem:[#allocation2 + $0x8] sm:$0xf]  ;;  %s7580_s13 = smov 95  }
 0x515   : > { %1164 = vrot.lane.b32.xlu1 %v1156_v8, %s7478_s26  ;;  %s7483_s26 = smov 62   ;;  %v1728_v8 = vsel %vm7544_vm14, %v1726_v4, %v5216_v14  ;;  %v1805_v14 = vsel %vm7518_vm15, %v1803_v7, %v5218_v15  ;;  %v866_v4 = vmul.f32 %v7489_v29, %v845_v40  ;;  %v5558_v7 = vcombine.high %v5410_v62, %v5410_v62  ;;  %v710_v40 = vld [vmem:[#allocation2 + $0x8] sm:$0xf] }
 0x516   : > { %v5534_v63 = vmul.f32 %v1728_v8, %v5410_v62  ;;  %v7488_v8 = vrot.slane %v5295_v2, 4  ;;  %vm7597_vm15 = vcmask 302080   ;;  %vm7641_vm14 = vcmask 179200  }
 0x518   : > { %1951 = vrot.lane.b32.xlu0 %v1943_v21, %s7481_s30  ;;  %v1022_v21 = vmul.f32 %v7485_v9, %v1002_v34  ;;  %s7569_s30 = smov 110   ;;  %v5546_v34 = vmul.f32 %v1805_v14, %v5410_v62  ;;  %v7496_v9 = vrot.slane %v5408_v61, 4 }
 0x519   : > { %1241 = vrot.lane.b32.xlu1 %v1233_v26, %s7580_s13  ;;  %v924_v26 = vld [vmem:[#allocation2 + $0x8] sm:$0xf] }
 0x51a   : > { %v945_v15 = vmul.f32 %v7488_v8, %v924_v26  ;;  %v729_v26 = vmul.f32 %v7496_v9, %v710_v40  ;;  %v787_v8 = vld [vmem:[#allocation2 + $0x8] sm:$0xf]  ;;  %v7508_v9 = vrot.slane %v5388_v39, 4 }
 0x51c   : > { %1777 = vrot.lane.b32.xlu0 %v5520_v33, %s7483_s26  ;;  %s7564_s26 = smov 123  }
 0x51d   : > { %1030 = vrot.lane.b32.xlu1 %v1022_v21, %s7569_s30  ;;  %v7491_v21 = vrot.slane %v5222_v17, 4  ;;  %s7573_s30 = smov 45  }
 0x51f   : > { %v1612_v14 = vsel %vm7537_vm1, %v7491_v21, %v5222_v17  ;;  %vm7558_vm1 = vcmask 793600  }
 0x520   : > { %1736 = vrot.lane.b32.xlu0 %v5534_v63, %s7486_s14  ;;  %s7533_s14 = smov 121   ;;  %v5571_v29 = vmul.f32 %v1612_v14, %v5410_v62 }
 0x521   : > { %874 = vrot.lane.b32.xlu1 %v866_v4, %s7564_s26  ;;  %v7497_v4 = vrot.slane %v5224_v18, 4  ;;  %s7758_s26 = smov 106  }
 0x523   : > { %v1689_v21 = vsel %vm7519_vm2, %v7497_v4, %v5224_v18  ;;  %v4554_v4 = vld [vmem:[#allocation2 + $0x8] ss:$0 sps:$4 sm:$0xff]   ;;  %vm7535_vm2 = vcmask 801792  }
 0x524   : > { %1813 = vrot.lane.b32.xlu0 %v5546_v34, %s7492_s16  ;;  %v5584_v14 = vmul.f32 %v1689_v21, %v5410_v62  ;;  %s7498_s16 = smov 125   ;;  %v7505_v21 = vrot.slane %v5234_v23, 4 }
 0x525   : > { %953 = vrot.lane.b32.xlu1 %v945_v15, %s7533_s14  ;;  %v7502_v15 = vrot.slane %v5317_v30, 4  ;;  %s7746_s14 = smov 91  }
 0x527   : > { %v808_v40 = vmul.f32 %v7502_v15, %v787_v8 }
 0x528   : > { %1584 = vrot.lane.b32.xlu0 %v5558_v7, %s7490_s15  ;;  %s7541_s15 = smov 75  }
 0x529   : > { %737 = vrot.lane.b32.xlu1 %v729_v26, %s7494_s24  ;;  %s7500_s24 = smov 73   ;;  %v1651_v26 = vsel %vm7563_vm3, %v1649_v44, %v5220_v16  ;;  %v5607_v16 = vcombine.low %v5410_v62, %v5410_v62  ;;  %vm7648_vm3 = vcmask 154624  }
 0x52a   : > { %v5595_v8 = vmul.f32 %v1651_v26, %v5410_v62  ;;  %v7510_v26 = vrot.slane %v5437_v11, 4 }
 0x52c   : > { %1623 = vrot.lane.b32.xlu0 %v5571_v29, %s7541_s15  ;;  %s7556_s15 = smov 105  }
 0x52d   : > { %816 = vrot.lane.b32.xlu1 %v808_v40, %s7498_s16  ;;  %v1478_v40 = vsel %vm7577_vm4, %v7508_v9, %v5388_v39  ;;  %s7736_s16 = smov 60   ;;  %vm7646_vm4 = vcmask 171008  }
 0x52e   : > { %v5610_v44 = vmul.f32 %v1478_v40, %v5410_v62  ;;  %v1440_v40 = vsel %vm7593_vm8, %v1438_v6, %v5230_v22  ;;  %v1517_v22 = vsel %vm7590_vm11, %v1515_v38, %v5232_v0  ;;  %v7524_v6 = vrot.slane %v5392_v41, 4 }
 0x52f   : > { %vm7647_vm11 = vcmask 48128   ;;  %vm7610_vm8 = vcmask 564224  }
 0x530   : > { %1700 = vrot.lane.b32.xlu0 %v5584_v14, %s7500_s24  ;;  %s7522_s24 = smov 79  }
 0x531   : > { %835 = vrot.lane.b32.xlu1 %v4554_v4, %s7511_s25  ;;  %v1555_v4 = vsel %vm7575_vm7, %v7505_v21, %v5234_v23  ;;  %v5637_v21 = vmul.f32 %v1440_v40, %v5410_v62  ;;  %v2304_v40 = vsel %vm7517_vm6, %v2302_v25, %v5426_v19  ;;  %v7741_v25 = vrot.slane %v5336_v47, 4 }
 0x532   : > { %v5622_v15 = vmul.f32 %v1555_v4, %v5410_v62  ;;  %v2399_v4 = vsel %vm7509_vm9, %v7510_v26, %v5437_v11  ;;  %vm7579_vm9 = vcmask 310272   ;;  %v5656_v26 = vmul.f32 %v1517_v22, %v5410_v62 }
 0x533   : > { %v5649_v9 = vmul.f32 %v2399_v4, %v5410_v62  ;;  %v1401_v0 = vsel %vm7579_vm9, %v7524_v6, %v5392_v41  ;;  %v5667_v38 = vmul.f32 %v2304_v40, %v5410_v62  ;;  %v2361_v4 = vsel %vm7525_vm13, %v7741_v25, %v5336_v47 }
 0x534   : > { %1659 = vrot.lane.b32.xlu0 %v5595_v8, %s7503_s12  ;;  %s7513_s12 = smov 77   ;;  %v5670_v19 = vmul.f32 %v1401_v0, %v5410_v62  ;;  %v7527_v22 = vrot.slane %v5342_v50, 4  ;;  %vm7532_vm6 = vcmask 711680   ;;  %v5682_v40 = vmul.f32 %v2361_v4, %v5410_v62 }
 0x535   : > { %1832 = vrot.lane.b32.xlu1 %v5607_v16, %s7736_s16  ;;  %7738 = vst [vmem:[#allocation32_spill] sm:$0xff] %v5649_v9  ;;  %7739 = vst [vmem:[#allocation33_spill] sm:$0xff] %v5667_v38  ;;  %v7536_v0 = vrot.slane %v5465_v20, 4  ;;  %v1363_v25 = vsel %vm7597_vm15, %v1361_v5, %v5236_v24  ;;  %v7540_v4 = vrot.slane %v5265_v46, 4  ;;  %vm7619_vm13 = vcmask 187392   ;;  %s7835_s16 = smov 107  }
 0x536   : > { %7742 = vst [vmem:[#allocation34_spill] sm:$0xff] %v5682_v40  ;;  %v2188_v47 = vsel %vm7532_vm6, %v7527_v22, %v5342_v50  ;;  %v5705_v22 = vpop.permute.xlu0 %1896  ;;  %v5708_v3 = vmul.f32 %v1363_v25, %v5410_v62  ;;  %vm7612_vm6 = vcmask 277504   ;;  %vm7589_vm7 = vcmask 670720  }
 0x537   : > { %v5699_v6 = vmul.f32 %v2188_v47, %v5410_v62  ;;  %v2265_v48 = vsel %vm7535_vm2, %v7536_v0, %v5465_v20  ;;  %v1190_v24 = vsel %vm7619_vm13, %v7540_v4, %v5265_v46  ;;  %vm7553_vm2 = vcmask 703488  }
 0x538   : > { %1489 = vrot.lane.b32.xlu0 %v5610_v44, %s7522_s24  ;;  %s7744_s24 = smov 93   ;;  %v5720_v5 = vmul.f32 %v2265_v48, %v5410_v62  ;;  %v5723_v47 = vmul.f32 %v1190_v24, %v5410_v62  ;;  %v1267_v0 = vsel %vm7612_vm6, %v7545_v36, %v5396_v10  ;;  %v7749_v48 = vrot.slane %v5340_v49, 4 }
 0x539   : > { %1333 = vrot.lane.b32.xlu1 %v5607_v16, %s7507_s29  ;;  %s7737_s29 = smov 89   ;;  %7745 = vst [vmem:[#allocation35_spill] sm:$0xff] %v5699_v6  ;;  %v7751_v36 = vrot.slane %v5452_v58, 4  ;;  %v5750_v54 = vmul.f32 %v1267_v0, %v5410_v62  ;;  %vm7591_vm9 = vcmask 572416   ;;  %vm7654_vm15 = vcmask 138240  }
 0x53a   : > { %7747 = vst [vmem:[#allocation36_spill] sm:$0xff] %v5720_v5  ;;  %v2150_v24 = vsel %vm7553_vm2, %v7749_v48, %v5340_v49  ;;  %vm7572_vm2 = vcmask 678912   ;;  %vm7656_vm6 = vcmask 15360   ;;  %vm7657_vm13 = vcmask 23552  }
 0x53b   : > { %v5742_v35 = vmul.f32 %v2150_v24, %v5410_v62  ;;  %v2227_v31 = vsel %vm7558_vm1, %v7751_v36, %v5452_v58  ;;  %v7754_v36 = vrot.slane %v5251_v37, 4  ;;  %vm7615_vm1 = vcmask 269312  }
 0x53c   : > { %1566 = vrot.lane.b32.xlu0 %v5622_v15, %s7513_s12  ;;  %s7740_s12 = smov 29   ;;  %v5765_v0 = vmul.f32 %v2227_v31, %v5410_v62  ;;  %v2054_v48 = vsel %vm7572_vm2, %v7566_v28, %v5480_v27  ;;  %v7759_v31 = vrot.slane %v5394_v43, 4  ;;  %vm7585_vm2 = vcmask 695296  }
 0x53d   : > { %831 = vrot.lane.b32.xlu1 %v5607_v16, %s7511_s25  ;;  %s7520_s25 = smov 26   ;;  %7750 = vst [vmem:[#allocation38_spill] sm:$0xff] %v5742_v35  ;;  %v1152_v58 = vsel %vm7641_vm14, %v7754_v36, %v5251_v37  ;;  %vm7643_vm14 = vcmask 580608  }
 0x53e   : > { %7755 = vst [vmem:[#allocation40_spill] sm:$0xff] %v5765_v0  ;;  %v5772_v24 = vmul.f32 %v1152_v58, %v5410_v62  ;;  %v1229_v36 = vsel %vm7615_vm1, %v7759_v31, %v5394_v43  ;;  %v5788_v58 = vmul.f32 %v2054_v48, %v5410_v62  ;;  %v7582_v43 = vrot.slane %v5346_v53, 4 }
 0x53f   : > { %v5791_v28 = vmul.f32 %v1229_v36, %v5410_v62  ;;  %vm7637_vm1 = vcmask 752640  }
 0x540   : > { %1448 = vrot.lane.b32.xlu0 %v5637_v21, %s7737_s29  ;;  %7760 = vst [vmem:[#allocation42_spill] sm:$0xff] %v5788_v58 }
 0x541   : > { %2410 = vrot.lane.b32.xlu1 %v5649_v9, %s7520_s25  ;;  %s7743_s25 = smov 27  }
 0x544   : > { %1525 = vrot.lane.b32.xlu0 %v5656_v26, %s7515_s22  ;;  %s7530_s22 = smov 90  }
 0x545   : > { %2312 = vrot.lane.b32.xlu1 %v5667_v38, %s7740_s12 }
 0x548   : > { %1412 = vrot.lane.b32.xlu0 %v5670_v19, %s7530_s22  ;;  %s7538_s22 = smov 41  }
 0x549   : > { %2369 = vrot.lane.b32.xlu1 %v5682_v40, %s7743_s25 }
 0x54c   : > { %1314 = vrot.lane.b32.xlu0 %v5457_v59, %s7744_s24 }
 0x54d   : > { %2199 = vrot.lane.b32.xlu1 %v5699_v6, %s7538_s22  ;;  %s7554_s22 = smov 30  }
 0x550   : > { %1371 = vrot.lane.b32.xlu0 %v5708_v3, %s7746_s14 }
 0x551   : > { %2276 = vrot.lane.b32.xlu1 %v5720_v5, %s7554_s22  ;;  %s7752_s22 = smov 42  }
 0x552   : > { %v5725_v25 = vpop.permute.xlu0 %2085 }
 0x553   : > { %7748 = vst [vmem:[#allocation37_spill] sm:$0xff] %v5725_v25  ;;  %v5733_v4 = vpop.permute.xlu1 %1586 }
 0x554   : > { %1201 = vrot.lane.b32.xlu0 %v5723_v47, %s7556_s15  ;;  %s7561_s15 = smov 94  }
 0x555   : > { %2158 = vrot.lane.b32.xlu1 %v5742_v35, %s7752_s22 }
 0x556   : > { %v5752_v5 = vpop.permute.xlu0 %1834 }
 0x557   : > { %v5756_v49 = vpop.permute.xlu1 %1087 }
 0x558   : > { %7753 = vst [vmem:[#allocation39_spill] sm:$0xff] %v5756_v49  ;;  %1278 = vrot.lane.b32.xlu0 %v5750_v54, %s7561_s15  ;;  %s7756_s15 = smov 31  }
 0x559   : > { %2235 = vrot.lane.b32.xlu1 %v5765_v0, %s7756_s15  ;;  %v7761_v0 = vrot.slane %v5398_v45, 4 }
 0x55a   : > { %v5774_v6 = vpop.permute.xlu0 %1582 }
 0x55b   : > { %v5779_v37 = vpop.permute.xlu1 %2333  ;;  %v1056_v9 = vsel %vm7648_vm3, %v7761_v0, %v5398_v45  ;;  %v2111_v0 = vsel %vm7585_vm2, %v7582_v43, %v5346_v53  ;;  %v7767_v43 = vrot.slane %v5344_v52, 4  ;;  %vm7653_vm2 = vcmask 146432  }
 0x55c   : > { %7757 = vst [vmem:[#allocation41_spill] sm:$0xff] %v5779_v37  ;;  %1160 = vrot.lane.b32.xlu0 %v5772_v24, %s7758_s26  ;;  %v5807_v48 = vmul.f32 %v1056_v9, %v5410_v62  ;;  %v5821_v9 = vmul.f32 %v2111_v0, %v5410_v62  ;;  %v7769_v0 = vrot.slane %v5287_v60, 4  ;;  %vm1205_vm3 = vcmask 859136  }
 0x55d   : > { %2065 = vrot.lane.b32.xlu1 %v5788_v58, %s7573_s30  ;;  %s7583_s30 = smov 109   ;;  %v2016_v36 = vsel %vm7589_vm7, %v7767_v43, %v5344_v52  ;;  %v7772_v52 = vrot.slane %v5705_v22, 4  ;;  %vm7636_vm7 = vcmask 490496  }
 0x55e   : > { %v5793_v35 = vpop.permute.xlu0 %1335  ;;  %7765 = vst [vmem:[#allocation45_spill] sm:$0xff] %v5821_v9  ;;  %v1113_v38 = vsel %vm7646_vm4, %v7769_v0, %v5287_v60  ;;  %vm7673_vm4 = vcmask 736256  }
 0x55f   : > { %v5801_v40 = vpop.permute.xlu1 %2081  ;;  %v1900_v43 = vsel %vm7591_vm9, %v7772_v52, %v5705_v22  ;;  %vm7601_vm9 = vcmask 662528  }
 0x560   : > { %7762 = vst [vmem:[#allocation43_spill] sm:$0xff] %v5801_v40  ;;  %1237 = vrot.lane.b32.xlu0 %v5791_v28, %s7580_s13  ;;  %s7587_s13 = smov 43   ;;  %v5865_v52 = vmul.f32 %v1900_v43, %v5410_v62 }
 0x561   : > { %2083 = vrot.lane.b32.xlu1 %v5558_v7, %s7764_s0  ;;  %s7832_s0 = smov 41  }
 0x562   : > { %v5809_v31 = vpop.permute.xlu0 %1083  ;;  %7776 = vst [vmem:[#allocation50_spill] sm:$0xff] %v5865_v52 }
 0x563   : > { %7763 = vst [vmem:[#allocation44_spill] sm:$0xff] %v5809_v31  ;;  %v5823_v58 = vpop.permute.xlu1 %1740 }
 0x564   : > { %1067 = vrot.lane.b32.xlu0 %v5807_v48, %s7583_s30  ;;  %7766 = vst [vmem:[#allocation46_spill] sm:$0xff] %v5823_v58  ;;  %s7768_s30 = smov 108   ;;  %v5841_v58 = vmul.f32 %v2016_v36, %v5410_v62 }
 0x565   : > { %2122 = vrot.lane.b32.xlu1 %v5821_v9, %s7587_s13  ;;  %v5846_v9 = vmul.f32 %v1113_v38, %v5410_v62  ;;  %s7774_s13 = smov 46   ;;  %v7775_v38 = vrot.slane %v5273_v51, 4 }
 0x566   : > { %v5826_v49 = vpop.permute.xlu0 %833  ;;  %7770 = vst [vmem:[#allocation47_spill] sm:$0xff] %v5841_v58 }
 0x567   : > { %v5843_v31 = vpop.permute.xlu1 %1817  ;;  %v1018_v0 = vsel %vm7653_vm2, %v7775_v38, %v5273_v51  ;;  %v7780_v51 = vrot.slane %v5350_v55, 4  ;;  %vm7662_vm2 = vcmask 211968  }
 0x568   : > { %1085 = vrot.lane.b32.xlu0 %v5558_v7, %s7768_s30  ;;  %7771 = vst [vmem:[#allocation48_spill] sm:$0xff] %v5843_v31  ;;  %s7836_s30 = smov 30  }
 0x569   : > { %2024 = vrot.lane.b32.xlu1 %v5841_v58, %s7774_s13  ;;  %v7779_v58 = vrot.slane %v5404_v57, 4  ;;  %v1977_v43 = vsel %vm7601_vm9, %v7780_v51, %v5350_v55  ;;  %vm7652_vm9 = vcmask 39936   ;;  %s7844_s13 = smov 43  }
 0x56a   : > { %v5852_v7 = vpop.permute.xlu0 %2450  ;;  %v5888_v38 = vmul.f32 %v1977_v43, %v5410_v62 }
 0x56b   : > { %7773 = vst [vmem:[#allocation49_spill] sm:$0xff] %v5852_v7  ;;  %v1837_v25 = vpop.permute.xlu1 %1836  ;;  %v5868_v7 = vmul.f32 %v1018_v0, %v5410_v62  ;;  %v901_v40 = vsel %vm7647_vm11, %v7779_v58, %v5404_v57  ;;  %vm2552_vm11 = vcmask 556032  }
 0x56c   : > { %1124 = vrot.lane.b32.xlu0 %v5846_v9, %s7594_s1  ;;  %v1840_v36 = vsel %vm7636_vm7, %v5752_v5, %v1837_v25  ;;  %s7599_s1 = smov 58   ;;  %v7611_v25 = vrot.slane %v5309_v13, 4  ;;  %7782 = vst [vmem:[#allocation53_spill] sm:$0xff] %v5888_v38  ;;  %v5893_v0 = vmul.f32 %v901_v40, %v5410_v62 }
 0x56d   : > { %7777 = vst [vmem:[#allocation51_spill] sm:$0xff] %v5868_v7  ;;  %1844 = vst [vmem:[#allocation4 + $0x140] sm:$0xf0] %v1840_v36  ;;  %1911 = vrot.lane.b32.xlu1 %v5865_v52, %s7599_s1  ;;  %v1750_v36 = vld [vmem:[#allocation2 + $0x8] sm:$0xf]  ;;  %s7606_s1 = smov 47  }
 0x56e   : > { %v5872_v31 = vpop.permute.xlu0 %2316  ;;  %7784 = vst [vmem:[#allocation55_spill] sm:$0xff] %v5893_v0  ;;  %v979_v40 = vsel %vm7654_vm15, %v7611_v25, %v5309_v13  ;;  %vm1071_vm15 = vcmask 891904  }
 0x56f   : > { %7778 = vst [vmem:[#allocation52_spill] sm:$0xff] %v5872_v31  ;;  %v5890_v58 = vpop.permute.xlu1 %1663  ;;  %v7785_v31 = vrot.slane %v5489_v12, 4 }
 0x570   : > { %1026 = vrot.lane.b32.xlu0 %v5868_v7, %s7781_s2  ;;  %7783 = vst [vmem:[#allocation54_spill] sm:$0xff] %v5890_v58  ;;  %v7789_v7 = vrot.slane %v5402_v56, 4 }
 0x571   : > { %v1862_v51 = vsel %vm7610_vm8, %v7785_v31, %v5489_v12  ;;  %1988 = vrot.lane.b32.xlu1 %v5888_v38, %s7606_s1  ;;  %v7786_v12 = vrot.slane %v5386_v32, 4  ;;  %s7790_s1 = smov 59   ;;  %v7791_v32 = vrot.slane %v5222_v17, 4  ;;  %vm7642_vm8 = vcmask 56320  }
 0x572   : > { %v2336_v52 = vpop.permute.xlu0 %2335  ;;  %v5912_v58 = vmul.f32 %v1862_v51, %v5410_v62  ;;  %v7796_v17 = vrot.slane %v5295_v2, 4 }
 0x573   : > { %v2339_v43 = vsel %vm7655_vm12, %v5779_v37, %v2336_v52  ;;  %v1770_v31 = vmul.f32 %v7786_v12, %v1750_v36  ;;  %v5914_v38 = vpop.permute.xlu1 %1452  ;;  %v1596_v52 = vld [vmem:[#allocation2 + $0x8] sm:$0xf] }
 0x574   : > { %2343 = vst [vmem:[#allocation4 + $0x80] sm:$0xf0] %v2339_v43  ;;  %912 = vrot.lane.b32.xlu0 %v5893_v0, %s7608_s3  ;;  %7787 = vst [vmem:[#allocation56_spill] sm:$0xff] %v5914_v38  ;;  %v5917_v43 = vmul.f32 %v979_v40, %v5410_v62  ;;  %v862_v0 = vsel %vm7652_vm9, %v7789_v7, %v5402_v56  ;;  %s7613_s3 = smov 111   ;;  %v1616_v36 = vmul.f32 %v7791_v32, %v1596_v52  ;;  %v1673_v12 = vld [vmem:[#allocation2 + $0x8] sm:$0xf] }
 0x575   : > { %1870 = vrot.lane.b32.xlu1 %v5912_v58, %s7790_s1  ;;  %v1774_v51 = vcombine.low %v1770_v31, %v1770_v31  ;;  %v5934_v25 = vmul.f32 %v862_v0, %v5410_v62  ;;  %v941_v7 = vsel %vm7642_vm8, %v7796_v17, %v5295_v2  ;;  %v7797_v31 = vrot.slane %v5224_v18, 4  ;;  %v1539_v17 = vld [vmem:[#allocation2 + $0x8] sm:$0xf]  ;;  %s7843_s1 = smov 111  }
 0x576   : > { %v5919_v37 = vpop.permute.xlu0 %2373  ;;  %v1620_v0 = vcombine.low %v1616_v36, %v1616_v36  ;;  %v5951_v56 = vmul.f32 %v941_v7, %v5410_v62  ;;  %v7802_v18 = vrot.slane %v5388_v39, 4  ;;  %v7806_v39 = vrot.slane %v5234_v23, 4 }
 0x577   : > { %7788 = vst [vmem:[#allocation57_spill] sm:$0xff] %v5919_v37  ;;  %v5931_v40 = vpop.permute.xlu1 %1529  ;;  %v1693_v52 = vmul.f32 %v7797_v31, %v1673_v12  ;;  %vm7672_vm8 = vcmask 646144   ;;  %vm7677_vm9 = vcmask 769024  }
 0x578   : > { %990 = vrot.lane.b32.xlu0 %v5917_v43, %s7613_s3  ;;  %7792 = vst [vmem:[#allocation58_spill] sm:$0xff] %v5931_v40  ;;  %v7799_v40 = vrot.slane %v5417_v1, 4  ;;  %s7800_s3 = smov 75  }
 0x579   : > { %1779 = vrot.lane.b32.xlu1 %v1774_v51, %s7794_s4  ;;  %v1697_v36 = vcombine.low %v1693_v52, %v1693_v52 }
 0x57a   : > { %v5936_v37 = vpop.permute.xlu0 %2162  ;;  %v764_v38 = vsel %vm7656_vm6, %v7799_v40, %v5417_v1  ;;  %v7804_v40 = vrot.slane %v5408_v61, 4  ;;  %vm7661_vm6 = vcmask 244736  }
 0x57b   : > { %7793 = vst [vmem:[#allocation59_spill] sm:$0xff] %v5936_v37  ;;  %v5948_v32 = vpop.permute.xlu1 %1318  ;;  %v1462_v37 = vld [vmem:[#allocation2 + $0x8] sm:$0xf]  ;;  %v5965_v7 = vmul.f32 %v764_v38, %v5410_v62 }
 0x57c   : > { %870 = vrot.lane.b32.xlu0 %v5934_v25, %s7795_s5  ;;  %v1482_v2 = vmul.f32 %v7802_v18, %v1462_v37  ;;  %v1559_v37 = vmul.f32 %v7806_v39, %v1539_v17  ;;  %v1385_v18 = vld [vmem:[#allocation2 + $0x8] sm:$0xf] }
 0x57d   : > { %1625 = vrot.lane.b32.xlu1 %v1620_v0, %s7800_s3  ;;  %v725_v0 = vsel %vm7622_vm5, %v7804_v40, %v5408_v61  ;;  %v7810_v61 = vrot.slane %v5317_v30, 4  ;;  %vm7632_vm5 = vcmask 842752   ;;  %v1174_v40 = vld [vmem:[#allocation2 + $0x8] sm:$0xf] }
 0x57e   : > { %v5953_v51 = vpop.permute.xlu0 %2239  ;;  %v1486_v38 = vcombine.low %v1482_v2, %v1482_v2  ;;  %v7811_v2 = vrot.slane %v5392_v41, 4  ;;  %v1563_v17 = vcombine.low %v1559_v37, %v1559_v37  ;;  %v7816_v37 = vrot.slane %v5265_v46, 4 }
 0x57f   : > { %7798 = vst [vmem:[#allocation60_spill] sm:$0xff] %v5953_v51  ;;  %v1338_v12 = vpop.permute.xlu1 %1337  ;;  %v804_v23 = vsel %vm7657_vm13, %v7810_v61, %v5317_v30  ;;  %v7815_v30 = vrot.slane %v5331_v42, 4  ;;  %vm916_vm13 = vcmask 998400  }
 0x580   : > { %949 = vrot.lane.b32.xlu0 %v5951_v56, %s7801_s8  ;;  %v1341_v31 = vsel %vm7637_vm1, %v5793_v35, %v1338_v12  ;;  %v5983_v12 = vmul.f32 %v725_v0, %v5410_v62  ;;  %v5999_v0 = vmul.f32 %v804_v23, %v5410_v62  ;;  %v1251_v23 = vld [vmem:[#allocation2 + $0x8] sm:$0xf] }
 0x581   : > { %1345 = vst [vmem:[#allocation4 + $0x130] sm:$0xf0] %v1341_v31  ;;  %1702 = vrot.lane.b32.xlu1 %v1697_v36, %s7805_s19  ;;  %v1405_v36 = vmul.f32 %v7811_v2, %v1385_v18  ;;  %v2438_v41 = vsel %vm7632_vm5, %v7815_v30, %v5331_v42  ;;  %v7820_v42 = vrot.slane %v5396_v10, 4  ;;  %vm7634_vm5 = vcmask 621568  }
 0x582   : > { %v5969_v51 = vpop.permute.xlu0 %2028  ;;  %v6015_v2 = vmul.f32 %v2438_v41, %v5410_v62  ;;  %v2172_v41 = vld [vmem:[#allocation2 + $0x8] sm:$0xf] }
 0x583   : > { %7803 = vst [vmem:[#allocation61_spill] sm:$0xff] %v5969_v51  ;;  %v5980_v52 = vpop.permute.xlu1 %1375  ;;  %v1409_v18 = vcombine.low %v1405_v36, %v1405_v36  ;;  %v1271_v30 = vmul.f32 %v7820_v42, %v1251_v23  ;;  %v1040_v36 = vld [vmem:[#allocation2 + $0x8] sm:$0xf]  ;;  %v7826_v42 = vrot.slane %v5342_v50, 4 }
 0x584   : > { %775 = vrot.lane.b32.xlu0 %v5965_v7, %s7623_s23  ;;  %s7813_s23 = smov 77  }
 0x585   : > { %1491 = vrot.lane.b32.xlu1 %v1486_v38, %s7808_s28  ;;  %v1194_v38 = vmul.f32 %v7816_v37, %v1174_v40  ;;  %v7822_v37 = vrot.slane %v5437_v11, 4  ;;  %v1275_v10 = vcombine.low %v1271_v30, %v1271_v30 }
 0x586   : > { %v5985_v51 = vpop.permute.xlu0 %1874 }
 0x587   : > { %7807 = vst [vmem:[#allocation62_spill] sm:$0xff] %v5985_v51  ;;  %v5996_v31 = vpop.permute.xlu1 %1164  ;;  %v1198_v46 = vcombine.low %v1194_v38, %v1194_v38  ;;  %v1097_v38 = vld [vmem:[#allocation2 + $0x8] sm:$0xf] }
 0x588   : > { %733 = vrot.lane.b32.xlu0 %v5983_v12, %s7809_s17 }
 0x589   : > { %1568 = vrot.lane.b32.xlu1 %v1563_v17, %s7813_s23  ;;  %v2383_v17 = vld [vmem:[#allocation2 + $0x8] sm:$0xf] }
 0x58a   : > { %v6001_v39 = vpop.permute.xlu0 %1951  ;;  %v2403_v51 = vmul.f32 %v7822_v37, %v2383_v17  ;;  %v2249_v37 = vld [vmem:[#allocation2 + $0x8] sm:$0xf] }
 0x58b   : > { %7812 = vst [vmem:[#allocation63_spill] sm:$0xff] %v6001_v39  ;;  %v6012_v61 = vpop.permute.xlu1 %1241 }
 0x58c   : > { %812 = vrot.lane.b32.xlu0 %v5999_v0, %s7814_s20  ;;  %7817 = vst [vmem:[#allocation64_spill] sm:$0xff] %v6012_v61  ;;  %v2407_v11 = vcombine.low %v2403_v51, %v2403_v51 }
 0x58d   : > { %1414 = vrot.lane.b32.xlu1 %v1409_v18, %s7818_s11  ;;  %v7825_v18 = vrot.slane %v5398_v45, 4 }
 0x58e   : > { %v6017_v39 = vpop.permute.xlu0 %1777 }
 0x58f   : > { %v6024_v40 = vpop.permute.xlu1 %1030  ;;  %v1060_v61 = vmul.f32 %v7825_v18, %v1040_v36  ;;  %v884_v36 = vld [vmem:[#allocation2 + $0x8] sm:$0xf]  ;;  %v7830_v18 = vrot.slane %v5465_v20, 4 }
 0x590   : > { %2446 = vrot.lane.b32.xlu0 %v6015_v2, %s7819_s27  ;;  %7821 = vst [vmem:[#allocation65_spill] sm:$0xff] %v6024_v40  ;;  %v2192_v40 = vmul.f32 %v7826_v42, %v2172_v41  ;;  %v2038_v42 = vld [vmem:[#allocation2 + $0x8] sm:$0xf] }
 0x591   : > { %1203 = vrot.lane.b32.xlu1 %v1198_v46, %s7823_s21  ;;  %v1064_v46 = vcombine.low %v1060_v61, %v1060_v61  ;;  %v2269_v50 = vmul.f32 %v7830_v18, %v2249_v37  ;;  %v7834_v37 = vrot.slane %v5480_v27, 4 }
 0x592   : > { %v6028_v62 = vpop.permute.xlu0 %1736  ;;  %v2196_v41 = vcombine.low %v2192_v40, %v2192_v40  ;;  %v963_v40 = vld [vmem:[#allocation2 + $0x8] sm:$0xf] }
 0x593   : > { %v6035_v23 = vpop.permute.xlu1 %874 }
 0x594   : > { %2331 = vrot.lane.b32.xlu0 %v5607_v16, %s7824_s9  ;;  %v7829_v16 = vrot.slane %v5287_v60, 4  ;;  %s7831_s9 = smov 109   ;;  %v7833_v60 = vrot.slane %v5404_v57, 4 }
 0x595   : > { %1280 = vrot.lane.b32.xlu1 %v1275_v10, %s7827_s18 }
 0x596   : > { %v6039_v17 = vpop.permute.xlu0 %1813  ;;  %v1117_v45 = vmul.f32 %v7829_v16, %v1097_v38  ;;  %v905_v61 = vmul.f32 %v7833_v60, %v884_v36  ;;  %v2058_v16 = vmul.f32 %v7834_v37, %v2038_v42 }
 0x597   : > { %v6045_v30 = vpop.permute.xlu1 %953 }
 0x598   : > { %2412 = vrot.lane.b32.xlu0 %v2407_v11, %s7828_s10  ;;  %v1121_v20 = vcombine.low %v1117_v45, %v1117_v45  ;;  %v909_v57 = vcombine.low %v905_v61, %v905_v61  ;;  %v747_v45 = vld [vmem:[#allocation2 + $0x8] sm:$0xf] }
 0x599   : > { %1069 = vrot.lane.b32.xlu1 %v1064_v46, %s7831_s9  ;;  %v2273_v46 = vcombine.low %v2269_v50, %v2269_v50  ;;  %v1884_v50 = vld [vmem:[#allocation2 + $0x8] sm:$0xf] }
 0x59a   : > { %v1585_v51 = vpop.permute.xlu0 %1584 }
 0x59b   : > { %v1589_v10 = vsel %vm7634_vm5, %v5774_v6, %v1585_v51  ;;  %v1590_v11 = vsel %vm7634_vm5, %v1585_v51, %v5733_v4  ;;  %v6057_v38 = vpop.permute.xlu1 %737  ;;  %v2095_v6 = vld [vmem:[#allocation2 + $0x8] sm:$0xf]  ;;  %v7837_v4 = vrot.slane %v5309_v13, 4  ;;  %v2062_v51 = vcombine.low %v2058_v16, %v2058_v16 }
 0x59c   : > { %1593 = vst [vmem:[#allocation4 + $0xe8] sm:$0xf] %v1589_v10  ;;  %1594 = vst [vmem:[#allocation4 + $0xf8] sm:$0xf] %v1590_v11  ;;  %2201 = vrot.lane.b32.xlu0 %v2196_v41, %s7832_s0  ;;  %v7838_v10 = vrot.slane %v5346_v53, 4  ;;  %vm7640_vm5 = vcmask 1014784  }
 0x59d   : > { %1126 = vrot.lane.b32.xlu1 %v1121_v20, %s7835_s16  ;;  %v983_v41 = vmul.f32 %v7837_v4, %v963_v40  ;;  %v7841_v11 = vrot.slane %v5417_v1, 4  ;;  %v7842_v40 = vrot.slane %v5705_v22, 4  ;;  %v7845_v4 = vrot.slane %v5350_v55, 4 }
 0x59e   : > { %v6061_v18 = vpop.permute.xlu0 %1623  ;;  %v2115_v27 = vmul.f32 %v7838_v10, %v2095_v6 }
 0x59f   : > { %v6067_v36 = vpop.permute.xlu1 %816  ;;  %v768_v13 = vmul.f32 %v7841_v11, %v747_v45  ;;  %v987_v60 = vcombine.low %v983_v41, %v983_v41  ;;  %v1904_v37 = vmul.f32 %v7842_v40, %v1884_v50  ;;  %v1658_v40 = vcombine.high %v5595_v8, %v5595_v8 }
 0x5a0   : > { %2278 = vrot.lane.b32.xlu0 %v2273_v46, %s7836_s30  ;;  %v2119_v20 = vcombine.low %v2115_v27, %v2115_v27  ;;  %v1961_v46 = vld [vmem:[#allocation2 + $0x8] sm:$0xf]  ;;  %s7847_s30 = smov 58   ;;  %v1408_v8 = vcombine.low %v5670_v19, %v5670_v19 }
 0x5a1   : > { %914 = vrot.lane.b32.xlu1 %v909_v57, %s7839_s7  ;;  %v772_v6 = vcombine.low %v768_v13, %v768_v13  ;;  %v1981_v41 = vmul.f32 %v7845_v4, %v1961_v46  ;;  %v1908_v57 = vcombine.low %v1904_v37, %v1904_v37  ;;  %v1735_v13 = vcombine.high %v5534_v63, %v5534_v63 }
 0x5a2   : > { %v6071_v42 = vpop.permute.xlu0 %1700  ;;  %v1485_v63 = vcombine.low %v5610_v44, %v5610_v44  ;;  %v1313_v4 = vcombine.high %v5457_v59, %v5457_v59  ;;  %v1063_v59 = vcombine.low %v5807_v48, %v5807_v48 }
 0x5a3   : > { %v836_v61 = vpop.permute.xlu1 %835  ;;  %v1985_v27 = vcombine.low %v1981_v41, %v1981_v41 }
 0x5a4   : > { %2067 = vrot.lane.b32.xlu0 %v2062_v51, %s7840_s6  ;;  %v839_v53 = vsel %vm7640_vm5, %v5826_v49, %v836_v61  ;;  %s7846_s6 = smov 126   ;;  %v1773_v51 = vcombine.low %v5520_v33, %v5520_v33 }
 0x5a5   : > { %843 = vst [vmem:[#allocation4 + $0x48] sm:$0xf0] %v839_v53  ;;  %992 = vrot.lane.b32.xlu1 %v987_v60, %s7843_s1  ;;  %v1447_v53 = vcombine.high %v5637_v21, %v5637_v21  ;;  %v1197_v21 = vcombine.low %v5723_v47, %v5723_v47 }
 0x5a6   : > { %v6081_v16 = vpop.permute.xlu0 %1659 }
 0x5a7   : > { %v1833_v1 = vpop.permute.xlu1 %1832 }
 0x5a8   : > { %2124 = vrot.lane.b32.xlu0 %v2119_v20, %s7844_s13  ;;  %v1839_v22 = vsel %vm7636_vm7, %v1833_v1, %v5752_v5  ;;  %s7848_s13 = smov 47   ;;  %v1619_v5 = vcombine.low %v5571_v29, %v5571_v29  ;;  %v1812_v29 = vcombine.high %v5546_v34, %v5546_v34  ;;  %v1562_v34 = vcombine.low %v5622_v15, %v5622_v15 }
 0x5a9   : > { %1843 = vst [vmem:[#allocation4 + $0xf0] sm:$0xf0] %v1839_v22  ;;  %777 = vrot.lane.b32.xlu1 %v772_v6, %s7846_s6  ;;  %v1524_v6 = vcombine.high %v5656_v26, %v5656_v26  ;;  %v1274_v26 = vcombine.low %v5750_v54, %v5750_v54  ;;  %vm7638_vm7 = vcmask 359424  }
 0x5aa   : > { %v6089_v45 = vpop.permute.xlu0 %1489 }
 0x5ab   : > { %v1334_v10 = vpop.permute.xlu1 %1333 }
 0x5ac   : > { %1913 = vrot.lane.b32.xlu0 %v1908_v57, %s7847_s30  ;;  %v1340_v55 = vsel %vm7637_vm1, %v1334_v10, %v5793_v35  ;;  %s7849_s30 = smov 63   ;;  %v1696_v35 = vcombine.low %v5584_v14, %v5584_v14  ;;  %v1370_v57 = vcombine.high %v5708_v3, %v5708_v3  ;;  %v1120_v3 = vcombine.low %v5846_v9, %v5846_v9  ;;  %v7856_v9 = vld [vmem:[#allocation43_spill] sm:$0xff] }
 0x5ad   : > { %1344 = vst [vmem:[#allocation4 + $0x180] sm:$0xf0] %v1340_v55  ;;  %1775 = vrot.lane.b32.xlu1 %v1773_v51, %s7794_s4  ;;  %s7850_s4 = smov 61   ;;  %v1159_v51 = vcombine.high %v5772_v24, %v5772_v24  ;;  %v7854_v24 = vld [vmem:[#allocation55_spill] sm:$0xff]  ;;  %vm7639_vm1 = vcmask 883712  }
 0x5ae   : > { %v6097_v50 = vpop.permute.xlu0 %1566  ;;  %v908_v55 = vcombine.low %v7854_v24, %v7854_v24 }
 0x5af   : > { %v832_v11 = vpop.permute.xlu1 %831 }
 0x5b0   : > { %1990 = vrot.lane.b32.xlu0 %v1985_v27, %s7848_s13  ;;  %v838_v33 = vsel %vm7640_vm5, %v832_v11, %v5826_v49  ;;  %v1236_v27 = vcombine.high %v5791_v28, %v5791_v28  ;;  %v7855_v11 = vld [vmem:[#allocation51_spill] sm:$0xff]  ;;  %vm1704_vm5 = vcmask 596992  }
 0x5b1   : > { %842 = vst [vmem:[#allocation4 + $0x10] sm:$0xf0] %v838_v33  ;;  %1621 = vrot.lane.b32.xlu1 %v1619_v5, %s7800_s3  ;;  %s6639_s3 = sld [smem:[#allocation12 + $0xe]] }
 0x5b2   : > { %v6107_v60 = vpop.permute.xlu0 %1448 }
 0x5b3   : > { %v6113_v61 = vpop.permute.xlu1 %2410 }
 0x5b4   : > { %1738 = vrot.lane.b32.xlu0 %v1735_v13, %s7849_s30  ;;  %s7851_s30 = smov 74   ;;  %v1025_v13 = vcombine.high %v7855_v11, %v7855_v11 }
 0x5b5   : > { %1698 = vrot.lane.b32.xlu1 %v1696_v35, %s7805_s19  ;;  %s7852_s19 = smov 78   ;;  %v7857_v35 = vld [vmem:[#allocation37_spill] sm:$0xff] }
 0x5b6   : > { %v6117_v20 = vpop.permute.xlu0 %1525 }
 0x5b7   : > { %v6123_v49 = vpop.permute.xlu1 %2312 }
 0x5b8   : > { %1815 = vrot.lane.b32.xlu0 %v1812_v29, %s7850_s4  ;;  %s6625_s4 = sld [smem:[#allocation12 + $0x7]] }
 0x5b9   : > { %1487 = vrot.lane.b32.xlu1 %v1485_v63, %s7808_s28  ;;  %v986_v63 = vcombine.low %v5917_v43, %v5917_v43  ;;  %v771_v43 = vcombine.low %v5965_v7, %v5965_v7  ;;  %s6659_s28 = sld [smem:[#allocation12 + $0x17]] }
 0x5ba   : > { %v6127_v14 = vpop.permute.xlu0 %1412 }
 0x5bb   : > { %v6133_v37 = vpop.permute.xlu1 %2369 }
 0x5bc   : > { %1661 = vrot.lane.b32.xlu0 %v1658_v40, %s7851_s30  ;;  %s6633_s30 = sld [smem:[#allocation12 + $0x6]] }
 0x5bd   : > { %1564 = vrot.lane.b32.xlu1 %v1562_v34, %s7813_s23  ;;  %v869_v34 = vcombine.high %v5934_v25, %v5934_v25  ;;  %v948_v25 = vcombine.high %v5951_v56, %v5951_v56  ;;  %v7860_v56 = vld [vmem:[#allocation33_spill] sm:$0xff]  ;;  %s6641_s23 = sld [smem:[#allocation12 + $0x13]] }
 0x5be   : > { %v6137_v44 = vpop.permute.xlu0 %1314 }
 0x5bf   : > { %v6143_v46 = vpop.permute.xlu1 %2199 }
 0x5c0   : > { %1450 = vrot.lane.b32.xlu0 %v1447_v53, %s7737_s29  ;;  %s7875_s29 = smov 59  }
 0x5c1   : > { %1410 = vrot.lane.b32.xlu1 %v1408_v8, %s7818_s11  ;;  %v7858_v8 = vld [vmem:[#allocation44_spill] sm:$0xff] }
 0x5c2   : > { %v6147_v15 = vpop.permute.xlu0 %1371 }
 0x5c3   : > { %v6153_v1 = vpop.permute.xlu1 %2276 }
 0x5c4   : > { %1527 = vrot.lane.b32.xlu0 %v1524_v6, %s7852_s19  ;;  %s6635_s19 = sld [smem:[#allocation12 + $0x11]] }
 0x5c5   : > { %1199 = vrot.lane.b32.xlu1 %v1197_v21, %s7823_s21  ;;  %s7853_s21 = smov 95   ;;  %v7859_v21 = vld [vmem:[#allocation39_spill] sm:$0xff] }
 0x5c6   : > { %v6157_v19 = vpop.permute.xlu0 %1201 }
 0x5c7   : > { %v6163_v41 = vpop.permute.xlu1 %2158 }
 0x5c8   : > { %1316 = vrot.lane.b32.xlu0 %v1313_v4, %s7744_s24 }
 0x5c9   : > { %1276 = vrot.lane.b32.xlu1 %v1274_v26, %s7827_s18 }
 0x5ca   : > { %v6167_v47 = vpop.permute.xlu0 %1278 }
 0x5cb   : > { %v6173_v22 = vpop.permute.xlu1 %2235 }
 0x5cc   : > { %1373 = vrot.lane.b32.xlu0 %v1370_v57, %s7746_s14  ;;  %s6643_s14 = sld [smem:[#allocation12 + $0x8]] }
 0x5cd   : > { %1065 = vrot.lane.b32.xlu1 %v1063_v59, %s7831_s9  ;;  %v2445_v59 = vcombine.high %v6015_v2, %v6015_v2 }
 0x5ce   : > { %v6177_v54 = vpop.permute.xlu0 %1160 }
 0x5cf   : > { %v6183_v10 = vpop.permute.xlu1 %2065 }
 0x5d0   : > { %1162 = vrot.lane.b32.xlu0 %v1159_v51, %s7758_s26 }
 0x5d1   : > { %1122 = vrot.lane.b32.xlu1 %v1120_v3, %s7835_s16  ;;  %v732_v3 = vcombine.high %v5983_v12, %v5983_v12  ;;  %v7861_v12 = vld [vmem:[#allocation34_spill] sm:$0xff] }
 0x5d2   : > { %v6187_v48 = vpop.permute.xlu0 %1237 }
 0x5d3   : > { %v2084_v5 = vpop.permute.xlu1 %2083 }
 0x5d4   : > { %1239 = vrot.lane.b32.xlu0 %v1236_v27, %s7853_s21  ;;  %v2088_v33 = vsel %vm7638_vm7, %v7856_v9, %v2084_v5  ;;  %v2089_v28 = vsel %vm7638_vm7, %v2084_v5, %v7857_v35  ;;  %v2311_v27 = vcombine.high %v7860_v56, %v7860_v56  ;;  %v2368_v5 = vcombine.high %v7861_v12, %v7861_v12  ;;  %v7868_v56 = vld [vmem:[#allocation47_spill] sm:$0xff]  ;;  %v7869_v12 = vld [vmem:[#allocation42_spill] sm:$0xff] }
 0x5d5   : > { %2092 = vst [vmem:[#allocation4 + $0x188] sm:$0xf] %v2088_v33  ;;  %2093 = vst [vmem:[#allocation4 + $0x18] sm:$0xf] %v2089_v28  ;;  %910 = vrot.lane.b32.xlu1 %v908_v55, %s7839_s7  ;;  %v811_v55 = vcombine.high %v5999_v0, %v5999_v0  ;;  %vm7665_vm7 = vcmask 506880   ;;  %v7863_v0 = vld [vmem:[#allocation38_spill] sm:$0xff] }
 0x5d6   : > { %v6199_v29 = vpop.permute.xlu0 %1067  ;;  %v2157_v35 = vcombine.high %v7863_v0, %v7863_v0  ;;  %v7871_v0 = vld [vmem:[#allocation29_spill] sm:$0xff] }
 0x5d7   : > { %v6205_v40 = vpop.permute.xlu1 %2122 }
 0x5d8   : > { %1028 = vrot.lane.b32.xlu0 %v1025_v13, %s7781_s2  ;;  %v7862_v13 = vld [vmem:[#allocation32_spill] sm:$0xff] }
 0x5d9   : > { %988 = vrot.lane.b32.xlu1 %v986_v63, %s7843_s1  ;;  %v2406_v9 = vcombine.low %v7862_v13, %v7862_v13  ;;  %v7864_v63 = vld [vmem:[#allocation35_spill] sm:$0xff] }
 0x5da   : > { %v1086_v53 = vpop.permute.xlu0 %1085 }
 0x5db   : > { %v1090_v6 = vsel %vm7639_vm1, %v7858_v8, %v1086_v53  ;;  %v1091_v4 = vsel %vm7639_vm1, %v1086_v53, %v7859_v21  ;;  %v6217_v26 = vpop.permute.xlu1 %2024  ;;  %vm7666_vm1 = vcmask 613376  }
 0x5dc   : > { %1094 = vst [vmem:[#allocation4 + $0x90] sm:$0xf] %v1090_v6  ;;  %1095 = vst [vmem:[#allocation4 + $0x118] sm:$0xf] %v1091_v4  ;;  %872 = vrot.lane.b32.xlu0 %v869_v34, %s7795_s5  ;;  %v2195_v34 = vcombine.low %v7864_v63, %v7864_v63  ;;  %v7865_v6 = vld [vmem:[#allocation40_spill] sm:$0xff]  ;;  %v4564_v63 = vld [vmem:[#allocation2] sm:$0xff] }
 0x5dd   : > { %773 = vrot.lane.b32.xlu1 %v771_v43, %s7846_s6  ;;  %v2234_v21 = vcombine.high %v7865_v6, %v7865_v6  ;;  %v7866_v43 = vld [vmem:[#allocation36_spill] sm:$0xff] }
 0x5de   : > { %v6221_v57 = vpop.permute.xlu0 %1124 }
 0x5df   : > { %v6227_v51 = vpop.permute.xlu1 %1911 }
 0x5e0   : > { %951 = vrot.lane.b32.xlu0 %v948_v25, %s7801_s8  ;;  %v2272_v25 = vcombine.low %v7866_v43, %v7866_v43  ;;  %s7867_s8 = smov 30  }
 0x5e1   : > { %2448 = vrot.lane.b32.xlu1 %v2445_v59, %s7819_s27  ;;  %s7873_s27 = smov 45  }
 0x5e2   : > { %v6231_v7 = vpop.permute.xlu0 %1026 }
 0x5e3   : > { %v6237_v24 = vpop.permute.xlu1 %1988 }
 0x5e4   : > { %735 = vrot.lane.b32.xlu0 %v732_v3, %s7809_s17 }
 0x5e5   : > { %2314 = vrot.lane.b32.xlu1 %v2311_v27, %s7740_s12  ;;  %v2023_v27 = vcombine.high %v7868_v56, %v7868_v56  ;;  %s7921_s12 = smov 33  }
 0x5e6   : > { %v6241_v2 = vpop.permute.xlu0 %912 }
 0x5e7   : > { %v6247_v11 = vpop.permute.xlu1 %1870 }
 0x5e8   : > { %814 = vrot.lane.b32.xlu0 %v811_v55, %s7814_s20 }
 0x5e9   : > { %2371 = vrot.lane.b32.xlu1 %v2368_v5, %s7743_s25  ;;  %v2061_v5 = vcombine.low %v7869_v12, %v7869_v12  ;;  %s7878_s25 = smov 57  }
 0x5ea   : > { %v6251_v33 = vpop.permute.xlu0 %990 }
 0x5eb   : > { %v1780_v28 = vpop.permute.xlu1 %1779 }
 0x5ec   : > { %2408 = vrot.lane.b32.xlu0 %v2406_v9, %s7828_s10  ;;  %v1783_v53 = vsel %vm7665_vm7, %v6017_v39, %v1780_v28  ;;  %s7876_s10 = smov 43  }
 0x5ed   : > { %1787 = vst [vmem:[#allocation4 + $0x170] sm:$0xf0] %v1783_v53  ;;  %2160 = vrot.lane.b32.xlu1 %v2157_v35, %s7752_s22  ;;  %v7872_v35 = vrot.slane %v7871_v0, 4  ;;  %v1869_v53 = vcombine.high %v5912_v58, %v5912_v58  ;;  %s7881_s22 = sld [smem:[#allocation72_spill]] }
 0x5ee   : > { %v6261_v8 = vpop.permute.xlu0 %870 }
 0x5ef   : > { %v1626_v4 = vpop.permute.xlu1 %1625  ;;  %v1939_v28 = vsel %vm7643_vm14, %v7872_v35, %v7871_v0  ;;  %vm7670_vm14 = vcmask 629760  }
 0x5f0   : > { %2197 = vrot.lane.b32.xlu0 %v2195_v34, %s7832_s0  ;;  %v1629_v59 = vsel %vm7666_vm1, %v6061_v18, %v1626_v4  ;;  %s7870_s0 = smov 46   ;;  %v1942_v34 = vmul.f32 %v4564_v63, %v1939_v28  ;;  %v6313_v63 = vld.sshfl [vmem:[#allocation11] sm:$0x33 pattern:$0x76325410] }
 0x5f1   : > { %1633 = vst [vmem:[#allocation4 + $0xf8] sm:$0xf0] %v1629_v59  ;;  %2237 = vrot.lane.b32.xlu1 %v2234_v21, %s7756_s15  ;;  %v7874_v21 = vld [vmem:[#allocation45_spill] sm:$0xff]  ;;  %s7922_s15 = smov 23  }
 0x5f2   : > { %v6271_v3 = vpop.permute.xlu0 %949  ;;  %v2118_v4 = vcombine.low %v7874_v21, %v7874_v21  ;;  %v1946_v59 = vcombine.high %v1942_v34, %v1942_v34 }
 0x5f3   : > { %v1703_v55 = vpop.permute.xlu1 %1702 }
 0x5f4   : > { %2274 = vrot.lane.b32.xlu0 %v2272_v25, %s7867_s8  ;;  %v1706_v13 = vsel %vm1704_vm5, %v6071_v42, %v1703_v55  ;;  %s7879_s8 = smov 58  }
 0x5f5   : > { %1710 = vst [vmem:[#allocation4 + $0x88] sm:$0xf0] %v1706_v13  ;;  %2026 = vrot.lane.b32.xlu1 %v2023_v27, %s7870_s0  ;;  %v7877_v27 = vld [vmem:[#allocation50_spill] sm:$0xff]  ;;  %v7880_v13 = vld [vmem:[#allocation53_spill] sm:$0xff]  ;;  %s7906_s0 = smov 2  }
 0x5f6   : > { %v6281_v9 = vpop.permute.xlu0 %775  ;;  %v1907_v58 = vcombine.low %v7877_v27, %v7877_v27  ;;  %v1984_v0 = vcombine.low %v7880_v13, %v7880_v13 }
 0x5f7   : > { %v1492_v6 = vpop.permute.xlu1 %1491 }
 0x5f8   : > { %2063 = vrot.lane.b32.xlu0 %v2061_v5, %s7873_s27  ;;  %v1495_v43 = vsel %vm7672_vm8, %v6089_v45, %v1492_v6  ;;  %v2536_v6 = vld [vmem:[%s7881_s22] sm:$0xf]  ;;  %s7903_s22 = sld [smem:[#allocation73_spill]]  ;;  %s7918_s27 = smov 18  }
 0x5f9   : > { %1499 = vst [vmem:[#allocation4 + $0xa8] sm:$0xf0] %v1495_v43  ;;  %1872 = vrot.lane.b32.xlu1 %v1869_v53, %s7875_s29  ;;  %v2550_v53 = vcombine.high %v6313_v63, %v6313_v63  ;;  %s7920_s29 = smov 21  }
 0x5fa   : > { %v6295_v25 = vpop.permute.xlu0 %733 }
 0x5fb   : > { %v1569_v56 = vpop.permute.xlu1 %1568  ;;  %4185 = vmatprep.mubr.msk.bf16.mxu0 %vm2552_vm11, %v2550_v53  ;;  %vm7660_vm11 = vcmask 334848  }
 0x5fc   : > { %2120 = vrot.lane.b32.xlu0 %v2118_v4, %s7876_s10  ;;  %v1572_v55 = vsel %vm7670_vm14, %v6097_v50, %v1569_v56  ;;  %s7907_s10 = smov 6  }
 0x5fd   : > { %1576 = vst [vmem:[#allocation4 + $0x168] sm:$0xf0] %v1572_v55  ;;  %1949 = vrot.lane.b32.xlu1 %v1946_v59, %s7878_s25 }
 0x5fe   : > { %v6303_v12 = vpop.permute.xlu0 %812 }
 0x5ff   : > { %v1415_v5 = vpop.permute.xlu1 %1414 }
 0x600   : > { %1909 = vrot.lane.b32.xlu0 %v1907_v58, %s7879_s8  ;;  %v1418_v35 = vsel %vm7673_vm4, %v6127_v14, %v1415_v5  ;;  %s6627_s8 = sld [smem:[#allocation12 + $0x14]] }
 0x601   : > { %1422 = vst [vmem:[#allocation4 + $0x120] sm:$0xf0] %v1418_v35  ;;  %1947 = vrot.lane.b32.xlu1 %v1942_v34, %s7878_s25  ;;  %v7882_v34 = vld [vmem:[#allocation41_spill] sm:$0xff]  ;;  %s7905_s25 = smov 3  }
 0x602   : > { %v6311_v28 = vpop.permute.xlu0 %2446 }
 0x603   : > { %v1204_v21 = vpop.permute.xlu1 %1203 }
 0x604   : > { %1986 = vrot.lane.b32.xlu0 %v1984_v0, %s7848_s13  ;;  %v1207_v4 = vsel %vm1205_vm3, %v6157_v19, %v1204_v21  ;;  %s7908_s13 = smov 5  }
 0x605   : > { %1211 = vst [vmem:[#allocation4 + $0x100] sm:$0xf0] %v1207_v4  ;;  %2539 = vperm.xlu1 %4548, %v2536_v6  }
 0x606   : > { %v2332_v43 = vpop.permute.xlu0 %2331 }
 0x607   : > { %v2338_v59 = vsel %vm7655_vm12, %v2332_v43, %v7882_v34  ;;  %v1281_v56 = vpop.permute.xlu1 %1280  ;;  %vm1128_vm12 = vcmask 875520  }
 0x608   : > { %2342 = vst [vmem:[#allocation4 + $0x68] sm:$0xf0] %v2338_v59  ;;  %v1284_v27 = vsel %vm7677_vm9, %v6167_v47, %v1281_v56 }
 0x609   : > { %1288 = vst [vmem:[#allocation4 + $0xd8] sm:$0xf0] %v1284_v27 }
 0x60a   : > { %v2413_v58 = vpop.permute.xlu0 %2412 }
 0x60b   : > { %v2416_v55 = vsel %vm7662_vm2, %v6113_v61, %v2413_v58  ;;  %v1070_v5 = vpop.permute.xlu1 %1069  ;;  %vm7686_vm2 = vcmask 474112  }
 0x60c   : > { %2420 = vst [vmem:[#allocation4 + $0x60] sm:$0xf0] %v2416_v55  ;;  %v1073_v13 = vsel %vm1071_vm15, %v6199_v29, %v1070_v5 }
 0x60d   : > { %1077 = vst [vmem:[#allocation4 + $0x110] sm:$0xf0] %v1073_v13 }
 0x60e   : > { %v2202_v0 = vpop.permute.xlu0 %2201 }
 0x60f   : > { %v2205_v35 = vsel %vm7660_vm11, %v6143_v46, %v2202_v0  ;;  %v1127_v53 = vpop.permute.xlu1 %1126  ;;  %vm7664_vm11 = vcmask 351232  }
 0x610   : > { %2209 = vst [vmem:[#allocation4 + $0x158] sm:$0xf0] %v2205_v35  ;;  %v1130_v6 = vsel %vm1128_vm12, %v6221_v57, %v1127_v53 }
 0x611   : > { %1134 = vst [vmem:[#allocation4 + $0x118] sm:$0xf0] %v1130_v6 }
 0x612   : > { %v2279_v21 = vpop.permute.xlu0 %2278 }
 0x613   : > { %v2282_v4 = vsel %vm7661_vm6, %v6153_v1, %v2279_v21  ;;  %v915_v43 = vpop.permute.xlu1 %914  ;;  %vm779_vm6 = vcmask 1031168  }
 0x614   : > { %2286 = vst [vmem:[#allocation4 + $0x70] sm:$0xf0] %v2282_v4  ;;  %v918_v34 = vsel %vm916_vm13, %v6241_v2, %v915_v43 }
 0x615   : > { %922 = vst [vmem:[#allocation4 + $0x128] sm:$0xf0] %v918_v34 }
 0x616   : > { %v2068_v59 = vpop.permute.xlu0 %2067 }
 0x617   : > { %v2071_v56 = vsel %vm7663_vm10, %v6183_v10, %v2068_v59  ;;  %v993_v27 = vpop.permute.xlu1 %992  ;;  %vm7685_vm10 = vcmask 384000  }
 0x618   : > { %2075 = vst [vmem:[#allocation4 + $0x30] sm:$0xf0] %v2071_v56  ;;  %v996_v58 = vsel %vm994_vm0, %v6251_v33, %v993_v27 }
 0x619   : > { %1000 = vst [vmem:[#allocation4 + $0x178] sm:$0xf0] %v996_v58  ;;  %v7883_v58 = vld [vmem:[#allocation46_spill] sm:$0xff] }
 0x61a   : > { %v2125_v55 = vpop.permute.xlu0 %2124 }
 0x61b   : > { %v2128_v5 = vsel %vm7664_vm11, %v6205_v40, %v2125_v55  ;;  %v778_v13 = vpop.permute.xlu1 %777  ;;  %vm7668_vm11 = vcmask 515072  }
 0x61c   : > { %2132 = vst [vmem:[#allocation4 + $0x18] sm:$0xf0] %v2128_v5  ;;  %v781_v0 = vsel %vm779_vm6, %v6281_v9, %v778_v13 }
 0x61d   : > { %785 = vst [vmem:[#allocation4 + $0xd0] sm:$0xf0] %v781_v0  ;;  %v7884_v0 = vld [vmem:[#allocation48_spill] sm:$0xff] }
 0x61e   : > { %v1914_v35 = vpop.permute.xlu0 %1913 }
 0x61f   : > { %v1917_v53 = vsel %vm7686_vm2, %v6227_v51, %v1914_v35  ;;  %v1776_v6 = vpop.permute.xlu1 %1775 }
 0x620   : > { %1921 = vst [vmem:[#allocation4] sm:$0xf0] %v1917_v53  ;;  %v1782_v21 = vsel %vm7665_vm7, %v1776_v6, %v6017_v39  ;;  %vm7667_vm7 = vcmask 498688  }
 0x621   : > { %1786 = vst [vmem:[#allocation4 + $0xa0] sm:$0xf0] %v1782_v21  ;;  %v7885_v21 = vld [vmem:[#allocation54_spill] sm:$0xff] }
 0x622   : > { %v1991_v4 = vpop.permute.xlu0 %1990 }
 0x623   : > { %v1994_v43 = vsel %vm7685_vm10, %v6237_v24, %v1991_v4  ;;  %v1622_v34 = vpop.permute.xlu1 %1621 }
 0x624   : > { %1998 = vst [vmem:[#allocation4 + $0xc0] sm:$0xf0] %v1994_v43  ;;  %v1628_v59 = vsel %vm7666_vm1, %v1622_v34, %v6061_v18  ;;  %vm7669_vm1 = vcmask 605184  }
 0x625   : > { %1632 = vst [vmem:[#allocation4 + $0xe8] sm:$0xf0] %v1628_v59 }
 0x626   : > { %v1739_v56 = vpop.permute.xlu0 %1738 }
 0x627   : > { %v1743_v27 = vsel %vm7668_vm11, %v6028_v62, %v1739_v56  ;;  %v1744_v55 = vsel %vm7668_vm11, %v1739_v56, %v7883_v58  ;;  %v1699_v39 = vpop.permute.xlu1 %1698  ;;  %v7886_v56 = vld [vmem:[#allocation56_spill] sm:$0xff]  ;;  %vm7674_vm11 = vcmask 744448  }
 0x628   : > { %1747 = vst [vmem:[#allocation4 + $0xa0] sm:$0xf] %v1743_v27  ;;  %1748 = vst [vmem:[#allocation4 + $0x170] sm:$0xf] %v1744_v55  ;;  %v1705_v5 = vsel %vm1704_vm5, %v1699_v39, %v6071_v42  ;;  %vm1454_vm5 = vcmask 728064  }
 0x629   : > { %1709 = vst [vmem:[#allocation4 + $0x20] sm:$0xf0] %v1705_v5 }
 0x62a   : > { %v1816_v13 = vpop.permute.xlu0 %1815 }
 0x62b   : > { %v1820_v18 = vsel %vm7667_vm7, %v6039_v17, %v1816_v13  ;;  %v1821_v35 = vsel %vm7667_vm7, %v1816_v13, %v7884_v0  ;;  %v1488_v62 = vpop.permute.xlu1 %1487  ;;  %vm7671_vm7 = vcmask 637952   ;;  %v2485_v0 = vld [vmem:[#allocation4 + $0xf8] sm:$0xff] }
 0x62c   : > { %1824 = vst [vmem:[#allocation4 + $0xf0] sm:$0xf] %v1820_v18  ;;  %1825 = vst [vmem:[#allocation4 + $0x140] sm:$0xf] %v1821_v35  ;;  %v1494_v53 = vsel %vm7672_vm8, %v1488_v62, %v6089_v45  ;;  %v7887_v35 = vld [vmem:[#allocation58_spill] sm:$0xff]  ;;  %vm955_vm8 = vcmask 990208  }
 0x62d   : > { %1498 = vst [vmem:[#allocation4 + $0xe0] sm:$0xf0] %v1494_v53 }
 0x62e   : > { %v1662_v6 = vpop.permute.xlu0 %1661 }
 0x62f   : > { %v1666_v42 = vsel %vm7669_vm1, %v6081_v16, %v1662_v6  ;;  %v1667_v4 = vsel %vm7669_vm1, %v1662_v6, %v7885_v21  ;;  %v1565_v17 = vpop.permute.xlu1 %1564  ;;  %v2489_v59 = vld [vmem:[#allocation4 + $0x170] sm:$0xff]  ;;  %v2488_v55 = vld [vmem:[#allocation4 + $0xa0] sm:$0xff]  ;;  %v2484_v6 = vld [vmem:[#allocation4 + $0xe8] sm:$0xff]  ;;  %vm7679_vm1 = vcmask 777216  }
 0x630   : > { %1670 = vst [vmem:[#allocation4 + $0x20] sm:$0xf] %v1666_v42  ;;  %1671 = vst [vmem:[#allocation4 + $0x88] sm:$0xf] %v1667_v4  ;;  %v1571_v43 = vsel %vm7670_vm14, %v1565_v17, %v6097_v50  ;;  %vm1032_vm14 = vcmask 900096  }
 0x631   : > { %1575 = vst [vmem:[#allocation4 + $0xb8] sm:$0xf0] %v1571_v43 }
 0x632   : > { %v1451_v34 = vpop.permute.xlu0 %1450 }
 0x633   : > { %v1455_v45 = vsel %vm1454_vm5, %v6107_v60, %v1451_v34  ;;  %v1456_v27 = vsel %vm1454_vm5, %v1451_v34, %v7886_v56  ;;  %v2491_v58 = vld [vmem:[#allocation4 + $0x140] sm:$0xff]  ;;  %v2490_v16 = vld [vmem:[#allocation4 + $0xf0] sm:$0xff]  ;;  %v1411_v13 = vpop.permute.xlu1 %1410  ;;  %vm7675_vm5 = vcmask 760832  }
 0x634   : > { %1459 = vst [vmem:[#allocation4 + $0xe0] sm:$0xf] %v1455_v45  ;;  %1460 = vst [vmem:[#allocation4 + $0xa8] sm:$0xf] %v1456_v27  ;;  %v2525_v39 = vpack.c.bf16 %v2491_v58, %v2489_v59  ;;  %v2524_v5 = vpack.c.bf16 %v2490_v16, %v2488_v55  ;;  %v1417_v18 = vsel %vm7673_vm4, %v1411_v13, %v6127_v14  ;;  %vm2452_vm4 = vcmask 203776  }
 0x635   : > { %1421 = vst [vmem:[#allocation4 + $0x138] sm:$0xf0] %v1417_v18 }
 0x636   : > { %2563 = vmatprep.subr.bf16.mxu0 %v2525_v39  ;;  %v1528_v50 = vpop.permute.xlu0 %1527 }
 0x637   : > { %v1532_v60 = vsel %vm7671_vm7, %v6117_v20, %v1528_v50  ;;  %v1533_v62 = vsel %vm7671_vm7, %v1528_v50, %v7887_v35  ;;  %2564 = vmatpush1.bf16.msra.mxu0 %v2524_v5  ;;  %v2487_v53 = vld [vmem:[#allocation4 + $0x88] sm:$0xff]  ;;  %v2486_v42 = vld [vmem:[#allocation4 + $0x20] sm:$0xff]  ;;  %v1200_v14 = vpop.permute.xlu1 %1199  ;;  %vm876_vm7 = vcmask 1006592  }
 0x638   : > { %1536 = vst [vmem:[#allocation4 + $0xb8] sm:$0xf] %v1532_v60  ;;  %1537 = vst [vmem:[#allocation4 + $0x168] sm:$0xf] %v1533_v62  ;;  %v2523_v21 = vpack.c.bf16 %v2487_v53, %v2485_v0  ;;  %v2522_v4 = vpack.c.bf16 %v2486_v42, %v2484_v6  ;;  %v1206_v17 = vsel %vm1205_vm3, %v1200_v14, %v6157_v19  ;;  %vm1166_vm3 = vcmask 867328   ;;  %v7888_v35 = vld [vmem:[#allocation64_spill] sm:$0xff] }
 0x639   : > { %1210 = vst [vmem:[#allocation4 + $0x148] sm:$0xf0] %v1206_v17  ;;  %v7889_v14 = vld [vmem:[#allocation65_spill] sm:$0xff] }
 0x63a   : > { %2565 = vmatprep.subr.bf16.mxu0 %v2523_v21  ;;  %v1317_v43 = vpop.permute.xlu0 %1316 }
 0x63b   : > { %v1321_v20 = vsel %vm7675_vm5, %v6137_v44, %v1317_v43  ;;  %v1322_v34 = vsel %vm7675_vm5, %v1317_v43, %v5948_v32  ;;  %2566 = vmatpush1.bf16.msra.mxu0 %v2522_v4  ;;  %v1277_v59 = vpop.permute.xlu1 %1276  ;;  %v2481_v27 = vld [vmem:[#allocation4 + $0xa8] sm:$0xff]  ;;  %v2480_v55 = vld [vmem:[#allocation4 + $0xe0] sm:$0xff]  ;;  %vm7676_vm5 = vcmask 236544  }
 0x63c   : > { %1325 = vst [vmem:[#allocation4 + $0x180] sm:$0xf] %v1321_v20  ;;  %1326 = vst [vmem:[#allocation4 + $0x130] sm:$0xf] %v1322_v34  ;;  %v1283_v45 = vsel %vm7677_vm9, %v1277_v59, %v6167_v47  ;;  %vm7893_vm9 = vcmask 211968  }
 0x63d   : > { %1287 = vst [vmem:[#allocation4 + $0x58] sm:$0xf0] %v1283_v45 }
 0x63e   : > { %v1374_v56 = vpop.permute.xlu0 %1373 }
 0x63f   : > { %v1378_v19 = vsel %vm7674_vm11, %v6147_v15, %v1374_v56  ;;  %v1379_v44 = vsel %vm7674_vm11, %v1374_v56, %v5980_v52  ;;  %v2483_v58 = vld [vmem:[#allocation4 + $0x168] sm:$0xff]  ;;  %v2482_v32 = vld [vmem:[#allocation4 + $0xb8] sm:$0xff]  ;;  %v1066_v5 = vpop.permute.xlu1 %1065  ;;  %vm739_vm11 = vcmask 1039360  }
 0x640   : > { %1382 = vst [vmem:[#allocation4 + $0x138] sm:$0xf] %v1378_v19  ;;  %1383 = vst [vmem:[#allocation4 + $0x120] sm:$0xf] %v1379_v44  ;;  %v2521_v16 = vpack.c.bf16 %v2483_v58, %v2481_v27  ;;  %v2520_v39 = vpack.c.bf16 %v2482_v32, %v2480_v55  ;;  %v1072_v47 = vsel %vm1071_vm15, %v1066_v5, %v6199_v29  ;;  %v2471_v32 = vld [vmem:[#allocation4 + $0x118] sm:$0xff] }
 0x641   : > { %1076 = vst [vmem:[#allocation4 + $0x108] sm:$0xf0] %v1072_v47 }
 0x642   : > { %2567 = vmatprep.subr.bf16.mxu0 %v2521_v16  ;;  %v1163_v13 = vpop.permute.xlu0 %1162 }
 0x643   : > { %v1167_v15 = vsel %vm1166_vm3, %v6177_v54, %v1163_v13  ;;  %v1168_v52 = vsel %vm1166_vm3, %v1163_v13, %v5996_v31  ;;  %2568 = vmatpush1.bf16.msra.mxu0 %v2520_v39  ;;  %v1123_v18 = vpop.permute.xlu1 %1122  ;;  %v2477_v60 = vld [vmem:[#allocation4 + $0x130] sm:$0xff]  ;;  %v2476_v53 = vld [vmem:[#allocation4 + $0x180] sm:$0xff] }
 0x644   : > { %1171 = vst [vmem:[#allocation4 + $0x148] sm:$0xf] %v1167_v15  ;;  %1172 = vst [vmem:[#allocation4 + $0x100] sm:$0xf] %v1168_v52  ;;  %v1129_v50 = vsel %vm1128_vm12, %v1123_v18, %v6221_v57  ;;  %v7890_v52 = vld [vmem:[#allocation49_spill] sm:$0xff] }
 0x645   : > { %1133 = vst [vmem:[#allocation4 + $0x90] sm:$0xf0] %v1129_v50 }
 0x646   : > { %v1240_v0 = vpop.permute.xlu0 %1239 }
 0x647   : > { %v1244_v29 = vsel %vm7679_vm1, %v6187_v48, %v1240_v0  ;;  %v1245_v54 = vsel %vm7679_vm1, %v1240_v0, %v7888_v35  ;;  %v2479_v62 = vld [vmem:[#allocation4 + $0x120] sm:$0xff]  ;;  %v2478_v31 = vld [vmem:[#allocation4 + $0x138] sm:$0xff]  ;;  %v911_v21 = vpop.permute.xlu1 %910  ;;  %vm7895_vm1 = vcmask 334848  }
 0x648   : > { %1248 = vst [vmem:[#allocation4 + $0x58] sm:$0xf] %v1244_v29  ;;  %1249 = vst [vmem:[#allocation4 + $0xd8] sm:$0xf] %v1245_v54  ;;  %v2519_v6 = vpack.c.bf16 %v2479_v62, %v2477_v60  ;;  %v2518_v42 = vpack.c.bf16 %v2478_v31, %v2476_v53  ;;  %v917_v57 = vsel %vm916_vm13, %v911_v21, %v6241_v2  ;;  %v7891_v60 = vld [vmem:[#allocation52_spill] sm:$0xff] }
 0x649   : > { %921 = vst [vmem:[#allocation4 + $0x160] sm:$0xf0] %v917_v57  ;;  %v7892_v57 = vld [vmem:[#allocation57_spill] sm:$0xff] }
 0x64a   : > { %2569 = vmatprep.subr.bf16.mxu0 %v2519_v6  ;;  %v1029_v4 = vpop.permute.xlu0 %1028 }
 0x64b   : > { %v1033_v48 = vsel %vm1032_vm14, %v6231_v7, %v1029_v4  ;;  %v1034_v17 = vsel %vm1032_vm14, %v1029_v4, %v7889_v14  ;;  %2570 = vmatpush1.bf16.msra.mxu0 %v2518_v42  ;;  %v989_v43 = vpop.permute.xlu1 %988  ;;  %v2473_v59 = vld [vmem:[#allocation4 + $0x100] sm:$0xff]  ;;  %v2472_v56 = vld [vmem:[#allocation4 + $0x148] sm:$0xff] }
 0x64c   : > { %1037 = vst [vmem:[#allocation4 + $0x108] sm:$0xf] %v1033_v48  ;;  %1038 = vst [vmem:[#allocation4 + $0x110] sm:$0xf] %v1034_v17  ;;  %v995_v20 = vsel %vm994_vm0, %v989_v43, %v6251_v33  ;;  %v2470_v5 = vld [vmem:[#allocation4 + $0x90] sm:$0xff]  ;;  %v7894_v17 = vld [vmem:[#allocation59_spill] sm:$0xff] }
 0x64d   : > { %999 = vst [vmem:[#allocation4 + $0x40] sm:$0xf0] %v995_v20 }
 0x64e   : > { %v873_v34 = vpop.permute.xlu0 %872 }
 0x64f   : > { %v877_v2 = vsel %vm876_vm7, %v6261_v8, %v873_v34  ;;  %v878_v7 = vsel %vm876_vm7, %v873_v34, %v6035_v23  ;;  %v2475_v45 = vld [vmem:[#allocation4 + $0xd8] sm:$0xff]  ;;  %v774_v58 = vpop.permute.xlu1 %773 }
 0x650   : > { %v2474_v27 = vld [vmem:[#allocation4 + $0x58] sm:$0xff]  ;;  %881 = vst [vmem:[#allocation4 + $0x160] sm:$0xf] %v877_v2  ;;  %882 = vst [vmem:[#allocation4 + $0x128] sm:$0xf] %v878_v7  ;;  %v2517_v19 = vpack.c.bf16 %v2475_v45, %v2473_v59  ;;  %v780_v33 = vsel %vm779_vm6, %v774_v58, %v6281_v9 }
 0x651   : > { %v2516_v44 = vpack.c.bf16 %v2474_v27, %v2472_v56  ;;  %784 = vst [vmem:[#allocation4 + $0xb0] sm:$0xf0] %v780_v33 }
 0x652   : > { %2571 = vmatprep.subr.bf16.mxu0 %v2517_v19  ;;  %v952_v55 = vpop.permute.xlu0 %951 }
 0x653   : > { %v956_v8 = vsel %vm955_vm8, %v6271_v3, %v952_v55  ;;  %v957_v23 = vsel %vm955_vm8, %v952_v55, %v6045_v30  ;;  %2572 = vmatpush1.bf16.msra.mxu0 %v2516_v44  ;;  %v2469_v16 = vld [vmem:[#allocation4 + $0x110] sm:$0xff]  ;;  %v2468_v39 = vld [vmem:[#allocation4 + $0x108] sm:$0xff]  ;;  %v2449_v15 = vpop.permute.xlu1 %2448  ;;  %vm818_vm8 = vcmask 1022976   ;;  %v7896_v44 = vld [vmem:[#allocation60_spill] sm:$0xff] }
 0x654   : > { %960 = vst [vmem:[#allocation4 + $0x40] sm:$0xf] %v956_v8  ;;  %961 = vst [vmem:[#allocation4 + $0x178] sm:$0xf] %v957_v23  ;;  %v2515_v47 = vpack.c.bf16 %v2471_v32, %v2469_v16  ;;  %v2514_v13 = vpack.c.bf16 %v2470_v5, %v2468_v39  ;;  %v2453_v9 = vsel %vm2452_vm4, %v6311_v28, %v2449_v15  ;;  %v7898_v39 = vld [vmem:[#allocation61_spill] sm:$0xff] }
 0x655   : > { %v2454_v18 = vsel %vm2452_vm4, %v2449_v15, %v7890_v52  ;;  %2457 = vst [vmem:[#allocation4 + $0x78] sm:$0xf] %v2453_v9  ;;  %vm7678_vm4 = vcmask 220160  }
 0x656   : > { %2573 = vmatprep.subr.bf16.mxu0 %v2515_v47  ;;  %v736_v50 = vpop.permute.xlu0 %735  ;;  %2458 = vst [vmem:[#allocation4 + $0x150] sm:$0xf] %v2454_v18 }
 0x657   : > { %v740_v30 = vsel %vm739_vm11, %v6295_v25, %v736_v50  ;;  %v741_v3 = vsel %vm739_vm11, %v736_v50, %v6057_v38  ;;  %2574 = vmatpush1.bf16.msra.mxu0 %v2514_v13  ;;  %v2315_v0 = vpop.permute.xlu1 %2314  ;;  %v2465_v54 = vld [vmem:[#allocation4 + $0x128] sm:$0xff]  ;;  %v2464_v53 = vld [vmem:[#allocation4 + $0x160] sm:$0xff] }
 0x658   : > { %744 = vst [vmem:[#allocation4 + $0xb0] sm:$0xf] %v740_v30  ;;  %745 = vst [vmem:[#allocation4 + $0xd0] sm:$0xf] %v741_v3  ;;  %v2319_v28 = vsel %vm7676_vm5, %v6123_v49, %v2315_v0  ;;  %v2320_v29 = vsel %vm7676_vm5, %v2315_v0, %v7891_v60  ;;  %vm7680_vm5 = vcmask 343040   ;;  %v7900_v30 = vld [vmem:[#allocation62_spill] sm:$0xff] }
 0x659   : > { %2323 = vst [vmem:[#allocation4 + $0x68] sm:$0xf] %v2319_v28  ;;  %2324 = vst [vmem:[#allocation4 + $0x80] sm:$0xf] %v2320_v29 }
 0x65a   : > { %v815_v35 = vpop.permute.xlu0 %814 }
 0x65b   : > { %v819_v25 = vsel %vm818_vm8, %v6303_v12, %v815_v35  ;;  %v820_v38 = vsel %vm818_vm8, %v815_v35, %v6067_v36  ;;  %v2467_v62 = vld [vmem:[#allocation4 + $0x178] sm:$0xff]  ;;  %v2466_v31 = vld [vmem:[#allocation4 + $0x40] sm:$0xff]  ;;  %v2372_v42 = vpop.permute.xlu1 %2371 }
 0x65c   : > { %823 = vst [vmem:[#allocation4 + $0x10] sm:$0xf] %v819_v25  ;;  %824 = vst [vmem:[#allocation4 + $0x48] sm:$0xf] %v820_v38  ;;  %v2513_v49 = vpack.c.bf16 %v2467_v62, %v2465_v54  ;;  %v2512_v6 = vpack.c.bf16 %v2466_v31, %v2464_v53  ;;  %v2376_v21 = vsel %vm7678_vm4, %v6133_v37, %v2372_v42  ;;  %v2508_v59 = vld [vmem:[#allocation4 + $0x78] sm:$0xf] }
 0x65d   : > { %v2377_v4 = vsel %vm7678_vm4, %v2372_v42, %v7892_v57  ;;  %2380 = vst [vmem:[#allocation4 + $0xc8] sm:$0xf] %v2376_v21  ;;  %v2509_v34 = vld [vmem:[#allocation4 + $0x150] sm:$0xf]  ;;  %vm7681_vm4 = vcmask 252928   ;;  %v2534_v32 = vpack.c.bf16 %v2508_v59, %v2508_v59 }
 0x65e   : > { %2575 = vmatprep.subr.bf16.mxu0 %v2513_v49  ;;  %v2409_v48 = vpop.permute.xlu0 %2408  ;;  %2381 = vst [vmem:[#allocation4 + $0x60] sm:$0xf] %v2377_v4  ;;  %v2535_v55 = vpack.c.bf16 %v2509_v34, %v2509_v34  ;;  %v2499_v49 = vld [vmem:[#allocation4 + $0x18] sm:$0xff]  ;;  %v4832_v34 = vmov 857870592  }
 0x65f   : > { %v2415_v36 = vsel %vm7893_vm9, %v2409_v48, %v6113_v61  ;;  %2576 = vmatpush1.bf16.msra.mxu0 %v2512_v6  ;;  %v2161_v12 = vpop.permute.xlu1 %2160  ;;  %v2461_v20 = vld [vmem:[#allocation4 + $0xd0] sm:$0xff]  ;;  %vm7897_vm9 = vcmask 244736   ;;  %v2705_v59 = vunpack.c.l.s4 %v4832_v34 }
 0x660   : > { %2419 = vst [vmem:[#allocation4 + $0xc8] sm:$0xf0] %v2415_v36  ;;  %v2165_v14 = vsel %vm7680_vm5, %v6163_v41, %v2161_v12  ;;  %v2166_v37 = vsel %vm7680_vm5, %v2161_v12, %v7894_v17  ;;  %v2460_v7 = vld [vmem:[#allocation4 + $0xb0] sm:$0xff]  ;;  %vm7682_vm5 = vcmask 1041408   ;;  %v2505_v23 = vld [vmem:[#allocation4 + $0x80] sm:$0xff]  ;;  %v2504_v52 = vld [vmem:[#allocation4 + $0x68] sm:$0xff] }
 0x661   : > { %2169 = vst [vmem:[#allocation4 + $0x28] sm:$0xf] %v2165_v14  ;;  %2170 = vst [vmem:[#allocation4 + $0x158] sm:$0xf] %v2166_v37  ;;  %v2558_v13 = vsel %vm7682_vm5, %v2534_v32, 0 }
 0x662   : > { %v2198_v43 = vpop.permute.xlu0 %2197 }
 0x663   : > { %v2204_v2 = vsel %vm7895_vm1, %v2198_v43, %v6143_v46  ;;  %v2463_v61 = vld [vmem:[#allocation4 + $0x48] sm:$0xff]  ;;  %v2462_v45 = vld [vmem:[#allocation4 + $0x10] sm:$0xff]  ;;  %v2238_v41 = vpop.permute.xlu1 %2237  ;;  %vm7684_vm1 = vcmask 375808  }
 0x664   : > { %2208 = vst [vmem:[#allocation4 + $0x28] sm:$0xf0] %v2204_v2  ;;  %v2511_v56 = vpack.c.bf16 %v2463_v61, %v2461_v20  ;;  %v2510_v27 = vpack.c.bf16 %v2462_v45, %v2460_v7  ;;  %v2242_v19 = vsel %vm7681_vm4, %v6173_v22, %v2238_v41  ;;  %v2243_v58 = vsel %vm7681_vm4, %v2238_v41, %v7896_v44  ;;  %v4191_v61 = vld [vmem:[%s7903_s22 + $0x1] ss:$8 sm:$0x3]  ;;  %v7904_v7 = vld [vmem:[#allocation27_spill] sm:$0xff] }
 0x665   : > { %2246 = vst [vmem:[#allocation4 + $0x38] sm:$0xf] %v2242_v19  ;;  %2247 = vst [vmem:[#allocation4 + $0x70] sm:$0xf] %v2243_v58  ;;  %v2507_v8 = vld [vmem:[#allocation4 + $0x60] sm:$0xff]  ;;  %vm7899_vm4 = vcmask 367616   ;;  %v2706_v2 = vunpack.c.0.s8 %v2705_v59 }
 0x666   : > { %2577 = vmatprep.subr.bf16.mxu0 %v2511_v56  ;;  %v2275_v33 = vpop.permute.xlu0 %2274  ;;  %v2533_v15 = vpack.c.bf16 %v2507_v8, %v2505_v23  ;;  %v4206_v56 = vld [vmem:[%s7903_s22 + $0x5] ss:$8 sm:$0x3]  ;;  %v7909_v58 = vmov 0.0  }
 0x667   : > { %v2281_v46 = vsel %vm7897_vm9, %v2275_v33, %v6153_v1  ;;  %2578 = vmatpush1.bf16.msra.mxu0 %v2510_v27  ;;  %v2027_v22 = vpop.permute.xlu1 %2026  ;;  %v2506_v9 = vld [vmem:[#allocation4 + $0xc8] sm:$0xff]  ;;  %vm1876_vm9 = vcmask 482304   ;;  %v6483_v45 = vsub.s32 %v2706_v2, %v7904_v7 }
 0x668   : > { %2285 = vst [vmem:[#allocation4 + $0x38] sm:$0xf0] %v2281_v46  ;;  %4184 = vmatprep.subr.msk.bf16.mxu0 %vm7682_vm5, %v2535_v55  ;;  %v2031_v16 = vsel %vm7684_vm1, %v6217_v26, %v2027_v22  ;;  %v2032_v5 = vsel %vm7684_vm1, %v2027_v22, %v7898_v39  ;;  %v2532_v26 = vpack.c.bf16 %v2506_v9, %v2504_v52  ;;  %v2501_v28 = vld [vmem:[#allocation4 + $0x158] sm:$0xff]  ;;  %vm1953_vm5 = vcmask 465920  }
 0x669   : > { %2035 = vst [vmem:[#allocation4 + $0x98] sm:$0xf] %v2031_v16  ;;  %2036 = vst [vmem:[#allocation4 + $0x30] sm:$0xf] %v2032_v5  ;;  %v6495_v41 = vrot.slane %v4191_v61, %v6483_v45  ;;  %v6502_v19 = vrot.slane %v4206_v56, %v6483_v45  ;;  %vm7910_vm1 = vcmask 1043456  }
 0x66a   : > { %v2064_v47 = vpop.permute.xlu0 %2063 }
 0x66b   : > { %v2070_v1 = vsel %vm7899_vm4, %v2064_v47, %v6183_v10  ;;  %2586 = vmatpush2.bf16.msra.mxu0 %v2558_v13  ;;  %v1873_v18 = vpop.permute.xlu1 %1872  ;;  %vm7901_vm4 = vcmask 351232   ;;  %v2500_v35 = vld [vmem:[#allocation4 + $0x28] sm:$0xff]  ;;  %2738 = vrot.lane.b32.xlu0 %v6495_v41, %s7906_s0  ;;  %s7915_s0 = smov 17  }
 0x66c   : > { %2074 = vst [vmem:[#allocation4 + $0x98] sm:$0xf0] %v2070_v1  ;;  %2587 = vmatprep.subr.bf16.mxu0 %v2533_v15  ;;  %v1877_v50 = vsel %vm1876_vm9, %v6247_v11, %v1873_v18  ;;  %v1878_v3 = vsel %vm1876_vm9, %v1873_v18, %v7900_v30  ;;  %v2503_v60 = vld [vmem:[#allocation4 + $0x70] sm:$0xff]  ;;  %v7902_v11 = vld [vmem:[#allocation63_spill] sm:$0xff] }
 0x66d   : > { %1881 = vst [vmem:[#allocation4 + $0x50] sm:$0xf] %v1877_v50  ;;  %1882 = vst [vmem:[#allocation4] sm:$0xf] %v1878_v3  ;;  %v2531_v29 = vpack.c.bf16 %v2503_v60, %v2501_v28 }
 0x66e   : > { %v2121_v0 = vpop.permute.xlu0 %2120 }
 0x66f   : > { %v2127_v10 = vsel %vm7901_vm4, %v2121_v0, %v6205_v40  ;;  %2588 = vmatpush2.bf16.msra.mxu0 %v2532_v26  ;;  %v2502_v54 = vld [vmem:[#allocation4 + $0x38] sm:$0xff]  ;;  %v1950_v38 = vpop.permute.xlu1 %1949  ;;  %vm2606_vm4 = vcmask 845216   ;;  %v4833_v26 = vmov 1966171168  }
 0x670   : > { %2131 = vst [vmem:[#allocation4 + $0x188] sm:$0xf0] %v2127_v10  ;;  %v2530_v25 = vpack.c.bf16 %v2502_v54, %v2500_v35  ;;  %2589 = vmatprep.subr.bf16.mxu0 %v2531_v29  ;;  %v1955_v62 = vsel %vm1953_vm5, %v1950_v38, %v7902_v11  ;;  %v2497_v31 = vld [vmem:[#allocation4 + $0x30] sm:$0xff]  ;;  %2607 = vst.msk [vmem:[#allocation3 + $0x4] sm:$0x3] %vm2606_vm4, %v7909_v58  ;;  %v2629_v50 = vunpack.c.l.s4 %v4833_v26 }
 0x671   : > { %1959 = vst [vmem:[#allocation4 + $0xc0] sm:$0xf] %v1955_v62  ;;  %v2529_v40 = vpack.c.bf16 %v2499_v49, %v2497_v31  ;;  %vm7913_vm4 = vmmov %vm7910_vm1 }
 0x672   : > { %v1910_v53 = vpop.permute.xlu0 %1909  ;;  %v2630_v54 = vunpack.c.0.s8 %v2629_v50 }
 0x673   : > { %v1916_v6 = vsel %vm7686_vm2, %v1910_v53, %v6227_v51  ;;  %2590 = vmatpush2.bf16.msra.mxu0 %v2530_v25  ;;  %v1948_v42 = vpop.permute.xlu1 %1947  ;;  %v2496_v48 = vld [vmem:[#allocation4 + $0x98] sm:$0xff] }
 0x674   : > { %1920 = vst [vmem:[#allocation4 + $0x50] sm:$0xf0] %v1916_v6  ;;  %2591 = vmatprep.subr.bf16.mxu0 %v2529_v40  ;;  %v1954_v21 = vsel %vm1953_vm5, %v1948_v42, %v1950_v38  ;;  %v2493_v14 = vld [vmem:[#allocation4] sm:$0xff]  ;;  %vm2604_vm5 = vcmask 418816  }
 0x675   : > { %1958 = vst [vmem:[#allocation4 + $0x8] sm:$0xf] %v1954_v21  ;;  %2605 = vst.msk [vmem:[#allocation3] sm:$0x3] %vm2604_vm5, %v7909_v58  ;;  %v2633_v21 = vsub.s32 %v2630_v54, %v7904_v7  ;;  %v2785_v54 = vstv %s6633_s30  ;;  %s6678_s30 = sld [smem:[#allocation12 + $0x19]] }
 0x676   : > { %v1987_v57 = vpop.permute.xlu0 %1986  ;;  %vm7912_vm5 = vmmov %vm7910_vm1 }
 0x677   : > { %v1993_v4 = vsel %vm7685_vm10, %v1987_v57, %v6237_v24  ;;  %v2498_v36 = vld [vmem:[#allocation4 + $0x188] sm:$0xff]  ;;  %v4195_v24 = vld [vmem:[%s7903_s22 + $0x2] ss:$8 sm:$0x3]  ;;  %vm7911_vm10 = vmmov %vm7910_vm1 }
 0x678   : > { %1997 = vst [vmem:[#allocation4 + $0x8] sm:$0xf0] %v1993_v4  ;;  %v2528_v12 = vpack.c.bf16 %v2498_v36, %v2496_v48  ;;  %v2495_v17 = vld [vmem:[#allocation4 + $0xc0] sm:$0xff]  ;;  %v6492_v27 = vrot.slane %v4195_v24, %v6483_v45 }
 0x679   : > { %v2527_v51 = vpack.c.bf16 %v2495_v17, %v2493_v14  ;;  %v2702_v14 = vld [vmem:[%s7903_s22] ss:$8 sm:$0x3] }
 0x67a   : > { %2592 = vmatpush2.bf16.msra.mxu0 %v2528_v12  ;;  %2771 = vrot.lane.b32.xlu1 %v6492_v27, %s7905_s25  ;;  %s7914_s25 = smov 52  }
 0x67b   : > { %2593 = vmatprep.subr.bf16.mxu0 %v2527_v51  ;;  %v2492_v37 = vld [vmem:[#allocation4 + $0x50] sm:$0xff] }
 0x67e   : > { %2855 = vrot.lane.b32.xlu1 %v6502_v19, %s7907_s10  ;;  %s7916_s10 = smov 7  }
 0x67f   : > { %v2494_v43 = vld [vmem:[#allocation4 + $0x8] sm:$0xff] }
 0x680   : > { %v2526_v20 = vpack.c.bf16 %v2494_v43, %v2492_v37  ;;  %v2540_v33 = vpop.permute.xlu1 %2539  ;;  %v4210_v37 = vld [vmem:[%s7903_s22 + $0x6] ss:$8 sm:$0x3] }
 0x681   : > { %v6536_v34 = vrot.slane %v4210_v37, %v6483_v45 }
 0x682   : > { %2594 = vmatpush2.bf16.msra.mxu0 %v2526_v20  ;;  %v2710_v20 = vrot.slane %v2702_v14, %v6483_v45 }
 0x685   : > { %2596 = vmatmul.mubr.bf16.vlgmr.msra.gmra.mxu0 %v6313_v63  ;;  %v4202_v63 = vld [vmem:[%s7903_s22 + $0x4] ss:$8 sm:$0x3]  ;;  %s7919_s22 = smov 22  }
 0x686   : > { %v6505_v44 = vrot.slane %v4202_v63, %v6483_v45  ;;  %v7948_v45 = vlaneseq }
 0x688   : > { %2822 = vrot.lane.b32.xlu0 %v6505_v44, %s7908_s13  ;;  %s7917_s13 = smov 19  }
 0x6dd   : > { %v6599_v2 = vpop.permute.xlu0 %2738 }
 0x6ec   : > { %v6597_v59 = vpop.permute.xlu1 %2771 }
 0x6f0   : > { %v6601_v24 = vpop.permute.xlu1 %2855 }
 0x6fa   : > { %v6603_v61 = vpop.permute.xlu0 %2822 }
 0x745   : > { %v2597_v55 = vpop.f32.mrf.mxu0 }
 0x746   : > { %v6513_v32 = vadd.f32 %v2597_v55, %v2540_v33 }
 0x747   : > { %v2599_v46 = vpop.f32.mrf.mxu0 }
 0x748   : > { %v2608_v8 = vsel %vm7910_vm1, %v6513_v32, 0.0  ;;  %v2652_v22 = vsel %vm7911_vm10, %v6513_v32, -inf  ;;  %v6519_v23 = vadd.f32 %v2599_v46, %v2540_v33  ;;  %vm2648_vm10 = vcmp.ge.s32.totalorder %v7948_v45, 52 }
 0x749   : > { %v2609_v16 = vrot.slane %v2608_v8, 4  ;;  %v2653_v39 = vrot.slane %v2652_v22, 4  ;;  %v2601_v5 = vpop.f32.mrf.mxu0  ;;  %vm2649_vm1 = vcmp.lt.s32.totalorder %v7948_v45, 308 }
 0x74a   : > { %v2615_v47 = vsel %vm7912_vm5, %v6519_v23, 0.0  ;;  %v2659_v13 = vsel %vm7913_vm4, %v6519_v23, -inf  ;;  %vm2650_vm5 = vmand %vm2648_vm10, %vm2649_vm1  ;;  %vm7949_vm4 = vcmask 424960   ;;  %vm7952_vm10 = vcmask 15360  }
 0x74b   : > { %v2610_v15 = vadd.f32 %v2609_v16, %v2608_v8  ;;  %v2654_v9 = vmax.f32 %v2652_v22, %v2653_v39  ;;  %v2616_v1 = vrot.slane %v2615_v47, 4  ;;  %v2660_v52 = vrot.slane %v2659_v13, 4  ;;  %v2602_v18 = vpop.f32.mrf.mxu0  ;;  %vm7950_vm2 = vmmov %vm7949_vm4 }
 0x74c   : > { %vm7953_vm1 = vcmask 138240  }
 0x74d   : > { %v2611_v30 = vrot.slane %v2610_v15, 2  ;;  %v2655_v3 = vrot.slane %v2654_v9, 2  ;;  %v2617_v0 = vadd.f32 %v2616_v1, %v2615_v47  ;;  %v2661_v28 = vmax.f32 %v2659_v13, %v2660_v52 }
 0x74f   : > { %v2612_v60 = vadd.f32 %v2611_v30, %v2610_v15  ;;  %v2656_v10 = vmax.f32 %v2654_v9, %v2655_v3  ;;  %v2618_v29 = vrot.slane %v2617_v0, 2  ;;  %v2662_v35 = vrot.slane %v2661_v28, 2 }
 0x750   : > { %v2788_v30 = vstv %s6625_s4  ;;  %s6673_s4 = sld [smem:[#allocation12 + $0x12]] }
 0x751   : > { %v2613_v25 = vrot.slane %v2612_v60, 1  ;;  %v2657_v38 = vrot.slane %v2656_v10, 1  ;;  %v2619_v11 = vadd.f32 %v2618_v29, %v2617_v0  ;;  %v2663_v62 = vmax.f32 %v2661_v28, %v2662_v35 }
 0x753   : > { %v2614_v53 = vadd.f32 %v2613_v25, %v2612_v60  ;;  %v2620_v31 = vrot.slane %v2619_v11, 1  ;;  %v2664_v49 = vrot.slane %v2663_v62, 1  ;;  %v2658_v6 = vmax.f32 %v2656_v10, %v2657_v38 }
 0x754   : > { %v2975_v60 = vstv %s6627_s8  ;;  %v2773_v10 = vrot.slane %v6597_v59, 6  ;;  %s6731_s8 = sld [smem:[#allocation12 + $0x1b]] }
 0x755   : > { %v2621_v40 = vadd.f32 %v2620_v31, %v2619_v11  ;;  %v2665_v42 = vmax.f32 %v2663_v62, %v2664_v49  ;;  %v2623_v57 = vmul.f32 0.25, %v2614_v53  ;;  %v2930_v11 = vstv %s6635_s19  ;;  %s6702_s19 = sld [smem:[#allocation12 + $0x16]] }
 0x756   : > { %v2740_v53 = vrot.slane %v6599_v2, 6  ;;  %v2902_v31 = vstv %s6639_s3  ;;  %s6688_s3 = sld [smem:[#allocation12 + $0xc]] }
 0x757   : > { %v2624_v4 = vmul.f32 0.25, %v2621_v40  ;;  %v2668_v48 = vcombine.low %v2658_v6, %v2665_v42  ;;  %v2954_v42 = vstv %s6641_s23  ;;  %s6696_s23 = sld [smem:[#allocation12 + $0x18]] }
 0x759   : > { %v2675_v36 = vrot.slane %v2668_v48, %v2633_v21  ;;  %v2627_v12 = vcombine.low %v2623_v57, %v2624_v4 }
 0x75b   : > { %v2682_v17 = vrot.slane %v2675_v36, %v2633_v21  ;;  %v2634_v51 = vrot.slane %v2627_v12, %v2633_v21 }
 0x75d   : > { %2683 = vrot.lane.b32.xlu1 %v2682_v17, %s7914_s25  ;;  %v2641_v43 = vrot.slane %v2634_v51, %v2633_v21 }
 0x75f   : > { %2642 = vrot.lane.b32.xlu0 %v2641_v43, %s7914_s25  ;;  %s7923_s25 = smov 35  }
 0x761   : > { %2912 = vrot.lane.b32.xlu1 %v2710_v20, %s7915_s0  ;;  %s7924_s0 = smov 34  }
 0x763   : > { %2888 = vrot.lane.b32.xlu0 %v6536_v34, %s7916_s10  ;;  %s7925_s10 = smov 38  }
 0x765   : > { %2961 = vrot.lane.b32.xlu1 %v6492_v27, %s7917_s13  ;;  %s7926_s13 = smov 37  }
 0x767   : > { %2937 = vrot.lane.b32.xlu0 %v6495_v41, %s7918_s27  ;;  %s7927_s27 = smov 49  }
 0x769   : > { %3027 = vrot.lane.b32.xlu1 %v6502_v19, %s7919_s22  ;;  %s7928_s22 = smov 39  }
 0x76b   : > { %3003 = vrot.lane.b32.xlu0 %v6505_v44, %s7920_s29  ;;  %s7929_s29 = smov 51  }
 0x76d   : > { %3075 = vrot.lane.b32.xlu1 %v2710_v20, %s7921_s12  ;;  %s7930_s12 = smov 50  }
 0x76f   : > { %3051 = vrot.lane.b32.xlu0 %v6536_v34, %s7922_s15  ;;  %s7931_s15 = smov 54  }
 0x771   : > { %3124 = vrot.lane.b32.xlu1 %v6492_v27, %s7923_s25  ;;  %s7932_s25 = smov 53  }
 0x773   : > { %3100 = vrot.lane.b32.xlu0 %v6495_v41, %s7924_s0  ;;  %s7933_s0 = smov 65  }
 0x775   : > { %3190 = vrot.lane.b32.xlu1 %v6502_v19, %s7925_s10  ;;  %s7934_s10 = smov 55  }
 0x777   : > { %3166 = vrot.lane.b32.xlu0 %v6505_v44, %s7926_s13  ;;  %s7935_s13 = smov 67  }
 0x779   : > { %3238 = vrot.lane.b32.xlu1 %v2710_v20, %s7927_s27  ;;  %s7936_s27 = smov 66  }
 0x77b   : > { %3214 = vrot.lane.b32.xlu0 %v6536_v34, %s7928_s22  ;;  %s7937_s22 = smov 69  }
 0x77d   : > { %3287 = vrot.lane.b32.xlu1 %v6492_v27, %s7929_s29  ;;  %s7938_s29 = smov 1  }
 0x77f   : > { %3263 = vrot.lane.b32.xlu0 %v6495_v41, %s7930_s12  ;;  %s7939_s12 = smov 70  }
 0x781   : > { %3353 = vrot.lane.b32.xlu1 %v6502_v19, %s7931_s15  ;;  %s7940_s15 = smov 85  }
 0x783   : > { %3329 = vrot.lane.b32.xlu0 %v6505_v44, %s7932_s25  ;;  %s7941_s25 = smov 71  }
 0x785   : > { %3401 = vrot.lane.b32.xlu1 %v2710_v20, %s7933_s0  ;;  %s7942_s0 = smov 86  }
 0x787   : > { %3377 = vrot.lane.b32.xlu0 %v6536_v34, %s7934_s10  ;;  %s7943_s10 = smov 81  }
 0x789   : > { %3450 = vrot.lane.b32.xlu1 %v6492_v27, %s7935_s13  ;;  %s7944_s13 = smov 87  }
 0x78b   : > { %3426 = vrot.lane.b32.xlu0 %v6495_v41, %s7936_s27  ;;  %s7945_s27 = smov 82  }
 0x78d   : > { %3492 = vrot.lane.b32.xlu1 %v6505_v44, %s7937_s22  ;;  %s7946_s22 = smov 97  }
 0x78f   : > { %2711 = vrot.lane.b32.xlu0 %v2710_v20, %s7938_s29  ;;  %s7947_s29 = smov 83  }
 0x791   : > { %3516 = vrot.lane.b32.xlu1 %v6502_v19, %s7939_s12  ;;  %s6611_s12 = sld [smem:[#allocation12 + $0x4]] }
 0x793   : > { %3655 = vrot.lane.b32.xlu0 %v6505_v44, %s7940_s15  ;;  %s6613_s15 = sld [smem:[#allocation12 + $0x5]] }
 0x795   : > { %3540 = vrot.lane.b32.xlu1 %v6536_v34, %s7941_s25  ;;  %s6615_s25 = sld [smem:[#allocation12 + $0x2]] }
 0x797   : > { %3679 = vrot.lane.b32.xlu0 %v6502_v19, %s7942_s0  ;;  %s4189_s0 = sld [smem:[#allocation12 + $0x3]]  ;;  %v2752_v1 = vstv %s6611_s12 }
 0x798   : > { %s6667_s12 = sld [smem:[#allocation12 + $0xd]] }
 0x799   : > { %3564 = vrot.lane.b32.xlu1 %v2710_v20, %s7943_s10  ;;  %s6617_s10 = sld [smem:[#allocation12 + $0xa]]  ;;  %v2755_v52 = vstv %s6613_s15 }
 0x79a   : > { %s6735_s15 = sld [smem:[#allocation12 + $0x20]] }
 0x79b   : > { %3703 = vrot.lane.b32.xlu0 %v6536_v34, %s7944_s13  ;;  %s6619_s13 = sld [smem:[#allocation12 + $0xb]]  ;;  %v2719_v18 = vstv %s6615_s25 }
 0x79c   : > { %s6738_s25 = sld [smem:[#allocation12 + $0x21]] }
 0x79d   : > { %3589 = vrot.lane.b32.xlu1 %v6495_v41, %s7945_s27  ;;  %s6623_s27 = sld [smem:[#allocation12 + $0x9]]  ;;  %v2722_v5 = vstv %s4189_s0 }
 0x79e   : > { %s6649_s0 = sld [smem:[#allocation12 + $0x10]] }
 0x79f   : > { %3727 = vrot.lane.b32.xlu0 %v2710_v20, %s7946_s22  ;;  %s4212_s22 = sld [smem:[#allocation12 + $0xf]]  ;;  %v2836_v3 = vstv %s6617_s10 }
 0x7a0   : > { %s6759_s10 = sld [smem:[#allocation12 + $0x26]] }
 0x7a1   : > { %3613 = vrot.lane.b32.xlu1 %v6492_v27, %s7947_s29  ;;  %s4221_s29 = sld [smem:[#allocation12 + $0x15]]  ;;  %v2839_v0 = vstv %s6619_s13 }
 0x7a2   : > { %s6744_s13 = sld [smem:[#allocation12 + $0x1e]] }
 0x7a3   : > { %v2806_v28 = vstv %s6623_s27  ;;  %s4834_s27 = smov 112  }
 0x7a5   : > { %v2905_v15 = vstv %s4212_s22  ;;  %s6753_s22 = sld [smem:[#allocation12 + $0x1f]] }
 0x7a7   : > { %v2978_v9 = vstv %s4221_s29  ;;  %s6764_s29 = sld [smem:[#allocation12 + $0x27]] }
 0x7cf   : > { %v2684_v56 = vpop.permute.xlu1 %2683 }
 0x7d0   : > { %v2685_v63 = vrot.slane %v2684_v56, 7 }
 0x7d1   : > { %v2643_v58 = vpop.permute.xlu0 %2642 }
 0x7d2   : > { %v2686_v33 = vsel %vm7949_vm4, %v2685_v63, %v2684_v56  ;;  %v2644_v55 = vrot.slane %v2643_v58, 7  ;;  %v2741_v56 = vsel %vm7952_vm10, %v2740_v53, %v6599_v2  ;;  %v2803_v63 = vstv %s6643_s14  ;;  %s6712_s14 = sld [smem:[#allocation12 + $0x1d]] }
 0x7d3   : > { %2689 = vst.msk [vmem:[#allocation3 + $0x1] ss:$2 sm:$0x7] %vm2650_vm5, %v2686_v33  ;;  %v6609_v8 = vpop.permute.xlu1 %2912  ;;  %vm7956_vm4 = vcmask 39936   ;;  %vm7959_vm10 = vcmask 48128  }
 0x7d4   : > { %v2645_v46 = vsel %vm7950_vm2, %v2644_v55, %v2643_v58  ;;  %v2914_v48 = vrot.slane %v6609_v8, 6  ;;  %vm7951_vm2 = vcmask 23552   ;;  %v2927_v55 = vstv %s6649_s0  ;;  %s6774_s0 = sld [smem:[#allocation12 + $0x25]] }
 0x7d5   : > { %2651 = vst.msk [vmem:[#allocation3] ss:$2 sm:$0x7] %vm2650_vm5, %v2645_v46  ;;  %v6629_v16 = vpop.permute.xlu0 %2888  ;;  %v2774_v45 = vsel %vm7951_vm2, %v2773_v10, %v6597_v59  ;;  %v2996_v59 = vstv %s6659_s28  ;;  %s7954_s28 = smov 101   ;;  %vm7955_vm5 = vcmask 146432   ;;  %vm7957_vm2 = vcmask 154624  }
 0x7d7   : > { %v6621_v22 = vpop.permute.xlu1 %2961 }
 0x7d9   : > { %v6651_v26 = vpop.permute.xlu0 %2937 }
 0x7da   : > { %v2939_v46 = vrot.slane %v6651_v26, 6 }
 0x7db   : > { %v6631_v39 = vpop.permute.xlu1 %3027 }
 0x7dc   : > { %v6637_v47 = vld [vmem:[#allocation3] sm:$0x3f] }
 0x7dd   : > { %v2723_v13 = vmul.f32 %v2722_v5, %v6637_v47  ;;  %v2906_v29 = vmul.f32 %v2905_v15, %v6637_v47  ;;  %v2979_v35 = vmul.f32 %v2978_v9, %v6637_v47  ;;  %v2756_v25 = vmul.f32 %v2755_v52, %v6637_v47  ;;  %v6683_v12 = vpop.permute.xlu0 %3003 }
 0x7de   : > { %v2789_v62 = vmul.f32 %v2788_v30, %v6637_v47  ;;  %v2976_v49 = vmul.f32 %v2975_v60, %v6637_v47  ;;  %v2720_v40 = vmul.f32 %v2719_v18, %v6637_v47  ;;  %v2786_v21 = vmul.f32 %v2785_v54, %v6637_v47 }
 0x7df   : > { %v6653_v50 = vpop.permute.xlu1 %3075  ;;  %v4190_v38 = vrot.slane %v2723_v13, 9  ;;  %v4222_v6 = vrot.slane %v2979_v35, 9  ;;  %v4213_v4 = vrot.slane %v2906_v29, 9  ;;  %v2931_v36 = vmul.f32 %v2930_v11, %v6637_v47 }
 0x7e0   : > { %v4198_v57 = vrot.slane %v2789_v62, 9  ;;  %v2807_v51 = vmul.f32 %v2806_v28, %v6637_v47  ;;  %v4194_v37 = vrot.slane %v2756_v25, 9  ;;  %v2903_v58 = vmul.f32 %v2902_v31, %v6637_v47 }
 0x7e1   : > { %v2984_v17 = vadd.f32 %v4222_v6, %v2976_v49  ;;  %v2728_v43 = vadd.f32 %v4190_v38, %v2720_v40  ;;  %v2753_v33 = vmul.f32 %v2752_v1, %v6637_v47  ;;  %v2915_v5 = vsel %vm7953_vm1, %v2914_v48, %v6609_v8  ;;  %v6720_v8 = vpop.permute.xlu0 %3051 }
 0x7e2   : > { %v2794_v20 = vadd.f32 %v4198_v57, %v2786_v21  ;;  %v2911_v2 = vadd.f32 %v4213_v4, %v2903_v58  ;;  %v2955_v13 = vmul.f32 %v2954_v42, %v6637_v47  ;;  %v4216_v15 = vrot.slane %v2931_v36, 9 }
 0x7e3   : > { %v6685_v14 = vpop.permute.xlu1 %3124  ;;  %2986 = vrot.lane.b32.xlu1 %v2984_v17, %s7831_s9  ;;  %s6709_s9 = sld [smem:[#allocation12 + $0x1c]]  ;;  %v2840_v9 = vmul.f32 %v2839_v0, %v6637_v47  ;;  %v4201_v1 = vrot.slane %v2807_v51, 9  ;;  %v2761_v52 = vadd.f32 %v4194_v37, %v2753_v33  ;;  %v2743_v18 = vmul.f32 %v2741_v56, %v2728_v43 }
 0x7e4   : > { %2796 = vrot.lane.b32.xlu0 %v2794_v20, %s7814_s20  ;;  %v2824_v30 = vrot.slane %v6603_v61, 6  ;;  %v2872_v28 = vstv %s6667_s12  ;;  %v2951_v60 = vstv %s6673_s4  ;;  %v2928_v10 = vmul.f32 %v2927_v55, %v6637_v47  ;;  %s6718_s20 = sld [smem:[#allocation12 + $0x1a]]  ;;  %s7958_s12 = smov 124  }
 0x7e5   : > { %v2804_v0 = vmul.f32 %v2803_v63, %v6637_v47  ;;  %v2963_v35 = vrot.slane %v6621_v22, 6  ;;  %v2940_v54 = vsel %vm7955_vm5, %v2939_v46, %v6651_v26  ;;  %v3020_v25 = vstv %s6678_s30  ;;  %v6757_v37 = vpop.permute.xlu0 %3100  ;;  %s6779_s4 = sld [smem:[#allocation12 + $0x2a]] }
 0x7e6   : > { %v2917_v38 = vmul.f32 %v2915_v5, %v2911_v2  ;;  %v4219_v11 = vrot.slane %v2955_v13, 9  ;;  %v2936_v62 = vadd.f32 %v4216_v15, %v2928_v10  ;;  %v2997_v53 = vmul.f32 %v2996_v59, %v6637_v47  ;;  %s6793_s30 = sld [smem:[#allocation12 + $0x28]] }
 0x7e7   : > { %v6722_v29 = vpop.permute.xlu1 %3190  ;;  %3818 = vrot.lane.b32.xlu1 %v6505_v44, %s7954_s28  ;;  %v4205_v44 = vrot.slane %v2840_v9, 9  ;;  %v2873_v31 = vmul.f32 %v2872_v28, %v6637_v47  ;;  %v2812_v49 = vadd.f32 %v4201_v1, %v2804_v0  ;;  %v2776_v26 = vmul.f32 %v2774_v45, %v2761_v52  ;;  %s6837_s28 = sld [smem:[#allocation12 + $0x32]] }
 0x7e8   : > { %2745 = vrot.lane.b32.xlu0 %v2743_v18, %s7809_s17  ;;  %v2857_v6 = vrot.slane %v6601_v24, 6  ;;  %v2825_v40 = vsel %vm7956_vm4, %v2824_v30, %v6603_v61  ;;  %v2952_v42 = vmul.f32 %v2951_v60, %v6637_v47  ;;  %v2837_v21 = vmul.f32 %v2836_v3, %v6637_v47 }
 0x7e9   : > { %v2869_v57 = vstv %s6688_s3  ;;  %v2964_v4 = vsel %vm7957_vm2, %v2963_v35, %v6621_v22  ;;  %v2993_v48 = vstv %s6702_s19  ;;  %v2942_v61 = vmul.f32 %v2940_v54, %v2936_v62  ;;  %v6791_v28 = vpop.permute.xlu0 %3166  ;;  %s6798_s3 = sld [smem:[#allocation12 + $0x29]] }
 0x7ea   : > { %v2960_v36 = vadd.f32 %v4219_v11, %v2952_v42  ;;  %v3021_v17 = vmul.f32 %v3020_v25, %v6637_v47  ;;  %v4225_v51 = vrot.slane %v2997_v53, 9  ;;  %v4209_v43 = vrot.slane %v2873_v31, 9  ;;  %s6810_s19 = sld [smem:[#allocation12 + $0x2c]] }
 0x7eb   : > { %2919 = vrot.lane.b32.xlu1 %v2917_v38, %s4834_s27  ;;  %v6761_v3 = vpop.permute.xlu1 %3238  ;;  %v2845_v22 = vadd.f32 %v4205_v44, %v2837_v21  ;;  %v2827_v20 = vmul.f32 %v2825_v40, %v2812_v49  ;;  %v3005_v45 = vrot.slane %v6683_v12, 6  ;;  %v2890_v56 = vrot.slane %v6629_v16, 6  ;;  %s6844_s27 = sld [smem:[#allocation12 + $0x33]] }
 0x7ec   : > { %2778 = vrot.lane.b32.xlu0 %v2776_v26, %s7846_s6  ;;  %v2994_v63 = vmul.f32 %v2993_v48, %v6637_v47  ;;  %s6768_s6 = sld [smem:[#allocation12 + $0x24]]  ;;  %v2870_v58 = vmul.f32 %v2869_v57, %v6637_v47  ;;  %v3017_v33 = vstv %s6696_s23  ;;  %v3044_v55 = vstv %s6731_s8  ;;  %s7965_s8 = smov 98  }
 0x7ed   : > { %v2858_v46 = vsel %vm7959_vm10, %v2857_v6, %v6601_v24  ;;  %v2966_v59 = vmul.f32 %v2964_v4, %v2960_v36  ;;  %v4228_v2 = vrot.slane %v3021_v17, 9  ;;  %v3029_v9 = vrot.slane %v6631_v39, 6  ;;  %s6802_s23 = sld [smem:[#allocation12 + $0x2e]]  ;;  %v6819_v44 = vpop.permute.xlu0 %3214 }
 0x7ee   : > { %v3002_v5 = vadd.f32 %v4225_v51, %v2994_v63  ;;  %v2878_v13 = vadd.f32 %v4209_v43, %v2870_v58  ;;  %v2860_v15 = vmul.f32 %v2858_v46, %v2845_v22  ;;  %vm7960_vm1 = vcmask 171008  }
 0x7ef   : > { %2944 = vrot.lane.b32.xlu1 %v2942_v61, %s7843_s1  ;;  %v3006_v1 = vsel %vm7960_vm1, %v3005_v45, %v6683_v12  ;;  %s6784_s1 = sld [smem:[#allocation12 + $0x2b]]  ;;  %vm7961_vm5 = vcmask 56320   ;;  %v3018_v24 = vmul.f32 %v3017_v33, %v6637_v47  ;;  %v3068_v18 = vstv %s6712_s14  ;;  %v6795_v60 = vpop.permute.xlu1 %3287 }
 0x7f0   : > { %2829 = vrot.lane.b32.xlu0 %v2827_v20, %s7958_s12  ;;  %v2891_v52 = vsel %vm7961_vm5, %v2890_v56, %v6629_v16  ;;  %v3045_v30 = vmul.f32 %v3044_v55, %v6637_v47  ;;  %v3008_v16 = vmul.f32 %v3006_v1, %v3002_v5  ;;  %v3041_v10 = vstv %s6718_s20  ;;  %s6813_s14 = sld [smem:[#allocation12 + $0x2d]] }
 0x7f1   : > { %v3026_v12 = vadd.f32 %v4228_v2, %v3018_v24  ;;  %v2893_v0 = vmul.f32 %v2891_v52, %v2878_v13  ;;  %vm7962_vm4 = vcmask 179200   ;;  %v3069_v54 = vmul.f32 %v3068_v18, %v6637_v47  ;;  %s6821_s20 = sld [smem:[#allocation12 + $0x34]]  ;;  %v6856_v63 = vpop.permute.xlu0 %3263 }
 0x7f2   : > { %v3030_v35 = vsel %vm7962_vm4, %v3029_v9, %v6631_v39  ;;  %v3053_v25 = vrot.slane %v6720_v8, 6  ;;  %v4231_v38 = vrot.slane %v3045_v30, 9  ;;  %v3065_v62 = vstv %s6709_s9  ;;  %s6830_s9 = sld [smem:[#allocation12 + $0x35]] }
 0x7f3   : > { %2968 = vrot.lane.b32.xlu1 %v2966_v59, %s7781_s2  ;;  %s6808_s2 = sld [smem:[#allocation12 + $0x2f]]  ;;  %v3032_v11 = vmul.f32 %v3030_v35, %v3026_v12  ;;  %v3042_v39 = vmul.f32 %v3041_v10, %v6637_v47  ;;  %v3093_v53 = vstv %s6753_s22  ;;  %v6823_v31 = vpop.permute.xlu1 %3353  ;;  %v4234_v49 = vrot.slane %v3069_v54, 9 }
 0x7f4   : > { %2862 = vrot.lane.b32.xlu0 %v2860_v15, %s7795_s5  ;;  %s7963_s5 = smov 108   ;;  %vm7964_vm2 = vcmask 187392   ;;  %v3077_v6 = vrot.slane %v6653_v50, 6  ;;  %v3066_v42 = vmul.f32 %v3065_v62, %v6637_v47  ;;  %v3114_v21 = vstv %s6735_s15  ;;  %s6858_s15 = sld [smem:[#allocation12 + $0x39]] }
 0x7f5   : > { %v3054_v26 = vsel %vm7964_vm2, %v3053_v25, %v6720_v8  ;;  %v3050_v40 = vadd.f32 %v4231_v38, %v3042_v39  ;;  %v3094_v57 = vmul.f32 %v3093_v53, %v6637_v47  ;;  %v3159_v4 = vstv %s6774_s0  ;;  %s6874_s22 = sld [smem:[#allocation12 + $0x31]]  ;;  %s4835_s0 = smov 96   ;;  %v6895_v38 = vpop.permute.xlu0 %3329 }
 0x7f6   : > { %v3117_v48 = vstv %s6738_s25  ;;  %v3090_v36 = vstv %s6744_s13  ;;  %v3180_v61 = vstv %s6759_s10  ;;  %v3074_v17 = vadd.f32 %v4234_v49, %v3066_v42  ;;  %s7967_s25 = smov 99   ;;  %s6868_s13 = sld [smem:[#allocation12 + $0x22]] }
 0x7f7   : > { %3010 = vrot.lane.b32.xlu1 %v3008_v16, %s7963_s5  ;;  %v3056_v8 = vmul.f32 %v3054_v26, %v3050_v40  ;;  %v3183_v51 = vstv %s6764_s29  ;;  %v3156_v43 = vstv %s6768_s6  ;;  %v3228_v22 = vstv %s6779_s4  ;;  %v6860_v58 = vpop.permute.xlu1 %3401  ;;  %s7969_s29 = smov 102   ;;  %s6889_s6 = sld [smem:[#allocation12 + $0x37]] }
 0x7f8   : > { %2895 = vrot.lane.b32.xlu0 %v2893_v0, %s7839_s7  ;;  %s6827_s7 = sld [smem:[#allocation12 + $0x23]]  ;;  %vm7966_vm10 = vcmask 269312   ;;  %v3160_v45 = vmul.f32 %v3159_v4, %v6637_v47  ;;  %v3231_v56 = vstv %s6784_s1  ;;  %v3118_v33 = vmul.f32 %v3117_v48, %v6637_v47  ;;  %s7972_s5 = smov 103  }
 0x7f9   : > { %v3078_v20 = vsel %vm7966_vm10, %v3077_v6, %v6653_v50  ;;  %v4237_v55 = vrot.slane %v3094_v57, 9  ;;  %v3204_v50 = vstv %s6793_s30  ;;  %v3207_v46 = vstv %s6798_s3  ;;  %s6897_s12 = sld [smem:[#allocation12 + $0x3c]]  ;;  %s7979_s4 = smov 91  }
 0x7fa   : > { %v3277_v59 = vstv %s6802_s23  ;;  %v3280_v2 = vstv %s6808_s2  ;;  %v3253_v5 = vstv %s6810_s19  ;;  %v3256_v13 = vstv %s6813_s14  ;;  %s6904_s30 = sld [smem:[#allocation12 + $0x3d]]  ;;  %s7982_s2 = smov 77  }
 0x7fb   : > { %3034 = vrot.lane.b32.xlu1 %v3032_v11, %s7835_s16  ;;  %s6849_s16 = sld [smem:[#allocation12 + $0x38]]  ;;  %v3080_v15 = vmul.f32 %v3078_v20, %v3074_v17  ;;  %v3091_v9 = vmul.f32 %v3090_v36, %v6637_v47  ;;  %v3168_v1 = vrot.slane %v6791_v28, 6  ;;  %v3126_v24 = vrot.slane %v6685_v14, 6 }
 0x7fc   : > { %3752 = vrot.lane.b32.xlu0 %v6495_v41, %s7965_s8  ;;  %v3102_v41 = vrot.slane %v6757_v37, 6  ;;  %vm7968_vm1 = vcmask 277504   ;;  %v4246_v18 = vrot.slane %v3160_v45, 9  ;;  %v3208_v30 = vmul.f32 %v3207_v46, %v6637_v47  ;;  %s6910_s3 = sld [smem:[#allocation12 + $0x3a]] }
 0x7fd   : > { %v4240_v12 = vrot.slane %v3118_v33, 9  ;;  %v3099_v16 = vadd.f32 %v4237_v55, %v3091_v9  ;;  %v3343_v10 = vstv %s6821_s20  ;;  %v3346_v0 = vstv %s6830_s9  ;;  %s6918_s14 = sld [smem:[#allocation12 + $0x30]]  ;;  %v6930_v33 = vpop.permute.xlu0 %3377  ;;  %s4836_s20 = smov 80  }
 0x7fe   : > { %v3141_v52 = vstv %s6827_s7  ;;  %v3115_v35 = vmul.f32 %v3114_v21, %v6637_v47  ;;  %v3319_v54 = vstv %s6837_s28  ;;  %v3322_v25 = vstv %s6844_s27  ;;  %s6921_s7 = sld [smem:[#allocation12 + $0x3b]] }
 0x7ff   : > { %3058 = vrot.lane.b32.xlu1 %v3056_v8, %s7758_s26  ;;  %s6883_s26 = sld [smem:[#allocation12 + $0x36]]  ;;  %vm7970_vm5 = vcmask 302080   ;;  %v3216_v39 = vrot.slane %v6819_v44, 6  ;;  %v3142_v53 = vmul.f32 %v3141_v52, %v6637_v47  ;;  %vm7971_vm4 = vcmask 285696  }
 0x800   : > { %3776 = vrot.lane.b32.xlu0 %v6492_v27, %s7967_s25  ;;  %v3103_v27 = vsel %vm7968_vm1, %v3102_v41, %v6757_v37  ;;  %v3157_v37 = vmul.f32 %v3156_v43, %v6637_v47  ;;  %v3169_v62 = vsel %vm7970_vm5, %v3168_v1, %v6791_v28  ;;  %v3127_v49 = vsel %vm7971_vm4, %v3126_v24, %v6685_v14  ;;  %s6939_s9 = sld [smem:[#allocation12 + $0x40]]  ;;  %s7986_s25 = smov 78  }
 0x801   : > { %v3105_v11 = vmul.f32 %v3103_v27, %v3099_v16  ;;  %v4252_v6 = vrot.slane %v3208_v30, 9  ;;  %v3257_v40 = vmul.f32 %v3256_v13, %v6637_v47  ;;  %v3123_v28 = vadd.f32 %v4240_v12, %v3115_v35  ;;  %s6947_s8 = sld [smem:[#allocation12 + $0x41]] }
 0x802   : > { %v3165_v26 = vadd.f32 %v4246_v18, %v3157_v37  ;;  %v3184_v42 = vmul.f32 %v3183_v51, %v6637_v47  ;;  %v3391_v21 = vstv %s6849_s16  ;;  %v3394_v57 = vstv %s6858_s15  ;;  %s6972_s10 = sld [smem:[#allocation12 + $0x43]]  ;;  %s7985_s16 = smov 75  }
 0x803   : > { %3842 = vrot.lane.b32.xlu1 %v6502_v19, %s7969_s29  ;;  %v6899_v19 = vpop.permute.xlu1 %3450  ;;  %v3205_v4 = vmul.f32 %v3204_v50, %v6637_v47  ;;  %v3138_v8 = vstv %s6868_s13  ;;  %v3304_v48 = vstv %s6874_s22  ;;  %vm7973_vm2 = vcmask 318464   ;;  %s7000_s1 = sld [smem:[#allocation12 + $0x3f]]  ;;  %s4837_s29 = smov 64  }
 0x804   : > { %3082 = vrot.lane.b32.xlu0 %v3080_v15, %s4835_s0  ;;  %v3171_v14 = vmul.f32 %v3169_v62, %v3165_v26  ;;  %v3217_v36 = vsel %vm7973_vm2, %v3216_v39, %v6819_v44  ;;  %v3265_v17 = vrot.slane %v6856_v63, 6  ;;  %v4243_v51 = vrot.slane %v3142_v53, 9  ;;  %v6970_v39 = vpop.permute.xlu0 %3426  ;;  %s7011_s23 = sld [smem:[#allocation12 + $0x4f]]  ;;  %s7989_s0 = smov 76  }
 0x805   : > { %v3192_v43 = vrot.slane %v6722_v29, 6  ;;  %v3213_v20 = vadd.f32 %v4252_v6, %v3205_v4  ;;  %v4258_v41 = vrot.slane %v3257_v40, 9  ;;  %v3367_v45 = vstv %s6883_s26  ;;  %s7020_s19 = sld [smem:[#allocation12 + $0x49]] }
 0x806   : > { %v4249_v50 = vrot.slane %v3184_v42, 9  ;;  %v3232_v44 = vmul.f32 %v3231_v56, %v6637_v47  ;;  %v3370_v46 = vstv %s6889_s6  ;;  %v3139_v13 = vmul.f32 %v3138_v8, %v6637_v47  ;;  %s7029_s27 = sld [smem:[#allocation12 + $0x44]] }
 0x807   : > { %3866 = vrot.lane.b32.xlu1 %v6536_v34, %s7972_s5  ;;  %v3129_v34 = vmul.f32 %v3127_v49, %v3123_v28  ;;  %v6932_v55 = vpop.permute.xlu1 %3492  ;;  %v3219_v15 = vmul.f32 %v3217_v36, %v3213_v20  ;;  %v3254_v9 = vmul.f32 %v3253_v5, %v6637_v47  ;;  %v3440_v1 = vstv %s6897_s12  ;;  %s7035_s15 = sld [smem:[#allocation12 + $0x47]]  ;;  %s7992_s5 = smov 62  }
 0x808   : > { %3107 = vrot.lane.b32.xlu0 %v3105_v11, %s7853_s21  ;;  %s7974_s21 = smov 92   ;;  %v3305_v52 = vmul.f32 %v3304_v48, %v6637_v47  ;;  %v3181_v56 = vmul.f32 %v3180_v61, %v6637_v47  ;;  %vm7975_vm10 = vcmask 408576   ;;  %v3443_v27 = vstv %s6904_s30  ;;  %s7040_s28 = sld [smem:[#allocation12 + $0x48]] }
 0x809   : > { %v3266_v24 = vsel %vm7975_vm10, %v3265_v17, %v6856_v63  ;;  %v3147_v18 = vadd.f32 %v4243_v51, %v3139_v13  ;;  %vm7976_vm1 = vcmask 310272   ;;  %v3240_v5 = vrot.slane %v6761_v3, 6  ;;  %s7046_s13 = sld [smem:[#allocation12 + $0x3e]] }
 0x80a   : > { %v3193_v30 = vsel %vm7976_vm1, %v3192_v43, %v6722_v29  ;;  %v3262_v12 = vadd.f32 %v4258_v41, %v3254_v9  ;;  %v3347_v16 = vmul.f32 %v3346_v0, %v6637_v47  ;;  %v3189_v35 = vadd.f32 %v4249_v50, %v3181_v56  ;;  %v7009_v50 = vpop.permute.xlu0 %2711  ;;  %s7059_s22 = sld [smem:[#allocation12 + $0x4d]] }
 0x80b   : > { %3173 = vrot.lane.b32.xlu1 %v3171_v14, %s7974_s21  ;;  %v4255_v61 = vrot.slane %v3232_v44, 9  ;;  %v3281_v37 = vmul.f32 %v3280_v2, %v6637_v47  ;;  %v3301_v63 = vstv %s6918_s14  ;;  %v3416_v29 = vstv %s6910_s3  ;;  %v6974_v0 = vpop.permute.xlu1 %3516  ;;  %s7068_s26 = sld [smem:[#allocation12 + $0x51]]  ;;  %s7993_s14 = smov 74  }
 0x80c   : > { %3131 = vrot.lane.b32.xlu0 %v3129_v34, %s7827_s18  ;;  %s6964_s18 = sld [smem:[#allocation12 + $0x42]]  ;;  %v3268_v11 = vmul.f32 %v3266_v24, %v3262_v12  ;;  %v3419_v62 = vstv %s6921_s7  ;;  %v4264_v53 = vrot.slane %v3305_v52, 9  ;;  %v3195_v49 = vmul.f32 %v3193_v30, %v3189_v35 }
 0x80d   : > { %v3229_v2 = vmul.f32 %v3228_v22, %v6637_v47  ;;  %v3289_v26 = vrot.slane %v6795_v60, 6  ;;  %v3355_v6 = vrot.slane %v6823_v31, 6  ;;  %vm7977_vm5 = vcmask 400384   ;;  %s7071_s6 = sld [smem:[#allocation12 + $0x46]] }
 0x80e   : > { %v3241_v40 = vsel %vm7977_vm5, %v3240_v5, %v6761_v3  ;;  %v4270_v28 = vrot.slane %v3347_v16, 9  ;;  %v3395_v42 = vmul.f32 %v3394_v57, %v6637_v47  ;;  %v3302_v14 = vmul.f32 %v3301_v63, %v6637_v47  ;;  %s7082_s12 = sld [smem:[#allocation12 + $0x4b]] }
 0x80f   : > { %3221 = vrot.lane.b32.xlu1 %v3219_v15, %s7818_s11  ;;  %s7978_s11 = smov 79   ;;  %v3237_v4 = vadd.f32 %v4255_v61, %v3229_v2  ;;  %v4261_v8 = vrot.slane %v3281_v37, 9  ;;  %v3323_v22 = vmul.f32 %v3322_v25, %v6637_v47  ;;  %v3482_v48 = vstv %s6939_s9  ;;  %v7013_v44 = vpop.permute.xlu1 %3540  ;;  %s7087_s30 = sld [smem:[#allocation12 + $0x50]] }
 0x810   : > { %3149 = vrot.lane.b32.xlu0 %v3147_v18, %s7744_s24  ;;  %s6990_s24 = sld [smem:[#allocation12 + $0x45]]  ;;  %v3278_v3 = vmul.f32 %v3277_v59, %v6637_v47  ;;  %v3344_v57 = vmul.f32 %v3343_v10, %v6637_v47  ;;  %v3485_v34 = vstv %s6947_s8  ;;  %v3310_v36 = vadd.f32 %v4264_v53, %v3302_v14  ;;  %s7995_s8 = smov 60  }
 0x811   : > { %v3243_v17 = vmul.f32 %v3241_v40, %v3237_v4  ;;  %vm7980_vm4 = vcmask 416768   ;;  %vm7981_vm2 = vcmask 441344   ;;  %v3403_v43 = vrot.slane %v6860_v58, 6  ;;  %s7095_s3 = sld [smem:[#allocation12 + $0x55]] }
 0x812   : > { %v3290_v25 = vsel %vm7980_vm4, %v3289_v26, %v6795_v60  ;;  %v3356_v51 = vsel %vm7981_vm2, %v3355_v6, %v6823_v31  ;;  %v3352_v20 = vadd.f32 %v4270_v28, %v3344_v57  ;;  %v3331_v59 = vrot.slane %v6895_v38, 6  ;;  %s7102_s7 = sld [smem:[#allocation12 + $0x4c]] }
 0x813   : > { %3270 = vrot.lane.b32.xlu1 %v3268_v11, %s7978_s11  ;;  %v4276_v10 = vrot.slane %v3395_v42, 9  ;;  %v3444_v41 = vmul.f32 %v3443_v27, %v6637_v47  ;;  %v3286_v60 = vadd.f32 %v4261_v8, %v3278_v3  ;;  %v4267_v31 = vrot.slane %v3323_v22, 9  ;;  %v7054_v11 = vpop.permute.xlu0 %3655  ;;  %v7056_v53 = vpop.permute.xlu1 %3564  ;;  %s7105_s21 = sld [smem:[#allocation12 + $0x4a]]  ;;  %s7996_s11 = smov 63  }
 0x814   : > { %3197 = vrot.lane.b32.xlu0 %v3195_v49, %s7979_s4  ;;  %v3371_v13 = vmul.f32 %v3370_v46, %v6637_v47  ;;  %v3506_v15 = vstv %s6964_s18  ;;  %v3358_v9 = vmul.f32 %v3356_v51, %v3352_v20  ;;  %v3320_v52 = vmul.f32 %v3319_v54, %v6637_v47  ;;  %s7112_s9 = sld [smem:[#allocation12 + $0x4e]]  ;;  %s7999_s4 = smov 58  }
 0x815   : > { %v3392_v56 = vmul.f32 %v3391_v21, %v6637_v47  ;;  %v3509_v24 = vstv %s6972_s10  ;;  %v3292_v27 = vmul.f32 %v3290_v25, %v3286_v60  ;;  %vm7983_vm10 = vcmask 531456   ;;  %s7118_s10 = sld [smem:[#allocation12 + $0x53]]  ;;  %s8000_s18 = smov 61  }
 0x816   : > { %v3404_v46 = vsel %vm7983_vm10, %v3403_v43, %v6860_v58  ;;  %v3379_v18 = vrot.slane %v6930_v33, 6  ;;  %v3452_v30 = vrot.slane %v6899_v19, 6  ;;  %vm7984_vm1 = vcmask 433152  }
 0x817   : > { %3312 = vrot.lane.b32.xlu1 %v3310_v36, %s7982_s2  ;;  %v3332_v54 = vsel %vm7984_vm1, %v3331_v59, %v6895_v38  ;;  %v3400_v21 = vadd.f32 %v4276_v10, %v3392_v56  ;;  %v4282_v5 = vrot.slane %v3444_v41, 9  ;;  %v3486_v12 = vmul.f32 %v3485_v34, %v6637_v47  ;;  %v7092_v51 = vpop.permute.xlu0 %3679  ;;  %v3590_v43 = vpop.permute.xlu1 %3589  ;;  %s8002_s2 = smov 47  }
 0x818   : > { %3245 = vrot.lane.b32.xlu0 %v3243_v17, %s4836_s20  ;;  %v3328_v58 = vadd.f32 %v4267_v31, %v3320_v52  ;;  %v4273_v16 = vrot.slane %v3371_v13, 9  ;;  %v3420_v35 = vmul.f32 %v3419_v62, %v6637_v47  ;;  %v3533_v61 = vstv %s6990_s24  ;;  %s7125_s24 = sld [smem:[#allocation12 + $0x54]]  ;;  %s4838_s20 = smov 48  }
 0x819   : > { %v3406_v37 = vmul.f32 %v3404_v46, %v3400_v21  ;;  %v3368_v38 = vmul.f32 %v3367_v45, %v6637_v47  ;;  %v3441_v63 = vmul.f32 %v3440_v1, %v6637_v47  ;;  %v3467_v49 = vstv %s7000_s1  ;;  %s7148_s1 = sld [smem:[#allocation12 + $0x52]] }
 0x81a   : > { %v3334_v62 = vmul.f32 %v3332_v54, %v3328_v58  ;;  %vm7987_vm5 = vcmask 449536   ;;  %vm7988_vm4 = vcmask 547840   ;;  %v3494_v45 = vrot.slane %v6932_v55, 6 }
 0x81b   : > { %3360 = vrot.lane.b32.xlu1 %v3358_v9, %s7985_s16  ;;  %v3380_v2 = vsel %vm7987_vm5, %v3379_v18, %v6930_v33  ;;  %v3453_v26 = vsel %vm7988_vm4, %v3452_v30, %v6899_v19  ;;  %v3449_v1 = vadd.f32 %v4282_v5, %v3441_v63  ;;  %v3428_v6 = vrot.slane %v6970_v39, 6  ;;  %v7122_v58 = vpop.permute.xlu0 %3703  ;;  %s8012_s16 = smov 44  }
 0x81c   : > { %3294 = vrot.lane.b32.xlu0 %v3292_v27, %s7986_s25  ;;  %v4288_v40 = vrot.slane %v3486_v12, 9  ;;  %v3534_v28 = vmul.f32 %v3533_v61, %v6637_v47  ;;  %v3376_v42 = vadd.f32 %v4273_v16, %v3368_v38  ;;  %v4279_v33 = vrot.slane %v3420_v35, 9  ;;  %s8013_s25 = smov 42  }
 0x81d   : > { %v3648_v14 = vstv %s7011_s23  ;;  %v3582_v19 = vstv %s7020_s19  ;;  %v3455_v4 = vmul.f32 %v3453_v26, %v3449_v1  ;;  %v3417_v8 = vmul.f32 %v3416_v29, %v6637_v47  ;;  %s8003_s19 = smov 59   ;;  %s8006_s23 = smov 45  }
 0x81e   : > { %v3483_v22 = vmul.f32 %v3482_v48, %v6637_v47  ;;  %v3530_v3 = vstv %s7029_s27  ;;  %v3382_v57 = vmul.f32 %v3380_v2, %v3376_v42  ;;  %vm7990_vm2 = vcmask 564224   ;;  %s8009_s27 = smov 43  }
 0x81f   : > { %3408 = vrot.lane.b32.xlu1 %v3406_v37, %s4837_s29  ;;  %v3495_v34 = vsel %vm7990_vm2, %v3494_v45, %v6932_v55  ;;  %v3542_v36 = vrot.slane %v7013_v44, 6  ;;  %v3468_v17 = vmul.f32 %v3467_v49, %v6637_v47  ;;  %vm7991_vm10 = vcmask 539648   ;;  %s7190_s29 = sld [smem:[#allocation12 + $0x5d]] }
 0x820   : > { %3336 = vrot.lane.b32.xlu0 %v3334_v62, %s7989_s0  ;;  %v3429_v29 = vsel %vm7991_vm10, %v3428_v6, %v6970_v39  ;;  %v3491_v25 = vadd.f32 %v4288_v40, %v3483_v22  ;;  %v4294_v48 = vrot.slane %v3534_v28, 9  ;;  %v3583_v20 = vmul.f32 %v3582_v19, %v6637_v47  ;;  %v3614_v40 = vpop.permute.xlu1 %3613  ;;  %s7199_s0 = sld [smem:[#allocation12 + $0x57]] }
 0x821   : > { %v3425_v55 = vadd.f32 %v4279_v33, %v3417_v8  ;;  %v3510_v59 = vmul.f32 %v3509_v24, %v6637_v47  ;;  %v3557_v10 = vstv %s7035_s15  ;;  %v3579_v41 = vstv %s7040_s28  ;;  %s8010_s15 = smov 46   ;;  %s4839_s28 = smov 32  }
 0x822   : > { %v3497_v39 = vmul.f32 %v3495_v34, %v3491_v25  ;;  %v3531_v60 = vmul.f32 %v3530_v3, %v6637_v47  ;;  %v3464_v31 = vstv %s7046_s13  ;;  %v3630_v13 = vstv %s7059_s22  ;;  %s4186_s13 = sld [smem:[#allocation12 + $0x1]] }
 0x823   : > { %3457 = vrot.lane.b32.xlu1 %v3455_v4, %s7992_s5  ;;  %v3431_v9 = vmul.f32 %v3429_v29, %v3425_v55  ;;  %vm7994_vm1 = vcmask 580608   ;;  %v3591_v56 = vrot.slane %v3590_v43, 6  ;;  %v4285_v24 = vrot.slane %v3468_v17, 9  ;;  %s2691_s22 = sld [smem:[#allocation12]] }
 0x824   : > { %3384 = vrot.lane.b32.xlu0 %v3382_v57, %s7993_s14  ;;  %v3543_v52 = vsel %vm7994_vm1, %v3542_v36, %v7013_v44  ;;  %v3518_v27 = vrot.slane %v6974_v0, 6  ;;  %v3539_v46 = vadd.f32 %v4294_v48, %v3531_v60  ;;  %v3672_v18 = vstv %s7068_s26  ;;  %v3728_v36 = vpop.permute.xlu0 %3727  ;;  %s7188_s26 = sld [smem:[#allocation12 + $0x5c]] }
 0x825   : > { %v4300_v30 = vrot.slane %v3583_v20, 9  ;;  %v4291_v54 = vrot.slane %v3510_v59, 9  ;;  %v3554_v21 = vstv %s7071_s6  ;;  %v3558_v5 = vmul.f32 %v3557_v10, %v6637_v47  ;;  %s7195_s6 = sld [smem:[#allocation12 + $0x56]] }
 0x826   : > { %v3465_v44 = vmul.f32 %v3464_v31, %v6637_v47  ;;  %v3545_v12 = vmul.f32 %v3543_v52, %v3539_v46  ;;  %v3580_v16 = vmul.f32 %v3579_v41, %v6637_v47  ;;  %v3606_v35 = vstv %s7082_s12  ;;  %s7201_s12 = sld [smem:[#allocation12 + $0x58]] }
 0x827   : > { %3499 = vrot.lane.b32.xlu1 %v3497_v39, %s7995_s8  ;;  %v3631_v61 = vmul.f32 %v3630_v13, %v6637_v47  ;;  %v3507_v37 = vmul.f32 %v3506_v15, %v6637_v47  ;;  %v3673_v38 = vmul.f32 %v3672_v18, %v6637_v47  ;;  %vm7997_vm5 = vcmask 670720   ;;  %s7208_s5 = sld [smem:[#allocation12 + $0x5f]]  ;;  %s8017_s8 = smov 31  }
 0x828   : > { %3433 = vrot.lane.b32.xlu0 %v3431_v9, %s7996_s11  ;;  %v3592_v63 = vsel %vm7997_vm5, %v3591_v56, %v3590_v43  ;;  %v3473_v49 = vadd.f32 %v4285_v24, %v3465_v44  ;;  %vm7998_vm4 = vcmask 572416   ;;  %v3566_v2 = vrot.slane %v7056_v53, 6  ;;  %s7210_s14 = sld [smem:[#allocation12 + $0x5a]]  ;;  %s8023_s11 = smov 30  }
 0x829   : > { %v3519_v62 = vsel %vm7998_vm4, %v3518_v27, %v6974_v0  ;;  %v3588_v26 = vadd.f32 %v4300_v30, %v3580_v16  ;;  %v3720_v45 = vstv %s7095_s3  ;;  %v3515_v1 = vadd.f32 %v4291_v54, %v3507_v37  ;;  %s7206_s3 = sld [smem:[#allocation12 + $0x5e]] }
 0x82a   : > { %v4297_v6 = vrot.slane %v3558_v5, 9  ;;  %v3607_v15 = vmul.f32 %v3606_v35, %v6637_v47  ;;  %v3627_v28 = vstv %s7102_s7  ;;  %v3669_v42 = vstv %s7087_s30  ;;  %s7204_s30 = sld [smem:[#allocation12 + $0x59]] }
 0x82b   : > { %3547 = vrot.lane.b32.xlu1 %v3545_v12, %s7999_s4  ;;  %v3594_v33 = vmul.f32 %v3592_v63, %v3588_v26  ;;  %v3603_v19 = vstv %s7105_s21  ;;  %v4306_v0 = vrot.slane %v3631_v61, 9  ;;  %v3521_v4 = vmul.f32 %v3519_v62, %v3515_v1  ;;  %s7213_s7 = sld [smem:[#allocation12 + $0x5b]]  ;;  %s8026_s4 = smov 28  }
 0x82c   : > { %3475 = vrot.lane.b32.xlu0 %v3473_v49, %s8000_s18  ;;  %v4312_v8 = vrot.slane %v3673_v38, 9  ;;  %v3681_v22 = vrot.slane %v7092_v51, 6  ;;  %v3555_v3 = vmul.f32 %v3554_v21, %v6637_v47  ;;  %vm8001_vm2 = vcmask 662528   ;;  %s7215_s21 = sld [smem:[#allocation12 + $0x60]]  ;;  %s8028_s18 = smov 26  }
 0x82d   : > { %v3567_v57 = vsel %vm8001_vm2, %v3566_v2, %v7056_v53  ;;  %v3721_v34 = vmul.f32 %v3720_v45, %v6637_v47  ;;  %v3615_v17 = vrot.slane %v3614_v40, 6  ;;  %v3628_v29 = vmul.f32 %v3627_v28, %v6637_v47  ;;  %v7182_v2 = vld [vmem:[#allocation3] sm:$0x3f] }
 0x82e   : > { %v3645_v25 = vstv %s7112_s9  ;;  %v3649_v48 = vmul.f32 %v3648_v14, %v6637_v47  ;;  %v3563_v43 = vadd.f32 %v4297_v6, %v3555_v3  ;;  %v4303_v20 = vrot.slane %v3607_v15, 9  ;;  %s7218_s9 = sld [smem:[#allocation12 + $0x61]] }
 0x82f   : > { %3596 = vrot.lane.b32.xlu1 %v3594_v33, %s8002_s2  ;;  %v3670_v53 = vmul.f32 %v3669_v42, %v6637_v47  ;;  %v3696_v55 = vstv %s7118_s10  ;;  %v3717_v59 = vstv %s7125_s24  ;;  %v3636_v10 = vadd.f32 %v4306_v0, %v3628_v29  ;;  %s8022_s10 = smov 29   ;;  %s8025_s24 = smov 27  }
 0x830   : > { %3523 = vrot.lane.b32.xlu0 %v3521_v4, %s8003_s19  ;;  %vm8004_vm10 = vcmask 703488   ;;  %v3569_v39 = vmul.f32 %v3567_v57, %v3563_v43  ;;  %v3729_v60 = vrot.slane %v3728_v36, 6  ;;  %v3604_v31 = vmul.f32 %v3603_v19, %v6637_v47  ;;  %s8058_s19 = sld [smem:[#allocation76_spill]] }
 0x831   : > { %v3682_v41 = vsel %vm8004_vm10, %v3681_v22, %v7092_v51  ;;  %v3657_v13 = vrot.slane %v7054_v11, 6  ;;  %v3678_v14 = vadd.f32 %v4312_v8, %v3670_v53  ;;  %v4318_v9 = vrot.slane %v3721_v34, 9 }
 0x832   : > { %vm8005_vm1 = vcmask 678912   ;;  %v4309_v56 = vrot.slane %v3649_v48, 9  ;;  %v3697_v24 = vmul.f32 %v3696_v55, %v6637_v47  ;;  %v3612_v27 = vadd.f32 %v4303_v20, %v3604_v31 }
 0x833   : > { %v3616_v52 = vsel %vm8005_vm1, %v3615_v17, %v3614_v40  ;;  %3638 = vrot.lane.b32.xlu1 %v3636_v10, %s8006_s23  ;;  %v3684_v51 = vmul.f32 %v3682_v41, %v3678_v14  ;;  %v3718_v46 = vmul.f32 %v3717_v59, %v6637_v47  ;;  %v3646_v18 = vmul.f32 %v3645_v25, %v6637_v47 }
 0x834   : > { %3571 = vrot.lane.b32.xlu0 %v3569_v39, %s4838_s20  ;;  %vm8007_vm5 = vcmask 793600   ;;  %v3618_v54 = vmul.f32 %v3616_v52, %v3612_v27  ;;  %vm8008_vm4 = vcmask 695296   ;;  %v3693_v5 = vstv %s7148_s1 }
 0x835   : > { %v3730_v30 = vsel %vm8007_vm5, %v3729_v60, %v3728_v36  ;;  %v3658_v21 = vsel %vm8008_vm4, %v3657_v13, %v7054_v11  ;;  %v3705_v44 = vrot.slane %v7122_v58, 6  ;;  %v3726_v12 = vadd.f32 %v4318_v9, %v3718_v46 }
 0x836   : > { %v3654_v16 = vadd.f32 %v4309_v56, %v3646_v18  ;;  %v4315_v35 = vrot.slane %v3697_v24, 9  ;;  %v3694_v38 = vmul.f32 %v3693_v5, %v6637_v47  ;;  %vm8011_vm2 = vcmask 711680   ;;  %s8059_s23 = smov %s8058_s19 }
 0x837   : > { %3686 = vrot.lane.b32.xlu1 %v3684_v51, %s8009_s27  ;;  %v3732_v61 = vmul.f32 %v3730_v30, %v3726_v12  ;;  %v3706_v63 = vsel %vm8011_vm2, %v3705_v44, %v7122_v58  ;;  %v2695_v62 = vstv %s4186_s13  ;;  %v2692_v1 = vstv %s2691_s22 }
 0x838   : > { %3620 = vrot.lane.b32.xlu0 %v3618_v54, %s8010_s15  ;;  %v3660_v37 = vmul.f32 %v3658_v21, %v3654_v16  ;;  %v3702_v11 = vadd.f32 %v4315_v35, %v3694_v38  ;;  %v2696_v26 = vmul.f32 %v7182_v2, %v2695_v62  ;;  %v2713_v58 = vrot.slane %v7009_v50, 6  ;;  %s8060_s15 = sld [smem:[#allocation19_spill]] }
 0x839   : > { %v2693_v15 = vmul.f32 %v7182_v2, %v2692_v1  ;;  %vm8014_vm10 = vcmask 7168   ;;  %v3745_v53 = vstv %s7199_s0  ;;  %v3808_v41 = vstv %s7188_s26 }
 0x83a   : > { %v3708_v49 = vmul.f32 %v3706_v63, %v3702_v11  ;;  %v4187_v6 = vrot.slane %v2696_v26, 9  ;;  %v2714_v42 = vsel %vm8014_vm10, %v2713_v58, %v7009_v50  ;;  %v3811_v39 = vstv %s7190_s29 }
 0x83b   : > { %3734 = vrot.lane.b32.xlu1 %v3732_v61, %s4839_s28  ;;  %v3742_v60 = vstv %s7195_s6  ;;  %v3746_v31 = vmul.f32 %v7182_v2, %v3745_v53  ;;  %v3766_v9 = vstv %s7201_s12  ;;  %v3769_v52 = vstv %s7204_s30  ;;  %s8068_s6 = sld [smem:[#allocation25_spill]] }
 0x83c   : > { %3662 = vrot.lane.b32.xlu0 %v3660_v37, %s8012_s16  ;;  %v2701_v19 = vadd.f32 %v4187_v6, %v2693_v15  ;;  %v3832_v56 = vstv %s7206_s3  ;;  %v3835_v51 = vstv %s7208_s5  ;;  %v3790_v46 = vstv %s7210_s14  ;;  %s8065_s16 = sld [smem:[#allocation75_spill]] }
 0x83d   : > { %v3793_v18 = vstv %s7213_s7  ;;  %v3856_v21 = vstv %s7215_s21  ;;  %v3859_v5 = vstv %s7218_s9  ;;  %v4321_v12 = vrot.slane %v3746_v31, 9  ;;  %s8069_s3 = sld [smem:[#allocation77_spill]]  ;;  %s4840_s21 = smov [#allocation13]  }
 0x83e   : > { %v2716_v8 = vmul.f32 %v2714_v42, %v2701_v19  ;;  %v3770_v16 = vmul.f32 %v7182_v2, %v3769_v52  ;;  %v3809_v35 = vmul.f32 %v7182_v2, %v3808_v41  ;;  %v3836_v63 = vmul.f32 %v7182_v2, %v3835_v51  ;;  %s429_s13 = sand.u32 1, %s8060_s15   ;;  %s4663_s9 = sshll.u32 %s4840_s21, 4  ;;  %s4664_s9 = int_to_ptr.vmem [resolvable:$false] %s4663_s9 }
 0x83f   : > { %v3812_v11 = vmul.f32 %v7182_v2, %v3811_v39  ;;  %v3743_v62 = vmul.f32 %v7182_v2, %v3742_v60  ;;  %v3767_v15 = vmul.f32 %v7182_v2, %v3766_v9  ;;  %v3833_v19 = vmul.f32 %v7182_v2, %v3832_v56  ;;  %s4138_s22 = sshll.u32 %s429_s13, 5  ;;  %s7340_s14 = scalar_lea.sflag [#allocation7], %s429_s13 }
 0x840   : > { %3710 = vrot.lane.b32.xlu0 %v3708_v49, %s8013_s25  ;;  %vm3085_vm1 = vcmask 785408   ;;  %vm8024_vm5 = vcmask 842752   ;;  %vm8030_vm4 = vcmask 760832   ;;  %vm8031_vm2 = vcmask 752640   ;;  %s8066_s25 = sld [smem:[#allocation22_spill]]  ;;  %s431_s26 = scalar_lea.vmem [#allocation13], %s4138_s22 }
 0x841   : > { %v3751_v42 = vadd.f32 %v4321_v12, %v3743_v62  ;;  %vm8032_vm10 = vcmask 744448   ;;  %s4021_s29 = sshll.u32 %s431_s26, 4  ;;  %p8070_p11 = scmp.ne.s32.totalorder %s8068_s6, 0  ;;  %s7333_s29 = int_to_ptr.vmem [resolvable:$true] %s4021_s29 }
 0x842   : > { %s4659_s7 = scalar_lea.vmem %s7333_s29, 512  ;;  %p4666_p2 = scmp.lt.s32.totalorder %s7333_s29, %s4664_s9 }
 0x843   : > { %p4660_p8 = scmp.ne.s32.totalorder %s7333_s29, %s4659_s7 }
 0x845   : > { %p4661_p0 = pnand %p4660_p8, %p8070_p11 }
 0x846   : > { %s4347_s0 = sshll.u32 %s8066_s25, 9 }
 0x847   : > { %s7338_s5 = scalar_lea.hbm %s8069_s3, %s4347_s0  ;;  %p4662_p1 = pneg %p4661_p0 }
 0x855   : > { %v7185_v45 = vpop.permute.xlu1 %2986 }
 0x856   : > { %v2797_v47 = vpop.permute.xlu0 %2796 }
 0x857   : > { %v2798_v3 = vrot.slane %v2797_v47, 2 }
 0x859   : > { %v7192_v40 = vpop.permute.xlu1 %3818  ;;  %v2799_v25 = vsel %vm818_vm8, %v2797_v47, %v2798_v3  ;;  %vm2922_vm8 = vcmask 916480   ;;  %v3794_v47 = vmul.f32 %v7182_v2, %v3793_v18 }
 0x85a   : > { %v2746_v28 = vpop.permute.xlu0 %2745 }
 0x85b   : > { %v2747_v33 = vrot.slane %v2746_v28, 2 }
 0x85d   : > { %v2748_v0 = vsel %vm739_vm11, %v2746_v28, %v2747_v33  ;;  %v2920_v4 = vpop.permute.xlu1 %2919  ;;  %v4324_v33 = vrot.slane %v3770_v16, 9 }
 0x85e   : > { %v2779_v22 = vpop.permute.xlu0 %2778  ;;  %v2750_v50 = vadd.f32 %v2748_v0, %v2716_v8  ;;  %v2921_v30 = vrot.slane %v2920_v4, 2  ;;  %v2988_v0 = vrot.slane %v7185_v45, 2 }
 0x85f   : > { %v2780_v57 = vrot.slane %v2779_v22, 2 }
 0x860   : > { %v2923_v1 = vsel %vm2922_vm8, %v2920_v4, %v2921_v30  ;;  %v2989_v41 = vsel %vm1071_vm15, %v7185_v45, %v2988_v0  ;;  %vm8021_vm15 = vcmask 834560   ;;  %vm8033_vm8 = vcmask 736256  }
 0x861   : > { %v2781_v34 = vsel %vm779_vm6, %v2779_v22, %v2780_v57  ;;  %v2945_v36 = vpop.permute.xlu1 %2944  ;;  %vm8015_vm6 = vcmask 1014784   ;;  %v4333_v57 = vrot.slane %v3836_v63, 9 }
 0x862   : > { %v2783_v17 = vadd.f32 %v2781_v34, %v2750_v50  ;;  %v2830_v29 = vpop.permute.xlu0 %2829  ;;  %v2946_v61 = vrot.slane %v2945_v36, 2 }
 0x863   : > { %v2831_v48 = vrot.slane %v2830_v29, 2  ;;  %v3841_v31 = vadd.f32 %v4333_v57, %v3833_v19 }
 0x864   : > { %v2801_v43 = vadd.f32 %v2799_v25, %v2783_v17  ;;  %v2947_v8 = vsel %vm994_vm0, %v2945_v36, %v2946_v61  ;;  %v4327_v17 = vrot.slane %v3794_v47, 9  ;;  %v3820_v25 = vrot.slane %v7192_v40, 6 }
 0x865   : > { %v2969_v20 = vpop.permute.xlu1 %2968  ;;  %v2832_v59 = vsel %vm8015_vm6, %v2830_v29, %v2831_v48  ;;  %v3860_v29 = vmul.f32 %v7182_v2, %v3859_v5  ;;  %v3775_v36 = vadd.f32 %v4324_v33, %v3767_v15  ;;  %vm8018_vm0 = vcmask 809984  }
 0x866   : > { %v2863_v55 = vpop.permute.xlu0 %2862  ;;  %v2834_v24 = vadd.f32 %v2832_v59, %v2801_v43  ;;  %v2970_v58 = vrot.slane %v2969_v20, 2  ;;  %vm3248_vm6 = vcmask 654336  }
 0x867   : > { %v2864_v10 = vrot.slane %v2863_v55, 2  ;;  %v4336_v18 = vrot.slane %v3860_v29, 9 }
 0x868   : > { %v2971_v48 = vsel %vm1032_vm14, %v2969_v20, %v2970_v58  ;;  %vm8019_vm14 = vcmask 826368  }
 0x869   : > { %v2865_v13 = vsel %vm876_vm7, %v2863_v55, %v2864_v10  ;;  %v7227_v14 = vpop.permute.xlu1 %3010  ;;  %v4330_v55 = vrot.slane %v3812_v11, 9  ;;  %v3791_v10 = vmul.f32 %v7182_v2, %v3790_v46  ;;  %vm8020_vm7 = vcmask 883712  }
 0x86a   : > { %v2896_v27 = vpop.permute.xlu0 %2895  ;;  %v2867_v44 = vadd.f32 %v2865_v13, %v2834_v24  ;;  %v3012_v43 = vrot.slane %v7227_v14, 2 }
 0x86b   : > { %v2897_v54 = vrot.slane %v2896_v27, 2  ;;  %v3799_v24 = vadd.f32 %v4327_v17, %v3791_v10  ;;  %v3817_v45 = vadd.f32 %v4330_v55, %v3809_v35 }
 0x86c   : > { %v3013_v51 = vsel %vm8020_vm7, %v7227_v14, %v3012_v43  ;;  %vm8037_vm7 = vcmask 621568  }
 0x86d   : > { %v2898_v37 = vsel %vm916_vm13, %v2896_v27, %v2897_v54  ;;  %v3035_v38 = vpop.permute.xlu1 %3034  ;;  %vm8016_vm13 = vcmask 801792   ;;  %v3821_v27 = vsel %vm8019_vm14, %v3820_v25, %v7192_v40  ;;  %v3857_v40 = vmul.f32 %v7182_v2, %v3856_v21 }
 0x86e   : > { %v2900_v49 = vadd.f32 %v2898_v37, %v2867_v44  ;;  %v3753_v26 = vpop.permute.xlu0 %3752  ;;  %v3036_v39 = vrot.slane %v3035_v38, 2  ;;  %v3823_v61 = vmul.f32 %v3821_v27, %v3817_v45  ;;  %vm8036_vm14 = vcmask 629760  }
 0x86f   : > { %v3754_v6 = vrot.slane %v3753_v26, 6  ;;  %v3865_v11 = vadd.f32 %v4336_v18, %v3857_v40 }
 0x870   : > { %v2925_v28 = vadd.f32 %v2923_v1, %v2900_v49  ;;  %v3037_v5 = vsel %vm1128_vm12, %v3035_v38, %v3036_v39  ;;  %vm8027_vm12 = vcmask 777216  }
 0x871   : > { %v3755_v22 = vsel %vm8016_vm13, %v3754_v6, %v3753_v26  ;;  %v3059_v3 = vpop.permute.xlu1 %3058  ;;  %vm8034_vm13 = vcmask 646144  }
 0x872   : > { %v2949_v50 = vadd.f32 %v2947_v8, %v2925_v28  ;;  %v3757_v34 = vmul.f32 %v3755_v22, %v3751_v42  ;;  %v3777_v4 = vpop.permute.xlu0 %3776  ;;  %v3060_v46 = vrot.slane %v3059_v3, 2 }
 0x873   : > { %v3778_v53 = vrot.slane %v3777_v4, 6 }
 0x874   : > { %v2973_v59 = vadd.f32 %v2971_v48, %v2949_v50  ;;  %3759 = vrot.lane.b32.xlu0 %v3757_v34, %s8017_s8  ;;  %v3061_v63 = vsel %vm1166_vm3, %v3059_v3, %v3060_v46  ;;  %vm8029_vm3 = vcmask 769024   ;;  %s4665_s8 = scalar_lea.vmem %s4664_s9, 1024 }
 0x875   : > { %v3779_v60 = vsel %vm8018_vm0, %v3778_v53, %v3777_v4  ;;  %v3843_v13 = vpop.permute.xlu1 %3842  ;;  %vm8035_vm0 = vcmask 637952   ;;  %p4667_p9 = scmp.lt.s32.totalorder %s4665_s8, %s4659_s7 }
 0x876   : > { %v2991_v9 = vadd.f32 %v2989_v41, %v2973_v59  ;;  %v3781_v20 = vmul.f32 %v3779_v60, %v3775_v36  ;;  %v3844_v52 = vrot.slane %v3843_v13, 6  ;;  %v3083_v56 = vpop.permute.xlu0 %3082 }
 0x877   : > { %v3084_v12 = vrot.slane %v3083_v56, 2  ;;  %p4668_p3 = por %p4667_p9, %p4666_p2 }
 0x878   : > { %v3015_v30 = vadd.f32 %v3013_v51, %v2991_v9  ;;  %v3845_v54 = vsel %vm8021_vm15, %v3844_v52, %v3843_v13  ;;  %3801 = vrot.lane.b32.xlu0 %v3799_v24, %s8022_s10  ;;  %3783 = vrot.lane.b32.xlu1 %v3781_v20, %s8023_s11  ;;  %vm8038_vm15 = vcmask 613376  }
 0x879   : > { %v3847_v44 = vmul.f32 %v3845_v54, %v3841_v31  ;;  %v3867_v16 = vpop.permute.xlu1 %3866  ;;  %v3086_v38 = vsel %vm3085_vm1, %v3083_v56, %v3084_v12  ;;  %vm8039_vm1 = vcmask 605184   ;;  %p4669_p6 = pnand %p4668_p3, %p4662_p1 }
 0x87a   : > { %v3039_v14 = vadd.f32 %v3037_v5, %v3015_v30  ;;  %v3868_v37 = vrot.slane %v3867_v16, 6  ;;  %v3108_v35 = vpop.permute.xlu0 %3107 }
 0x87b   : > { %v3109_v49 = vrot.slane %v3108_v35, 2 }
 0x87c   : > { %v3063_v62 = vadd.f32 %v3061_v63, %v3039_v14  ;;  %v3869_v26 = vsel %vm8024_vm5, %v3868_v37, %v3867_v16  ;;  %3849 = vrot.lane.b32.xlu0 %v3847_v44, %s8025_s24  ;;  %3825 = vrot.lane.b32.xlu1 %v3823_v61, %s8026_s4  ;;  %vm3411_vm5 = vcmask 523264  }
 0x87d   : > { %v3871_v47 = vmul.f32 %v3869_v26, %v3865_v11  ;;  %v3110_v1 = vsel %vm8027_vm12, %v3108_v35, %v3109_v49  ;;  %v3174_v28 = vpop.permute.xlu1 %3173  ;;  %vm8040_vm12 = vcmask 515072  }
 0x87e   : > { %v3088_v2 = vadd.f32 %v3086_v38, %v3063_v62  ;;  %v3132_v21 = vpop.permute.xlu0 %3131  ;;  %v3175_v0 = vrot.slane %v3174_v28, 2 }
 0x87f   : > { %v3133_v58 = vrot.slane %v3132_v21, 2 }
 0x880   : > { %v3112_v6 = vadd.f32 %v3110_v1, %v3088_v2  ;;  %3873 = vrot.lane.b32.xlu1 %v3871_v47, %s8028_s18  ;;  %v3176_v50 = vsel %vm8031_vm2, %v3174_v28, %v3175_v0  ;;  %vm8043_vm2 = vcmask 490496  }
 0x881   : > { %v3134_v15 = vsel %vm8029_vm3, %v3132_v21, %v3133_v58  ;;  %v3222_v34 = vpop.permute.xlu1 %3221  ;;  %vm8041_vm3 = vcmask 506880  }
 0x882   : > { %v3150_v42 = vpop.permute.xlu0 %3149  ;;  %v3136_v19 = vadd.f32 %v3134_v15, %v3112_v6  ;;  %v3223_v25 = vrot.slane %v3222_v34, 2 }
 0x883   : > { %v3151_v33 = vrot.slane %v3150_v42, 2 }
 0x884   : > { %v3224_v53 = vsel %vm8033_vm8, %v3222_v34, %v3223_v25  ;;  %vm8045_vm8 = vcmask 384000  }
 0x885   : > { %v3152_v8 = vsel %vm8030_vm4, %v3150_v42, %v3151_v33  ;;  %v3271_v55 = vpop.permute.xlu1 %3270  ;;  %vm8042_vm4 = vcmask 498688  }
 0x886   : > { %v3154_v22 = vadd.f32 %v3152_v8, %v3136_v19  ;;  %v3198_v3 = vpop.permute.xlu0 %3197  ;;  %v3272_v41 = vrot.slane %v3271_v55, 2 }
 0x887   : > { %v3199_v57 = vrot.slane %v3198_v3, 2 }
 0x888   : > { %v3178_v4 = vadd.f32 %v3176_v50, %v3154_v22  ;;  %v3273_v31 = vsel %vm8034_vm13, %v3271_v55, %v3272_v41  ;;  %vm8046_vm13 = vcmask 375808  }
 0x889   : > { %v3200_v17 = vsel %vm8032_vm10, %v3198_v3, %v3199_v57  ;;  %v3313_v13 = vpop.permute.xlu1 %3312  ;;  %vm3574_vm10 = vcmask 392192  }
 0x88a   : > { %v3246_v29 = vpop.permute.xlu0 %3245  ;;  %v3202_v48 = vadd.f32 %v3200_v17, %v3178_v4  ;;  %v3314_v56 = vrot.slane %v3313_v13, 2 }
 0x88b   : > { %v3247_v43 = vrot.slane %v3246_v29, 2 }
 0x88c   : > { %v3226_v59 = vadd.f32 %v3224_v53, %v3202_v48  ;;  %v3315_v51 = vsel %vm8036_vm14, %v3313_v13, %v3314_v56  ;;  %vm8049_vm14 = vcmask 351232  }
 0x88d   : > { %v3249_v36 = vsel %vm3248_vm6, %v3246_v29, %v3247_v43  ;;  %v3361_v46 = vpop.permute.xlu1 %3360  ;;  %vm8044_vm6 = vcmask 474112  }
 0x88e   : > { %v3295_v10 = vpop.permute.xlu0 %3294  ;;  %v3251_v39 = vadd.f32 %v3249_v36, %v3226_v59  ;;  %v3362_v54 = vrot.slane %v3361_v46, 2 }
 0x88f   : > { %v3296_v60 = vrot.slane %v3295_v10, 2 }
 0x890   : > { %v3275_v9 = vadd.f32 %v3273_v31, %v3251_v39  ;;  %v3363_v12 = vsel %vm8038_vm15, %v3361_v46, %v3362_v54  ;;  %vm3737_vm15 = vcmask 261120  }
 0x891   : > { %v3297_v20 = vsel %vm8035_vm0, %v3295_v10, %v3296_v60  ;;  %v3409_v40 = vpop.permute.xlu1 %3408  ;;  %vm8048_vm0 = vcmask 359424  }
 0x892   : > { %v3337_v52 = vpop.permute.xlu0 %3336  ;;  %v3299_v24 = vadd.f32 %v3297_v20, %v3275_v9  ;;  %v3410_v37 = vrot.slane %v3409_v40, 2 }
 0x893   : > { %v3338_v27 = vrot.slane %v3337_v52, 2 }
 0x894   : > { %v3317_v18 = vadd.f32 %v3315_v51, %v3299_v24  ;;  %v3412_v11 = vsel %vm3411_vm5, %v3409_v40, %v3410_v37  ;;  %vm8052_vm5 = vcmask 244736  }
 0x895   : > { %v3339_v45 = vsel %vm8037_vm7, %v3337_v52, %v3338_v27  ;;  %v3458_v49 = vpop.permute.xlu1 %3457  ;;  %vm8050_vm7 = vcmask 343040  }
 0x896   : > { %v3385_v30 = vpop.permute.xlu0 %3384  ;;  %v3341_v5 = vadd.f32 %v3339_v45, %v3317_v18  ;;  %v3459_v47 = vrot.slane %v3458_v49, 2 }
 0x897   : > { %v3386_v44 = vrot.slane %v3385_v30, 2 }
 0x898   : > { %v3365_v16 = vadd.f32 %v3363_v12, %v3341_v5  ;;  %v3460_v1 = vsel %vm8041_vm3, %v3458_v49, %v3459_v47  ;;  %vm8054_vm3 = vcmask 228352  }
 0x899   : > { %v3387_v61 = vsel %vm8039_vm1, %v3385_v30, %v3386_v44  ;;  %v3500_v58 = vpop.permute.xlu1 %3499  ;;  %vm8051_vm1 = vcmask 252928  }
 0x89a   : > { %v3434_v14 = vpop.permute.xlu0 %3433  ;;  %v3389_v35 = vadd.f32 %v3387_v61, %v3365_v16  ;;  %v3501_v42 = vrot.slane %v3500_v58, 2 }
 0x89b   : > { %v3435_v63 = vrot.slane %v3434_v14, 2 }
 0x89c   : > { %v3414_v62 = vadd.f32 %v3412_v11, %v3389_v35  ;;  %v3502_v0 = vsel %vm8043_vm2, %v3500_v58, %v3501_v42  ;;  %vm8056_vm2 = vcmask 211968  }
 0x89d   : > { %v3436_v26 = vsel %vm8040_vm12, %v3434_v14, %v3435_v63  ;;  %v3548_v8 = vpop.permute.xlu1 %3547  ;;  %vm8053_vm12 = vcmask 236544  }
 0x89e   : > { %v3476_v38 = vpop.permute.xlu0 %3475  ;;  %v3438_v2 = vadd.f32 %v3436_v26, %v3414_v62  ;;  %v3549_v50 = vrot.slane %v3548_v8, 2 }
 0x89f   : > { %v3477_v21 = vrot.slane %v3476_v38, 2 }
 0x8a0   : > { %v3462_v6 = vadd.f32 %v3460_v1, %v3438_v2  ;;  %v3550_v17 = vsel %vm8044_vm6, %v3548_v8, %v3549_v50 }
 0x8a1   : > { %v3478_v15 = vsel %vm8042_vm4, %v3476_v38, %v3477_v21  ;;  %v3597_v29 = vpop.permute.xlu1 %3596  ;;  %vm8055_vm4 = vcmask 220160  }
 0x8a2   : > { %v3524_v28 = vpop.permute.xlu0 %3523  ;;  %v3480_v33 = vadd.f32 %v3478_v15, %v3462_v6  ;;  %v3598_v53 = vrot.slane %v3597_v29, 2 }
 0x8a3   : > { %v3525_v19 = vrot.slane %v3524_v28, 2 }
 0x8a4   : > { %v3504_v22 = vadd.f32 %v3502_v0, %v3480_v33  ;;  %v3599_v36 = vsel %vm8045_vm8, %v3597_v29, %v3598_v53  ;;  %vm8067_vm8 = vcmask 31744  }
 0x8a5   : > { %v3526_v3 = vsel %vm1876_vm9, %v3524_v28, %v3525_v19  ;;  %v3639_v10 = vpop.permute.xlu1 %3638  ;;  %vm8047_vm9 = vcmask 367616  }
 0x8a6   : > { %v3572_v57 = vpop.permute.xlu0 %3571  ;;  %v3528_v34 = vadd.f32 %v3526_v3, %v3504_v22  ;;  %v3640_v31 = vrot.slane %v3639_v10, 2 }
 0x8a7   : > { %v3573_v4 = vrot.slane %v3572_v57, 2 }
 0x8a8   : > { %v3552_v25 = vadd.f32 %v3550_v17, %v3528_v34  ;;  %v3641_v20 = vsel %vm8047_vm9, %v3639_v10, %v3640_v31  ;;  %v3894_v34 = vsub.s32 2, %v7904_v7  ;;  %v8061_v31 = vld [vmem:[#allocation30_spill] sm:$0xff] }
 0x8a9   : > { %v3575_v48 = vsel %vm3574_vm10, %v3572_v57, %v3573_v4  ;;  %v3687_v52 = vpop.permute.xlu1 %3686  ;;  %v3898_v4 = vsub.s32 4, %v7904_v7  ;;  %v3935_v7 = vld [vmem:[%s8059_s23 + $0x8] sm:$0xff]  ;;  %vm8063_vm10 = vcmask 1041408  }
 0x8aa   : > { %v3621_v43 = vpop.permute.xlu0 %3620  ;;  %v3577_v55 = vadd.f32 %v3575_v48, %v3552_v25  ;;  %v3688_v51 = vrot.slane %v3687_v52, 2  ;;  %v8057_v25 = vld [vmem:[#allocation28_spill] sm:$0xff]  ;;  %vm8064_vm6 = vmmov %vm8063_vm10 }
 0x8ab   : > { %v3622_v59 = vrot.slane %v3621_v43, 2 }
 0x8ac   : > { %v3601_v41 = vadd.f32 %v3599_v36, %v3577_v55  ;;  %v3689_v45 = vsel %vm8049_vm14, %v3687_v52, %v3688_v51 }
 0x8ad   : > { %v3623_v39 = vsel %vm8046_vm13, %v3621_v43, %v3622_v59  ;;  %v3735_v30 = vpop.permute.xlu1 %3734  ;;  %v3934_v59 = vld [vmem:[%s8058_s19] sm:$0xff] }
 0x8ae   : > { %v3663_v60 = vpop.permute.xlu0 %3662  ;;  %v3625_v13 = vadd.f32 %v3623_v39, %v3601_v41  ;;  %v3736_v44 = vrot.slane %v3735_v30, 2 }
 0x8af   : > { %v3664_v9 = vrot.slane %v3663_v60, 2 }
 0x8b0   : > { %v3643_v56 = vadd.f32 %v3641_v20, %v3625_v13  ;;  %v3738_v61 = vsel %vm3737_vm15, %v3735_v30, %v3736_v44 }
 0x8b1   : > { %v3665_v24 = vsel %vm8048_vm0, %v3663_v60, %v3664_v9 }
 0x8b2   : > { %v3711_v27 = vpop.permute.xlu0 %3710  ;;  %v3667_v46 = vadd.f32 %v3665_v24, %v3643_v56  ;;  %v8062_v24 = vld [vmem:[#allocation31_spill] sm:$0xff] }
 0x8b3   : > { %v3712_v18 = vrot.slane %v3711_v27, 2 }
 0x8b4   : > { %v3691_v54 = vadd.f32 %v3689_v45, %v3667_v46 }
 0x8b5   : > { %v3713_v5 = vsel %vm8050_vm7, %v3711_v27, %v3712_v18 }
 0x8b6   : > { %v3715_v12 = vadd.f32 %v3713_v5, %v3691_v54 }
 0x8b8   : > { %v3740_v37 = vadd.f32 %v3738_v61, %v3715_v12 }
 0x8e6   : > { %v3760_v40 = vpop.permute.xlu0 %3759 }
 0x8e7   : > { %v3761_v16 = vrot.slane %v3760_v40, 2 }
 0x8e9   : > { %v3762_v14 = vsel %vm8051_vm1, %v3760_v40, %v3761_v16 }
 0x8ea   : > { %v3784_v35 = vpop.permute.xlu1 %3783  ;;  %v3802_v63 = vpop.permute.xlu0 %3801  ;;  %v3764_v62 = vadd.f32 %v3762_v14, %v3740_v37 }
 0x8eb   : > { %v3785_v11 = vrot.slane %v3784_v35, 2  ;;  %v3803_v49 = vrot.slane %v3802_v63, 2 }
 0x8ed   : > { %v3786_v26 = vsel %vm8052_vm5, %v3784_v35, %v3785_v11  ;;  %v3804_v21 = vsel %vm8053_vm12, %v3802_v63, %v3803_v49 }
 0x8ee   : > { %v3788_v38 = vadd.f32 %v3786_v26, %v3764_v62  ;;  %v3826_v47 = vpop.permute.xlu1 %3825  ;;  %v3850_v2 = vpop.permute.xlu0 %3849 }
 0x8ef   : > { %v3827_v1 = vrot.slane %v3826_v47, 2  ;;  %v3851_v58 = vrot.slane %v3850_v2, 2 }
 0x8f0   : > { %v3806_v6 = vadd.f32 %v3804_v21, %v3788_v38 }
 0x8f1   : > { %v3828_v15 = vsel %vm8054_vm3, %v3826_v47, %v3827_v1  ;;  %v3852_v33 = vsel %vm8055_vm4, %v3850_v2, %v3851_v58 }
 0x8f2   : > { %v3830_v28 = vadd.f32 %v3828_v15, %v3806_v6  ;;  %v3874_v42 = vpop.permute.xlu1 %3873 }
 0x8f3   : > { %v3875_v19 = vrot.slane %v3874_v42, 2 }
 0x8f4   : > { %v3854_v0 = vadd.f32 %v3852_v33, %v3830_v28 }
 0x8f5   : > { %v3876_v8 = vsel %vm8056_vm2, %v3874_v42, %v3875_v19 }
 0x8f6   : > { %v3878_v22 = vadd.f32 %v3876_v8, %v3854_v0 }
 0x8f8   : > { %v4337_v3 = vmul.f32 -1.442695, %v3878_v22 }
 0x8fa   : > { %4560 = vpow2.f32 %v4337_v3 }
 0x907   : > { %v4561_v57 = vpop.eup %4560 }
 0x908   : > { %v3882_v50 = vadd.f32 1.0, %v4561_v57 }
 0x90a   : > { %4562 = vrcp.f32 %v3882_v50 }
 0x917   : > { %v4563_v17 = vpop.eup %4562 }
 0x918   : > { %v3895_v29 = vrot.slane %v4563_v17, %v3894_v34  ;;  %v3891_v48 = vrot.slane %v4563_v17, %v8057_v25  ;;  %v3899_v55 = vrot.slane %v4563_v17, %v3898_v4 }
 0x91a   : > { %v3910_v43 = vrot.slane %v3895_v29, %v8057_v25  ;;  %v3906_v53 = vrot.slane %v3891_v48, %v8057_v25  ;;  %v3914_v36 = vrot.slane %v3899_v55, %v8057_v25 }
 0x91c   : > { %3920 = vrot.lane.b32.xlu1 %v3910_v43, %s7809_s17  ;;  %3918 = vrot.lane.b32.xlu0 %v3906_v53, %s7809_s17 }
 0x920   : > { %3938 = vperm.xlu1 %4548, %v3934_v59   ;;  %3922 = vrot.lane.b32.xlu0 %v3914_v36, %s7809_s17 }
 0x924   : > { %3943 = vperm.xlu0 %4547, %v3935_v7  }
 0x98e   : > { %v3921_v10 = vpop.permute.xlu1 %3920  ;;  %v3919_v41 = vpop.permute.xlu0 %3918 }
 0x98f   : > { %v3924_v39 = vsel %vm739_vm11, %v3919_v41, %v3921_v10 }
 0x990   : > { %v3928_v60 = vmul.f32 %v3924_v39, %v6513_v32  ;;  %v4555_v32 = vld [vmem:[%s8065_s16] sm:$0xff]  }
 0x992   : > { %v3930_v13 = vadd.f32 %v3928_v60, %v8061_v31  ;;  %v3923_v9 = vpop.permute.xlu0 %3922 }
 0x993   : > { %v3925_v20 = vsel %vm739_vm11, %v3921_v10, %v3923_v9 }
 0x994   : > { %v3929_v52 = vmul.f32 %v3925_v20, %v6519_v23  ;;  %v3932_v56 = vpack.c.bf16 %v3930_v13, %v3930_v13 }
 0x996   : > { %v3931_v27 = vadd.f32 %v3929_v52, %v8062_v24  ;;  %v3955_v46 = vsel %vm8064_vm6, %v3932_v56, 0 }
 0x998   : > { %v3933_v51 = vpack.c.bf16 %v3931_v27, %v3931_v27 }
 0x99a   : > { %4339 = vmatprep.subr.msk.bf16.mxu1 %vm8063_vm10, %v3933_v51 }
 0x99b   : > { %3975 = vmatpush1.bf16.msra.mxu1 %v3955_v46  ;;  %v3939_v18 = vpop.permute.xlu1 %3938 }
 0x99e   : > { %4340 = vmatmul.mubr.msk.bf16.vlgmr.msra.gmra.mxu1 %vm8067_vm8, %v4555_v32 }
 0x99f   : > { %v3944_v5 = vpop.permute.xlu0 %3943 }
 0xa5e   : > { %v3994_v23 = vpop.f32.mrf.mxu1 }
 0xa5f   : > { %v3995_v45 = vadd.f32 %v3994_v23, %v3939_v18 }
 0xa60   : > { %v3996_v30 = vpop.f32.mrf.mxu1 }
 0xa61   : > { %4003 = vst [vmem:[%s431_s26] sm:$0xff] %v3995_v45  ;;  %v3997_v54 = vadd.f32 %v3996_v30, %v3939_v18 }
 0xa62   : > { %v3998_v44 = vpop.f32.mrf.mxu1 }
 0xa63   : > { %4004 = vst [vmem:[%s431_s26 + $0x8] sm:$0xff] %v3997_v54  ;;  %v3999_v12 = vadd.f32 %v3998_v44, %v3944_v5 }
 0xa64   : > { %v4000_v40 = vpop.f32.mrf.mxu1 }
 0xa65   : > { %4005 = vst [vmem:[%s431_s26 + $0x10] sm:$0xff] %v3999_v12  ;;  %v4001_v16 = vadd.f32 %v4000_v40, %v3944_v5 }
 0xa67   : > { %4006 = vst [vmem:[%s431_s26 + $0x18] sm:$0xff] %v4001_v16 }
 0xa68   : > { %4672 = shalt.err (!%p4669_p6)
}
 0xa69   : > { %s4673_s10 = scalar_lea.hbm %s7338_s5, 512  ;;  %s4677_s4 = scalar_lea.hbm %s8069_s3, 1024 }
 0xa6a   : > { %p4674_p5 = scmp.ne.s32.totalorder %s7338_s5, %s4673_s10  ;;  %p4678_p4 = scmp.lt.s32.totalorder %s7338_s5, %s8069_s3 }
 0xa6b   : > { %p4679_p12 = scmp.lt.s32.totalorder %s4677_s4, %s4673_s10 }
 0xa6c   : > { %p4675_p13 = pnand %p4674_p5, %p8070_p11 }
 0xa6d   : > { %p4680_p7 = por %p4679_p12, %p4678_p4 }
 0xa6e   : > { %p4676_p10 = pneg %p4675_p13 }
 0xa70   : > { %p4681_p8 = pnand %p4680_p7, %p4676_p10 }
 0xa72   : > { %4684 = shalt.err (!%p4681_p8)
}
 0xa73   : > { %s4841_s2 = smov 256   ;;  %s4842_s19 = smov 16  }
 0xa74   : > { %4378 = dma.vmem_to_hbm [thread:$0]  (%p8070_p11), %s7333_s29, 512, %s7338_s5, %s7340_s14, %s4841_s2, %s4841_s2, %s4842_s19  }
 0xa75 PF: > { %s8071_s20 = sld [smem:[#allocation21_spill]] }
 0xa76   : > { %s8072_s27 = sld [smem:[#allocation18_spill]] }
 0xa77   : > { %s8073_s15 = sld [smem:[#allocation26_spill]] }
 0xa7b   : > { %p4405_p0 = scmp.ge.s32.totalorder %s8071_s20, 2 }
 0xa7c   : > { %s4036_s17 = sand.u32 1, %s8072_s27  }
 0xa7d   : > { %p8074_p1 = scmp.ne.s32.totalorder %s8073_s15, 0  ;;  %s4037_s28 = scalar_lea.sflag [#allocation7], %s4036_s17 }
 0xa7f   : > { %p4394_p2 = pnand %p4405_p0, %p8074_p1 }
 0xa81   : > { %p4395_p9 = pneg %p4394_p2 }
 0xa83   : > { %4714 = dma.done.wait (%p4395_p9), %s4037_s28, 512  }
 0xa84   : > { %4716 = vsyncadd (%p4395_p9), %s4037_s28, 4294966784  ;;  %s8075_s20 = sld [smem:[#allocation23_spill]] }
 0xa85   : > { %s8076_s17 = sld [smem:[#allocation19_spill]] }
 0xa86   : > { %s8077_s18 = sld [smem:[#allocation20_spill]] }
 0xa87   : > { %s8078_s19 = sld [smem:[#allocation24_spill]] }
 0xa8a   : > { %p24_p3 = scmp.ge.s32.totalorder %s8075_s20, 4  }
 0xa8c   :  { %26 = sbr.rel (!%p24_p3) target bundleno = 19 (0x13), region = 123 }
 0xa91   :  { %4042 = vsyncpa [#allocation6], 1 }
 0xa92   :  { %4044 = vsyncpa [#allocation6 + $0x1], 1 }
 0xa93   :  { %4045 = vsyncpa [#allocation10], 1 }
 0xa94   :  { %4046 = vsyncpa [#allocation7], 1 }
 0xa95   :  { %4048 = vsyncpa [#allocation7 + $0x1], 1 }
 0xa96   :  { %4049 = vsyncpa [#allocation8], 1 }
 0xa97   :  { %4051 = vsyncpa [#allocation8 + $0x1], 1 }

</bundles_post_ra>
